<compile_context>
chip_gen: v5e
topology: v5e:2x2
jax: 0.10.0
libtpu: 0.0.40
codegen_flags: <defaults>
</compile_context>

<pallas_src>
import numpy as np
import jax
import jax.numpy as jnp
from jax import lax
from jax.experimental import pallas as pl
from jax.experimental.pallas import tpu as pltpu

BLOOD_TYPES = ["A+", "A-", "B+", "B-", "AB+", "AB-", "O+", "O-"]
NUM_CLASSES = len(BLOOD_TYPES)

H = W = 64              # input spatial; pool(2) -> 32x32, so fc1 expects 16*32*32
CIN, COUT = 3, 16
KH = KW = 3
POOLED = 32             # pooled spatial size
HIDDEN = 128
CHUNK = 16              # pooled rows handled per grid step (2 chunks per image)
LANE_IN = (POOLED + 1) * CIN          # 99  : folded (w, c) minor dim of the parity slab
LANE_OUT = POOLED * COUT              # 512 : folded (w, c) minor dim of the pooled maps


# --------------------------------------------------------------------------------------
# Fused kernel: conv(3x3) + ReLU + maxpool(2x2) + fc1 + ReLU + fc2
# --------------------------------------------------------------------------------------
def _fused_kernel(xpf_ref, band_ref, bias_ref, w1_ref, b1_ref, w2_ref, b2_ref,
                  out_ref, acc_ref):
    # xpf_ref : (B, 4, 33, 99)        parity-split, (w,c)-folded padded input, f32
    #                                 xpf[b, 2*ph+pw, r, s*3+c] == x_pad[b, 2r+ph, 2s+pw, c]
    # band_ref: (3, 2, 2, 99, 512)    banded conv weights [kh, pw, dw], bf16
    # bias_ref: (1, 512)              conv bias tiled over the 32 w-positions, f32
    # w1_ref  : (8192, 128)           fc1 weight rows for this chunk, (h,w,c)-ordered, bf16
    # b1/w2/b2: fc biases / fc2 weight, f32
    # out_ref : (B, 8)                logits (written at the last chunk)
    # acc_ref : (B, 128) f32 scratch  fc1 accumulator, persists across chunks
    c_idx = pl.program_id(0)
    n_chunks = pl.num_programs(0)
    batch = xpf_ref.shape[0]
    row_base = c_idx * CHUNK

    @pl.when(c_idx == 0)
    def _init():
        acc_ref[...] = jnp.zeros_like(acc_ref)

    # ---- Conv + fused 2x2 maxpool, evaluated directly on the pooled grid -------------
    # For each pool parity (dh,dw) the conv is a sum over (kh, pw) of one MXU matmul:
    #   lhs  = two stacked input rows (dh=0/1) of the relevant plane      -> (32, 99)
    #   rhs  = prepacked banded weight  band[kh, pw, dw]                  -> (99, 512)
    # Bias-add / ReLU commute with the max, so they are applied once at the end.
    pooled_per_b = []
    for b in range(batch):
        accs = [[jnp.zeros((CHUNK, LANE_OUT), jnp.float32) for _ in range(2)]
                for _ in range(2)]                     # accs[dh][dw], lane-dense (16,512)
        for kh in range(KH):
            for pw in range(2):
                parts = []
                for dh in range(2):
                    a = dh + kh
                    plane = (a % 2) * 2 + pw
                    r0 = a // 2
                    parts.append(
                        xpf_ref[b, plane, pl.ds(row_base + r0, CHUNK), :])   # (16, 99)
                lhs = jnp.concatenate(parts, axis=0).astype(jnp.bfloat16)    # (32, 99)
                for dw in range(2):
                    res = jnp.dot(lhs, band_ref[kh, pw, dw],
                                  preferred_element_type=jnp.float32)        # (32, 512)
                    for dh in range(2):
                        accs[dh][dw] = accs[dh][dw] + res[dh * CHUNK:(dh + 1) * CHUNK, :]
        pooled = jnp.maximum(jnp.maximum(accs[0][0], accs[0][1]),
                             jnp.maximum(accs[1][0], accs[1][1]))            # (16, 512)
        pooled = jnp.maximum(pooled + bias_ref[...], 0.0)
        pooled_per_b.append(pooled)

    # ---- fc1 partial sums for this chunk (weights stream once, batched over B) -------
    # pooled row r holds the 512 features (h = c_idx*16 + r, w, c) in exactly the order
    # of w1_ref rows [r*512, (r+1)*512), so each step is B-row GEMMs against contiguous
    # weight slabs - the bf16 w1 stream is the only large HBM traffic and it is hidden
    # behind the conv compute of the previous chunk by the BlockSpec pipeline.
    hp = jnp.zeros((batch, HIDDEN), jnp.float32)
    for r in range(CHUNK):
        lhs = jnp.concatenate([p[r:r + 1, :] for p in pooled_per_b],
                              axis=0).astype(jnp.bfloat16)                   # (B, 512)
        hp = hp + jnp.dot(lhs, w1_ref[r * LANE_OUT:(r + 1) * LANE_OUT, :],
                          preferred_element_type=jnp.float32)
    acc_ref[...] = acc_ref[...] + hp

    # ---- fc2 epilogue at the last chunk ----------------------------------------------
    @pl.when(c_idx == n_chunks - 1)
    def _finalize():
        hidden = jnp.maximum(acc_ref[...] + b1_ref[...], 0.0)                # (B, 128)
        out_ref[...] = (jnp.dot(hidden, w2_ref[...],
                                preferred_element_type=jnp.float32)
                        + b2_ref[...]).astype(out_ref.dtype)


def fused_cnn(xpf, band, bias_t, w1p, b1, w2, b2):
    B = xpf.shape[0]
    n_chunks = POOLED // CHUNK
    cost = pl.CostEstimate(
        flops=2 * B * (H * W * KH * KW * CIN * COUT
                       + COUT * POOLED * POOLED * HIDDEN
                       + HIDDEN * NUM_CLASSES),
        transcendentals=0,
        bytes_accessed=(xpf.size * 4 + band.size * 2 + bias_t.size * 4
                        + w1p.size * 2 + b1.size * 4 + w2.size * 4 + b2.size * 4
                        + B * NUM_CLASSES * 4),
    )
    return pl.pallas_call(
        _fused_kernel,
        out_shape=jax.ShapeDtypeStruct((B, NUM_CLASSES), jnp.float32),
        grid_spec=pltpu.PrefetchScalarGridSpec(
            num_scalar_prefetch=0,
            grid=(n_chunks,),
            in_specs=[
                pl.BlockSpec((B, 4, POOLED + 1, LANE_IN), lambda c: (0, 0, 0, 0)),
                pl.BlockSpec((KH, 2, 2, LANE_IN, LANE_OUT), lambda c: (0, 0, 0, 0, 0)),
                pl.BlockSpec((1, LANE_OUT), lambda c: (0, 0)),
                pl.BlockSpec((CHUNK * LANE_OUT, HIDDEN), lambda c: (c, 0)),
                pl.BlockSpec((1, HIDDEN), lambda c: (0, 0)),
                pl.BlockSpec((HIDDEN, NUM_CLASSES), lambda c: (0, 0)),
                pl.BlockSpec((1, NUM_CLASSES), lambda c: (0, 0)),
            ],
            out_specs=pl.BlockSpec((B, NUM_CLASSES), lambda c: (0, 0)),
            scratch_shapes=[pltpu.VMEM((B, HIDDEN), jnp.float32)],
        ),
        # Single sequential grid axis (output/acc are revisited across it). For large B,
        # add a leading "parallel" batch axis so both v7x TensorCores engage.
        compiler_params=pltpu.CompilerParams(
            dimension_semantics=("arbitrary",),
            vmem_limit_bytes=32 * 1024 * 1024),
        cost_estimate=cost,
    )(xpf, band, bias_t, w1p, b1, w2, b2)


# --------------------------------------------------------------------------------------
# Forward pass, one-time parameter repacking, pure-JAX reference
# --------------------------------------------------------------------------------------
def simple_cnn_forward(x_nchw, kparams):
    band, bias_t, w1p, b1, w2, b2 = kparams
    B = x_nchw.shape[0]
    x_nhwc = jnp.transpose(x_nchw, (0, 2, 3, 1))
    x_pad = jnp.pad(x_nhwc, ((0, 0), (1, 1), (1, 1), (0, 0)))                # (B,66,66,3)
    # parity split (space-to-depth by 2) + fold (w, c) into the lane dim: (B,4,33,99)
    xp = x_pad.reshape(B, 33, 2, 33, 2, CIN).transpose(0, 2, 4, 1, 3, 5)
    xpf = xp.reshape(B, 4, POOLED + 1, LANE_IN)
    return fused_cnn(xpf, band, bias_t, w1p, b1, w2, b2)


def _pack_conv_band(w_oihw):
    """Prepack the 3x3 conv weight into banded (99,512) matrices, one per (kh, pw, dw).

    band[kh, pw, dw, s*3+c, J*16+o] = sum over kw with (dw+kw)%2==pw and (dw+kw)//2==s-J
                                      of w_hwio[kh, kw, c, o]
    so that  xpf_row(plane=2*((dh+kh)%2)+pw, r=I+(dh+kh)//2) @ band[kh,pw,dw]
    summed over (kh,pw) equals the conv evaluated at pool parity (dh,dw).
    """
    w = np.asarray(jax.device_get(w_oihw)).transpose(2, 3, 1, 0)             # HWIO
    band = np.zeros((KH, 2, 2, LANE_IN, LANE_OUT), np.float32)
    j = np.arange(POOLED)
    for kh in range(KH):
        for dw in range(2):
            for kw in range(KW):
                pw = (dw + kw) % 2
                c0 = (dw + kw) // 2
                for cin in range(CIN):
                    for o in range(COUT):
                        band[kh, pw, dw, (j + c0) * CIN + cin, j * COUT + o] += \
                            w[kh, kw, cin, o]
    return jnp.asarray(band, dtype=jnp.bfloat16)


def prepare_params(params):
    """One-time (outside jit) repack of PyTorch-layout params for the fused kernel."""
    w_oihw, cb, w1, b1, w2, b2 = params
    band = _pack_conv_band(w_oihw)                                           # (3,2,2,99,512) bf16
    bias_t = jnp.tile(cb, POOLED).reshape(1, LANE_OUT)                       # (1,512) f32
    # torch flattens the pooled maps in (C,H,W) order; the kernel produces (H,W,C).
    # Permute w1's rows once so the in-kernel slab slicing is a pure row-range select.
    old_idx = (jnp.arange(COUT * POOLED * POOLED)
               .reshape(COUT, POOLED, POOLED)            # (c, h, w)
               .transpose(1, 2, 0)                       # (h, w, c)
               .reshape(-1))
    w1p = w1[old_idx].astype(jnp.bfloat16)               # bf16 HBM stream, streamed once
    # NOTE(perf): per the review, w1 could additionally be int8-quantized (v5e/v6e) or
    # fp8 (v7x) with per-channel scales; kept bf16 here for generation portability.
    return (band, bias_t, w1p, b1.reshape(1, HIDDEN), w2, b2.reshape(1, NUM_CLASSES))


def reference_forward(x_nchw, params):
    # Pure-JAX f32 reference matching the PyTorch module (NCHW conv, torch flatten order).
    w_oihw, cb, w1, b1, w2, b2 = params
    y = lax.conv_general_dilated(
        x_nchw, w_oihw, window_strides=(1, 1), padding=((1, 1), (1, 1)),
        dimension_numbers=("NCHW", "OIHW", "NCHW"),
        precision=lax.Precision.HIGHEST)
    y = jnp.maximum(y + cb.reshape(1, COUT, 1, 1), 0.0)
    y = lax.reduce_window(y, -jnp.inf, lax.max, (1, 1, 2, 2), (1, 1, 2, 2), "VALID")
    f = y.reshape(x_nchw.shape[0], -1)
    h = jnp.maximum(jnp.dot(f, w1, precision=lax.Precision.HIGHEST) + b1, 0.0)
    return jnp.dot(h, w2, precision=lax.Precision.HIGHEST) + b2


def init_params(key):
    # PyTorch-layout parameters (OIHW conv weight, torch-order fc1 rows).
    k = jax.random.split(key, 6)
    w_oihw = 0.05 * jax.random.normal(k[0], (COUT, CIN, KH, KW), jnp.float32)
    cb = 0.05 * jax.random.normal(k[1], (COUT,), jnp.float32)
    w1 = 0.02 * jax.random.normal(k[2], (COUT * POOLED * POOLED, HIDDEN), jnp.float32)
    b1 = 0.02 * jax.random.normal(k[3], (HIDDEN,), jnp.float32)
    w2 = 0.05 * jax.random.normal(k[4], (HIDDEN, NUM_CLASSES), jnp.float32)
    b2 = 0.05 * jax.random.normal(k[5], (NUM_CLASSES,), jnp.float32)
    return (w_oihw, cb, w1, b1, w2, b2)


if __name__ == "__main__":
    key = jax.random.PRNGKey(0)
    kx, kp = jax.random.split(key)
    B = 2
    x = jax.random.normal(kx, (B, CIN, H, W), jnp.float32)   # NCHW, like PyTorch
    params = init_params(kp)                                 # PyTorch-layout params
    kparams = prepare_params(params)                         # one-time repack for the kernel

    out = jax.jit(simple_cnn_forward)(x, kparams)
    out = jax.block_until_ready(out)

    ref = reference_forward(x, params)
    assert out.shape == (B, NUM_CLASSES)
    max_err = float(jnp.max(jnp.abs(out - ref)))
    # bf16 MXU operands (conv inputs/weights, fc1 activations/weights) with f32 accumulation.
    assert jnp.allclose(out, ref, atol=1e-2, rtol=1e-2), max_err
    print("KERNEL_OK")
</pallas_src>

<mosaic_0001>
module attributes {stable_mosaic.version = 11 : i64} {
  func.func @_fused_kernel(%arg0: i32, %arg1: memref<2x4x33x99xf32, #tpu.memory_space<vmem>>, %arg2: memref<3x2x2x99x512xbf16, #tpu.memory_space<vmem>>, %arg3: memref<1x512xf32, #tpu.memory_space<vmem>>, %arg4: memref<8192x128xbf16, #tpu.memory_space<vmem>>, %arg5: memref<1x128xf32, #tpu.memory_space<vmem>>, %arg6: memref<128x8xf32, #tpu.memory_space<vmem>>, %arg7: memref<1x8xf32, #tpu.memory_space<vmem>>, %arg8: memref<2x8xf32, #tpu.memory_space<vmem>>, %arg9: memref<2x128xf32, #tpu.memory_space<vmem>>) attributes {dimension_semantics = [#tpu.dimension_semantics<arbitrary>], iteration_bounds = array<i64: 2>, scalar_prefetch = 0 : i64, scratch_operands = 1 : i64, tpu.core_type = #tpu.core_type<tc>, window_params = [{pipeline_mode = #tpu.pipeline_mode<synchronous>, transform_indices = @transform_0, window_bounds = array<i64: 2, 4, 33, 99>}, {pipeline_mode = #tpu.pipeline_mode<synchronous>, transform_indices = @transform_1, window_bounds = array<i64: 3, 2, 2, 99, 512>}, {pipeline_mode = #tpu.pipeline_mode<synchronous>, transform_indices = @transform_2, window_bounds = array<i64: 1, 512>}, {transform_indices = @transform_3, window_bounds = array<i64: 8192, 128>}, {pipeline_mode = #tpu.pipeline_mode<synchronous>, transform_indices = @transform_4, window_bounds = array<i64: 1, 128>}, {pipeline_mode = #tpu.pipeline_mode<synchronous>, transform_indices = @transform_5, window_bounds = array<i64: 128, 8>}, {pipeline_mode = #tpu.pipeline_mode<synchronous>, transform_indices = @transform_6, window_bounds = array<i64: 1, 8>}, {pipeline_mode = #tpu.pipeline_mode<synchronous>, transform_indices = @transform_7, window_bounds = array<i64: 2, 8>}]} {
    %c16_i32 = arith.constant 16 : i32
    %0 = arith.muli %arg0, %c16_i32 : i32
    %c0_i32 = arith.constant 0 : i32
    %1 = arith.cmpi eq, %arg0, %c0_i32 : i32
    %2 = arith.extui %1 : i1 to i32
    %c0_i32_0 = arith.constant 0 : i32
    %3 = arith.cmpi ne, %2, %c0_i32_0 : i32
    scf.if %3 {
      %cst_289 = arith.constant 0.000000e+00 : f32
      %435 = vector.broadcast %cst_289 : f32 to vector<2x128xf32>
      %c0_290 = arith.constant 0 : index
      %c0_291 = arith.constant 0 : index
      %436 = vector.load %arg9[%c0_290, %c0_291] : memref<2x128xf32, #tpu.memory_space<vmem>>, vector<2x128xf32>
      tpu.vector_store %arg9[%c0_290, %c0_291], %435 {strides = array<i32>} : memref<2x128xf32, #tpu.memory_space<vmem>>, vector<2x128xf32>,
    } else {
    }
    %cst = arith.constant 0.000000e+00 : f32
    %4 = vector.broadcast %cst : f32 to vector<16x512xf32>
    %cst_1 = arith.constant 0.000000e+00 : f32
    %5 = vector.broadcast %cst_1 : f32 to vector<16x512xf32>
    %cst_2 = arith.constant 0.000000e+00 : f32
    %6 = vector.broadcast %cst_2 : f32 to vector<16x512xf32>
    %cst_3 = arith.constant 0.000000e+00 : f32
    %7 = vector.broadcast %cst_3 : f32 to vector<16x512xf32>
    %c0_i32_4 = arith.constant 0 : i32
    %8 = arith.addi %0, %c0_i32_4 : i32
    %c0 = arith.constant 0 : index
    %c0_5 = arith.constant 0 : index
    %9 = arith.index_cast %8 : i32 to index
    %c0_6 = arith.constant 0 : index
    %10 = vector.load %arg1[%c0, %c0_5, %9, %c0_6] : memref<2x4x33x99xf32, #tpu.memory_space<vmem>>, vector<1x1x16x99xf32>
    %11 = vector.shape_cast %10 : vector<1x1x16x99xf32> to vector<16x99xf32>
    %c0_i32_7 = arith.constant 0 : i32
    %12 = arith.addi %0, %c0_i32_7 : i32
    %c0_8 = arith.constant 0 : index
    %c2 = arith.constant 2 : index
    %13 = arith.index_cast %12 : i32 to index
    %c0_9 = arith.constant 0 : index
    %14 = vector.load %arg1[%c0_8, %c2, %13, %c0_9] : memref<2x4x33x99xf32, #tpu.memory_space<vmem>>, vector<1x1x16x99xf32>
    %15 = vector.shape_cast %14 : vector<1x1x16x99xf32> to vector<16x99xf32>
    %16 = tpu.concatenate %11, %15 in 0 : vector<16x99xf32>, vector<16x99xf32> -> vector<32x99xf32>
    %17 = arith.truncf %16 : vector<32x99xf32> to vector<32x99xbf16>
    %c0_10 = arith.constant 0 : index
    %c0_11 = arith.constant 0 : index
    %c0_12 = arith.constant 0 : index
    %c0_13 = arith.constant 0 : index
    %c0_14 = arith.constant 0 : index
    %18 = vector.load %arg2[%c0_10, %c0_11, %c0_12, %c0_13, %c0_14] : memref<3x2x2x99x512xbf16, #tpu.memory_space<vmem>>, vector<1x1x1x99x512xbf16>
    %19 = vector.shape_cast %18 : vector<1x1x1x99x512xbf16> to vector<99x512xbf16>
    %cst_15 = arith.constant dense<0.000000e+00> : vector<32x512xf32>
    %20 = tpu.matmul %17, %19, %cst_15 {dimension_numbers = #tpu.dot_dimension_numbers<[1], [0], [0], [1], [0, 0, 1, 1], [], []>} : vector<32x99xbf16>, vector<99x512xbf16>, vector<32x512xf32> -> vector<32x512xf32>
    %21 = vector.extract_strided_slice %20 {offsets = [0, 0], sizes = [16, 512], strides = [1, 1]} : vector<32x512xf32> to vector<16x512xf32>
    %22 = arith.addf %4, %21 : vector<16x512xf32>
    %23 = vector.extract_strided_slice %20 {offsets = [16, 0], sizes = [16, 512], strides = [1, 1]} : vector<32x512xf32> to vector<16x512xf32>
    %24 = arith.addf %6, %23 : vector<16x512xf32>
    %c0_16 = arith.constant 0 : index
    %c0_17 = arith.constant 0 : index
    %c1 = arith.constant 1 : index
    %c0_18 = arith.constant 0 : index
    %c0_19 = arith.constant 0 : index
    %25 = vector.load %arg2[%c0_16, %c0_17, %c1, %c0_18, %c0_19] : memref<3x2x2x99x512xbf16, #tpu.memory_space<vmem>>, vector<1x1x1x99x512xbf16>
    %26 = vector.shape_cast %25 : vector<1x1x1x99x512xbf16> to vector<99x512xbf16>
    %cst_20 = arith.constant dense<0.000000e+00> : vector<32x512xf32>
    %27 = tpu.matmul %17, %26, %cst_20 {dimension_numbers = #tpu.dot_dimension_numbers<[1], [0], [0], [1], [0, 0, 1, 1], [], []>} : vector<32x99xbf16>, vector<99x512xbf16>, vector<32x512xf32> -> vector<32x512xf32>
    %28 = vector.extract_strided_slice %27 {offsets = [0, 0], sizes = [16, 512], strides = [1, 1]} : vector<32x512xf32> to vector<16x512xf32>
    %29 = arith.addf %5, %28 : vector<16x512xf32>
    %30 = vector.extract_strided_slice %27 {offsets = [16, 0], sizes = [16, 512], strides = [1, 1]} : vector<32x512xf32> to vector<16x512xf32>
    %31 = arith.addf %7, %30 : vector<16x512xf32>
    %c0_i32_21 = arith.constant 0 : i32
    %32 = arith.addi %0, %c0_i32_21 : i32
    %c0_22 = arith.constant 0 : index
    %c1_23 = arith.constant 1 : index
    %33 = arith.index_cast %32 : i32 to index
    %c0_24 = arith.constant 0 : index
    %34 = vector.load %arg1[%c0_22, %c1_23, %33, %c0_24] : memref<2x4x33x99xf32, #tpu.memory_space<vmem>>, vector<1x1x16x99xf32>
    %35 = vector.shape_cast %34 : vector<1x1x16x99xf32> to vector<16x99xf32>
    %c0_i32_25 = arith.constant 0 : i32
    %36 = arith.addi %0, %c0_i32_25 : i32
    %c0_26 = arith.constant 0 : index
    %c3 = arith.constant 3 : index
    %37 = arith.index_cast %36 : i32 to index
    %c0_27 = arith.constant 0 : index
    %38 = vector.load %arg1[%c0_26, %c3, %37, %c0_27] : memref<2x4x33x99xf32, #tpu.memory_space<vmem>>, vector<1x1x16x99xf32>
    %39 = vector.shape_cast %38 : vector<1x1x16x99xf32> to vector<16x99xf32>
    %40 = tpu.concatenate %35, %39 in 0 : vector<16x99xf32>, vector<16x99xf32> -> vector<32x99xf32>
    %41 = arith.truncf %40 : vector<32x99xf32> to vector<32x99xbf16>
    %c0_28 = arith.constant 0 : index
    %c1_29 = arith.constant 1 : index
    %c0_30 = arith.constant 0 : index
    %c0_31 = arith.constant 0 : index
    %c0_32 = arith.constant 0 : index
    %42 = vector.load %arg2[%c0_28, %c1_29, %c0_30, %c0_31, %c0_32] : memref<3x2x2x99x512xbf16, #tpu.memory_space<vmem>>, vector<1x1x1x99x512xbf16>
    %43 = vector.shape_cast %42 : vector<1x1x1x99x512xbf16> to vector<99x512xbf16>
    %cst_33 = arith.constant dense<0.000000e+00> : vector<32x512xf32>
    %44 = tpu.matmul %41, %43, %cst_33 {dimension_numbers = #tpu.dot_dimension_numbers<[1], [0], [0], [1], [0, 0, 1, 1], [], []>} : vector<32x99xbf16>, vector<99x512xbf16>, vector<32x512xf32> -> vector<32x512xf32>
    %45 = vector.extract_strided_slice %44 {offsets = [0, 0], sizes = [16, 512], strides = [1, 1]} : vector<32x512xf32> to vector<16x512xf32>
    %46 = arith.addf %22, %45 : vector<16x512xf32>
    %47 = vector.extract_strided_slice %44 {offsets = [16, 0], sizes = [16, 512], strides = [1, 1]} : vector<32x512xf32> to vector<16x512xf32>
    %48 = arith.addf %24, %47 : vector<16x512xf32>
    %c0_34 = arith.constant 0 : index
    %c1_35 = arith.constant 1 : index
    %c1_36 = arith.constant 1 : index
    %c0_37 = arith.constant 0 : index
    %c0_38 = arith.constant 0 : index
    %49 = vector.load %arg2[%c0_34, %c1_35, %c1_36, %c0_37, %c0_38] : memref<3x2x2x99x512xbf16, #tpu.memory_space<vmem>>, vector<1x1x1x99x512xbf16>
    %50 = vector.shape_cast %49 : vector<1x1x1x99x512xbf16> to vector<99x512xbf16>
    %cst_39 = arith.constant dense<0.000000e+00> : vector<32x512xf32>
    %51 = tpu.matmul %41, %50, %cst_39 {dimension_numbers = #tpu.dot_dimension_numbers<[1], [0], [0], [1], [0, 0, 1, 1], [], []>} : vector<32x99xbf16>, vector<99x512xbf16>, vector<32x512xf32> -> vector<32x512xf32>
    %52 = vector.extract_strided_slice %51 {offsets = [0, 0], sizes = [16, 512], strides = [1, 1]} : vector<32x512xf32> to vector<16x512xf32>
    %53 = arith.addf %29, %52 : vector<16x512xf32>
    %54 = vector.extract_strided_slice %51 {offsets = [16, 0], sizes = [16, 512], strides = [1, 1]} : vector<32x512xf32> to vector<16x512xf32>
    %55 = arith.addf %31, %54 : vector<16x512xf32>
    %c0_i32_40 = arith.constant 0 : i32
    %56 = arith.addi %0, %c0_i32_40 : i32
    %c0_41 = arith.constant 0 : index
    %c2_42 = arith.constant 2 : index
    %57 = arith.index_cast %56 : i32 to index
    %c0_43 = arith.constant 0 : index
    %58 = vector.load %arg1[%c0_41, %c2_42, %57, %c0_43] : memref<2x4x33x99xf32, #tpu.memory_space<vmem>>, vector<1x1x16x99xf32>
    %59 = vector.shape_cast %58 : vector<1x1x16x99xf32> to vector<16x99xf32>
    %c1_i32 = arith.constant 1 : i32
    %60 = arith.addi %0, %c1_i32 : i32
    %c0_44 = arith.constant 0 : index
    %c0_45 = arith.constant 0 : index
    %61 = arith.index_cast %60 : i32 to index
    %c0_46 = arith.constant 0 : index
    %62 = vector.load %arg1[%c0_44, %c0_45, %61, %c0_46] : memref<2x4x33x99xf32, #tpu.memory_space<vmem>>, vector<1x1x16x99xf32>
    %63 = vector.shape_cast %62 : vector<1x1x16x99xf32> to vector<16x99xf32>
    %64 = tpu.concatenate %59, %63 in 0 : vector<16x99xf32>, vector<16x99xf32> -> vector<32x99xf32>
    %65 = arith.truncf %64 : vector<32x99xf32> to vector<32x99xbf16>
    %c1_47 = arith.constant 1 : index
    %c0_48 = arith.constant 0 : index
    %c0_49 = arith.constant 0 : index
    %c0_50 = arith.constant 0 : index
    %c0_51 = arith.constant 0 : index
    %66 = vector.load %arg2[%c1_47, %c0_48, %c0_49, %c0_50, %c0_51] : memref<3x2x2x99x512xbf16, #tpu.memory_space<vmem>>, vector<1x1x1x99x512xbf16>
    %67 = vector.shape_cast %66 : vector<1x1x1x99x512xbf16> to vector<99x512xbf16>
    %cst_52 = arith.constant dense<0.000000e+00> : vector<32x512xf32>
    %68 = tpu.matmul %65, %67, %cst_52 {dimension_numbers = #tpu.dot_dimension_numbers<[1], [0], [0], [1], [0, 0, 1, 1], [], []>} : vector<32x99xbf16>, vector<99x512xbf16>, vector<32x512xf32> -> vector<32x512xf32>
    %69 = vector.extract_strided_slice %68 {offsets = [0, 0], sizes = [16, 512], strides = [1, 1]} : vector<32x512xf32> to vector<16x512xf32>
    %70 = arith.addf %46, %69 : vector<16x512xf32>
    %71 = vector.extract_strided_slice %68 {offsets = [16, 0], sizes = [16, 512], strides = [1, 1]} : vector<32x512xf32> to vector<16x512xf32>
    %72 = arith.addf %48, %71 : vector<16x512xf32>
    %c1_53 = arith.constant 1 : index
    %c0_54 = arith.constant 0 : index
    %c1_55 = arith.constant 1 : index
    %c0_56 = arith.constant 0 : index
    %c0_57 = arith.constant 0 : index
    %73 = vector.load %arg2[%c1_53, %c0_54, %c1_55, %c0_56, %c0_57] : memref<3x2x2x99x512xbf16, #tpu.memory_space<vmem>>, vector<1x1x1x99x512xbf16>
    %74 = vector.shape_cast %73 : vector<1x1x1x99x512xbf16> to vector<99x512xbf16>
    %cst_58 = arith.constant dense<0.000000e+00> : vector<32x512xf32>
    %75 = tpu.matmul %65, %74, %cst_58 {dimension_numbers = #tpu.dot_dimension_numbers<[1], [0], [0], [1], [0, 0, 1, 1], [], []>} : vector<32x99xbf16>, vector<99x512xbf16>, vector<32x512xf32> -> vector<32x512xf32>
    %76 = vector.extract_strided_slice %75 {offsets = [0, 0], sizes = [16, 512], strides = [1, 1]} : vector<32x512xf32> to vector<16x512xf32>
    %77 = arith.addf %53, %76 : vector<16x512xf32>
    %78 = vector.extract_strided_slice %75 {offsets = [16, 0], sizes = [16, 512], strides = [1, 1]} : vector<32x512xf32> to vector<16x512xf32>
    %79 = arith.addf %55, %78 : vector<16x512xf32>
    %c0_i32_59 = arith.constant 0 : i32
    %80 = arith.addi %0, %c0_i32_59 : i32
    %c0_60 = arith.constant 0 : index
    %c3_61 = arith.constant 3 : index
    %81 = arith.index_cast %80 : i32 to index
    %c0_62 = arith.constant 0 : index
    %82 = vector.load %arg1[%c0_60, %c3_61, %81, %c0_62] : memref<2x4x33x99xf32, #tpu.memory_space<vmem>>, vector<1x1x16x99xf32>
    %83 = vector.shape_cast %82 : vector<1x1x16x99xf32> to vector<16x99xf32>
    %c1_i32_63 = arith.constant 1 : i32
    %84 = arith.addi %0, %c1_i32_63 : i32
    %c0_64 = arith.constant 0 : index
    %c1_65 = arith.constant 1 : index
    %85 = arith.index_cast %84 : i32 to index
    %c0_66 = arith.constant 0 : index
    %86 = vector.load %arg1[%c0_64, %c1_65, %85, %c0_66] : memref<2x4x33x99xf32, #tpu.memory_space<vmem>>, vector<1x1x16x99xf32>
    %87 = vector.shape_cast %86 : vector<1x1x16x99xf32> to vector<16x99xf32>
    %88 = tpu.concatenate %83, %87 in 0 : vector<16x99xf32>, vector<16x99xf32> -> vector<32x99xf32>
    %89 = arith.truncf %88 : vector<32x99xf32> to vector<32x99xbf16>
    %c1_67 = arith.constant 1 : index
    %c1_68 = arith.constant 1 : index
    %c0_69 = arith.constant 0 : index
    %c0_70 = arith.constant 0 : index
    %c0_71 = arith.constant 0 : index
    %90 = vector.load %arg2[%c1_67, %c1_68, %c0_69, %c0_70, %c0_71] : memref<3x2x2x99x512xbf16, #tpu.memory_space<vmem>>, vector<1x1x1x99x512xbf16>
    %91 = vector.shape_cast %90 : vector<1x1x1x99x512xbf16> to vector<99x512xbf16>
    %cst_72 = arith.constant dense<0.000000e+00> : vector<32x512xf32>
    %92 = tpu.matmul %89, %91, %cst_72 {dimension_numbers = #tpu.dot_dimension_numbers<[1], [0], [0], [1], [0, 0, 1, 1], [], []>} : vector<32x99xbf16>, vector<99x512xbf16>, vector<32x512xf32> -> vector<32x512xf32>
    %93 = vector.extract_strided_slice %92 {offsets = [0, 0], sizes = [16, 512], strides = [1, 1]} : vector<32x512xf32> to vector<16x512xf32>
    %94 = arith.addf %70, %93 : vector<16x512xf32>
    %95 = vector.extract_strided_slice %92 {offsets = [16, 0], sizes = [16, 512], strides = [1, 1]} : vector<32x512xf32> to vector<16x512xf32>
    %96 = arith.addf %72, %95 : vector<16x512xf32>
    %c1_73 = arith.constant 1 : index
    %c1_74 = arith.constant 1 : index
    %c1_75 = arith.constant 1 : index
    %c0_76 = arith.constant 0 : index
    %c0_77 = arith.constant 0 : index
    %97 = vector.load %arg2[%c1_73, %c1_74, %c1_75, %c0_76, %c0_77] : memref<3x2x2x99x512xbf16, #tpu.memory_space<vmem>>, vector<1x1x1x99x512xbf16>
    %98 = vector.shape_cast %97 : vector<1x1x1x99x512xbf16> to vector<99x512xbf16>
    %cst_78 = arith.constant dense<0.000000e+00> : vector<32x512xf32>
    %99 = tpu.matmul %89, %98, %cst_78 {dimension_numbers = #tpu.dot_dimension_numbers<[1], [0], [0], [1], [0, 0, 1, 1], [], []>} : vector<32x99xbf16>, vector<99x512xbf16>, vector<32x512xf32> -> vector<32x512xf32>
    %100 = vector.extract_strided_slice %99 {offsets = [0, 0], sizes = [16, 512], strides = [1, 1]} : vector<32x512xf32> to vector<16x512xf32>
    %101 = arith.addf %77, %100 : vector<16x512xf32>
    %102 = vector.extract_strided_slice %99 {offsets = [16, 0], sizes = [16, 512], strides = [1, 1]} : vector<32x512xf32> to vector<16x512xf32>
    %103 = arith.addf %79, %102 : vector<16x512xf32>
    %c1_i32_79 = arith.constant 1 : i32
    %104 = arith.addi %0, %c1_i32_79 : i32
    %c0_80 = arith.constant 0 : index
    %c0_81 = arith.constant 0 : index
    %105 = arith.index_cast %104 : i32 to index
    %c0_82 = arith.constant 0 : index
    %106 = vector.load %arg1[%c0_80, %c0_81, %105, %c0_82] : memref<2x4x33x99xf32, #tpu.memory_space<vmem>>, vector<1x1x16x99xf32>
    %107 = vector.shape_cast %106 : vector<1x1x16x99xf32> to vector<16x99xf32>
    %c1_i32_83 = arith.constant 1 : i32
    %108 = arith.addi %0, %c1_i32_83 : i32
    %c0_84 = arith.constant 0 : index
    %c2_85 = arith.constant 2 : index
    %109 = arith.index_cast %108 : i32 to index
    %c0_86 = arith.constant 0 : index
    %110 = vector.load %arg1[%c0_84, %c2_85, %109, %c0_86] : memref<2x4x33x99xf32, #tpu.memory_space<vmem>>, vector<1x1x16x99xf32>
    %111 = vector.shape_cast %110 : vector<1x1x16x99xf32> to vector<16x99xf32>
    %112 = tpu.concatenate %107, %111 in 0 : vector<16x99xf32>, vector<16x99xf32> -> vector<32x99xf32>
    %113 = arith.truncf %112 : vector<32x99xf32> to vector<32x99xbf16>
    %c2_87 = arith.constant 2 : index
    %c0_88 = arith.constant 0 : index
    %c0_89 = arith.constant 0 : index
    %c0_90 = arith.constant 0 : index
    %c0_91 = arith.constant 0 : index
    %114 = vector.load %arg2[%c2_87, %c0_88, %c0_89, %c0_90, %c0_91] : memref<3x2x2x99x512xbf16, #tpu.memory_space<vmem>>, vector<1x1x1x99x512xbf16>
    %115 = vector.shape_cast %114 : vector<1x1x1x99x512xbf16> to vector<99x512xbf16>
    %cst_92 = arith.constant dense<0.000000e+00> : vector<32x512xf32>
    %116 = tpu.matmul %113, %115, %cst_92 {dimension_numbers = #tpu.dot_dimension_numbers<[1], [0], [0], [1], [0, 0, 1, 1], [], []>} : vector<32x99xbf16>, vector<99x512xbf16>, vector<32x512xf32> -> vector<32x512xf32>
    %117 = vector.extract_strided_slice %116 {offsets = [0, 0], sizes = [16, 512], strides = [1, 1]} : vector<32x512xf32> to vector<16x512xf32>
    %118 = arith.addf %94, %117 : vector<16x512xf32>
    %119 = vector.extract_strided_slice %116 {offsets = [16, 0], sizes = [16, 512], strides = [1, 1]} : vector<32x512xf32> to vector<16x512xf32>
    %120 = arith.addf %96, %119 : vector<16x512xf32>
    %c2_93 = arith.constant 2 : index
    %c0_94 = arith.constant 0 : index
    %c1_95 = arith.constant 1 : index
    %c0_96 = arith.constant 0 : index
    %c0_97 = arith.constant 0 : index
    %121 = vector.load %arg2[%c2_93, %c0_94, %c1_95, %c0_96, %c0_97] : memref<3x2x2x99x512xbf16, #tpu.memory_space<vmem>>, vector<1x1x1x99x512xbf16>
    %122 = vector.shape_cast %121 : vector<1x1x1x99x512xbf16> to vector<99x512xbf16>
    %cst_98 = arith.constant dense<0.000000e+00> : vector<32x512xf32>
    %123 = tpu.matmul %113, %122, %cst_98 {dimension_numbers = #tpu.dot_dimension_numbers<[1], [0], [0], [1], [0, 0, 1, 1], [], []>} : vector<32x99xbf16>, vector<99x512xbf16>, vector<32x512xf32> -> vector<32x512xf32>
    %124 = vector.extract_strided_slice %123 {offsets = [0, 0], sizes = [16, 512], strides = [1, 1]} : vector<32x512xf32> to vector<16x512xf32>
    %125 = arith.addf %101, %124 : vector<16x512xf32>
    %126 = vector.extract_strided_slice %123 {offsets = [16, 0], sizes = [16, 512], strides = [1, 1]} : vector<32x512xf32> to vector<16x512xf32>
    %127 = arith.addf %103, %126 : vector<16x512xf32>
    %c1_i32_99 = arith.constant 1 : i32
    %128 = arith.addi %0, %c1_i32_99 : i32
    %c0_100 = arith.constant 0 : index
    %c1_101 = arith.constant 1 : index
    %129 = arith.index_cast %128 : i32 to index
    %c0_102 = arith.constant 0 : index
    %130 = vector.load %arg1[%c0_100, %c1_101, %129, %c0_102] : memref<2x4x33x99xf32, #tpu.memory_space<vmem>>, vector<1x1x16x99xf32>
    %131 = vector.shape_cast %130 : vector<1x1x16x99xf32> to vector<16x99xf32>
    %c1_i32_103 = arith.constant 1 : i32
    %132 = arith.addi %0, %c1_i32_103 : i32
    %c0_104 = arith.constant 0 : index
    %c3_105 = arith.constant 3 : index
    %133 = arith.index_cast %132 : i32 to index
    %c0_106 = arith.constant 0 : index
    %134 = vector.load %arg1[%c0_104, %c3_105, %133, %c0_106] : memref<2x4x33x99xf32, #tpu.memory_space<vmem>>, vector<1x1x16x99xf32>
    %135 = vector.shape_cast %134 : vector<1x1x16x99xf32> to vector<16x99xf32>
    %136 = tpu.concatenate %131, %135 in 0 : vector<16x99xf32>, vector<16x99xf32> -> vector<32x99xf32>
    %137 = arith.truncf %136 : vector<32x99xf32> to vector<32x99xbf16>
    %c2_107 = arith.constant 2 : index
    %c1_108 = arith.constant 1 : index
    %c0_109 = arith.constant 0 : index
    %c0_110 = arith.constant 0 : index
    %c0_111 = arith.constant 0 : index
    %138 = vector.load %arg2[%c2_107, %c1_108, %c0_109, %c0_110, %c0_111] : memref<3x2x2x99x512xbf16, #tpu.memory_space<vmem>>, vector<1x1x1x99x512xbf16>
    %139 = vector.shape_cast %138 : vector<1x1x1x99x512xbf16> to vector<99x512xbf16>
    %cst_112 = arith.constant dense<0.000000e+00> : vector<32x512xf32>
    %140 = tpu.matmul %137, %139, %cst_112 {dimension_numbers = #tpu.dot_dimension_numbers<[1], [0], [0], [1], [0, 0, 1, 1], [], []>} : vector<32x99xbf16>, vector<99x512xbf16>, vector<32x512xf32> -> vector<32x512xf32>
    %141 = vector.extract_strided_slice %140 {offsets = [0, 0], sizes = [16, 512], strides = [1, 1]} : vector<32x512xf32> to vector<16x512xf32>
    %142 = arith.addf %118, %141 : vector<16x512xf32>
    %143 = vector.extract_strided_slice %140 {offsets = [16, 0], sizes = [16, 512], strides = [1, 1]} : vector<32x512xf32> to vector<16x512xf32>
    %144 = arith.addf %120, %143 : vector<16x512xf32>
    %c2_113 = arith.constant 2 : index
    %c1_114 = arith.constant 1 : index
    %c1_115 = arith.constant 1 : index
    %c0_116 = arith.constant 0 : index
    %c0_117 = arith.constant 0 : index
    %145 = vector.load %arg2[%c2_113, %c1_114, %c1_115, %c0_116, %c0_117] : memref<3x2x2x99x512xbf16, #tpu.memory_space<vmem>>, vector<1x1x1x99x512xbf16>
    %146 = vector.shape_cast %145 : vector<1x1x1x99x512xbf16> to vector<99x512xbf16>
    %cst_118 = arith.constant dense<0.000000e+00> : vector<32x512xf32>
    %147 = tpu.matmul %137, %146, %cst_118 {dimension_numbers = #tpu.dot_dimension_numbers<[1], [0], [0], [1], [0, 0, 1, 1], [], []>} : vector<32x99xbf16>, vector<99x512xbf16>, vector<32x512xf32> -> vector<32x512xf32>
    %148 = vector.extract_strided_slice %147 {offsets = [0, 0], sizes = [16, 512], strides = [1, 1]} : vector<32x512xf32> to vector<16x512xf32>
    %149 = arith.addf %125, %148 : vector<16x512xf32>
    %150 = vector.extract_strided_slice %147 {offsets = [16, 0], sizes = [16, 512], strides = [1, 1]} : vector<32x512xf32> to vector<16x512xf32>
    %151 = arith.addf %127, %150 : vector<16x512xf32>
    %152 = arith.maximumf %142, %149 : vector<16x512xf32>
    %153 = arith.maximumf %144, %151 : vector<16x512xf32>
    %154 = arith.maximumf %152, %153 : vector<16x512xf32>
    %c0_119 = arith.constant 0 : index
    %c0_120 = arith.constant 0 : index
    %155 = vector.load %arg3[%c0_119, %c0_120] : memref<1x512xf32, #tpu.memory_space<vmem>>, vector<1x512xf32>
    %156 = vector.broadcast %155 : vector<1x512xf32> to vector<16x512xf32>
    %157 = arith.addf %154, %156 : vector<16x512xf32>
    %cst_121 = arith.constant 0.000000e+00 : f32
    %158 = vector.broadcast %cst_121 : f32 to vector<16x512xf32>
    %159 = arith.maximumf %157, %158 : vector<16x512xf32>
    %cst_122 = arith.constant 0.000000e+00 : f32
    %160 = vector.broadcast %cst_122 : f32 to vector<16x512xf32>
    %cst_123 = arith.constant 0.000000e+00 : f32
    %161 = vector.broadcast %cst_123 : f32 to vector<16x512xf32>
    %cst_124 = arith.constant 0.000000e+00 : f32
    %162 = vector.broadcast %cst_124 : f32 to vector<16x512xf32>
    %cst_125 = arith.constant 0.000000e+00 : f32
    %163 = vector.broadcast %cst_125 : f32 to vector<16x512xf32>
    %c0_i32_126 = arith.constant 0 : i32
    %164 = arith.addi %0, %c0_i32_126 : i32
    %c1_127 = arith.constant 1 : index
    %c0_128 = arith.constant 0 : index
    %165 = arith.index_cast %164 : i32 to index
    %c0_129 = arith.constant 0 : index
    %166 = vector.load %arg1[%c1_127, %c0_128, %165, %c0_129] : memref<2x4x33x99xf32, #tpu.memory_space<vmem>>, vector<1x1x16x99xf32>
    %167 = vector.shape_cast %166 : vector<1x1x16x99xf32> to vector<16x99xf32>
    %c0_i32_130 = arith.constant 0 : i32
    %168 = arith.addi %0, %c0_i32_130 : i32
    %c1_131 = arith.constant 1 : index
    %c2_132 = arith.constant 2 : index
    %169 = arith.index_cast %168 : i32 to index
    %c0_133 = arith.constant 0 : index
    %170 = vector.load %arg1[%c1_131, %c2_132, %169, %c0_133] : memref<2x4x33x99xf32, #tpu.memory_space<vmem>>, vector<1x1x16x99xf32>
    %171 = vector.shape_cast %170 : vector<1x1x16x99xf32> to vector<16x99xf32>
    %172 = tpu.concatenate %167, %171 in 0 : vector<16x99xf32>, vector<16x99xf32> -> vector<32x99xf32>
    %173 = arith.truncf %172 : vector<32x99xf32> to vector<32x99xbf16>
    %c0_134 = arith.constant 0 : index
    %c0_135 = arith.constant 0 : index
    %c0_136 = arith.constant 0 : index
    %c0_137 = arith.constant 0 : index
    %c0_138 = arith.constant 0 : index
    %174 = vector.load %arg2[%c0_134, %c0_135, %c0_136, %c0_137, %c0_138] : memref<3x2x2x99x512xbf16, #tpu.memory_space<vmem>>, vector<1x1x1x99x512xbf16>
    %175 = vector.shape_cast %174 : vector<1x1x1x99x512xbf16> to vector<99x512xbf16>
    %cst_139 = arith.constant dense<0.000000e+00> : vector<32x512xf32>
    %176 = tpu.matmul %173, %175, %cst_139 {dimension_numbers = #tpu.dot_dimension_numbers<[1], [0], [0], [1], [0, 0, 1, 1], [], []>} : vector<32x99xbf16>, vector<99x512xbf16>, vector<32x512xf32> -> vector<32x512xf32>
    %177 = vector.extract_strided_slice %176 {offsets = [0, 0], sizes = [16, 512], strides = [1, 1]} : vector<32x512xf32> to vector<16x512xf32>
    %178 = arith.addf %160, %177 : vector<16x512xf32>
    %179 = vector.extract_strided_slice %176 {offsets = [16, 0], sizes = [16, 512], strides = [1, 1]} : vector<32x512xf32> to vector<16x512xf32>
    %180 = arith.addf %162, %179 : vector<16x512xf32>
    %c0_140 = arith.constant 0 : index
    %c0_141 = arith.constant 0 : index
    %c1_142 = arith.constant 1 : index
    %c0_143 = arith.constant 0 : index
    %c0_144 = arith.constant 0 : index
    %181 = vector.load %arg2[%c0_140, %c0_141, %c1_142, %c0_143, %c0_144] : memref<3x2x2x99x512xbf16, #tpu.memory_space<vmem>>, vector<1x1x1x99x512xbf16>
    %182 = vector.shape_cast %181 : vector<1x1x1x99x512xbf16> to vector<99x512xbf16>
    %cst_145 = arith.constant dense<0.000000e+00> : vector<32x512xf32>
    %183 = tpu.matmul %173, %182, %cst_145 {dimension_numbers = #tpu.dot_dimension_numbers<[1], [0], [0], [1], [0, 0, 1, 1], [], []>} : vector<32x99xbf16>, vector<99x512xbf16>, vector<32x512xf32> -> vector<32x512xf32>
    %184 = vector.extract_strided_slice %183 {offsets = [0, 0], sizes = [16, 512], strides = [1, 1]} : vector<32x512xf32> to vector<16x512xf32>
    %185 = arith.addf %161, %184 : vector<16x512xf32>
    %186 = vector.extract_strided_slice %183 {offsets = [16, 0], sizes = [16, 512], strides = [1, 1]} : vector<32x512xf32> to vector<16x512xf32>
    %187 = arith.addf %163, %186 : vector<16x512xf32>
    %c0_i32_146 = arith.constant 0 : i32
    %188 = arith.addi %0, %c0_i32_146 : i32
    %c1_147 = arith.constant 1 : index
    %c1_148 = arith.constant 1 : index
    %189 = arith.index_cast %188 : i32 to index
    %c0_149 = arith.constant 0 : index
    %190 = vector.load %arg1[%c1_147, %c1_148, %189, %c0_149] : memref<2x4x33x99xf32, #tpu.memory_space<vmem>>, vector<1x1x16x99xf32>
    %191 = vector.shape_cast %190 : vector<1x1x16x99xf32> to vector<16x99xf32>
    %c0_i32_150 = arith.constant 0 : i32
    %192 = arith.addi %0, %c0_i32_150 : i32
    %c1_151 = arith.constant 1 : index
    %c3_152 = arith.constant 3 : index
    %193 = arith.index_cast %192 : i32 to index
    %c0_153 = arith.constant 0 : index
    %194 = vector.load %arg1[%c1_151, %c3_152, %193, %c0_153] : memref<2x4x33x99xf32, #tpu.memory_space<vmem>>, vector<1x1x16x99xf32>
    %195 = vector.shape_cast %194 : vector<1x1x16x99xf32> to vector<16x99xf32>
    %196 = tpu.concatenate %191, %195 in 0 : vector<16x99xf32>, vector<16x99xf32> -> vector<32x99xf32>
    %197 = arith.truncf %196 : vector<32x99xf32> to vector<32x99xbf16>
    %c0_154 = arith.constant 0 : index
    %c1_155 = arith.constant 1 : index
    %c0_156 = arith.constant 0 : index
    %c0_157 = arith.constant 0 : index
    %c0_158 = arith.constant 0 : index
    %198 = vector.load %arg2[%c0_154, %c1_155, %c0_156, %c0_157, %c0_158] : memref<3x2x2x99x512xbf16, #tpu.memory_space<vmem>>, vector<1x1x1x99x512xbf16>
    %199 = vector.shape_cast %198 : vector<1x1x1x99x512xbf16> to vector<99x512xbf16>
    %cst_159 = arith.constant dense<0.000000e+00> : vector<32x512xf32>
    %200 = tpu.matmul %197, %199, %cst_159 {dimension_numbers = #tpu.dot_dimension_numbers<[1], [0], [0], [1], [0, 0, 1, 1], [], []>} : vector<32x99xbf16>, vector<99x512xbf16>, vector<32x512xf32> -> vector<32x512xf32>
    %201 = vector.extract_strided_slice %200 {offsets = [0, 0], sizes = [16, 512], strides = [1, 1]} : vector<32x512xf32> to vector<16x512xf32>
    %202 = arith.addf %178, %201 : vector<16x512xf32>
    %203 = vector.extract_strided_slice %200 {offsets = [16, 0], sizes = [16, 512], strides = [1, 1]} : vector<32x512xf32> to vector<16x512xf32>
    %204 = arith.addf %180, %203 : vector<16x512xf32>
    %c0_160 = arith.constant 0 : index
    %c1_161 = arith.constant 1 : index
    %c1_162 = arith.constant 1 : index
    %c0_163 = arith.constant 0 : index
    %c0_164 = arith.constant 0 : index
    %205 = vector.load %arg2[%c0_160, %c1_161, %c1_162, %c0_163, %c0_164] : memref<3x2x2x99x512xbf16, #tpu.memory_space<vmem>>, vector<1x1x1x99x512xbf16>
    %206 = vector.shape_cast %205 : vector<1x1x1x99x512xbf16> to vector<99x512xbf16>
    %cst_165 = arith.constant dense<0.000000e+00> : vector<32x512xf32>
    %207 = tpu.matmul %197, %206, %cst_165 {dimension_numbers = #tpu.dot_dimension_numbers<[1], [0], [0], [1], [0, 0, 1, 1], [], []>} : vector<32x99xbf16>, vector<99x512xbf16>, vector<32x512xf32> -> vector<32x512xf32>
    %208 = vector.extract_strided_slice %207 {offsets = [0, 0], sizes = [16, 512], strides = [1, 1]} : vector<32x512xf32> to vector<16x512xf32>
    %209 = arith.addf %185, %208 : vector<16x512xf32>
    %210 = vector.extract_strided_slice %207 {offsets = [16, 0], sizes = [16, 512], strides = [1, 1]} : vector<32x512xf32> to vector<16x512xf32>
    %211 = arith.addf %187, %210 : vector<16x512xf32>
    %c0_i32_166 = arith.constant 0 : i32
    %212 = arith.addi %0, %c0_i32_166 : i32
    %c1_167 = arith.constant 1 : index
    %c2_168 = arith.constant 2 : index
    %213 = arith.index_cast %212 : i32 to index
    %c0_169 = arith.constant 0 : index
    %214 = vector.load %arg1[%c1_167, %c2_168, %213, %c0_169] : memref<2x4x33x99xf32, #tpu.memory_space<vmem>>, vector<1x1x16x99xf32>
    %215 = vector.shape_cast %214 : vector<1x1x16x99xf32> to vector<16x99xf32>
    %c1_i32_170 = arith.constant 1 : i32
    %216 = arith.addi %0, %c1_i32_170 : i32
    %c1_171 = arith.constant 1 : index
    %c0_172 = arith.constant 0 : index
    %217 = arith.index_cast %216 : i32 to index
    %c0_173 = arith.constant 0 : index
    %218 = vector.load %arg1[%c1_171, %c0_172, %217, %c0_173] : memref<2x4x33x99xf32, #tpu.memory_space<vmem>>, vector<1x1x16x99xf32>
    %219 = vector.shape_cast %218 : vector<1x1x16x99xf32> to vector<16x99xf32>
    %220 = tpu.concatenate %215, %219 in 0 : vector<16x99xf32>, vector<16x99xf32> -> vector<32x99xf32>
    %221 = arith.truncf %220 : vector<32x99xf32> to vector<32x99xbf16>
    %c1_174 = arith.constant 1 : index
    %c0_175 = arith.constant 0 : index
    %c0_176 = arith.constant 0 : index
    %c0_177 = arith.constant 0 : index
    %c0_178 = arith.constant 0 : index
    %222 = vector.load %arg2[%c1_174, %c0_175, %c0_176, %c0_177, %c0_178] : memref<3x2x2x99x512xbf16, #tpu.memory_space<vmem>>, vector<1x1x1x99x512xbf16>
    %223 = vector.shape_cast %222 : vector<1x1x1x99x512xbf16> to vector<99x512xbf16>
    %cst_179 = arith.constant dense<0.000000e+00> : vector<32x512xf32>
    %224 = tpu.matmul %221, %223, %cst_179 {dimension_numbers = #tpu.dot_dimension_numbers<[1], [0], [0], [1], [0, 0, 1, 1], [], []>} : vector<32x99xbf16>, vector<99x512xbf16>, vector<32x512xf32> -> vector<32x512xf32>
    %225 = vector.extract_strided_slice %224 {offsets = [0, 0], sizes = [16, 512], strides = [1, 1]} : vector<32x512xf32> to vector<16x512xf32>
    %226 = arith.addf %202, %225 : vector<16x512xf32>
    %227 = vector.extract_strided_slice %224 {offsets = [16, 0], sizes = [16, 512], strides = [1, 1]} : vector<32x512xf32> to vector<16x512xf32>
    %228 = arith.addf %204, %227 : vector<16x512xf32>
    %c1_180 = arith.constant 1 : index
    %c0_181 = arith.constant 0 : index
    %c1_182 = arith.constant 1 : index
    %c0_183 = arith.constant 0 : index
    %c0_184 = arith.constant 0 : index
    %229 = vector.load %arg2[%c1_180, %c0_181, %c1_182, %c0_183, %c0_184] : memref<3x2x2x99x512xbf16, #tpu.memory_space<vmem>>, vector<1x1x1x99x512xbf16>
    %230 = vector.shape_cast %229 : vector<1x1x1x99x512xbf16> to vector<99x512xbf16>
    %cst_185 = arith.constant dense<0.000000e+00> : vector<32x512xf32>
    %231 = tpu.matmul %221, %230, %cst_185 {dimension_numbers = #tpu.dot_dimension_numbers<[1], [0], [0], [1], [0, 0, 1, 1], [], []>} : vector<32x99xbf16>, vector<99x512xbf16>, vector<32x512xf32> -> vector<32x512xf32>
    %232 = vector.extract_strided_slice %231 {offsets = [0, 0], sizes = [16, 512], strides = [1, 1]} : vector<32x512xf32> to vector<16x512xf32>
    %233 = arith.addf %209, %232 : vector<16x512xf32>
    %234 = vector.extract_strided_slice %231 {offsets = [16, 0], sizes = [16, 512], strides = [1, 1]} : vector<32x512xf32> to vector<16x512xf32>
    %235 = arith.addf %211, %234 : vector<16x512xf32>
    %c0_i32_186 = arith.constant 0 : i32
    %236 = arith.addi %0, %c0_i32_186 : i32
    %c1_187 = arith.constant 1 : index
    %c3_188 = arith.constant 3 : index
    %237 = arith.index_cast %236 : i32 to index
    %c0_189 = arith.constant 0 : index
    %238 = vector.load %arg1[%c1_187, %c3_188, %237, %c0_189] : memref<2x4x33x99xf32, #tpu.memory_space<vmem>>, vector<1x1x16x99xf32>
    %239 = vector.shape_cast %238 : vector<1x1x16x99xf32> to vector<16x99xf32>
    %c1_i32_190 = arith.constant 1 : i32
    %240 = arith.addi %0, %c1_i32_190 : i32
    %c1_191 = arith.constant 1 : index
    %c1_192 = arith.constant 1 : index
    %241 = arith.index_cast %240 : i32 to index
    %c0_193 = arith.constant 0 : index
    %242 = vector.load %arg1[%c1_191, %c1_192, %241, %c0_193] : memref<2x4x33x99xf32, #tpu.memory_space<vmem>>, vector<1x1x16x99xf32>
    %243 = vector.shape_cast %242 : vector<1x1x16x99xf32> to vector<16x99xf32>
    %244 = tpu.concatenate %239, %243 in 0 : vector<16x99xf32>, vector<16x99xf32> -> vector<32x99xf32>
    %245 = arith.truncf %244 : vector<32x99xf32> to vector<32x99xbf16>
    %c1_194 = arith.constant 1 : index
    %c1_195 = arith.constant 1 : index
    %c0_196 = arith.constant 0 : index
    %c0_197 = arith.constant 0 : index
    %c0_198 = arith.constant 0 : index
    %246 = vector.load %arg2[%c1_194, %c1_195, %c0_196, %c0_197, %c0_198] : memref<3x2x2x99x512xbf16, #tpu.memory_space<vmem>>, vector<1x1x1x99x512xbf16>
    %247 = vector.shape_cast %246 : vector<1x1x1x99x512xbf16> to vector<99x512xbf16>
    %cst_199 = arith.constant dense<0.000000e+00> : vector<32x512xf32>
    %248 = tpu.matmul %245, %247, %cst_199 {dimension_numbers = #tpu.dot_dimension_numbers<[1], [0], [0], [1], [0, 0, 1, 1], [], []>} : vector<32x99xbf16>, vector<99x512xbf16>, vector<32x512xf32> -> vector<32x512xf32>
    %249 = vector.extract_strided_slice %248 {offsets = [0, 0], sizes = [16, 512], strides = [1, 1]} : vector<32x512xf32> to vector<16x512xf32>
    %250 = arith.addf %226, %249 : vector<16x512xf32>
    %251 = vector.extract_strided_slice %248 {offsets = [16, 0], sizes = [16, 512], strides = [1, 1]} : vector<32x512xf32> to vector<16x512xf32>
    %252 = arith.addf %228, %251 : vector<16x512xf32>
    %c1_200 = arith.constant 1 : index
    %c1_201 = arith.constant 1 : index
    %c1_202 = arith.constant 1 : index
    %c0_203 = arith.constant 0 : index
    %c0_204 = arith.constant 0 : index
    %253 = vector.load %arg2[%c1_200, %c1_201, %c1_202, %c0_203, %c0_204] : memref<3x2x2x99x512xbf16, #tpu.memory_space<vmem>>, vector<1x1x1x99x512xbf16>
    %254 = vector.shape_cast %253 : vector<1x1x1x99x512xbf16> to vector<99x512xbf16>
    %cst_205 = arith.constant dense<0.000000e+00> : vector<32x512xf32>
    %255 = tpu.matmul %245, %254, %cst_205 {dimension_numbers = #tpu.dot_dimension_numbers<[1], [0], [0], [1], [0, 0, 1, 1], [], []>} : vector<32x99xbf16>, vector<99x512xbf16>, vector<32x512xf32> -> vector<32x512xf32>
    %256 = vector.extract_strided_slice %255 {offsets = [0, 0], sizes = [16, 512], strides = [1, 1]} : vector<32x512xf32> to vector<16x512xf32>
    %257 = arith.addf %233, %256 : vector<16x512xf32>
    %258 = vector.extract_strided_slice %255 {offsets = [16, 0], sizes = [16, 512], strides = [1, 1]} : vector<32x512xf32> to vector<16x512xf32>
    %259 = arith.addf %235, %258 : vector<16x512xf32>
    %c1_i32_206 = arith.constant 1 : i32
    %260 = arith.addi %0, %c1_i32_206 : i32
    %c1_207 = arith.constant 1 : index
    %c0_208 = arith.constant 0 : index
    %261 = arith.index_cast %260 : i32 to index
    %c0_209 = arith.constant 0 : index
    %262 = vector.load %arg1[%c1_207, %c0_208, %261, %c0_209] : memref<2x4x33x99xf32, #tpu.memory_space<vmem>>, vector<1x1x16x99xf32>
    %263 = vector.shape_cast %262 : vector<1x1x16x99xf32> to vector<16x99xf32>
    %c1_i32_210 = arith.constant 1 : i32
    %264 = arith.addi %0, %c1_i32_210 : i32
    %c1_211 = arith.constant 1 : index
    %c2_212 = arith.constant 2 : index
    %265 = arith.index_cast %264 : i32 to index
    %c0_213 = arith.constant 0 : index
    %266 = vector.load %arg1[%c1_211, %c2_212, %265, %c0_213] : memref<2x4x33x99xf32, #tpu.memory_space<vmem>>, vector<1x1x16x99xf32>
    %267 = vector.shape_cast %266 : vector<1x1x16x99xf32> to vector<16x99xf32>
    %268 = tpu.concatenate %263, %267 in 0 : vector<16x99xf32>, vector<16x99xf32> -> vector<32x99xf32>
    %269 = arith.truncf %268 : vector<32x99xf32> to vector<32x99xbf16>
    %c2_214 = arith.constant 2 : index
    %c0_215 = arith.constant 0 : index
    %c0_216 = arith.constant 0 : index
    %c0_217 = arith.constant 0 : index
    %c0_218 = arith.constant 0 : index
    %270 = vector.load %arg2[%c2_214, %c0_215, %c0_216, %c0_217, %c0_218] : memref<3x2x2x99x512xbf16, #tpu.memory_space<vmem>>, vector<1x1x1x99x512xbf16>
    %271 = vector.shape_cast %270 : vector<1x1x1x99x512xbf16> to vector<99x512xbf16>
    %cst_219 = arith.constant dense<0.000000e+00> : vector<32x512xf32>
    %272 = tpu.matmul %269, %271, %cst_219 {dimension_numbers = #tpu.dot_dimension_numbers<[1], [0], [0], [1], [0, 0, 1, 1], [], []>} : vector<32x99xbf16>, vector<99x512xbf16>, vector<32x512xf32> -> vector<32x512xf32>
    %273 = vector.extract_strided_slice %272 {offsets = [0, 0], sizes = [16, 512], strides = [1, 1]} : vector<32x512xf32> to vector<16x512xf32>
    %274 = arith.addf %250, %273 : vector<16x512xf32>
    %275 = vector.extract_strided_slice %272 {offsets = [16, 0], sizes = [16, 512], strides = [1, 1]} : vector<32x512xf32> to vector<16x512xf32>
    %276 = arith.addf %252, %275 : vector<16x512xf32>
    %c2_220 = arith.constant 2 : index
    %c0_221 = arith.constant 0 : index
    %c1_222 = arith.constant 1 : index
    %c0_223 = arith.constant 0 : index
    %c0_224 = arith.constant 0 : index
    %277 = vector.load %arg2[%c2_220, %c0_221, %c1_222, %c0_223, %c0_224] : memref<3x2x2x99x512xbf16, #tpu.memory_space<vmem>>, vector<1x1x1x99x512xbf16>
    %278 = vector.shape_cast %277 : vector<1x1x1x99x512xbf16> to vector<99x512xbf16>
    %cst_225 = arith.constant dense<0.000000e+00> : vector<32x512xf32>
    %279 = tpu.matmul %269, %278, %cst_225 {dimension_numbers = #tpu.dot_dimension_numbers<[1], [0], [0], [1], [0, 0, 1, 1], [], []>} : vector<32x99xbf16>, vector<99x512xbf16>, vector<32x512xf32> -> vector<32x512xf32>
    %280 = vector.extract_strided_slice %279 {offsets = [0, 0], sizes = [16, 512], strides = [1, 1]} : vector<32x512xf32> to vector<16x512xf32>
    %281 = arith.addf %257, %280 : vector<16x512xf32>
    %282 = vector.extract_strided_slice %279 {offsets = [16, 0], sizes = [16, 512], strides = [1, 1]} : vector<32x512xf32> to vector<16x512xf32>
    %283 = arith.addf %259, %282 : vector<16x512xf32>
    %c1_i32_226 = arith.constant 1 : i32
    %284 = arith.addi %0, %c1_i32_226 : i32
    %c1_227 = arith.constant 1 : index
    %c1_228 = arith.constant 1 : index
    %285 = arith.index_cast %284 : i32 to index
    %c0_229 = arith.constant 0 : index
    %286 = vector.load %arg1[%c1_227, %c1_228, %285, %c0_229] : memref<2x4x33x99xf32, #tpu.memory_space<vmem>>, vector<1x1x16x99xf32>
    %287 = vector.shape_cast %286 : vector<1x1x16x99xf32> to vector<16x99xf32>
    %c1_i32_230 = arith.constant 1 : i32
    %288 = arith.addi %0, %c1_i32_230 : i32
    %c1_231 = arith.constant 1 : index
    %c3_232 = arith.constant 3 : index
    %289 = arith.index_cast %288 : i32 to index
    %c0_233 = arith.constant 0 : index
    %290 = vector.load %arg1[%c1_231, %c3_232, %289, %c0_233] : memref<2x4x33x99xf32, #tpu.memory_space<vmem>>, vector<1x1x16x99xf32>
    %291 = vector.shape_cast %290 : vector<1x1x16x99xf32> to vector<16x99xf32>
    %292 = tpu.concatenate %287, %291 in 0 : vector<16x99xf32>, vector<16x99xf32> -> vector<32x99xf32>
    %293 = arith.truncf %292 : vector<32x99xf32> to vector<32x99xbf16>
    %c2_234 = arith.constant 2 : index
    %c1_235 = arith.constant 1 : index
    %c0_236 = arith.constant 0 : index
    %c0_237 = arith.constant 0 : index
    %c0_238 = arith.constant 0 : index
    %294 = vector.load %arg2[%c2_234, %c1_235, %c0_236, %c0_237, %c0_238] : memref<3x2x2x99x512xbf16, #tpu.memory_space<vmem>>, vector<1x1x1x99x512xbf16>
    %295 = vector.shape_cast %294 : vector<1x1x1x99x512xbf16> to vector<99x512xbf16>
    %cst_239 = arith.constant dense<0.000000e+00> : vector<32x512xf32>
    %296 = tpu.matmul %293, %295, %cst_239 {dimension_numbers = #tpu.dot_dimension_numbers<[1], [0], [0], [1], [0, 0, 1, 1], [], []>} : vector<32x99xbf16>, vector<99x512xbf16>, vector<32x512xf32> -> vector<32x512xf32>
    %297 = vector.extract_strided_slice %296 {offsets = [0, 0], sizes = [16, 512], strides = [1, 1]} : vector<32x512xf32> to vector<16x512xf32>
    %298 = arith.addf %274, %297 : vector<16x512xf32>
    %299 = vector.extract_strided_slice %296 {offsets = [16, 0], sizes = [16, 512], strides = [1, 1]} : vector<32x512xf32> to vector<16x512xf32>
    %300 = arith.addf %276, %299 : vector<16x512xf32>
    %c2_240 = arith.constant 2 : index
    %c1_241 = arith.constant 1 : index
    %c1_242 = arith.constant 1 : index
    %c0_243 = arith.constant 0 : index
    %c0_244 = arith.constant 0 : index
    %301 = vector.load %arg2[%c2_240, %c1_241, %c1_242, %c0_243, %c0_244] : memref<3x2x2x99x512xbf16, #tpu.memory_space<vmem>>, vector<1x1x1x99x512xbf16>
    %302 = vector.shape_cast %301 : vector<1x1x1x99x512xbf16> to vector<99x512xbf16>
    %cst_245 = arith.constant dense<0.000000e+00> : vector<32x512xf32>
    %303 = tpu.matmul %293, %302, %cst_245 {dimension_numbers = #tpu.dot_dimension_numbers<[1], [0], [0], [1], [0, 0, 1, 1], [], []>} : vector<32x99xbf16>, vector<99x512xbf16>, vector<32x512xf32> -> vector<32x512xf32>
    %304 = vector.extract_strided_slice %303 {offsets = [0, 0], sizes = [16, 512], strides = [1, 1]} : vector<32x512xf32> to vector<16x512xf32>
    %305 = arith.addf %281, %304 : vector<16x512xf32>
    %306 = vector.extract_strided_slice %303 {offsets = [16, 0], sizes = [16, 512], strides = [1, 1]} : vector<32x512xf32> to vector<16x512xf32>
    %307 = arith.addf %283, %306 : vector<16x512xf32>
    %308 = arith.maximumf %298, %305 : vector<16x512xf32>
    %309 = arith.maximumf %300, %307 : vector<16x512xf32>
    %310 = arith.maximumf %308, %309 : vector<16x512xf32>
    %c0_246 = arith.constant 0 : index
    %c0_247 = arith.constant 0 : index
    %311 = vector.load %arg3[%c0_246, %c0_247] : memref<1x512xf32, #tpu.memory_space<vmem>>, vector<1x512xf32>
    %312 = vector.broadcast %311 : vector<1x512xf32> to vector<16x512xf32>
    %313 = arith.addf %310, %312 : vector<16x512xf32>
    %cst_248 = arith.constant 0.000000e+00 : f32
    %314 = vector.broadcast %cst_248 : f32 to vector<16x512xf32>
    %315 = arith.maximumf %313, %314 : vector<16x512xf32>
    %cst_249 = arith.constant 0.000000e+00 : f32
    %316 = vector.broadcast %cst_249 : f32 to vector<2x128xf32>
    %317 = vector.extract_strided_slice %159 {offsets = [0, 0], sizes = [1, 512], strides = [1, 1]} : vector<16x512xf32> to vector<1x512xf32>
    %318 = vector.extract_strided_slice %315 {offsets = [0, 0], sizes = [1, 512], strides = [1, 1]} : vector<16x512xf32> to vector<1x512xf32>
    %319 = tpu.concatenate %317, %318 in 0 : vector<1x512xf32>, vector<1x512xf32> -> vector<2x512xf32>
    %320 = arith.truncf %319 : vector<2x512xf32> to vector<2x512xbf16>
    %c0_250 = arith.constant 0 : index
    %c0_251 = arith.constant 0 : index
    %321 = vector.load %arg4[%c0_250, %c0_251] : memref<8192x128xbf16, #tpu.memory_space<vmem>>, vector<512x128xbf16>
    %cst_252 = arith.constant dense<0.000000e+00> : vector<2x128xf32>
    %322 = tpu.matmul %320, %321, %cst_252 {dimension_numbers = #tpu.dot_dimension_numbers<[1], [0], [0], [1], [0, 0, 1, 1], [], []>} : vector<2x512xbf16>, vector<512x128xbf16>, vector<2x128xf32> -> vector<2x128xf32>
    %323 = arith.addf %316, %322 : vector<2x128xf32>
    %324 = vector.extract_strided_slice %159 {offsets = [1, 0], sizes = [1, 512], strides = [1, 1]} : vector<16x512xf32> to vector<1x512xf32>
    %325 = vector.extract_strided_slice %315 {offsets = [1, 0], sizes = [1, 512], strides = [1, 1]} : vector<16x512xf32> to vector<1x512xf32>
    %326 = tpu.concatenate %324, %325 in 0 : vector<1x512xf32>, vector<1x512xf32> -> vector<2x512xf32>
    %327 = arith.truncf %326 : vector<2x512xf32> to vector<2x512xbf16>
    %c512 = arith.constant 512 : index
    %c0_253 = arith.constant 0 : index
    %328 = vector.load %arg4[%c512, %c0_253] : memref<8192x128xbf16, #tpu.memory_space<vmem>>, vector<512x128xbf16>
    %cst_254 = arith.constant dense<0.000000e+00> : vector<2x128xf32>
    %329 = tpu.matmul %327, %328, %cst_254 {dimension_numbers = #tpu.dot_dimension_numbers<[1], [0], [0], [1], [0, 0, 1, 1], [], []>} : vector<2x512xbf16>, vector<512x128xbf16>, vector<2x128xf32> -> vector<2x128xf32>
    %330 = arith.addf %323, %329 : vector<2x128xf32>
    %331 = vector.extract_strided_slice %159 {offsets = [2, 0], sizes = [1, 512], strides = [1, 1]} : vector<16x512xf32> to vector<1x512xf32>
    %332 = vector.extract_strided_slice %315 {offsets = [2, 0], sizes = [1, 512], strides = [1, 1]} : vector<16x512xf32> to vector<1x512xf32>
    %333 = tpu.concatenate %331, %332 in 0 : vector<1x512xf32>, vector<1x512xf32> -> vector<2x512xf32>
    %334 = arith.truncf %333 : vector<2x512xf32> to vector<2x512xbf16>
    %c1024 = arith.constant 1024 : index
    %c0_255 = arith.constant 0 : index
    %335 = vector.load %arg4[%c1024, %c0_255] : memref<8192x128xbf16, #tpu.memory_space<vmem>>, vector<512x128xbf16>
    %cst_256 = arith.constant dense<0.000000e+00> : vector<2x128xf32>
    %336 = tpu.matmul %334, %335, %cst_256 {dimension_numbers = #tpu.dot_dimension_numbers<[1], [0], [0], [1], [0, 0, 1, 1], [], []>} : vector<2x512xbf16>, vector<512x128xbf16>, vector<2x128xf32> -> vector<2x128xf32>
    %337 = arith.addf %330, %336 : vector<2x128xf32>
    %338 = vector.extract_strided_slice %159 {offsets = [3, 0], sizes = [1, 512], strides = [1, 1]} : vector<16x512xf32> to vector<1x512xf32>
    %339 = vector.extract_strided_slice %315 {offsets = [3, 0], sizes = [1, 512], strides = [1, 1]} : vector<16x512xf32> to vector<1x512xf32>
    %340 = tpu.concatenate %338, %339 in 0 : vector<1x512xf32>, vector<1x512xf32> -> vector<2x512xf32>
    %341 = arith.truncf %340 : vector<2x512xf32> to vector<2x512xbf16>
    %c1536 = arith.constant 1536 : index
    %c0_257 = arith.constant 0 : index
    %342 = vector.load %arg4[%c1536, %c0_257] : memref<8192x128xbf16, #tpu.memory_space<vmem>>, vector<512x128xbf16>
    %cst_258 = arith.constant dense<0.000000e+00> : vector<2x128xf32>
    %343 = tpu.matmul %341, %342, %cst_258 {dimension_numbers = #tpu.dot_dimension_numbers<[1], [0], [0], [1], [0, 0, 1, 1], [], []>} : vector<2x512xbf16>, vector<512x128xbf16>, vector<2x128xf32> -> vector<2x128xf32>
    %344 = arith.addf %337, %343 : vector<2x128xf32>
    %345 = vector.extract_strided_slice %159 {offsets = [4, 0], sizes = [1, 512], strides = [1, 1]} : vector<16x512xf32> to vector<1x512xf32>
    %346 = vector.extract_strided_slice %315 {offsets = [4, 0], sizes = [1, 512], strides = [1, 1]} : vector<16x512xf32> to vector<1x512xf32>
    %347 = tpu.concatenate %345, %346 in 0 : vector<1x512xf32>, vector<1x512xf32> -> vector<2x512xf32>
    %348 = arith.truncf %347 : vector<2x512xf32> to vector<2x512xbf16>
    %c2048 = arith.constant 2048 : index
    %c0_259 = arith.constant 0 : index
    %349 = vector.load %arg4[%c2048, %c0_259] : memref<8192x128xbf16, #tpu.memory_space<vmem>>, vector<512x128xbf16>
    %cst_260 = arith.constant dense<0.000000e+00> : vector<2x128xf32>
    %350 = tpu.matmul %348, %349, %cst_260 {dimension_numbers = #tpu.dot_dimension_numbers<[1], [0], [0], [1], [0, 0, 1, 1], [], []>} : vector<2x512xbf16>, vector<512x128xbf16>, vector<2x128xf32> -> vector<2x128xf32>
    %351 = arith.addf %344, %350 : vector<2x128xf32>
    %352 = vector.extract_strided_slice %159 {offsets = [5, 0], sizes = [1, 512], strides = [1, 1]} : vector<16x512xf32> to vector<1x512xf32>
    %353 = vector.extract_strided_slice %315 {offsets = [5, 0], sizes = [1, 512], strides = [1, 1]} : vector<16x512xf32> to vector<1x512xf32>
    %354 = tpu.concatenate %352, %353 in 0 : vector<1x512xf32>, vector<1x512xf32> -> vector<2x512xf32>
    %355 = arith.truncf %354 : vector<2x512xf32> to vector<2x512xbf16>
    %c2560 = arith.constant 2560 : index
    %c0_261 = arith.constant 0 : index
    %356 = vector.load %arg4[%c2560, %c0_261] : memref<8192x128xbf16, #tpu.memory_space<vmem>>, vector<512x128xbf16>
    %cst_262 = arith.constant dense<0.000000e+00> : vector<2x128xf32>
    %357 = tpu.matmul %355, %356, %cst_262 {dimension_numbers = #tpu.dot_dimension_numbers<[1], [0], [0], [1], [0, 0, 1, 1], [], []>} : vector<2x512xbf16>, vector<512x128xbf16>, vector<2x128xf32> -> vector<2x128xf32>
    %358 = arith.addf %351, %357 : vector<2x128xf32>
    %359 = vector.extract_strided_slice %159 {offsets = [6, 0], sizes = [1, 512], strides = [1, 1]} : vector<16x512xf32> to vector<1x512xf32>
    %360 = vector.extract_strided_slice %315 {offsets = [6, 0], sizes = [1, 512], strides = [1, 1]} : vector<16x512xf32> to vector<1x512xf32>
    %361 = tpu.concatenate %359, %360 in 0 : vector<1x512xf32>, vector<1x512xf32> -> vector<2x512xf32>
    %362 = arith.truncf %361 : vector<2x512xf32> to vector<2x512xbf16>
    %c3072 = arith.constant 3072 : index
    %c0_263 = arith.constant 0 : index
    %363 = vector.load %arg4[%c3072, %c0_263] : memref<8192x128xbf16, #tpu.memory_space<vmem>>, vector<512x128xbf16>
    %cst_264 = arith.constant dense<0.000000e+00> : vector<2x128xf32>
    %364 = tpu.matmul %362, %363, %cst_264 {dimension_numbers = #tpu.dot_dimension_numbers<[1], [0], [0], [1], [0, 0, 1, 1], [], []>} : vector<2x512xbf16>, vector<512x128xbf16>, vector<2x128xf32> -> vector<2x128xf32>
    %365 = arith.addf %358, %364 : vector<2x128xf32>
    %366 = vector.extract_strided_slice %159 {offsets = [7, 0], sizes = [1, 512], strides = [1, 1]} : vector<16x512xf32> to vector<1x512xf32>
    %367 = vector.extract_strided_slice %315 {offsets = [7, 0], sizes = [1, 512], strides = [1, 1]} : vector<16x512xf32> to vector<1x512xf32>
    %368 = tpu.concatenate %366, %367 in 0 : vector<1x512xf32>, vector<1x512xf32> -> vector<2x512xf32>
    %369 = arith.truncf %368 : vector<2x512xf32> to vector<2x512xbf16>
    %c3584 = arith.constant 3584 : index
    %c0_265 = arith.constant 0 : index
    %370 = vector.load %arg4[%c3584, %c0_265] : memref<8192x128xbf16, #tpu.memory_space<vmem>>, vector<512x128xbf16>
    %cst_266 = arith.constant dense<0.000000e+00> : vector<2x128xf32>
    %371 = tpu.matmul %369, %370, %cst_266 {dimension_numbers = #tpu.dot_dimension_numbers<[1], [0], [0], [1], [0, 0, 1, 1], [], []>} : vector<2x512xbf16>, vector<512x128xbf16>, vector<2x128xf32> -> vector<2x128xf32>
    %372 = arith.addf %365, %371 : vector<2x128xf32>
    %373 = vector.extract_strided_slice %159 {offsets = [8, 0], sizes = [1, 512], strides = [1, 1]} : vector<16x512xf32> to vector<1x512xf32>
    %374 = vector.extract_strided_slice %315 {offsets = [8, 0], sizes = [1, 512], strides = [1, 1]} : vector<16x512xf32> to vector<1x512xf32>
    %375 = tpu.concatenate %373, %374 in 0 : vector<1x512xf32>, vector<1x512xf32> -> vector<2x512xf32>
    %376 = arith.truncf %375 : vector<2x512xf32> to vector<2x512xbf16>
    %c4096 = arith.constant 4096 : index
    %c0_267 = arith.constant 0 : index
    %377 = vector.load %arg4[%c4096, %c0_267] : memref<8192x128xbf16, #tpu.memory_space<vmem>>, vector<512x128xbf16>
    %cst_268 = arith.constant dense<0.000000e+00> : vector<2x128xf32>
    %378 = tpu.matmul %376, %377, %cst_268 {dimension_numbers = #tpu.dot_dimension_numbers<[1], [0], [0], [1], [0, 0, 1, 1], [], []>} : vector<2x512xbf16>, vector<512x128xbf16>, vector<2x128xf32> -> vector<2x128xf32>
    %379 = arith.addf %372, %378 : vector<2x128xf32>
    %380 = vector.extract_strided_slice %159 {offsets = [9, 0], sizes = [1, 512], strides = [1, 1]} : vector<16x512xf32> to vector<1x512xf32>
    %381 = vector.extract_strided_slice %315 {offsets = [9, 0], sizes = [1, 512], strides = [1, 1]} : vector<16x512xf32> to vector<1x512xf32>
    %382 = tpu.concatenate %380, %381 in 0 : vector<1x512xf32>, vector<1x512xf32> -> vector<2x512xf32>
    %383 = arith.truncf %382 : vector<2x512xf32> to vector<2x512xbf16>
    %c4608 = arith.constant 4608 : index
    %c0_269 = arith.constant 0 : index
    %384 = vector.load %arg4[%c4608, %c0_269] : memref<8192x128xbf16, #tpu.memory_space<vmem>>, vector<512x128xbf16>
    %cst_270 = arith.constant dense<0.000000e+00> : vector<2x128xf32>
    %385 = tpu.matmul %383, %384, %cst_270 {dimension_numbers = #tpu.dot_dimension_numbers<[1], [0], [0], [1], [0, 0, 1, 1], [], []>} : vector<2x512xbf16>, vector<512x128xbf16>, vector<2x128xf32> -> vector<2x128xf32>
    %386 = arith.addf %379, %385 : vector<2x128xf32>
    %387 = vector.extract_strided_slice %159 {offsets = [10, 0], sizes = [1, 512], strides = [1, 1]} : vector<16x512xf32> to vector<1x512xf32>
    %388 = vector.extract_strided_slice %315 {offsets = [10, 0], sizes = [1, 512], strides = [1, 1]} : vector<16x512xf32> to vector<1x512xf32>
    %389 = tpu.concatenate %387, %388 in 0 : vector<1x512xf32>, vector<1x512xf32> -> vector<2x512xf32>
    %390 = arith.truncf %389 : vector<2x512xf32> to vector<2x512xbf16>
    %c5120 = arith.constant 5120 : index
    %c0_271 = arith.constant 0 : index
    %391 = vector.load %arg4[%c5120, %c0_271] : memref<8192x128xbf16, #tpu.memory_space<vmem>>, vector<512x128xbf16>
    %cst_272 = arith.constant dense<0.000000e+00> : vector<2x128xf32>
    %392 = tpu.matmul %390, %391, %cst_272 {dimension_numbers = #tpu.dot_dimension_numbers<[1], [0], [0], [1], [0, 0, 1, 1], [], []>} : vector<2x512xbf16>, vector<512x128xbf16>, vector<2x128xf32> -> vector<2x128xf32>
    %393 = arith.addf %386, %392 : vector<2x128xf32>
    %394 = vector.extract_strided_slice %159 {offsets = [11, 0], sizes = [1, 512], strides = [1, 1]} : vector<16x512xf32> to vector<1x512xf32>
    %395 = vector.extract_strided_slice %315 {offsets = [11, 0], sizes = [1, 512], strides = [1, 1]} : vector<16x512xf32> to vector<1x512xf32>
    %396 = tpu.concatenate %394, %395 in 0 : vector<1x512xf32>, vector<1x512xf32> -> vector<2x512xf32>
    %397 = arith.truncf %396 : vector<2x512xf32> to vector<2x512xbf16>
    %c5632 = arith.constant 5632 : index
    %c0_273 = arith.constant 0 : index
    %398 = vector.load %arg4[%c5632, %c0_273] : memref<8192x128xbf16, #tpu.memory_space<vmem>>, vector<512x128xbf16>
    %cst_274 = arith.constant dense<0.000000e+00> : vector<2x128xf32>
    %399 = tpu.matmul %397, %398, %cst_274 {dimension_numbers = #tpu.dot_dimension_numbers<[1], [0], [0], [1], [0, 0, 1, 1], [], []>} : vector<2x512xbf16>, vector<512x128xbf16>, vector<2x128xf32> -> vector<2x128xf32>
    %400 = arith.addf %393, %399 : vector<2x128xf32>
    %401 = vector.extract_strided_slice %159 {offsets = [12, 0], sizes = [1, 512], strides = [1, 1]} : vector<16x512xf32> to vector<1x512xf32>
    %402 = vector.extract_strided_slice %315 {offsets = [12, 0], sizes = [1, 512], strides = [1, 1]} : vector<16x512xf32> to vector<1x512xf32>
    %403 = tpu.concatenate %401, %402 in 0 : vector<1x512xf32>, vector<1x512xf32> -> vector<2x512xf32>
    %404 = arith.truncf %403 : vector<2x512xf32> to vector<2x512xbf16>
    %c6144 = arith.constant 6144 : index
    %c0_275 = arith.constant 0 : index
    %405 = vector.load %arg4[%c6144, %c0_275] : memref<8192x128xbf16, #tpu.memory_space<vmem>>, vector<512x128xbf16>
    %cst_276 = arith.constant dense<0.000000e+00> : vector<2x128xf32>
    %406 = tpu.matmul %404, %405, %cst_276 {dimension_numbers = #tpu.dot_dimension_numbers<[1], [0], [0], [1], [0, 0, 1, 1], [], []>} : vector<2x512xbf16>, vector<512x128xbf16>, vector<2x128xf32> -> vector<2x128xf32>
    %407 = arith.addf %400, %406 : vector<2x128xf32>
    %408 = vector.extract_strided_slice %159 {offsets = [13, 0], sizes = [1, 512], strides = [1, 1]} : vector<16x512xf32> to vector<1x512xf32>
    %409 = vector.extract_strided_slice %315 {offsets = [13, 0], sizes = [1, 512], strides = [1, 1]} : vector<16x512xf32> to vector<1x512xf32>
    %410 = tpu.concatenate %408, %409 in 0 : vector<1x512xf32>, vector<1x512xf32> -> vector<2x512xf32>
    %411 = arith.truncf %410 : vector<2x512xf32> to vector<2x512xbf16>
    %c6656 = arith.constant 6656 : index
    %c0_277 = arith.constant 0 : index
    %412 = vector.load %arg4[%c6656, %c0_277] : memref<8192x128xbf16, #tpu.memory_space<vmem>>, vector<512x128xbf16>
    %cst_278 = arith.constant dense<0.000000e+00> : vector<2x128xf32>
    %413 = tpu.matmul %411, %412, %cst_278 {dimension_numbers = #tpu.dot_dimension_numbers<[1], [0], [0], [1], [0, 0, 1, 1], [], []>} : vector<2x512xbf16>, vector<512x128xbf16>, vector<2x128xf32> -> vector<2x128xf32>
    %414 = arith.addf %407, %413 : vector<2x128xf32>
    %415 = vector.extract_strided_slice %159 {offsets = [14, 0], sizes = [1, 512], strides = [1, 1]} : vector<16x512xf32> to vector<1x512xf32>
    %416 = vector.extract_strided_slice %315 {offsets = [14, 0], sizes = [1, 512], strides = [1, 1]} : vector<16x512xf32> to vector<1x512xf32>
    %417 = tpu.concatenate %415, %416 in 0 : vector<1x512xf32>, vector<1x512xf32> -> vector<2x512xf32>
    %418 = arith.truncf %417 : vector<2x512xf32> to vector<2x512xbf16>
    %c7168 = arith.constant 7168 : index
    %c0_279 = arith.constant 0 : index
    %419 = vector.load %arg4[%c7168, %c0_279] : memref<8192x128xbf16, #tpu.memory_space<vmem>>, vector<512x128xbf16>
    %cst_280 = arith.constant dense<0.000000e+00> : vector<2x128xf32>
    %420 = tpu.matmul %418, %419, %cst_280 {dimension_numbers = #tpu.dot_dimension_numbers<[1], [0], [0], [1], [0, 0, 1, 1], [], []>} : vector<2x512xbf16>, vector<512x128xbf16>, vector<2x128xf32> -> vector<2x128xf32>
    %421 = arith.addf %414, %420 : vector<2x128xf32>
    %422 = vector.extract_strided_slice %159 {offsets = [15, 0], sizes = [1, 512], strides = [1, 1]} : vector<16x512xf32> to vector<1x512xf32>
    %423 = vector.extract_strided_slice %315 {offsets = [15, 0], sizes = [1, 512], strides = [1, 1]} : vector<16x512xf32> to vector<1x512xf32>
    %424 = tpu.concatenate %422, %423 in 0 : vector<1x512xf32>, vector<1x512xf32> -> vector<2x512xf32>
    %425 = arith.truncf %424 : vector<2x512xf32> to vector<2x512xbf16>
    %c7680 = arith.constant 7680 : index
    %c0_281 = arith.constant 0 : index
    %426 = vector.load %arg4[%c7680, %c0_281] : memref<8192x128xbf16, #tpu.memory_space<vmem>>, vector<512x128xbf16>
    %cst_282 = arith.constant dense<0.000000e+00> : vector<2x128xf32>
    %427 = tpu.matmul %425, %426, %cst_282 {dimension_numbers = #tpu.dot_dimension_numbers<[1], [0], [0], [1], [0, 0, 1, 1], [], []>} : vector<2x512xbf16>, vector<512x128xbf16>, vector<2x128xf32> -> vector<2x128xf32>
    %428 = arith.addf %421, %427 : vector<2x128xf32>
    %c0_283 = arith.constant 0 : index
    %c0_284 = arith.constant 0 : index
    %429 = vector.load %arg9[%c0_283, %c0_284] : memref<2x128xf32, #tpu.memory_space<vmem>>, vector<2x128xf32>
    %430 = arith.addf %429, %428 : vector<2x128xf32>
    %c0_285 = arith.constant 0 : index
    %c0_286 = arith.constant 0 : index
    %431 = vector.load %arg9[%c0_285, %c0_286] : memref<2x128xf32, #tpu.memory_space<vmem>>, vector<2x128xf32>
    tpu.vector_store %arg9[%c0_285, %c0_286], %430 {strides = array<i32>} : memref<2x128xf32, #tpu.memory_space<vmem>>, vector<2x128xf32>,
    %c1_i32_287 = arith.constant 1 : i32
    %432 = arith.cmpi eq, %arg0, %c1_i32_287 : i32
    %433 = arith.extui %432 : i1 to i32
    %c0_i32_288 = arith.constant 0 : i32
    %434 = arith.cmpi ne, %433, %c0_i32_288 : i32
    scf.if %434 {
      %c0_289 = arith.constant 0 : index
      %c0_290 = arith.constant 0 : index
      %435 = vector.load %arg9[%c0_289, %c0_290] : memref<2x128xf32, #tpu.memory_space<vmem>>, vector<2x128xf32>
      %c0_291 = arith.constant 0 : index
      %c0_292 = arith.constant 0 : index
      %436 = vector.load %arg5[%c0_291, %c0_292] : memref<1x128xf32, #tpu.memory_space<vmem>>, vector<1x128xf32>
      %437 = vector.broadcast %436 : vector<1x128xf32> to vector<2x128xf32>
      %438 = arith.addf %435, %437 : vector<2x128xf32>
      %cst_293 = arith.constant 0.000000e+00 : f32
      %439 = vector.broadcast %cst_293 : f32 to vector<2x128xf32>
      %440 = arith.maximumf %438, %439 : vector<2x128xf32>
      %c0_294 = arith.constant 0 : index
      %c0_295 = arith.constant 0 : index
      %441 = vector.load %arg6[%c0_294, %c0_295] : memref<128x8xf32, #tpu.memory_space<vmem>>, vector<128x8xf32>
      %cst_296 = arith.constant dense<0.000000e+00> : vector<2x8xf32>
      %442 = tpu.matmul %440, %441, %cst_296 {dimension_numbers = #tpu.dot_dimension_numbers<[1], [0], [0], [1], [0, 0, 1, 1], [], []>} : vector<2x128xf32>, vector<128x8xf32>, vector<2x8xf32> -> vector<2x8xf32>
      %c0_297 = arith.constant 0 : index
      %c0_298 = arith.constant 0 : index
      %443 = vector.load %arg7[%c0_297, %c0_298] : memref<1x8xf32, #tpu.memory_space<vmem>>, vector<1x8xf32>
      %444 = vector.broadcast %443 : vector<1x8xf32> to vector<2x8xf32>
      %445 = arith.addf %442, %444 : vector<2x8xf32>
      %c0_299 = arith.constant 0 : index
      %c0_300 = arith.constant 0 : index
      %446 = vector.load %arg8[%c0_299, %c0_300] : memref<2x8xf32, #tpu.memory_space<vmem>>, vector<2x8xf32>
      tpu.vector_store %arg8[%c0_299, %c0_300], %445 {strides = array<i32>} : memref<2x8xf32, #tpu.memory_space<vmem>>, vector<2x8xf32>,
    } else {
    }
    return
  }
  func.func @transform_0(%arg0: i32) -> (i32, i32, i32, i32) {
    %c0_i32 = arith.constant 0 : i32
    %c0_i32_0 = arith.constant 0 : i32
    %c0_i32_1 = arith.constant 0 : i32
    %c0_i32_2 = arith.constant 0 : i32
    %c0_i32_3 = arith.constant 0 : i32
    return %c0_i32, %c0_i32_0, %c0_i32_1, %c0_i32_2 : i32, i32, i32, i32
  }
  func.func @transform_1(%arg0: i32) -> (i32, i32, i32, i32, i32) {
    %c0_i32 = arith.constant 0 : i32
    %c0_i32_0 = arith.constant 0 : i32
    %c0_i32_1 = arith.constant 0 : i32
    %c0_i32_2 = arith.constant 0 : i32
    %c0_i32_3 = arith.constant 0 : i32
    %c0_i32_4 = arith.constant 0 : i32
    return %c0_i32, %c0_i32_0, %c0_i32_1, %c0_i32_2, %c0_i32_3 : i32, i32, i32, i32, i32
  }
  func.func @transform_2(%arg0: i32) -> (i32, i32) {
    %c0_i32 = arith.constant 0 : i32
    %c0_i32_0 = arith.constant 0 : i32
    %c0_i32_1 = arith.constant 0 : i32
    return %c0_i32, %c0_i32_0 : i32, i32
  }
  func.func @transform_3(%arg0: i32) -> (i32, i32) {
    %c0_i32 = arith.constant 0 : i32
    %c0_i32_0 = arith.constant 0 : i32
    return %arg0, %c0_i32 : i32, i32
  }
  func.func @transform_4(%arg0: i32) -> (i32, i32) {
    %c0_i32 = arith.constant 0 : i32
    %c0_i32_0 = arith.constant 0 : i32
    %c0_i32_1 = arith.constant 0 : i32
    return %c0_i32, %c0_i32_0 : i32, i32
  }
  func.func @transform_5(%arg0: i32) -> (i32, i32) {
    %c0_i32 = arith.constant 0 : i32
    %c0_i32_0 = arith.constant 0 : i32
    %c0_i32_1 = arith.constant 0 : i32
    return %c0_i32, %c0_i32_0 : i32, i32
  }
  func.func @transform_6(%arg0: i32) -> (i32, i32) {
    %c0_i32 = arith.constant 0 : i32
    %c0_i32_0 = arith.constant 0 : i32
    %c0_i32_1 = arith.constant 0 : i32
    return %c0_i32, %c0_i32_0 : i32, i32
  }
  func.func @transform_7(%arg0: i32) -> (i32, i32) {
    %c0_i32 = arith.constant 0 : i32
    %c0_i32_0 = arith.constant 0 : i32
    %c0_i32_1 = arith.constant 0 : i32
    return %c0_i32, %c0_i32_0 : i32, i32
  }
}

</mosaic_0001>

<bundles_post_ra>
// kernel: simple_cnn_forward.1
= control target key start
LH: loop header
LB: loop body
LE: loop exit
PB: predicated region body
PF: predicated region fallthrough
CT: control target
= control target key end

     0   :  { %12 = vsyncpa [#allocation4], 0  ;;  %s14830_s24 = smov 0   ;;  %s20479_s0 = inlined_call_operand.vmem [shape: f32[2,4,33,99], index: 0, kind: input, shape index: {}]   ;;  %s20480_s1 = inlined_call_operand.vmem [shape: bf16[3,2,2,99,512], index: 1, kind: input, shape index: {}]   ;;  %s20481_s2 = inlined_call_operand.vmem [shape: f32[1,512], index: 2, kind: input, shape index: {}]   ;;  %s20482_s3 = inlined_call_operand.vmem [shape: bf16[16384,128], index: 3, kind: input, shape index: {}]   ;;  %s20483_s4 = inlined_call_operand.vmem [shape: f32[1,128], index: 4, kind: input, shape index: {}]   ;;  %s20484_s5 = inlined_call_operand.vmem [shape: f32[128,8], index: 5, kind: input, shape index: {}]   ;;  %s20485_s6 = inlined_call_operand.vmem [shape: f32[1,8], index: 6, kind: input, shape index: {}]   ;;  %s20486_s7 = inlined_call_operand.hbm [shape: f32[2,8], index: 7, kind: output, shape index: {}]  }
   0x1 LB: > { %s14836_s25 = sadd.s32 4294967295, %s14785_s24   ;;  %p10195_p0 = scmp.ge.s32.totalorder %s14785_s24, 1  ;;  %s14785_s24 = sphi %s14830_s24, %s18_s24  }
   0x2   : > { %p234_p1 = scmp.lt.s32.totalorder %s14785_s24, 3 }
   0x4   : > { %p235_p2 = pnand %p10195_p0, %p234_p1 }
   0x6   : > { %238 = sbr.rel (%p235_p2) target bundleno = 1711 (0x6af), region = 48 }
   0xb   : > { %s10196_s26 = sshll.u32 %s14836_s25, 10  ;;  %s10198_s27 = sshll.u32 %s14836_s25, 4 }
   0xc   : > { %p262_p3 = scmp.lt.s32.totalorder %s10196_s26, 2047  ;;  %p10199_p4 = scmp.ne.s32.totalorder %s14836_s25, 0 }
   0xe   : > { %s21516_s26 = smov (!%p262_p3, %s10196_s26), 2047  ;;  %272 = sbr.rel (%p10199_p4) target bundleno = 21 (0x15), region = 52 }
   0xf   : > { %s10197_s28 = sshll.u32 %s21516_s26, 2 }
  0x10   : > { %s14845_s8 = scalar_lea.vmem %s20482_s3, %s10197_s28 }
  0x13   : > { %v14787_v0 = vmov 0.0  }
  0x14   : > { %273 = vst [vmem:[#allocation2] sm:$0x3] %v14787_v0 }
  0x15 PF: > { %v307_v1 = vld [vmem:[%s20480_s1 + $0xc0] sm:$0x33]  ;;  %vm446_vm0 = vcmask 1040384   ;;  %vm447_vm1 = vcmask 1041408   ;;  %v14788_v3 = vmov 65535   ;;  %s15078_s16 = scalar_lea.vmem %s20479_s0, %s10198_s27  ;;  %vm439_vm2 = vcmask 809984  }
  0x16   : > { %v383_v2 = vunpack.c.l.b16 %v307_v1  ;;  %v448_v4 = vsel %vm446_vm0, 4294967295, %v14788_v3  ;;  %v384_v5 = vunpack.c.h.b16 %v307_v1  ;;  %v308_v6 = vld [vmem:[%s20480_s1 + $0xc8] sm:$0x33]  ;;  %v10285_v12 = vld [vmem:[%s20480_s1 + $0xa0] sm:$0xf]  ;;  %p13923_p5 = scmp.ne.s32.totalorder %s14836_s25, 1 }
  0x17   : > { %v14855_v7 = vsel %vm447_vm1, %v448_v4, 0  ;;  %v385_v8 = vunpack.c.l.b16 %v308_v6  ;;  %v386_v9 = vunpack.c.h.b16 %v308_v6  ;;  %v13950_v13 = vld [vmem:[%s20480_s1 + $0xac] sm:$0xf0]  ;;  %v13948_v16 = vld [vmem:[%s20480_s1 + $0xa4] sm:$0xf] }
  0x18   : > { %v411_v10 = vpack.c.b16 %v383_v2, %v383_v2  ;;  %v412_v11 = vpack.c.b16 %v384_v5, %v384_v5  ;;  %v10287_v17 = vld [vmem:[%s20480_s1 + $0xb0] sm:$0xf0]  ;;  %v10293_v18 = vld [vmem:[%s20480_s1 + $0xa8] sm:$0xf]  ;;  %v13951_v21 = vld [vmem:[%s20480_s1 + $0xb4] sm:$0xf0]  ;;  %v14895_v26 = vor.u32 %v13950_v13, %v10285_v12 }
  0x19   : > { %v413_v14 = vpack.c.b16 %v385_v8, %v385_v8  ;;  %v414_v15 = vpack.c.b16 %v386_v9, %v386_v9  ;;  %v13949_v22 = vld [vmem:[%s20480_s1 + $0xac] sm:$0xf]  ;;  %v10295_v23 = vld [vmem:[%s20480_s1 + $0xb8] sm:$0xf0]  ;;  %v14897_v27 = vor.u32 %v13948_v16, %v10287_v17  ;;  %v10269_v28 = vld [vmem:[%s20480_s1 + $0x80] sm:$0xf]  ;;  %v14907_v30 = vor.u32 %v13951_v21, %v10293_v18 }
  0x1a   : > { %v14873_v19 = vand.u32 %v14855_v7, %v411_v10  ;;  %v14876_v20 = vand.u32 %v14855_v7, %v412_v11  ;;  %v13946_v29 = vld [vmem:[%s20480_s1 + $0x8c] sm:$0xf0]  ;;  %v14909_v31 = vor.u32 %v13949_v22, %v10295_v23  ;;  %v13944_v32 = vld [vmem:[%s20480_s1 + $0x84] sm:$0xf]  ;;  %v10271_v33 = vld [vmem:[%s20480_s1 + $0x90] sm:$0xf0] }
  0x1b   : > { %v14888_v24 = vand.u32 %v14855_v7, %v413_v14  ;;  %v14891_v25 = vand.u32 %v14855_v7, %v414_v15  ;;  %v10277_v34 = vld [vmem:[%s20480_s1 + $0x88] sm:$0xf]  ;;  %v13947_v35 = vld [vmem:[%s20480_s1 + $0x94] sm:$0xf0]  ;;  %v13945_v36 = vld [vmem:[%s20480_s1 + $0x8c] sm:$0xf]  ;;  %v14931_v38 = vor.u32 %v13946_v29, %v10269_v28  ;;  %v14933_v39 = vor.u32 %v13944_v32, %v10271_v33 }
  0x1c   : > { %463 = vmatpush.bf16.msra.mxu0 %v14873_v19  ;;  %482 = vmatpush.bf16.msra.mxu1 %v14876_v20  ;;  %v10279_v37 = vld [vmem:[%s20480_s1 + $0x98] sm:$0xf0]  ;;  %v10253_v40 = vld [vmem:[%s20480_s1 + $0x60] sm:$0xf]  ;;  %v13942_v41 = vld [vmem:[%s20480_s1 + $0x6c] sm:$0xf0]  ;;  %v14943_v42 = vor.u32 %v13947_v35, %v10277_v34 }
  0x1d   : > { %501 = vmatpush.bf16.msra.mxu2 %v14888_v24  ;;  %520 = vmatpush.bf16.msra.mxu3 %v14891_v25  ;;  %v14945_v43 = vor.u32 %v13945_v36, %v10279_v37  ;;  %v13940_v44 = vld [vmem:[%s20480_s1 + $0x64] sm:$0xf]  ;;  %v10255_v45 = vld [vmem:[%s20480_s1 + $0x70] sm:$0xf0]  ;;  %v10261_v46 = vld [vmem:[%s20480_s1 + $0x68] sm:$0xf]  ;;  %v14967_v50 = vor.u32 %v13942_v41, %v10253_v40 }
  0x1e   : > { %v13943_v47 = vld [vmem:[%s20480_s1 + $0x74] sm:$0xf0]  ;;  %v13941_v48 = vld [vmem:[%s20480_s1 + $0x6c] sm:$0xf]  ;;  %v10263_v49 = vld [vmem:[%s20480_s1 + $0x78] sm:$0xf0]  ;;  %v14969_v51 = vor.u32 %v13940_v44, %v10255_v45 }
  0x1f   : > { %20803 = vst [vmem:[#allocation6_spill] sm:$0xff] %v14967_v50  ;;  %v10237_v52 = vld [vmem:[%s20480_s1 + $0x40] sm:$0xf]  ;;  %v13938_v53 = vld [vmem:[%s20480_s1 + $0x4c] sm:$0xf0]  ;;  %v14979_v54 = vor.u32 %v13943_v47, %v10261_v46  ;;  %v14981_v55 = vor.u32 %v13941_v48, %v10263_v49  ;;  %v276_v47 = vld [vmem:[%s15078_s16 + $0x8] sm:$0xff] }
  0x20   : > { %464 = vmatpush.bf16.msra.mxu0 %v14895_v26  ;;  %483 = vmatpush.bf16.msra.mxu1 %v14897_v27  ;;  %20804 = vst [vmem:[#allocation7_spill] sm:$0xff] %v14969_v51  ;;  %v13936_v56 = vld [vmem:[%s20480_s1 + $0x44] sm:$0xf]  ;;  %v10239_v57 = vld [vmem:[%s20480_s1 + $0x50] sm:$0xf0]  ;;  %v15006_v63 = vor.u32 %v13938_v53, %v10237_v52 }
  0x21   : > { %502 = vmatpush.bf16.msra.mxu2 %v14907_v30  ;;  %521 = vmatpush.bf16.msra.mxu3 %v14909_v31  ;;  %20805 = vst [vmem:[#allocation8_spill] sm:$0xff] %v14979_v54  ;;  %v10245_v58 = vld [vmem:[%s20480_s1 + $0x48] sm:$0xf]  ;;  %v13939_v59 = vld [vmem:[%s20480_s1 + $0x54] sm:$0xf0]  ;;  %v15008_v0 = vor.u32 %v13936_v56, %v10239_v57  ;;  %v275_v46 = vld [vmem:[%s15078_s16] sm:$0xff] }
  0x22   : > { %20806 = vst [vmem:[#allocation9_spill] sm:$0xff] %v14981_v55  ;;  %v13937_v60 = vld [vmem:[%s20480_s1 + $0x4c] sm:$0xf]  ;;  %v10247_v61 = vld [vmem:[%s20480_s1 + $0x58] sm:$0xf0]  ;;  %v15021_v4 = vor.u32 %v13939_v59, %v10245_v58  ;;  %v15109_v58 = vpack.c.bf16 %v276_v47, %v275_v46 }
  0x23   : > { %v10331_v62 = vld [vmem:[%s20480_s1 + $0x190] sm:$0x33]  ;;  %20807 = vst [vmem:[#allocation10_spill] sm:$0xff] %v15006_v63  ;;  %v10221_v1 = vld [vmem:[%s20480_s1 + $0x20] sm:$0xf]  ;;  %v15023_v5 = vor.u32 %v13937_v60, %v10247_v61 }
  0x24   : > { %465 = vmatpush.bf16.msra.mxu0 %v14931_v38  ;;  %484 = vmatpush.bf16.msra.mxu1 %v14933_v39  ;;  %20808 = vst [vmem:[#allocation11_spill] sm:$0xff] %v15008_v0  ;;  %v13934_v2 = vld [vmem:[%s20480_s1 + $0x2c] sm:$0xf0]  ;;  %v13932_v3 = vld [vmem:[%s20480_s1 + $0x24] sm:$0xf]  ;;  %v655_v12 = vunpack.c.l.b16 %v10331_v62  ;;  %v656_v13 = vunpack.c.h.b16 %v10331_v62 }
  0x25   : > { %503 = vmatpush.bf16.msra.mxu2 %v14943_v42  ;;  %522 = vmatpush.bf16.msra.mxu3 %v14945_v43  ;;  %20809 = vst [vmem:[#allocation12_spill] sm:$0xff] %v15021_v4  ;;  %v10223_v6 = vld [vmem:[%s20480_s1 + $0x30] sm:$0xf0]  ;;  %v10229_v8 = vld [vmem:[%s20480_s1 + $0x28] sm:$0xf]  ;;  %v15045_v15 = vor.u32 %v13934_v2, %v10221_v1 }
  0x26   : > { %20810 = vst [vmem:[#allocation13_spill] sm:$0xff] %v15023_v5  ;;  %v13935_v9 = vld [vmem:[%s20480_s1 + $0x34] sm:$0xf0]  ;;  %v13933_v10 = vld [vmem:[%s20480_s1 + $0x2c] sm:$0xf]  ;;  %v15047_v16 = vor.u32 %v13932_v3, %v10223_v6  ;;  %v683_v37 = vpack.c.b16 %v655_v12, %v655_v12  ;;  %v684_v40 = vpack.c.b16 %v656_v13, %v656_v13 }
  0x27   : > { %v10231_v11 = vld [vmem:[%s20480_s1 + $0x38] sm:$0xf0]  ;;  %20811 = vst [vmem:[#allocation14_spill] sm:$0xff] %v15045_v15  ;;  %v10205_v17 = vld [vmem:[%s20480_s1] sm:$0xf]  ;;  %v15060_v22 = vor.u32 %v13935_v9, %v10229_v8 }
  0x28   : > { %466 = vmatpush.bf16.msra.mxu0 %v14967_v50  ;;  %485 = vmatpush.bf16.msra.mxu1 %v14969_v51  ;;  %v10332_v14 = vld [vmem:[%s20480_s1 + $0x198] sm:$0x33]  ;;  %20812 = vst [vmem:[#allocation15_spill] sm:$0xff] %v15047_v16  ;;  %v13930_v18 = vld [vmem:[%s20480_s1 + $0xc] sm:$0xf0]  ;;  %v15062_v23 = vor.u32 %v13933_v10, %v10231_v11  ;;  %v15101_v53 = vand.u32 %v683_v37, %v14855_v7 }
  0x29   : > { %504 = vmatpush.bf16.msra.mxu2 %v14979_v54  ;;  %523 = vmatpush.bf16.msra.mxu3 %v14981_v55  ;;  %v13928_v21 = vld [vmem:[%s20480_s1 + $0x4] sm:$0xf]  ;;  %20813 = vst [vmem:[#allocation16_spill] sm:$0xff] %v15060_v22  ;;  %v10207_v28 = vld [vmem:[%s20480_s1 + $0x10] sm:$0xf0]  ;;  %v657_v33 = vunpack.c.l.b16 %v10332_v14  ;;  %v658_v34 = vunpack.c.h.b16 %v10332_v14  ;;  %v15088_v41 = vor.u32 %v13930_v18, %v10205_v17  ;;  %v15104_v56 = vand.u32 %v684_v40, %v14855_v7 }
  0x2a   : > { %20814 = vst [vmem:[#allocation17_spill] sm:$0xff] %v15062_v23  ;;  %v10213_v29 = vld [vmem:[%s20480_s1 + $0x8] sm:$0xf]  ;;  %v13931_v32 = vld [vmem:[%s20480_s1 + $0x14] sm:$0xf0]  ;;  %v15090_v44 = vor.u32 %v13928_v21, %v10207_v28 }
  0x2b   : > { %v13929_v35 = vld [vmem:[%s20480_s1 + $0xc] sm:$0xf]  ;;  %v10215_v36 = vld [vmem:[%s20480_s1 + $0x18] sm:$0xf0]  ;;  %20815 = vst [vmem:[#allocation18_spill] sm:$0xff] %v15088_v41  ;;  %v15092_v45 = vor.u32 %v13931_v32, %v10213_v29  ;;  %v685_v49 = vpack.c.b16 %v657_v33, %v657_v33  ;;  %v686_v52 = vpack.c.b16 %v658_v34, %v658_v34 }
  0x2c   : > { %467 = vmatpush.bf16.msra.mxu0 %v15006_v63  ;;  %486 = vmatpush.bf16.msra.mxu1 %v15008_v0  ;;  %20816 = vst [vmem:[#allocation19_spill] sm:$0xff] %v15090_v44  ;;  %v15098_v48 = vor.u32 %v13929_v35, %v10215_v36  ;;  %v10415_v57 = vld [vmem:[%s20480_s1 + $0x170] sm:$0xf]  ;;  %v13974_v59 = vld [vmem:[%s20480_s1 + $0x17c] sm:$0xf0] }
  0x2d   : > { %505 = vmatpush.bf16.msra.mxu2 %v15021_v4  ;;  %524 = vmatpush.bf16.msra.mxu3 %v15023_v5  ;;  %20817 = vst [vmem:[#allocation20_spill] sm:$0xff] %v15092_v45  ;;  %v13972_v60 = vld [vmem:[%s20480_s1 + $0x174] sm:$0xf]  ;;  %v10417_v61 = vld [vmem:[%s20480_s1 + $0x180] sm:$0xf0]  ;;  %v15125_v62 = vand.u32 %v685_v49, %v14855_v7  ;;  %v15128_v1 = vand.u32 %v686_v52, %v14855_v7 }
  0x2e   : > { %20818 = vst [vmem:[#allocation21_spill] sm:$0xff] %v15098_v48  ;;  %v10423_v2 = vld [vmem:[%s20480_s1 + $0x178] sm:$0xf]  ;;  %v13975_v3 = vld [vmem:[%s20480_s1 + $0x184] sm:$0xf0]  ;;  %v15138_v6 = vor.u32 %v13974_v59, %v10415_v57  ;;  %v15140_v8 = vor.u32 %v13972_v60, %v10417_v61 }
  0x2f   : > { %20819 = vst [vmem:[#allocation22_spill] sm:$0xff] %v15101_v53  ;;  %v13973_v9 = vld [vmem:[%s20480_s1 + $0x17c] sm:$0xf]  ;;  %v10425_v10 = vld [vmem:[%s20480_s1 + $0x188] sm:$0xf0]  ;;  %v15170_v17 = vor.u32 %v13975_v3, %v10423_v2 }
  0x30   : > { %468 = vmatpush.bf16.msra.mxu0 %v15045_v15  ;;  %487 = vmatpush.bf16.msra.mxu1 %v15047_v16  ;;  %20820 = vst [vmem:[#allocation23_spill] sm:$0xff] %v15104_v56  ;;  %v10399_v11 = vld [vmem:[%s20480_s1 + $0x150] sm:$0xf]  ;;  %v13970_v12 = vld [vmem:[%s20480_s1 + $0x15c] sm:$0xf0]  ;;  %v15172_v18 = vor.u32 %v13973_v9, %v10425_v10 }
  0x31   : > { %506 = vmatpush.bf16.msra.mxu2 %v15060_v22  ;;  %525 = vmatpush.bf16.msra.mxu3 %v15062_v23  ;;  %20821 = vst [vmem:[#allocation24_spill] sm:$0xff] %v15125_v62  ;;  %v13968_v13 = vld [vmem:[%s20480_s1 + $0x154] sm:$0xf]  ;;  %v10401_v14 = vld [vmem:[%s20480_s1 + $0x160] sm:$0xf0]  ;;  %v15182_v29 = vor.u32 %v13970_v12, %v10399_v11  ;;  %v10202_v12 = vld [vmem:[%s15078_s16 + $0x58] sm:$0xff] }
  0x32   : > { %20822 = vst [vmem:[#allocation25_spill] sm:$0xff] %v15128_v1  ;;  %v10407_v21 = vld [vmem:[%s20480_s1 + $0x158] sm:$0xf]  ;;  %v13971_v28 = vld [vmem:[%s20480_s1 + $0x164] sm:$0xf0]  ;;  %v15184_v32 = vor.u32 %v13968_v13, %v10401_v14  ;;  %v10201_v11 = vld [vmem:[%s15078_s16 + $0x50] sm:$0xff] }
  0x33   : > { %20823 = vst [vmem:[#allocation26_spill] sm:$0xff] %v15138_v6  ;;  %v13969_v33 = vld [vmem:[%s20480_s1 + $0x15c] sm:$0xf]  ;;  %v10409_v34 = vld [vmem:[%s20480_s1 + $0x168] sm:$0xf0]  ;;  %v15206_v46 = vor.u32 %v13971_v28, %v10407_v21 }
  0x34   : > { %469 = vmatpush.bf16.msra.mxu0 %v15088_v41  ;;  %488 = vmatpush.bf16.msra.mxu1 %v15090_v44  ;;  %20824 = vst [vmem:[#allocation27_spill] sm:$0xff] %v15140_v8  ;;  %v10383_v35 = vld [vmem:[%s20480_s1 + $0x130] sm:$0xf]  ;;  %v13966_v36 = vld [vmem:[%s20480_s1 + $0x13c] sm:$0xf0]  ;;  %v15208_v47 = vor.u32 %v13969_v33, %v10409_v34 }
  0x35   : > { %507 = vmatpush.bf16.msra.mxu2 %v15092_v45  ;;  %526 = vmatpush.bf16.msra.mxu3 %v15098_v48  ;;  %20825 = vst [vmem:[#allocation28_spill] sm:$0xff] %v15170_v17  ;;  %v13964_v37 = vld [vmem:[%s20480_s1 + $0x134] sm:$0xf]  ;;  %v10385_v40 = vld [vmem:[%s20480_s1 + $0x140] sm:$0xf0]  ;;  %v15218_v57 = vor.u32 %v13966_v36, %v10383_v35 }
  0x36   : > { %20826 = vst [vmem:[#allocation29_spill] sm:$0xff] %v15172_v18  ;;  %v10391_v49 = vld [vmem:[%s20480_s1 + $0x138] sm:$0xf]  ;;  %v13967_v52 = vld [vmem:[%s20480_s1 + $0x144] sm:$0xf0]  ;;  %v15220_v59 = vor.u32 %v13964_v37, %v10385_v40 }
  0x37   : > { %10299 = vmatmul.msk.bf16.vlgmr.msra.gmra.mxu0 %vm439_vm2, %v15109_v58  ;;  %10301 = vmatmul.msk.bf16.vlgmr.msra.gmra.mxu1 %vm439_vm2, %v15109_v58  ;;  %20827 = vst [vmem:[#allocation30_spill] sm:$0xff] %v15182_v29  ;;  %v13965_v60 = vld [vmem:[%s20480_s1 + $0x13c] sm:$0xf]  ;;  %v10393_v61 = vld [vmem:[%s20480_s1 + $0x148] sm:$0xf0]  ;;  %v15247_v14 = vor.u32 %v13967_v52, %v10391_v49  ;;  %v15275_v52 = vpack.c.bf16 %v10202_v12, %v10201_v11 }
  0x38   : > { %724 = vmatpush.bf16.msrb.mxu0 %v15101_v53  ;;  %743 = vmatpush.bf16.msrb.mxu1 %v15104_v56  ;;  %20828 = vst [vmem:[#allocation31_spill] sm:$0xff] %v15184_v32  ;;  %v10367_v2 = vld [vmem:[%s20480_s1 + $0x110] sm:$0xf]  ;;  %v13962_v3 = vld [vmem:[%s20480_s1 + $0x11c] sm:$0xf0]  ;;  %v15249_v21 = vor.u32 %v13965_v60, %v10393_v61 }
  0x39   : > { %10303 = vmatmul.msk.bf16.vlgmr.msra.gmra.mxu2 %vm439_vm2, %v15109_v58  ;;  %10305 = vmatmul.msk.bf16.vlgmr.msra.gmra.mxu3 %vm439_vm2, %v15109_v58  ;;  %20829 = vst [vmem:[#allocation32_spill] sm:$0xff] %v15206_v46  ;;  %v13960_v9 = vld [vmem:[%s20480_s1 + $0x114] sm:$0xf]  ;;  %v10369_v10 = vld [vmem:[%s20480_s1 + $0x120] sm:$0xf0]  ;;  %v15262_v35 = vor.u32 %v13962_v3, %v10367_v2 }
  0x3a   : > { %762 = vmatpush.bf16.msrb.mxu2 %v15125_v62  ;;  %781 = vmatpush.bf16.msrb.mxu3 %v15128_v1  ;;  %20830 = vst [vmem:[#allocation33_spill] sm:$0xff] %v15208_v47  ;;  %v10467_v13 = vld [vmem:[%s20480_s1 + $0x260] sm:$0x33]  ;;  %v10375_v28 = vld [vmem:[%s20480_s1 + $0x118] sm:$0xf]  ;;  %v15264_v36 = vor.u32 %v13960_v9, %v10369_v10 }
  0x3b   : > { %20831 = vst [vmem:[#allocation34_spill] sm:$0xff] %v15218_v57  ;;  %v13963_v33 = vld [vmem:[%s20480_s1 + $0x124] sm:$0xf0]  ;;  %v13961_v34 = vld [vmem:[%s20480_s1 + $0x11c] sm:$0xf]  ;;  %v926_v2 = vunpack.c.l.b16 %v10467_v13  ;;  %v927_v3 = vunpack.c.h.b16 %v10467_v13 }
  0x3c   : > { %725 = vmatpush.bf16.msrb.mxu0 %v15138_v6  ;;  %744 = vmatpush.bf16.msrb.mxu1 %v15140_v8  ;;  %20832 = vst [vmem:[#allocation35_spill] sm:$0xff] %v15220_v59  ;;  %v10377_v37 = vld [vmem:[%s20480_s1 + $0x128] sm:$0xf0]  ;;  %v10351_v40 = vld [vmem:[%s20480_s1 + $0xf0] sm:$0xf]  ;;  %v15288_v10 = vor.u32 %v13963_v33, %v10375_v28 }
  0x3d   : > { %20833 = vst [vmem:[#allocation36_spill] sm:$0xff] %v15247_v14  ;;  %v13958_v49 = vld [vmem:[%s20480_s1 + $0xfc] sm:$0xf0]  ;;  %v13956_v60 = vld [vmem:[%s20480_s1 + $0xf4] sm:$0xf]  ;;  %v15290_v11 = vor.u32 %v13961_v34, %v10377_v37 }
  0x3e   : > { %763 = vmatpush.bf16.msrb.mxu2 %v15170_v17  ;;  %782 = vmatpush.bf16.msrb.mxu3 %v15172_v18  ;;  %20834 = vst [vmem:[#allocation37_spill] sm:$0xff] %v15249_v21  ;;  %v10353_v61 = vld [vmem:[%s20480_s1 + $0x100] sm:$0xf0]  ;;  %v10468_v9 = vld [vmem:[%s20480_s1 + $0x268] sm:$0x33]  ;;  %v15303_v28 = vor.u32 %v13958_v49, %v10351_v40 }
  0x3f   : > { %20835 = vst [vmem:[#allocation38_spill] sm:$0xff] %v15262_v35  ;;  %v10359_v12 = vld [vmem:[%s20480_s1 + $0xf8] sm:$0xf]  ;;  %v13959_v13 = vld [vmem:[%s20480_s1 + $0x104] sm:$0xf0]  ;;  %v15305_v33 = vor.u32 %v13956_v60, %v10353_v61  ;;  %v954_v60 = vpack.c.b16 %v926_v2, %v926_v2  ;;  %v955_v61 = vpack.c.b16 %v927_v3, %v927_v3 }
  0x40   : > { %726 = vmatpush.bf16.msrb.mxu0 %v15182_v29  ;;  %745 = vmatpush.bf16.msrb.mxu1 %v15184_v32  ;;  %20836 = vst [vmem:[#allocation39_spill] sm:$0xff] %v15264_v36  ;;  %v10361_v34 = vld [vmem:[%s20480_s1 + $0x108] sm:$0xf0]  ;;  %v10335_v37 = vld [vmem:[%s20480_s1 + $0xd0] sm:$0xf] }
  0x41   : > { %20837 = vst [vmem:[#allocation40_spill] sm:$0xff] %v15288_v10  ;;  %v13952_v40 = vld [vmem:[%s20480_s1 + $0xd4] sm:$0xf]  ;;  %v10337_v49 = vld [vmem:[%s20480_s1 + $0xe0] sm:$0xf0] }
  0x42   : > { %764 = vmatpush.bf16.msrb.mxu2 %v15206_v46  ;;  %783 = vmatpush.bf16.msrb.mxu3 %v15208_v47  ;;  %20838 = vst [vmem:[#allocation41_spill] sm:$0xff] %v15290_v11  ;;  %v10343_v2 = vld [vmem:[%s20480_s1 + $0xd8] sm:$0xf]  ;;  %v15343_v3 = vor.u32 %v13952_v40, %v10337_v49  ;;  %v10551_v40 = vld [vmem:[%s20480_s1 + $0x240] sm:$0xf] }
  0x43   : > { %20839 = vst [vmem:[#allocation42_spill] sm:$0xff] %v15303_v28  ;;  %v13998_v49 = vld [vmem:[%s20480_s1 + $0x24c] sm:$0xf0]  ;;  %v11029_v8 = vld [vmem:[%s20480_s1 + $0x520] sm:$0xf] }
  0x44   : > { %727 = vmatpush.bf16.msrb.mxu0 %v15218_v57  ;;  %746 = vmatpush.bf16.msrb.mxu1 %v15220_v59  ;;  %v13957_v59 = vld [vmem:[%s20480_s1 + $0xfc] sm:$0xf]  ;;  %20840 = vst [vmem:[#allocation43_spill] sm:$0xff] %v15305_v33  ;;  %v11013_v1 = vld [vmem:[%s20480_s1 + $0x500] sm:$0xf] }
  0x45   : > { %20844 = vst [vmem:[#allocation47_spill] sm:$0xff] %v15343_v3  ;;  %v14078_v62 = vld [vmem:[%s20480_s1 + $0x50c] sm:$0xf0]  ;;  %v11169_v16 = vld [vmem:[%s20480_s1 + $0x608] sm:$0xf0] }
  0x46   : > { %765 = vmatpush.bf16.msrb.mxu2 %v15247_v14  ;;  %784 = vmatpush.bf16.msrb.mxu3 %v15249_v21  ;;  %v13954_v21 = vld [vmem:[%s20480_s1 + $0xdc] sm:$0xf0]  ;;  %v928_v14 = vunpack.c.l.b16 %v10468_v9  ;;  %v11123_v44 = vld [vmem:[%s20480_s1 + $0x670] sm:$0x33]  ;;  %v11334_v51 = vld [vmem:[%s20480_s1 + $0x718] sm:$0xf0] }
  0x47   : > { %10300 = vmatmul.msk.bf16.gmra.mxu0 %vm439_vm2, %v15275_v52  ;;  %10302 = vmatmul.msk.bf16.gmra.mxu1 %vm439_vm2, %v15275_v52  ;;  %v15336_v57 = vor.u32 %v13954_v21, %v10335_v37  ;;  %v10345_v21 = vld [vmem:[%s20480_s1 + $0xe8] sm:$0xf0]  ;;  %v15358_v37 = vand.u32 %v955_v61, %v14855_v7  ;;  %v11302_v50 = vld [vmem:[%s20480_s1 + $0x6d8] sm:$0xf0] }
  0x48   : > { %728 = vmatpush.bf16.msrb.mxu0 %v15262_v35  ;;  %747 = vmatpush.bf16.msrb.mxu1 %v15264_v36  ;;  %v929_v35 = vunpack.c.h.b16 %v10468_v9  ;;  %v15332_v9 = vor.u32 %v13959_v13, %v10359_v12  ;;  %v15334_v36 = vor.u32 %v13957_v59, %v10361_v34  ;;  %v13953_v59 = vld [vmem:[%s20480_s1 + $0xdc] sm:$0xf]  ;;  %v956_v12 = vpack.c.b16 %v928_v14, %v928_v14  ;;  %v10553_v14 = vld [vmem:[%s20480_s1 + $0x250] sm:$0xf0] }
  0x49   : > { %10304 = vmatmul.msk.bf16.gmra.mxu2 %vm439_vm2, %v15275_v52  ;;  %10306 = vmatmul.msk.bf16.gmra.mxu3 %vm439_vm2, %v15275_v52  ;;  %20843 = vst [vmem:[#allocation46_spill] sm:$0xff] %v15336_v57  ;;  %v15355_v34 = vand.u32 %v954_v60, %v14855_v7  ;;  %v15376_v60 = vor.u32 %v13953_v59, %v10345_v21  ;;  %v13999_v59 = vld [vmem:[%s20480_s1 + $0x254] sm:$0xf0]  ;;  %v13997_v21 = vld [vmem:[%s20480_s1 + $0x24c] sm:$0xf] }
  0x4a   : > { %766 = vmatpush.bf16.msrb.mxu2 %v15288_v10  ;;  %785 = vmatpush.bf16.msrb.mxu3 %v15290_v11  ;;  %20841 = vst [vmem:[#allocation44_spill] sm:$0xff] %v15332_v9  ;;  %v13955_v11 = vld [vmem:[%s20480_s1 + $0xe4] sm:$0xf0]  ;;  %v957_v13 = vpack.c.b16 %v929_v35, %v929_v35  ;;  %v15381_v61 = vand.u32 %v956_v12, %v14855_v7  ;;  %v10561_v12 = vld [vmem:[%s20480_s1 + $0x258] sm:$0xf0] }
  0x4b   : > { %20842 = vst [vmem:[#allocation45_spill] sm:$0xff] %v15334_v36  ;;  %v15374_v35 = vor.u32 %v13955_v11, %v10343_v2  ;;  %v15391_v11 = vor.u32 %v13998_v49, %v10551_v40  ;;  %v15416_v49 = vor.u32 %v13997_v21, %v10561_v12  ;;  %v10545_v21 = vld [vmem:[%s20480_s1 + $0x238] sm:$0xf0]  ;;  %v13978_v10 = vld [vmem:[%s20480_s1 + $0x1ac] sm:$0xf0] }
  0x4c   : > { %729 = vmatpush.bf16.msrb.mxu0 %v15303_v28  ;;  %748 = vmatpush.bf16.msrb.mxu1 %v15305_v33  ;;  %20845 = vst [vmem:[#allocation48_spill] sm:$0xff] %v15355_v34  ;;  %v13996_v33 = vld [vmem:[%s20480_s1 + $0x244] sm:$0xf]  ;;  %v15384_v28 = vand.u32 %v957_v13, %v14855_v7  ;;  %v13994_v13 = vld [vmem:[%s20480_s1 + $0x22c] sm:$0xf0] }
  0x4d   : > { %20846 = vst [vmem:[#allocation49_spill] sm:$0xff] %v15358_v37  ;;  %v15393_v2 = vor.u32 %v13996_v33, %v10553_v14  ;;  %v10535_v33 = vld [vmem:[%s20480_s1 + $0x220] sm:$0xf]  ;;  %v13992_v14 = vld [vmem:[%s20480_s1 + $0x224] sm:$0xf] }
  0x4e   : > { %767 = vmatpush.bf16.msrb.mxu2 %v15332_v9  ;;  %786 = vmatpush.bf16.msrb.mxu3 %v15334_v36  ;;  %20847 = vst [vmem:[#allocation50_spill] sm:$0xff] %v15374_v35  ;;  %v10559_v9 = vld [vmem:[%s20480_s1 + $0x248] sm:$0xf]  ;;  %v15438_v12 = vor.u32 %v13994_v13, %v10535_v33  ;;  %v10521_v33 = vld [vmem:[%s20480_s1 + $0x210] sm:$0xf0] }
  0x4f   : > { %20848 = vst [vmem:[#allocation51_spill] sm:$0xff] %v15376_v60  ;;  %v15414_v40 = vor.u32 %v13999_v59, %v10559_v9  ;;  %v13995_v9 = vld [vmem:[%s20480_s1 + $0x234] sm:$0xf0]  ;;  %v13993_v59 = vld [vmem:[%s20480_s1 + $0x22c] sm:$0xf] }
  0x50   : > { %730 = vmatpush.bf16.msrb.mxu0 %v15336_v57  ;;  %749 = vmatpush.bf16.msrb.mxu1 %v15343_v3  ;;  %20849 = vst [vmem:[#allocation52_spill] sm:$0xff] %v15381_v61  ;;  %v10527_v13 = vld [vmem:[%s20480_s1 + $0x208] sm:$0xf]  ;;  %v10471_v36 = vld [vmem:[%s20480_s1 + $0x1a0] sm:$0xf] }
  0x51   : > { %20850 = vst [vmem:[#allocation53_spill] sm:$0xff] %v15384_v28 }
  0x52   : > { %20851 = vst [vmem:[#allocation54_spill] sm:$0xff] %v15391_v11  ;;  %768 = vmatpush.bf16.msrb.mxu2 %v15374_v35  ;;  %787 = vmatpush.bf16.msrb.mxu3 %v15376_v60  ;;  %v15452_v60 = vor.u32 %v13993_v59, %v10545_v21  ;;  %v10598_v35 = vld [vmem:[%s20480_s1 + $0x338] sm:$0x33] }
  0x53   : > { %20852 = vst [vmem:[#allocation55_spill] sm:$0xff] %v15393_v2 }
  0x54   : > { %1001 = vmatpush.bf16.msra.mxu0 %v15355_v34  ;;  %1020 = vmatpush.bf16.msra.mxu1 %v15358_v37  ;;  %20853 = vst [vmem:[#allocation56_spill] sm:$0xff] %v15414_v40  ;;  %v10537_v37 = vld [vmem:[%s20480_s1 + $0x230] sm:$0xf0]  ;;  %v10543_v34 = vld [vmem:[%s20480_s1 + $0x228] sm:$0xf] }
  0x55   : > { %20854 = vst [vmem:[#allocation57_spill] sm:$0xff] %v15416_v49 }
  0x56   : > { %1039 = vmatpush.bf16.msra.mxu2 %v15381_v61  ;;  %1058 = vmatpush.bf16.msra.mxu3 %v15384_v28  ;;  %20855 = vst [vmem:[#allocation58_spill] sm:$0xff] %v15438_v12  ;;  %v15440_v28 = vor.u32 %v13992_v14, %v10537_v37  ;;  %v15450_v61 = vor.u32 %v13995_v9, %v10543_v34  ;;  %v13988_v37 = vld [vmem:[%s20480_s1 + $0x204] sm:$0xf]  ;;  %v13991_v34 = vld [vmem:[%s20480_s1 + $0x214] sm:$0xf0] }
  0x57   : > { %20858 = vst [vmem:[#allocation61_spill] sm:$0xff] %v15452_v60  ;;  %10429 = vmatmul.msk.bf16.vlgmr.msrb.gmra.mxu0 %vm439_vm2, %v15109_v58  ;;  %10431 = vmatmul.msk.bf16.vlgmr.msrb.gmra.mxu1 %vm439_vm2, %v15109_v58  ;;  %v13989_v14 = vld [vmem:[%s20480_s1 + $0x20c] sm:$0xf]  ;;  %v10529_v9 = vld [vmem:[%s20480_s1 + $0x218] sm:$0xf0]  ;;  %v15484_v21 = vor.u32 %v13988_v37, %v10521_v33 }
  0x58   : > { %1002 = vmatpush.bf16.msra.mxu0 %v15391_v11  ;;  %1021 = vmatpush.bf16.msra.mxu1 %v15393_v2  ;;  %20856 = vst [vmem:[#allocation59_spill] sm:$0xff] %v15440_v28  ;;  %v10519_v2 = vld [vmem:[%s20480_s1 + $0x200] sm:$0xf]  ;;  %v13990_v11 = vld [vmem:[%s20480_s1 + $0x20c] sm:$0xf0] }
  0x59   : > { %20857 = vst [vmem:[#allocation60_spill] sm:$0xff] %v15450_v61  ;;  %10433 = vmatmul.msk.bf16.vlgmr.msrb.gmra.mxu2 %vm439_vm2, %v15109_v58  ;;  %10435 = vmatmul.msk.bf16.vlgmr.msrb.gmra.mxu3 %vm439_vm2, %v15109_v58  ;;  %v15482_v59 = vor.u32 %v13990_v11, %v10519_v2  ;;  %v15494_v58 = vor.u32 %v13991_v34, %v10527_v13  ;;  %v13984_v11 = vld [vmem:[%s20480_s1 + $0x1e4] sm:$0xf]  ;;  %v10505_v2 = vld [vmem:[%s20480_s1 + $0x1f0] sm:$0xf0] }
  0x5a   : > { %1040 = vmatpush.bf16.msra.mxu2 %v15414_v40  ;;  %1059 = vmatpush.bf16.msra.mxu3 %v15416_v49  ;;  %20860 = vst [vmem:[#allocation63_spill] sm:$0xff] %v15484_v21  ;;  %v10503_v49 = vld [vmem:[%s20480_s1 + $0x1e0] sm:$0xf]  ;;  %v13986_v40 = vld [vmem:[%s20480_s1 + $0x1ec] sm:$0xf0] }
  0x5b   : > { %20859 = vst [vmem:[#allocation62_spill] sm:$0xff] %v15482_v59  ;;  %v10511_v37 = vld [vmem:[%s20480_s1 + $0x1e8] sm:$0xf]  ;;  %v13987_v33 = vld [vmem:[%s20480_s1 + $0x1f4] sm:$0xf0] }
  0x5c   : > { %1003 = vmatpush.bf16.msra.mxu0 %v15438_v12  ;;  %1022 = vmatpush.bf16.msra.mxu1 %v15440_v28  ;;  %20861 = vst [vmem:[#allocation64_spill] sm:$0xff] %v15494_v58  ;;  %v15496_v12 = vor.u32 %v13989_v14, %v10529_v9  ;;  %v13985_v13 = vld [vmem:[%s20480_s1 + $0x1ec] sm:$0xf]  ;;  %v10513_v34 = vld [vmem:[%s20480_s1 + $0x1f8] sm:$0xf0]  ;;  %v15521_v9 = vor.u32 %v13986_v40, %v10503_v49 }
  0x5d   : > { %v10597_v14 = vld [vmem:[%s20480_s1 + $0x330] sm:$0x33]  ;;  %v15536_v40 = vor.u32 %v13987_v33, %v10511_v37  ;;  %v15538_v49 = vor.u32 %v13985_v13, %v10513_v34  ;;  %v13981_v37 = vld [vmem:[%s20480_s1 + $0x1cc] sm:$0xf]  ;;  %v10497_v33 = vld [vmem:[%s20480_s1 + $0x1d8] sm:$0xf0] }
  0x5e   : > { %1041 = vmatpush.bf16.msra.mxu2 %v15450_v61  ;;  %1060 = vmatpush.bf16.msra.mxu3 %v15452_v60  ;;  %20862 = vst [vmem:[#allocation65_spill] sm:$0xff] %v15496_v12  ;;  %v15523_v60 = vor.u32 %v13984_v11, %v10505_v2  ;;  %v10487_v61 = vld [vmem:[%s20480_s1 + $0x1c0] sm:$0xf]  ;;  %v13982_v28 = vld [vmem:[%s20480_s1 + $0x1cc] sm:$0xf0]  ;;  %v1193_v13 = vunpack.c.l.b16 %v10597_v14  ;;  %v1194_v34 = vunpack.c.h.b16 %v10597_v14  ;;  %v15574_v14 = vor.u32 %v13981_v37, %v10497_v33 }
  0x5f   : > { %20863 = vst [vmem:[#allocation66_spill] sm:$0xff] %v15521_v9  ;;  %v13980_v11 = vld [vmem:[%s20480_s1 + $0x1c4] sm:$0xf]  ;;  %v10489_v2 = vld [vmem:[%s20480_s1 + $0x1d0] sm:$0xf0]  ;;  %v15560_v3 = vor.u32 %v13982_v28, %v10487_v61 }
  0x60   : > { %1004 = vmatpush.bf16.msra.mxu0 %v15482_v59  ;;  %1023 = vmatpush.bf16.msra.mxu1 %v15484_v21  ;;  %20864 = vst [vmem:[#allocation67_spill] sm:$0xff] %v15523_v60  ;;  %v10495_v21 = vld [vmem:[%s20480_s1 + $0x1c8] sm:$0xf]  ;;  %v1196_v59 = vunpack.c.h.b16 %v10598_v35  ;;  %v15562_v57 = vor.u32 %v13980_v11, %v10489_v2  ;;  %v13976_v28 = vld [vmem:[%s20480_s1 + $0x1a4] sm:$0xf]  ;;  %v1221_v37 = vpack.c.b16 %v1193_v13, %v1193_v13 }
  0x61   : > { %20865 = vst [vmem:[#allocation68_spill] sm:$0xff] %v15536_v40  ;;  %v10473_v61 = vld [vmem:[%s20480_s1 + $0x1b0] sm:$0xf0]  ;;  %v10479_v11 = vld [vmem:[%s20480_s1 + $0x1a8] sm:$0xf]  ;;  %v1222_v33 = vpack.c.b16 %v1194_v34, %v1194_v34 }
  0x62   : > { %1042 = vmatpush.bf16.msra.mxu2 %v15494_v58  ;;  %1061 = vmatpush.bf16.msra.mxu3 %v15496_v12  ;;  %20866 = vst [vmem:[#allocation69_spill] sm:$0xff] %v15538_v49  ;;  %v13983_v12 = vld [vmem:[%s20480_s1 + $0x1d4] sm:$0xf0]  ;;  %v1195_v58 = vunpack.c.l.b16 %v10598_v35 }
  0x63   : > { %20867 = vst [vmem:[#allocation70_spill] sm:$0xff] %v15560_v3  ;;  %v15572_v35 = vor.u32 %v13983_v12, %v10495_v21  ;;  %v13979_v2 = vld [vmem:[%s20480_s1 + $0x1b4] sm:$0xf0]  ;;  %v13977_v12 = vld [vmem:[%s20480_s1 + $0x1ac] sm:$0xf] }
  0x64   : > { %1005 = vmatpush.bf16.msra.mxu0 %v15521_v9  ;;  %1024 = vmatpush.bf16.msra.mxu1 %v15523_v60  ;;  %20868 = vst [vmem:[#allocation71_spill] sm:$0xff] %v15562_v57  ;;  %v10481_v21 = vld [vmem:[%s20480_s1 + $0x1b8] sm:$0xf0]  ;;  %v15596_v60 = vor.u32 %v13978_v10, %v10471_v36  ;;  %v15598_v9 = vor.u32 %v13976_v28, %v10473_v61  ;;  %v10681_v10 = vld [vmem:[%s20480_s1 + $0x310] sm:$0xf] }
  0x65   : > { %20869 = vst [vmem:[#allocation72_spill] sm:$0xff] %v15572_v35  ;;  %v15602_v47 = vor.u32 %v13979_v2, %v10479_v11  ;;  %v15604_v46 = vor.u32 %v13977_v12, %v10481_v21  ;;  %v15614_v36 = vand.u32 %v1222_v33, %v14855_v7  ;;  %v14020_v28 = vld [vmem:[%s20480_s1 + $0x314] sm:$0xf]  ;;  %v10683_v61 = vld [vmem:[%s20480_s1 + $0x320] sm:$0xf0] }
  0x66   : > { %1043 = vmatpush.bf16.msra.mxu2 %v15536_v40  ;;  %1062 = vmatpush.bf16.msra.mxu3 %v15538_v49  ;;  %20870 = vst [vmem:[#allocation73_spill] sm:$0xff] %v15574_v14  ;;  %v1223_v49 = vpack.c.b16 %v1195_v58, %v1195_v58  ;;  %v1224_v40 = vpack.c.b16 %v1196_v59, %v1196_v59  ;;  %v14022_v58 = vld [vmem:[%s20480_s1 + $0x31c] sm:$0xf0]  ;;  %v10689_v11 = vld [vmem:[%s20480_s1 + $0x318] sm:$0xf] }
  0x67   : > { %20871 = vst [vmem:[#allocation74_spill] sm:$0xff] %v15596_v60  ;;  %10430 = vmatmul.msk.bf16.gmra.mxu0 %vm439_vm2, %v15275_v52  ;;  %10432 = vmatmul.msk.bf16.gmra.mxu1 %vm439_vm2, %v15275_v52  ;;  %v15611_v59 = vand.u32 %v1221_v37, %v14855_v7  ;;  %v10691_v2 = vld [vmem:[%s20480_s1 + $0x328] sm:$0xf0]  ;;  %v15656_v12 = vor.u32 %v14022_v58, %v10681_v10  ;;  %v10665_v37 = vld [vmem:[%s20480_s1 + $0x2f0] sm:$0xf] }
  0x68   : > { %1006 = vmatpush.bf16.msra.mxu0 %v15560_v3  ;;  %1025 = vmatpush.bf16.msra.mxu1 %v15562_v57  ;;  %20872 = vst [vmem:[#allocation75_spill] sm:$0xff] %v15598_v9  ;;  %v15627_v13 = vand.u32 %v1223_v49, %v14855_v7  ;;  %v15630_v34 = vand.u32 %v1224_v40, %v14855_v7  ;;  %v14023_v40 = vld [vmem:[%s20480_s1 + $0x324] sm:$0xf0]  ;;  %v14021_v49 = vld [vmem:[%s20480_s1 + $0x31c] sm:$0xf] }
  0x69   : > { %20873 = vst [vmem:[#allocation76_spill] sm:$0xff] %v15602_v47  ;;  %10434 = vmatmul.msk.bf16.gmra.mxu2 %vm439_vm2, %v15275_v52  ;;  %10436 = vmatmul.msk.bf16.gmra.mxu3 %vm439_vm2, %v15275_v52  ;;  %v15658_v21 = vor.u32 %v14020_v28, %v10683_v61  ;;  %v14018_v33 = vld [vmem:[%s20480_s1 + $0x2fc] sm:$0xf0]  ;;  %v15670_v10 = vor.u32 %v14021_v49, %v10691_v2  ;;  %v14016_v58 = vld [vmem:[%s20480_s1 + $0x2f4] sm:$0xf] }
  0x6a   : > { %1044 = vmatpush.bf16.msra.mxu2 %v15572_v35  ;;  %1063 = vmatpush.bf16.msra.mxu3 %v15574_v14  ;;  %20874 = vst [vmem:[#allocation77_spill] sm:$0xff] %v15604_v46  ;;  %v10667_v28 = vld [vmem:[%s20480_s1 + $0x300] sm:$0xf0]  ;;  %v10673_v61 = vld [vmem:[%s20480_s1 + $0x2f8] sm:$0xf]  ;;  %v15692_v49 = vor.u32 %v14018_v33, %v10665_v37 }
  0x6b   : > { %20875 = vst [vmem:[#allocation78_spill] sm:$0xff] %v15611_v59  ;;  %v15694_v2 = vor.u32 %v14016_v58, %v10667_v28  ;;  %v14014_v37 = vld [vmem:[%s20480_s1 + $0x2dc] sm:$0xf0]  ;;  %v14012_v33 = vld [vmem:[%s20480_s1 + $0x2d4] sm:$0xf] }
  0x6c   : > { %20876 = vst [vmem:[#allocation79_spill] sm:$0xff] %v15614_v36  ;;  %1007 = vmatpush.bf16.msra.mxu0 %v15596_v60  ;;  %1026 = vmatpush.bf16.msra.mxu1 %v15598_v9  ;;  %v10651_v58 = vld [vmem:[%s20480_s1 + $0x2e0] sm:$0xf0]  ;;  %v14000_v60 = vld [vmem:[%s20480_s1 + $0x274] sm:$0xf] }
  0x6d   : > { %20877 = vst [vmem:[#allocation80_spill] sm:$0xff] %v15627_v13  ;;  %v10619_v9 = vld [vmem:[%s20480_s1 + $0x2a0] sm:$0xf0] }
  0x6e   : > { %20878 = vst [vmem:[#allocation81_spill] sm:$0xff] %v15630_v34  ;;  %1045 = vmatpush.bf16.msra.mxu2 %v15602_v47  ;;  %1064 = vmatpush.bf16.msra.mxu3 %v15604_v46 }
  0x6f   : > { %20879 = vst [vmem:[#allocation82_spill] sm:$0xff] %v15656_v12 }
  0x70   : > { %1262 = vmatpush.bf16.msrb.mxu0 %v15611_v59  ;;  %1281 = vmatpush.bf16.msrb.mxu1 %v15614_v36  ;;  %20880 = vst [vmem:[#allocation83_spill] sm:$0xff] %v15658_v21  ;;  %v15668_v59 = vor.u32 %v14023_v40, %v10689_v11  ;;  %v14017_v11 = vld [vmem:[%s20480_s1 + $0x2fc] sm:$0xf]  ;;  %v10675_v40 = vld [vmem:[%s20480_s1 + $0x308] sm:$0xf0]  ;;  %v10439_v36 = vld [vmem:[%s15078_s16 + $0x30] sm:$0xff] }
  0x71   : > { %20882 = vst [vmem:[#allocation85_spill] sm:$0xff] %v15670_v10  ;;  %v15702_v47 = vor.u32 %v14017_v11, %v10675_v40  ;;  %v14013_v11 = vld [vmem:[%s20480_s1 + $0x2dc] sm:$0xf]  ;;  %v10659_v40 = vld [vmem:[%s20480_s1 + $0x2e8] sm:$0xf0] }
  0x72   : > { %1300 = vmatpush.bf16.msrb.mxu2 %v15627_v13  ;;  %1319 = vmatpush.bf16.msrb.mxu3 %v15630_v34  ;;  %20881 = vst [vmem:[#allocation84_spill] sm:$0xff] %v15668_v59  ;;  %v14019_v34 = vld [vmem:[%s20480_s1 + $0x304] sm:$0xf0] }
  0x73   : > { %20883 = vst [vmem:[#allocation86_spill] sm:$0xff] %v15692_v49  ;;  %v10438_v13 = vld [vmem:[%s15078_s16 + $0x28] sm:$0xff]  ;;  %v15700_v46 = vor.u32 %v14019_v34, %v10673_v61  ;;  %v10657_v34 = vld [vmem:[%s20480_s1 + $0x2d8] sm:$0xf] }
  0x74   : > { %1263 = vmatpush.bf16.msrb.mxu0 %v15656_v12  ;;  %1282 = vmatpush.bf16.msrb.mxu1 %v15658_v21  ;;  %20884 = vst [vmem:[#allocation87_spill] sm:$0xff] %v15694_v2  ;;  %v10649_v12 = vld [vmem:[%s20480_s1 + $0x2d0] sm:$0xf]  ;;  %v15719_v28 = vpack.c.bf16 %v10439_v36, %v10438_v13  ;;  %v14015_v61 = vld [vmem:[%s20480_s1 + $0x2e4] sm:$0xf0]  ;;  %v15736_v13 = vor.u32 %v14012_v33, %v10651_v58 }
  0x75   : > { %20885 = vst [vmem:[#allocation88_spill] sm:$0xff] %v15700_v46  ;;  %v15734_v36 = vor.u32 %v14014_v37, %v10649_v12  ;;  %v10635_v12 = vld [vmem:[%s20480_s1 + $0x2c0] sm:$0xf0]  ;;  %v10641_v37 = vld [vmem:[%s20480_s1 + $0x2b8] sm:$0xf] }
  0x76   : > { %1301 = vmatpush.bf16.msrb.mxu2 %v15668_v59  ;;  %1320 = vmatpush.bf16.msrb.mxu3 %v15670_v10  ;;  %20886 = vst [vmem:[#allocation89_spill] sm:$0xff] %v15702_v47  ;;  %v15744_v10 = vor.u32 %v14015_v61, %v10657_v34  ;;  %v15746_v59 = vor.u32 %v14013_v11, %v10659_v40  ;;  %v14011_v33 = vld [vmem:[%s20480_s1 + $0x2c4] sm:$0xf0]  ;;  %v14009_v58 = vld [vmem:[%s20480_s1 + $0x2bc] sm:$0xf] }
  0x77   : > { %20887 = vst [vmem:[#allocation90_spill] sm:$0xff] %v15734_v36  ;;  %10565 = vmatmul.msk.bf16.vlgmr.msra.gmra.mxu0 %vm439_vm2, %v15719_v28  ;;  %10567 = vmatmul.msk.bf16.vlgmr.msra.gmra.mxu1 %vm439_vm2, %v15719_v28  ;;  %v10643_v34 = vld [vmem:[%s20480_s1 + $0x2c8] sm:$0xf0]  ;;  %v10617_v61 = vld [vmem:[%s20480_s1 + $0x290] sm:$0xf] }
  0x78   : > { %1264 = vmatpush.bf16.msrb.mxu0 %v15692_v49  ;;  %1283 = vmatpush.bf16.msrb.mxu1 %v15694_v2  ;;  %20888 = vst [vmem:[#allocation91_spill] sm:$0xff] %v15736_v13  ;;  %v10633_v2 = vld [vmem:[%s20480_s1 + $0x2b0] sm:$0xf]  ;;  %v14010_v49 = vld [vmem:[%s20480_s1 + $0x2bc] sm:$0xf0] }
  0x79   : > { %20889 = vst [vmem:[#allocation92_spill] sm:$0xff] %v15744_v10  ;;  %10569 = vmatmul.msk.bf16.vlgmr.msra.gmra.mxu2 %vm439_vm2, %v15719_v28  ;;  %10571 = vmatmul.msk.bf16.vlgmr.msra.gmra.mxu3 %vm439_vm2, %v15719_v28  ;;  %v15779_v11 = vor.u32 %v14010_v49, %v10633_v2  ;;  %v14004_v21 = vld [vmem:[%s20480_s1 + $0x294] sm:$0xf]  ;;  %v15794_v49 = vor.u32 %v14011_v33, %v10641_v37  ;;  %v10625_v2 = vld [vmem:[%s20480_s1 + $0x298] sm:$0xf] }
  0x7a   : > { %1302 = vmatpush.bf16.msrb.mxu2 %v15700_v46  ;;  %1321 = vmatpush.bf16.msrb.mxu3 %v15702_v47  ;;  %20890 = vst [vmem:[#allocation93_spill] sm:$0xff] %v15746_v59  ;;  %v14008_v47 = vld [vmem:[%s20480_s1 + $0x2b4] sm:$0xf]  ;;  %v14006_v46 = vld [vmem:[%s20480_s1 + $0x29c] sm:$0xf0] }
  0x7b   : > { %20891 = vst [vmem:[#allocation94_spill] sm:$0xff] %v15779_v11  ;;  %v15781_v40 = vor.u32 %v14008_v47, %v10635_v12  ;;  %v15796_v47 = vor.u32 %v14009_v58, %v10643_v34  ;;  %v14007_v12 = vld [vmem:[%s20480_s1 + $0x2a4] sm:$0xf0]  ;;  %v10627_v37 = vld [vmem:[%s20480_s1 + $0x2a8] sm:$0xf0]  ;;  %v15821_v34 = vor.u32 %v14006_v46, %v10617_v61 }
  0x7c   : > { %1265 = vmatpush.bf16.msrb.mxu0 %v15734_v36  ;;  %1284 = vmatpush.bf16.msrb.mxu1 %v15736_v13  ;;  %20893 = vst [vmem:[#allocation96_spill] sm:$0xff] %v15794_v49  ;;  %v10730_v13 = vld [vmem:[%s20480_s1 + $0x400] sm:$0x33]  ;;  %v10731_v33 = vld [vmem:[%s20480_s1 + $0x408] sm:$0x33]  ;;  %v15836_v46 = vor.u32 %v14007_v12, %v10625_v2 }
  0x7d   : > { %20892 = vst [vmem:[#allocation95_spill] sm:$0xff] %v15781_v40  ;;  %v10601_v58 = vld [vmem:[%s20480_s1 + $0x270] sm:$0xf]  ;;  %v14002_v36 = vld [vmem:[%s20480_s1 + $0x27c] sm:$0xf0]  ;;  %v1459_v14 = vunpack.c.l.b16 %v10730_v13  ;;  %v1461_v35 = vunpack.c.l.b16 %v10731_v33  ;;  %v1462_v57 = vunpack.c.h.b16 %v10731_v33 }
  0x7e   : > { %1303 = vmatpush.bf16.msrb.mxu2 %v15744_v10  ;;  %1322 = vmatpush.bf16.msrb.mxu3 %v15746_v59  ;;  %20894 = vst [vmem:[#allocation97_spill] sm:$0xff] %v15796_v47  ;;  %v14005_v59 = vld [vmem:[%s20480_s1 + $0x29c] sm:$0xf]  ;;  %v15823_v10 = vor.u32 %v14004_v21, %v10619_v9  ;;  %v10609_v21 = vld [vmem:[%s20480_s1 + $0x278] sm:$0xf]  ;;  %v10442_v12 = vld [vmem:[%s15078_s16 + $0x80] sm:$0xff] }
  0x7f   : > { %20895 = vst [vmem:[#allocation98_spill] sm:$0xff] %v15821_v34  ;;  %v15838_v9 = vor.u32 %v14005_v59, %v10627_v37  ;;  %v14003_v61 = vld [vmem:[%s20480_s1 + $0x284] sm:$0xf0]  ;;  %v10611_v2 = vld [vmem:[%s20480_s1 + $0x288] sm:$0xf0]  ;;  %v10441_v59 = vld [vmem:[%s15078_s16 + $0x78] sm:$0xff]  ;;  %v15854_v37 = vor.u32 %v14002_v36, %v10601_v58  ;;  %v1487_v33 = vpack.c.b16 %v1459_v14, %v1459_v14  ;;  %v1489_v29 = vpack.c.b16 %v1461_v35, %v1461_v35 }
  0x80   : > { %1266 = vmatpush.bf16.msrb.mxu0 %v15779_v11  ;;  %1285 = vmatpush.bf16.msrb.mxu1 %v15781_v40  ;;  %20896 = vst [vmem:[#allocation99_spill] sm:$0xff] %v15823_v10  ;;  %v10603_v11 = vld [vmem:[%s20480_s1 + $0x280] sm:$0xf0]  ;;  %v1460_v40 = vunpack.c.h.b16 %v10730_v13  ;;  %v14001_v13 = vld [vmem:[%s20480_s1 + $0x27c] sm:$0xf]  ;;  %v1490_v18 = vpack.c.b16 %v1462_v57, %v1462_v57  ;;  %v15866_v36 = vpack.c.bf16 %v10442_v12, %v10441_v59 }
  0x81   : > { %20897 = vst [vmem:[#allocation100_spill] sm:$0xff] %v15836_v46  ;;  %v15864_v32 = vor.u32 %v14001_v13, %v10611_v2  ;;  %v14046_v57 = vld [vmem:[%s20480_s1 + $0x3ec] sm:$0xf0]  ;;  %v15885_v35 = vand.u32 %v1489_v29, %v14855_v7  ;;  %v10816_v58 = vld [vmem:[%s20480_s1 + $0x3f0] sm:$0xf0] }
  0x82   : > { %1304 = vmatpush.bf16.msrb.mxu2 %v15794_v49  ;;  %1323 = vmatpush.bf16.msrb.mxu3 %v15796_v47  ;;  %20898 = vst [vmem:[#allocation101_spill] sm:$0xff] %v15838_v9  ;;  %v15856_v47 = vor.u32 %v14000_v60, %v10603_v11  ;;  %v15860_v49 = vor.u32 %v14003_v61, %v10609_v21  ;;  %v10814_v11 = vld [vmem:[%s20480_s1 + $0x3e0] sm:$0xf]  ;;  %v10822_v21 = vld [vmem:[%s20480_s1 + $0x3e8] sm:$0xf] }
  0x83   : > { %20899 = vst [vmem:[#allocation102_spill] sm:$0xff] %v15854_v37  ;;  %v1488_v3 = vpack.c.b16 %v1460_v40, %v1460_v40  ;;  %v15871_v60 = vand.u32 %v1487_v33, %v14855_v7  ;;  %v15888_v40 = vand.u32 %v1490_v18, %v14855_v7  ;;  %v14047_v18 = vld [vmem:[%s20480_s1 + $0x3f4] sm:$0xf0]  ;;  %v14045_v29 = vld [vmem:[%s20480_s1 + $0x3ec] sm:$0xf]  ;;  %v15918_v13 = vor.u32 %v14046_v57, %v10814_v11 }
  0x84   : > { %20900 = vst [vmem:[#allocation103_spill] sm:$0xff] %v15856_v47  ;;  %1267 = vmatpush.bf16.msrb.mxu0 %v15821_v34  ;;  %1286 = vmatpush.bf16.msrb.mxu1 %v15823_v10  ;;  %v10824_v61 = vld [vmem:[%s20480_s1 + $0x3f8] sm:$0xf0]  ;;  %v10798_v59 = vld [vmem:[%s20480_s1 + $0x3c0] sm:$0xf]  ;;  %v15930_v33 = vor.u32 %v14047_v18, %v10822_v21 }
  0x85   : > { %20901 = vst [vmem:[#allocation104_spill] sm:$0xff] %v15860_v49  ;;  %v15874_v14 = vand.u32 %v1488_v3, %v14855_v7  ;;  %v14044_v3 = vld [vmem:[%s20480_s1 + $0x3e4] sm:$0xf]  ;;  %v14042_v12 = vld [vmem:[%s20480_s1 + $0x3cc] sm:$0xf0] }
  0x86   : > { %1305 = vmatpush.bf16.msrb.mxu2 %v15836_v46  ;;  %1324 = vmatpush.bf16.msrb.mxu3 %v15838_v9  ;;  %20902 = vst [vmem:[#allocation105_spill] sm:$0xff] %v15864_v32  ;;  %v15920_v2 = vor.u32 %v14044_v3, %v10816_v58  ;;  %v14040_v11 = vld [vmem:[%s20480_s1 + $0x3c4] sm:$0xf]  ;;  %v10800_v57 = vld [vmem:[%s20480_s1 + $0x3d0] sm:$0xf0] }
  0x87   : > { %20903 = vst [vmem:[#allocation106_spill] sm:$0xff] %v15871_v60  ;;  %10566 = vmatmul.msk.bf16.gmra.mxu0 %vm439_vm2, %v15866_v36  ;;  %10568 = vmatmul.msk.bf16.gmra.mxu1 %vm439_vm2, %v15866_v36  ;;  %v10806_v3 = vld [vmem:[%s20480_s1 + $0x3c8] sm:$0xf]  ;;  %v14043_v58 = vld [vmem:[%s20480_s1 + $0x3d4] sm:$0xf0] }
  0x88   : > { %1268 = vmatpush.bf16.msrb.mxu0 %v15854_v37  ;;  %1287 = vmatpush.bf16.msrb.mxu1 %v15856_v47  ;;  %20904 = vst [vmem:[#allocation107_spill] sm:$0xff] %v15874_v14  ;;  %v14041_v21 = vld [vmem:[%s20480_s1 + $0x3cc] sm:$0xf]  ;;  %v10808_v18 = vld [vmem:[%s20480_s1 + $0x3d8] sm:$0xf0] }
  0x89   : > { %20905 = vst [vmem:[#allocation108_spill] sm:$0xff] %v15885_v35  ;;  %10570 = vmatmul.msk.bf16.gmra.mxu2 %vm439_vm2, %v15866_v36  ;;  %10572 = vmatmul.msk.bf16.gmra.mxu3 %vm439_vm2, %v15866_v36  ;;  %v14026_v37 = vld [vmem:[%s20480_s1 + $0x34c] sm:$0xf0] }
  0x8a   : > { %1306 = vmatpush.bf16.msrb.mxu2 %v15860_v49  ;;  %1325 = vmatpush.bf16.msrb.mxu3 %v15864_v32  ;;  %20906 = vst [vmem:[#allocation109_spill] sm:$0xff] %v15888_v40  ;;  %v10752_v32 = vld [vmem:[%s20480_s1 + $0x370] sm:$0xf0] }
  0x8b   : > { %20907 = vst [vmem:[#allocation110_spill] sm:$0xff] %v15918_v13 }
  0x8c   : > { %1531 = vmatpush.bf16.msra.mxu0 %v15871_v60  ;;  %1550 = vmatpush.bf16.msra.mxu1 %v15874_v14  ;;  %20908 = vst [vmem:[#allocation111_spill] sm:$0xff] %v15920_v2  ;;  %v15932_v60 = vor.u32 %v14045_v29, %v10824_v61  ;;  %v15954_v29 = vor.u32 %v14042_v12, %v10798_v59  ;;  %v14036_v59 = vld [vmem:[%s20480_s1 + $0x3a4] sm:$0xf]  ;;  %v10784_v12 = vld [vmem:[%s20480_s1 + $0x3b0] sm:$0xf0] }
  0x8d   : > { %20909 = vst [vmem:[#allocation112_spill] sm:$0xff] %v15930_v33  ;;  %v15956_v61 = vor.u32 %v14040_v11, %v10800_v57  ;;  %v15966_v14 = vor.u32 %v14043_v58, %v10806_v3  ;;  %v10790_v11 = vld [vmem:[%s20480_s1 + $0x3a8] sm:$0xf]  ;;  %v14039_v57 = vld [vmem:[%s20480_s1 + $0x3b4] sm:$0xf0] }
  0x8e   : > { %1569 = vmatpush.bf16.msra.mxu2 %v15885_v35  ;;  %1588 = vmatpush.bf16.msra.mxu3 %v15888_v40  ;;  %20910 = vst [vmem:[#allocation113_spill] sm:$0xff] %v15932_v60  ;;  %v10782_v40 = vld [vmem:[%s20480_s1 + $0x3a0] sm:$0xf]  ;;  %v14038_v35 = vld [vmem:[%s20480_s1 + $0x3ac] sm:$0xf0] }
  0x8f   : > { %20911 = vst [vmem:[#allocation114_spill] sm:$0xff] %v15954_v29  ;;  %v14037_v3 = vld [vmem:[%s20480_s1 + $0x3ac] sm:$0xf]  ;;  %v10792_v58 = vld [vmem:[%s20480_s1 + $0x3b8] sm:$0xf0] }
  0x90   : > { %1532 = vmatpush.bf16.msra.mxu0 %v15918_v13  ;;  %1551 = vmatpush.bf16.msra.mxu1 %v15920_v2  ;;  %20912 = vst [vmem:[#allocation115_spill] sm:$0xff] %v15956_v61  ;;  %v15968_v13 = vor.u32 %v14041_v21, %v10808_v18  ;;  %v15990_v21 = vor.u32 %v14038_v35, %v10782_v40  ;;  %v14032_v35 = vld [vmem:[%s20480_s1 + $0x384] sm:$0xf]  ;;  %v10768_v40 = vld [vmem:[%s20480_s1 + $0x390] sm:$0xf0] }
  0x91   : > { %20913 = vst [vmem:[#allocation116_spill] sm:$0xff] %v15966_v14  ;;  %v15992_v18 = vor.u32 %v14036_v59, %v10784_v12  ;;  %v16002_v2 = vor.u32 %v14039_v57, %v10790_v11  ;;  %v10774_v59 = vld [vmem:[%s20480_s1 + $0x388] sm:$0xf]  ;;  %v14035_v12 = vld [vmem:[%s20480_s1 + $0x394] sm:$0xf0] }
  0x92   : > { %1570 = vmatpush.bf16.msra.mxu2 %v15930_v33  ;;  %1589 = vmatpush.bf16.msra.mxu3 %v15932_v60  ;;  %20914 = vst [vmem:[#allocation117_spill] sm:$0xff] %v15968_v13  ;;  %v10766_v60 = vld [vmem:[%s20480_s1 + $0x380] sm:$0xf]  ;;  %v14034_v33 = vld [vmem:[%s20480_s1 + $0x38c] sm:$0xf0] }
  0x93   : > { %20915 = vst [vmem:[#allocation118_spill] sm:$0xff] %v15990_v21  ;;  %v14033_v11 = vld [vmem:[%s20480_s1 + $0x38c] sm:$0xf]  ;;  %v10776_v57 = vld [vmem:[%s20480_s1 + $0x398] sm:$0xf0] }
  0x94   : > { %1533 = vmatpush.bf16.msra.mxu0 %v15954_v29  ;;  %1552 = vmatpush.bf16.msra.mxu1 %v15956_v61  ;;  %20916 = vst [vmem:[#allocation119_spill] sm:$0xff] %v15992_v18  ;;  %v16004_v29 = vor.u32 %v14037_v3, %v10792_v58  ;;  %v10750_v3 = vld [vmem:[%s20480_s1 + $0x360] sm:$0xf]  ;;  %v16029_v58 = vor.u32 %v14034_v33, %v10766_v60  ;;  %v14028_v61 = vld [vmem:[%s20480_s1 + $0x364] sm:$0xf] }
  0x95   : > { %20917 = vst [vmem:[#allocation120_spill] sm:$0xff] %v16002_v2  ;;  %v16044_v60 = vor.u32 %v14035_v12, %v10774_v59  ;;  %v16046_v33 = vor.u32 %v14033_v11, %v10776_v57  ;;  %v14031_v59 = vld [vmem:[%s20480_s1 + $0x374] sm:$0xf0]  ;;  %v14029_v12 = vld [vmem:[%s20480_s1 + $0x36c] sm:$0xf]  ;;  %v16078_v47 = vor.u32 %v14028_v61, %v10752_v32 }
  0x96   : > { %1571 = vmatpush.bf16.msra.mxu2 %v15966_v14  ;;  %1590 = vmatpush.bf16.msra.mxu3 %v15968_v13  ;;  %20918 = vst [vmem:[#allocation121_spill] sm:$0xff] %v16004_v29  ;;  %v16031_v13 = vor.u32 %v14032_v35, %v10768_v40  ;;  %v14030_v14 = vld [vmem:[%s20480_s1 + $0x36c] sm:$0xf0]  ;;  %v10758_v35 = vld [vmem:[%s20480_s1 + $0x368] sm:$0xf] }
  0x97   : > { %20919 = vst [vmem:[#allocation122_spill] sm:$0xff] %v16029_v58  ;;  %v10860_v40 = vld [vmem:[%s20480_s1 + $0x4d0] sm:$0x33]  ;;  %10695 = vmatmul.msk.bf16.vlgmr.msrb.gmra.mxu0 %vm439_vm2, %v15719_v28  ;;  %10697 = vmatmul.msk.bf16.vlgmr.msrb.gmra.mxu1 %vm439_vm2, %v15719_v28  ;;  %v10760_v11 = vld [vmem:[%s20480_s1 + $0x378] sm:$0xf0]  ;;  %v16076_v49 = vor.u32 %v14030_v14, %v10750_v3 }
  0x98   : > { %1534 = vmatpush.bf16.msra.mxu0 %v15990_v21  ;;  %1553 = vmatpush.bf16.msra.mxu1 %v15992_v18  ;;  %20920 = vst [vmem:[#allocation123_spill] sm:$0xff] %v16031_v13  ;;  %v10861_v18 = vld [vmem:[%s20480_s1 + $0x4d8] sm:$0x33]  ;;  %v1723_v57 = vunpack.c.l.b16 %v10860_v40  ;;  %v14024_v32 = vld [vmem:[%s20480_s1 + $0x344] sm:$0xf] }
  0x99   : > { %20921 = vst [vmem:[#allocation124_spill] sm:$0xff] %v16044_v60  ;;  %10699 = vmatmul.msk.bf16.vlgmr.msrb.gmra.mxu2 %vm439_vm2, %v15719_v28  ;;  %10701 = vmatmul.msk.bf16.vlgmr.msrb.gmra.mxu3 %vm439_vm2, %v15719_v28  ;;  %v1726_v21 = vunpack.c.h.b16 %v10861_v18  ;;  %v16088_v28 = vor.u32 %v14031_v59, %v10758_v35  ;;  %v10736_v14 = vld [vmem:[%s20480_s1 + $0x350] sm:$0xf0]  ;;  %v10742_v61 = vld [vmem:[%s20480_s1 + $0x348] sm:$0xf] }
  0x9a   : > { %1572 = vmatpush.bf16.msra.mxu2 %v16002_v2  ;;  %1591 = vmatpush.bf16.msra.mxu3 %v16004_v29  ;;  %20922 = vst [vmem:[#allocation125_spill] sm:$0xff] %v16046_v33  ;;  %v1724_v29 = vunpack.c.h.b16 %v10860_v40  ;;  %v1725_v2 = vunpack.c.l.b16 %v10861_v18  ;;  %v10734_v40 = vld [vmem:[%s20480_s1 + $0x340] sm:$0xf]  ;;  %v16090_v18 = vor.u32 %v14029_v12, %v10760_v11  ;;  %v14027_v3 = vld [vmem:[%s20480_s1 + $0x354] sm:$0xf0]  ;;  %v1751_v12 = vpack.c.b16 %v1723_v57, %v1723_v57 }
  0x9b   : > { %20923 = vst [vmem:[#allocation126_spill] sm:$0xff] %v16076_v49  ;;  %v14025_v35 = vld [vmem:[%s20480_s1 + $0x34c] sm:$0xf]  ;;  %v10744_v59 = vld [vmem:[%s20480_s1 + $0x358] sm:$0xf0]  ;;  %v16118_v9 = vor.u32 %v14027_v3, %v10742_v61 }
  0x9c   : > { %1535 = vmatpush.bf16.msra.mxu0 %v16029_v58  ;;  %1554 = vmatpush.bf16.msra.mxu1 %v16031_v13  ;;  %20924 = vst [vmem:[#allocation127_spill] sm:$0xff] %v16078_v47  ;;  %v1752_v11 = vpack.c.b16 %v1724_v29, %v1724_v29  ;;  %v16112_v13 = vor.u32 %v14026_v37, %v10734_v40  ;;  %v10944_v57 = vld [vmem:[%s20480_s1 + $0x4b0] sm:$0xf]  ;;  %v14070_v40 = vld [vmem:[%s20480_s1 + $0x4bc] sm:$0xf0] }
  0x9d   : > { %20925 = vst [vmem:[#allocation128_spill] sm:$0xff] %v16088_v28  ;;  %v16114_v58 = vor.u32 %v14024_v32, %v10736_v14  ;;  %v16120_v46 = vor.u32 %v14025_v35, %v10744_v59  ;;  %v16123_v29 = vand.u32 %v1751_v12, %v14855_v7  ;;  %v10952_v32 = vld [vmem:[%s20480_s1 + $0x4b8] sm:$0xf]  ;;  %v14071_v14 = vld [vmem:[%s20480_s1 + $0x4c4] sm:$0xf0]  ;;  %v16166_v35 = vor.u32 %v14070_v40, %v10944_v57 }
  0x9e   : > { %1573 = vmatpush.bf16.msra.mxu2 %v16044_v60  ;;  %1592 = vmatpush.bf16.msra.mxu3 %v16046_v33  ;;  %20926 = vst [vmem:[#allocation129_spill] sm:$0xff] %v16090_v18  ;;  %v1753_v33 = vpack.c.b16 %v1725_v2, %v1725_v2  ;;  %v1754_v60 = vpack.c.b16 %v1726_v21, %v1726_v21  ;;  %v14069_v61 = vld [vmem:[%s20480_s1 + $0x4bc] sm:$0xf]  ;;  %v10954_v3 = vld [vmem:[%s20480_s1 + $0x4c8] sm:$0xf0] }
  0x9f   : > { %20927 = vst [vmem:[#allocation130_spill] sm:$0xff] %v16112_v13  ;;  %v16126_v2 = vand.u32 %v1752_v11, %v14855_v7  ;;  %v10928_v12 = vld [vmem:[%s20480_s1 + $0x490] sm:$0xf]  ;;  %v14066_v11 = vld [vmem:[%s20480_s1 + $0x49c] sm:$0xf0] }
  0xa0   : > { %1536 = vmatpush.bf16.msra.mxu0 %v16076_v49  ;;  %1555 = vmatpush.bf16.msra.mxu1 %v16078_v47  ;;  %20928 = vst [vmem:[#allocation131_spill] sm:$0xff] %v16114_v58  ;;  %v16129_v21 = vand.u32 %v1753_v33, %v14855_v7  ;;  %v16132_v37 = vand.u32 %v1754_v60, %v14855_v7  ;;  %v14068_v60 = vld [vmem:[%s20480_s1 + $0x4b4] sm:$0xf]  ;;  %v10946_v33 = vld [vmem:[%s20480_s1 + $0x4c0] sm:$0xf0] }
  0xa1   : > { %20929 = vst [vmem:[#allocation132_spill] sm:$0xff] %v16118_v9  ;;  %v16168_v59 = vor.u32 %v14068_v60, %v10946_v33  ;;  %v10930_v57 = vld [vmem:[%s20480_s1 + $0x4a0] sm:$0xf0]  ;;  %v10936_v40 = vld [vmem:[%s20480_s1 + $0x498] sm:$0xf] }
  0xa2   : > { %1574 = vmatpush.bf16.msra.mxu2 %v16088_v28  ;;  %1593 = vmatpush.bf16.msra.mxu3 %v16090_v18  ;;  %20930 = vst [vmem:[#allocation133_spill] sm:$0xff] %v16120_v46  ;;  %v14067_v60 = vld [vmem:[%s20480_s1 + $0x4a4] sm:$0xf0]  ;;  %v14065_v33 = vld [vmem:[%s20480_s1 + $0x49c] sm:$0xf] }
  0xa3   : > { %20931 = vst [vmem:[#allocation134_spill] sm:$0xff] %v16123_v29 }
  0xa4   : > { %20932 = vst [vmem:[#allocation135_spill] sm:$0xff] %v16126_v2  ;;  %1537 = vmatpush.bf16.msra.mxu0 %v16112_v13  ;;  %1556 = vmatpush.bf16.msra.mxu1 %v16114_v58  ;;  %v14048_v58 = vld [vmem:[%s20480_s1 + $0x414] sm:$0xf]  ;;  %v10866_v13 = vld [vmem:[%s20480_s1 + $0x420] sm:$0xf0] }
  0xa5   : > { %20933 = vst [vmem:[#allocation136_spill] sm:$0xff] %v16129_v21  ;;  %v16370_v28 = vor.u32 %v14048_v58, %v10866_v13 }
  0xa6   : > { %20934 = vst [vmem:[#allocation137_spill] sm:$0xff] %v16132_v37  ;;  %1575 = vmatpush.bf16.msra.mxu2 %v16118_v9  ;;  %1594 = vmatpush.bf16.msra.mxu3 %v16120_v46  ;;  %v16220_v46 = vor.u32 %v14067_v60, %v10936_v40  ;;  %v14061_v40 = vld [vmem:[%s20480_s1 + $0x47c] sm:$0xf]  ;;  %v10922_v60 = vld [vmem:[%s20480_s1 + $0x488] sm:$0xf0] }
  0xa7   : > { %20935 = vst [vmem:[#allocation138_spill] sm:$0xff] %v16166_v35  ;;  %10696 = vmatmul.msk.bf16.gmra.mxu0 %vm439_vm2, %v15866_v36  ;;  %10698 = vmatmul.msk.bf16.gmra.mxu1 %vm439_vm2, %v15866_v36  ;;  %v14050_v9 = vld [vmem:[%s20480_s1 + $0x41c] sm:$0xf0] }
  0xa8   : > { %1792 = vmatpush.bf16.msrb.mxu0 %v16123_v29  ;;  %1811 = vmatpush.bf16.msrb.mxu1 %v16126_v2  ;;  %20936 = vst [vmem:[#allocation139_spill] sm:$0xff] %v16168_v59  ;;  %v16176_v2 = vor.u32 %v14071_v14, %v10952_v32  ;;  %v16178_v29 = vor.u32 %v14069_v61, %v10954_v3  ;;  %v10938_v32 = vld [vmem:[%s20480_s1 + $0x4a8] sm:$0xf0]  ;;  %v10912_v3 = vld [vmem:[%s20480_s1 + $0x470] sm:$0xf] }
  0xa9   : > { %10700 = vmatmul.msk.bf16.gmra.mxu2 %vm439_vm2, %v15866_v36  ;;  %10702 = vmatmul.msk.bf16.gmra.mxu3 %vm439_vm2, %v15866_v36  ;;  %v16208_v14 = vor.u32 %v14066_v11, %v10928_v12  ;;  %20941 = vst [vmem:[#allocation144_spill] sm:$0xff] %v16220_v46  ;;  %v10914_v12 = vld [vmem:[%s20480_s1 + $0x480] sm:$0xf0]  ;;  %v10920_v11 = vld [vmem:[%s20480_s1 + $0x478] sm:$0xf] }
  0xaa   : > { %1830 = vmatpush.bf16.msrb.mxu2 %v16129_v21  ;;  %1849 = vmatpush.bf16.msrb.mxu3 %v16132_v37  ;;  %20937 = vst [vmem:[#allocation140_spill] sm:$0xff] %v16176_v2  ;;  %v14064_v37 = vld [vmem:[%s20480_s1 + $0x494] sm:$0xf]  ;;  %v14062_v21 = vld [vmem:[%s20480_s1 + $0x47c] sm:$0xf0] }
  0xab   : > { %20938 = vst [vmem:[#allocation141_spill] sm:$0xff] %v16178_v29  ;;  %v16210_v61 = vor.u32 %v14064_v37, %v10930_v57  ;;  %v14060_v37 = vld [vmem:[%s20480_s1 + $0x474] sm:$0xf]  ;;  %v14063_v57 = vld [vmem:[%s20480_s1 + $0x484] sm:$0xf0] }
  0xac   : > { %1793 = vmatpush.bf16.msrb.mxu0 %v16166_v35  ;;  %1812 = vmatpush.bf16.msrb.mxu1 %v16168_v59  ;;  %20939 = vst [vmem:[#allocation142_spill] sm:$0xff] %v16208_v14  ;;  %v16222_v35 = vor.u32 %v14065_v33, %v10938_v32  ;;  %v16244_v33 = vor.u32 %v14062_v21, %v10912_v3  ;;  %v14056_v21 = vld [vmem:[%s20480_s1 + $0x454] sm:$0xf]  ;;  %v10898_v3 = vld [vmem:[%s20480_s1 + $0x460] sm:$0xf0] }
  0xad   : > { %20940 = vst [vmem:[#allocation143_spill] sm:$0xff] %v16210_v61  ;;  %v16246_v32 = vor.u32 %v14060_v37, %v10914_v12  ;;  %v16256_v59 = vor.u32 %v14063_v57, %v10920_v11  ;;  %v10904_v37 = vld [vmem:[%s20480_s1 + $0x458] sm:$0xf]  ;;  %v14059_v12 = vld [vmem:[%s20480_s1 + $0x464] sm:$0xf0] }
  0xae   : > { %1831 = vmatpush.bf16.msrb.mxu2 %v16176_v2  ;;  %1850 = vmatpush.bf16.msrb.mxu3 %v16178_v29  ;;  %20942 = vst [vmem:[#allocation145_spill] sm:$0xff] %v16222_v35  ;;  %v10896_v29 = vld [vmem:[%s20480_s1 + $0x450] sm:$0xf]  ;;  %v14058_v2 = vld [vmem:[%s20480_s1 + $0x45c] sm:$0xf0] }
  0xaf   : > { %20943 = vst [vmem:[#allocation146_spill] sm:$0xff] %v16244_v33  ;;  %v14057_v11 = vld [vmem:[%s20480_s1 + $0x45c] sm:$0xf]  ;;  %v10906_v57 = vld [vmem:[%s20480_s1 + $0x468] sm:$0xf0] }
  0xb0   : > { %1794 = vmatpush.bf16.msrb.mxu0 %v16208_v14  ;;  %1813 = vmatpush.bf16.msrb.mxu1 %v16210_v61  ;;  %20944 = vst [vmem:[#allocation147_spill] sm:$0xff] %v16246_v32  ;;  %v16258_v14 = vor.u32 %v14061_v40, %v10922_v60  ;;  %v16280_v40 = vor.u32 %v14058_v2, %v10896_v29  ;;  %v14052_v29 = vld [vmem:[%s20480_s1 + $0x434] sm:$0xf]  ;;  %v10882_v2 = vld [vmem:[%s20480_s1 + $0x440] sm:$0xf0] }
  0xb1   : > { %20945 = vst [vmem:[#allocation148_spill] sm:$0xff] %v16256_v59  ;;  %v16282_v60 = vor.u32 %v14056_v21, %v10898_v3  ;;  %v16292_v61 = vor.u32 %v14059_v12, %v10904_v37  ;;  %v10888_v21 = vld [vmem:[%s20480_s1 + $0x438] sm:$0xf]  ;;  %v14055_v3 = vld [vmem:[%s20480_s1 + $0x444] sm:$0xf0] }
  0xb2   : > { %1832 = vmatpush.bf16.msrb.mxu2 %v16220_v46  ;;  %1851 = vmatpush.bf16.msrb.mxu3 %v16222_v35  ;;  %20946 = vst [vmem:[#allocation149_spill] sm:$0xff] %v16258_v14  ;;  %v10880_v35 = vld [vmem:[%s20480_s1 + $0x430] sm:$0xf]  ;;  %v14054_v46 = vld [vmem:[%s20480_s1 + $0x43c] sm:$0xf0] }
  0xb3   : > { %20947 = vst [vmem:[#allocation150_spill] sm:$0xff] %v16280_v40  ;;  %v14053_v37 = vld [vmem:[%s20480_s1 + $0x43c] sm:$0xf]  ;;  %v10890_v12 = vld [vmem:[%s20480_s1 + $0x448] sm:$0xf0] }
  0xb4   : > { %1795 = vmatpush.bf16.msrb.mxu0 %v16244_v33  ;;  %1814 = vmatpush.bf16.msrb.mxu1 %v16246_v32  ;;  %20948 = vst [vmem:[#allocation151_spill] sm:$0xff] %v16282_v60  ;;  %v16294_v33 = vor.u32 %v14057_v11, %v10906_v57  ;;  %v16314_v11 = vpop.f32.mrf.mxu0  ;;  %v16316_v57 = vpop.f32.mrf.mxu1  ;;  %v16325_v32 = vor.u32 %v14052_v29, %v10882_v2  ;;  %v10872_v29 = vld [vmem:[%s20480_s1 + $0x418] sm:$0xf]  ;;  %v10993_v2 = vld [vmem:[%s20480_s1 + $0x5a0] sm:$0x33] }
  0xb5   : > { %20949 = vst [vmem:[#allocation152_spill] sm:$0xff] %v16292_v61 }
  0xb6   : > { %1833 = vmatpush.bf16.msrb.mxu2 %v16256_v59  ;;  %1852 = vmatpush.bf16.msrb.mxu3 %v16258_v14  ;;  %20950 = vst [vmem:[#allocation153_spill] sm:$0xff] %v16294_v33  ;;  %v10864_v14 = vld [vmem:[%s20480_s1 + $0x410] sm:$0xf]  ;;  %v16323_v59 = vor.u32 %v14054_v46, %v10880_v35  ;;  %v16338_v46 = vor.u32 %v14055_v3, %v10888_v21  ;;  %v14051_v21 = vld [vmem:[%s20480_s1 + $0x424] sm:$0xf0] }
  0xb7   : > { %20952 = vst [vmem:[#allocation155_spill] sm:$0xff] %v16325_v32  ;;  %v16340_v35 = vor.u32 %v14053_v37, %v10890_v12  ;;  %10828 = vmatmul.msk.bf16.vlgmr.msra.gmra.mxu0 %vm439_vm2, %v15275_v52  ;;  %10830 = vmatmul.msk.bf16.vlgmr.msra.gmra.mxu1 %vm439_vm2, %v15275_v52  ;;  %v14049_v3 = vld [vmem:[%s20480_s1 + $0x41c] sm:$0xf]  ;;  %v10874_v37 = vld [vmem:[%s20480_s1 + $0x428] sm:$0xf0]  ;;  %v1989_v12 = vunpack.c.l.b16 %v10993_v2  ;;  %v16368_v18 = vor.u32 %v14050_v9, %v10864_v14 }
  0xb8   : > { %1796 = vmatpush.bf16.msrb.mxu0 %v16280_v40  ;;  %1815 = vmatpush.bf16.msrb.mxu1 %v16282_v60  ;;  %20951 = vst [vmem:[#allocation154_spill] sm:$0xff] %v16323_v59  ;;  %v10994_v60 = vld [vmem:[%s20480_s1 + $0x5a8] sm:$0x33] }
  0xb9   : > { %20953 = vst [vmem:[#allocation156_spill] sm:$0xff] %v16338_v46  ;;  %v1992_v40 = vunpack.c.h.b16 %v10994_v60  ;;  %10832 = vmatmul.msk.bf16.vlgmr.msra.gmra.mxu2 %vm439_vm2, %v15275_v52  ;;  %10834 = vmatmul.msk.bf16.vlgmr.msra.gmra.mxu3 %vm439_vm2, %v15275_v52  ;;  %v2017_v47 = vpack.c.b16 %v1989_v12, %v1989_v12  ;;  %v11087_v12 = vld [vmem:[%s20480_s1 + $0x598] sm:$0xf0] }
  0xba   : > { %1834 = vmatpush.bf16.msrb.mxu2 %v16292_v61  ;;  %1853 = vmatpush.bf16.msrb.mxu3 %v16294_v33  ;;  %20954 = vst [vmem:[#allocation157_spill] sm:$0xff] %v16340_v35  ;;  %v1990_v33 = vunpack.c.h.b16 %v10993_v2  ;;  %v1991_v61 = vunpack.c.l.b16 %v10994_v60  ;;  %v16376_v60 = vor.u32 %v14051_v21, %v10872_v29  ;;  %v16378_v2 = vor.u32 %v14049_v3, %v10874_v37  ;;  %v14095_v3 = vld [vmem:[%s20480_s1 + $0x594] sm:$0xf0]  ;;  %v14093_v37 = vld [vmem:[%s20480_s1 + $0x58c] sm:$0xf] }
  0xbb   : > { %20955 = vst [vmem:[#allocation158_spill] sm:$0xff] %v16368_v18  ;;  %v2020_v34 = vpack.c.b16 %v1992_v40, %v1992_v40  ;;  %v16385_v58 = vand.u32 %v2017_v47, %v14855_v7  ;;  %v11077_v40 = vld [vmem:[%s20480_s1 + $0x580] sm:$0xf]  ;;  %v14092_v47 = vld [vmem:[%s20480_s1 + $0x584] sm:$0xf] }
  0xbc   : > { %20956 = vst [vmem:[#allocation159_spill] sm:$0xff] %v16370_v28  ;;  %1797 = vmatpush.bf16.msrb.mxu0 %v16323_v59  ;;  %1816 = vmatpush.bf16.msrb.mxu1 %v16325_v32  ;;  %v2018_v49 = vpack.c.b16 %v1990_v33, %v1990_v33  ;;  %v2019_v10 = vpack.c.b16 %v1991_v61, %v1991_v61  ;;  %v16380_v9 = vpop.f32.mrf.mxu2  ;;  %v16382_v13 = vpop.f32.mrf.mxu3  ;;  %v14084_v59 = vld [vmem:[%s20480_s1 + $0x544] sm:$0xf] }
  0xbd   : > { %20957 = vst [vmem:[#allocation160_spill] sm:$0xff] %v16376_v60  ;;  %v16390_v61 = vpop.f32.mrf.mxu0  ;;  %v16392_v33 = vpop.f32.mrf.mxu1  ;;  %v16398_v21 = vand.u32 %v2020_v34, %v14855_v7  ;;  %v11085_v34 = vld [vmem:[%s20480_s1 + $0x588] sm:$0xf] }
  0xbe   : > { %1835 = vmatpush.bf16.msrb.mxu2 %v16338_v46  ;;  %1854 = vmatpush.bf16.msrb.mxu3 %v16340_v35  ;;  %20958 = vst [vmem:[#allocation161_spill] sm:$0xff] %v16378_v2  ;;  %v16388_v14 = vand.u32 %v2018_v49, %v14855_v7  ;;  %v16395_v29 = vand.u32 %v2019_v10, %v14855_v7  ;;  %v14094_v49 = vld [vmem:[%s20480_s1 + $0x58c] sm:$0xf0]  ;;  %v11079_v10 = vld [vmem:[%s20480_s1 + $0x590] sm:$0xf0]  ;;  %v10704_v35 = vld [vmem:[%s15078_s16 + $0x1] sm:$0xff] }
  0xbf   : > { %20959 = vst [vmem:[#allocation162_spill] sm:$0xff] %v16385_v58  ;;  %v16440_v46 = vor.u32 %v14093_v37, %v11087_v12  ;;  %v11069_v37 = vld [vmem:[%s20480_s1 + $0x568] sm:$0xf]  ;;  %v14091_v12 = vld [vmem:[%s20480_s1 + $0x574] sm:$0xf0] }
  0xc0   : > { %20960 = vst [vmem:[#allocation163_spill] sm:$0xff] %v16388_v14  ;;  %1798 = vmatpush.bf16.msrb.mxu0 %v16368_v18  ;;  %1817 = vmatpush.bf16.msrb.mxu1 %v16370_v28  ;;  %v16430_v28 = vor.u32 %v14094_v49, %v11077_v40  ;;  %v16432_v18 = vor.u32 %v14092_v47, %v11079_v10  ;;  %v14090_v40 = vld [vmem:[%s20480_s1 + $0x56c] sm:$0xf0]  ;;  %v14088_v49 = vld [vmem:[%s20480_s1 + $0x564] sm:$0xf] }
  0xc1   : > { %20961 = vst [vmem:[#allocation164_spill] sm:$0xff] %v16395_v29 }
  0xc2   : > { %20962 = vst [vmem:[#allocation165_spill] sm:$0xff] %v16398_v21  ;;  %1836 = vmatpush.bf16.msrb.mxu2 %v16376_v60  ;;  %1855 = vmatpush.bf16.msrb.mxu3 %v16378_v2  ;;  %v10705_v60 = vld [vmem:[%s15078_s16 + $0x9] sm:$0xff]  ;;  %v16438_v2 = vor.u32 %v14095_v3, %v11085_v34  ;;  %v11063_v3 = vld [vmem:[%s20480_s1 + $0x570] sm:$0xf0] }
  0xc3   : > { %20963 = vst [vmem:[#allocation166_spill] sm:$0xff] %v16430_v28  ;;  %v16455_v34 = vpack.c.bf16 %v10705_v60, %v10704_v35  ;;  %v14089_v60 = vld [vmem:[%s20480_s1 + $0x56c] sm:$0xf] }
  0xc4   : > { %2061 = vmatpush.bf16.msra.mxu0 %v16385_v58  ;;  %2080 = vmatpush.bf16.msra.mxu1 %v16388_v14  ;;  %20964 = vst [vmem:[#allocation167_spill] sm:$0xff] %v16432_v18  ;;  %v11061_v58 = vld [vmem:[%s20480_s1 + $0x560] sm:$0xf]  ;;  %v16451_v47 = vpop.f32.mrf.mxu2  ;;  %v16453_v10 = vpop.f32.mrf.mxu3  ;;  %v16484_v14 = vor.u32 %v14091_v12, %v11069_v37 }
  0xc5   : > { %20965 = vst [vmem:[#allocation168_spill] sm:$0xff] %v16438_v2  ;;  %v16470_v35 = vpop.f32.mrf.mxu1 }
  0xc6   : > { %2099 = vmatpush.bf16.msra.mxu2 %v16395_v29  ;;  %2118 = vmatpush.bf16.msra.mxu3 %v16398_v21  ;;  %20966 = vst [vmem:[#allocation169_spill] sm:$0xff] %v16440_v46  ;;  %v16468_v21 = vpop.f32.mrf.mxu0  ;;  %v16482_v29 = vor.u32 %v14088_v49, %v11063_v3  ;;  %v14085_v49 = vld [vmem:[%s20480_s1 + $0x54c] sm:$0xf]  ;;  %v11055_v3 = vld [vmem:[%s20480_s1 + $0x558] sm:$0xf0] }
  0xc7   : > { %20969 = vst [vmem:[#allocation172_spill] sm:$0xff] %v16484_v14  ;;  %10829 = vmatmul.msk.bf16.gmra.mxu0 %vm439_vm2, %v16455_v34  ;;  %10831 = vmatmul.msk.bf16.gmra.mxu1 %vm439_vm2, %v16455_v34  ;;  %v16530_v17 = vor.u32 %v14085_v49, %v11055_v3 }
  0xc8   : > { %2062 = vmatpush.bf16.msra.mxu0 %v16430_v28  ;;  %2081 = vmatpush.bf16.msra.mxu1 %v16432_v18  ;;  %v11071_v18 = vld [vmem:[%s20480_s1 + $0x578] sm:$0xf0]  ;;  %v16480_v28 = vor.u32 %v14090_v40, %v11061_v58  ;;  %20968 = vst [vmem:[#allocation171_spill] sm:$0xff] %v16482_v29  ;;  %v11053_v58 = vld [vmem:[%s20480_s1 + $0x548] sm:$0xf] }
  0xc9   : > { %v16486_v32 = vor.u32 %v14089_v60, %v11071_v18  ;;  %v11047_v18 = vld [vmem:[%s20480_s1 + $0x550] sm:$0xf0]  ;;  %v14087_v40 = vld [vmem:[%s20480_s1 + $0x554] sm:$0xf0]  ;;  %10833 = vmatmul.msk.bf16.gmra.mxu2 %vm439_vm2, %v16455_v34  ;;  %10835 = vmatmul.msk.bf16.gmra.mxu3 %vm439_vm2, %v16455_v34  ;;  %20974 = vst [vmem:[#allocation177_spill] sm:$0xff] %v16530_v17 }
  0xca   : > { %2100 = vmatpush.bf16.msra.mxu2 %v16438_v2  ;;  %2119 = vmatpush.bf16.msra.mxu3 %v16440_v46  ;;  %20967 = vst [vmem:[#allocation170_spill] sm:$0xff] %v16480_v28  ;;  %v11045_v46 = vld [vmem:[%s20480_s1 + $0x540] sm:$0xf]  ;;  %v14086_v2 = vld [vmem:[%s20480_s1 + $0x54c] sm:$0xf0]  ;;  %v16524_v12 = vor.u32 %v14084_v59, %v11047_v18  ;;  %v16528_v60 = vor.u32 %v14087_v40, %v11053_v58 }
  0xcb   : > { %20970 = vst [vmem:[#allocation173_spill] sm:$0xff] %v16486_v32  ;;  %v16522_v37 = vor.u32 %v14086_v2, %v11045_v46  ;;  %v14080_v59 = vld [vmem:[%s20480_s1 + $0x524] sm:$0xf]  ;;  %v11031_v18 = vld [vmem:[%s20480_s1 + $0x530] sm:$0xf0] }
  0xcc   : > { %2063 = vmatpush.bf16.msra.mxu0 %v16480_v28  ;;  %2082 = vmatpush.bf16.msra.mxu1 %v16482_v29  ;;  %20972 = vst [vmem:[#allocation175_spill] sm:$0xff] %v16524_v12  ;;  %v14082_v29 = vld [vmem:[%s20480_s1 + $0x52c] sm:$0xf0]  ;;  %v16541_v46 = vpop.f32.mrf.mxu2  ;;  %v16543_v2 = vpop.f32.mrf.mxu3  ;;  %v11037_v58 = vld [vmem:[%s20480_s1 + $0x528] sm:$0xf]  ;;  %v16568_v6 = vor.u32 %v14080_v59, %v11031_v18 }
  0xcd   : > { %20971 = vst [vmem:[#allocation174_spill] sm:$0xff] %v16522_v37  ;;  %v14083_v40 = vld [vmem:[%s20480_s1 + $0x534] sm:$0xf0]  ;;  %v16556_v3 = vpop.f32.mrf.mxu1  ;;  %v16566_v28 = vor.u32 %v14082_v29, %v11029_v8  ;;  %v14076_v8 = vld [vmem:[%s20480_s1 + $0x504] sm:$0xf] }
  0xce   : > { %2101 = vmatpush.bf16.msra.mxu2 %v16484_v14  ;;  %2120 = vmatpush.bf16.msra.mxu3 %v16486_v32  ;;  %20973 = vst [vmem:[#allocation176_spill] sm:$0xff] %v16528_v60  ;;  %v16554_v49 = vpop.f32.mrf.mxu0  ;;  %v14081_v32 = vld [vmem:[%s20480_s1 + $0x52c] sm:$0xf]  ;;  %v11039_v14 = vld [vmem:[%s20480_s1 + $0x538] sm:$0xf0]  ;;  %v16578_v56 = vor.u32 %v14083_v40, %v11037_v58  ;;  %v16602_v58 = vor.u32 %v14078_v62, %v11013_v1 }
  0xcf   : > { %20975 = vst [vmem:[#allocation178_spill] sm:$0xff] %v16566_v28  ;;  %v11015_v29 = vld [vmem:[%s20480_s1 + $0x510] sm:$0xf0]  ;;  %v11021_v59 = vld [vmem:[%s20480_s1 + $0x508] sm:$0xf] }
  0xd0   : > { %2064 = vmatpush.bf16.msra.mxu0 %v16522_v37  ;;  %2083 = vmatpush.bf16.msra.mxu1 %v16524_v12  ;;  %20976 = vst [vmem:[#allocation179_spill] sm:$0xff] %v16568_v6  ;;  %v16580_v37 = vor.u32 %v14081_v32, %v11039_v14  ;;  %v14079_v18 = vld [vmem:[%s20480_s1 + $0x514] sm:$0xf0]  ;;  %v14077_v32 = vld [vmem:[%s20480_s1 + $0x50c] sm:$0xf]  ;;  %v16604_v40 = vor.u32 %v14076_v8, %v11015_v29 }
  0xd1   : > { %20977 = vst [vmem:[#allocation180_spill] sm:$0xff] %v16578_v56  ;;  %v11023_v14 = vld [vmem:[%s20480_s1 + $0x518] sm:$0xf0]  ;;  %v10997_v12 = vld [vmem:[%s20480_s1 + $0x4e0] sm:$0xf] }
  0xd2   : > { %2102 = vmatpush.bf16.msra.mxu2 %v16528_v60  ;;  %2121 = vmatpush.bf16.msra.mxu3 %v16530_v17  ;;  %20978 = vst [vmem:[#allocation181_spill] sm:$0xff] %v16580_v37  ;;  %v16608_v17 = vor.u32 %v14079_v18, %v11021_v59  ;;  %v16610_v60 = vor.u32 %v14077_v32, %v11023_v14  ;;  %v14072_v62 = vld [vmem:[%s20480_s1 + $0x4e4] sm:$0xf]  ;;  %v10999_v29 = vld [vmem:[%s20480_s1 + $0x4f0] sm:$0xf0] }
  0xd3   : > { %20979 = vst [vmem:[#allocation182_spill] sm:$0xff] %v16602_v58  ;;  %v11005_v59 = vld [vmem:[%s20480_s1 + $0x4e8] sm:$0xf]  ;;  %v14075_v18 = vld [vmem:[%s20480_s1 + $0x4f4] sm:$0xf0]  ;;  %v16648_v53 = vor.u32 %v14072_v62, %v10999_v29 }
  0xd4   : > { %2065 = vmatpush.bf16.msra.mxu0 %v16566_v28  ;;  %2084 = vmatpush.bf16.msra.mxu1 %v16568_v6  ;;  %20980 = vst [vmem:[#allocation183_spill] sm:$0xff] %v16604_v40  ;;  %v14074_v6 = vld [vmem:[%s20480_s1 + $0x4ec] sm:$0xf0]  ;;  %v16621_v1 = vpop.f32.mrf.mxu2  ;;  %v16623_v8 = vpop.f32.mrf.mxu3  ;;  %v16652_v48 = vor.u32 %v14075_v18, %v11005_v59 }
  0xd5   : > { %20981 = vst [vmem:[#allocation184_spill] sm:$0xff] %v16608_v17  ;;  %v16636_v14 = vpop.f32.mrf.mxu1  ;;  %v16646_v28 = vor.u32 %v14074_v6, %v10997_v12  ;;  %v2253_v6 = vunpack.c.l.b16 %v11123_v44  ;;  %v2254_v12 = vunpack.c.h.b16 %v11123_v44 }
  0xd6   : > { %2103 = vmatpush.bf16.msra.mxu2 %v16578_v56  ;;  %2122 = vmatpush.bf16.msra.mxu3 %v16580_v37  ;;  %20982 = vst [vmem:[#allocation185_spill] sm:$0xff] %v16610_v60  ;;  %v16634_v32 = vpop.f32.mrf.mxu0  ;;  %v14073_v37 = vld [vmem:[%s20480_s1 + $0x4ec] sm:$0xf]  ;;  %v11007_v56 = vld [vmem:[%s20480_s1 + $0x4f8] sm:$0xf0] }
  0xd7   : > { %20983 = vst [vmem:[#allocation186_spill] sm:$0xff] %v16646_v28  ;;  %v16654_v45 = vor.u32 %v14073_v37, %v11007_v56  ;;  %10958 = vmatmul.msk.bf16.vlgmr.msrb.gmra.mxu0 %vm439_vm2, %v15275_v52  ;;  %10960 = vmatmul.msk.bf16.vlgmr.msrb.gmra.mxu1 %vm439_vm2, %v15275_v52  ;;  %v2281_v56 = vpack.c.b16 %v2253_v6, %v2253_v6 }
  0xd8   : > { %2066 = vmatpush.bf16.msra.mxu0 %v16602_v58  ;;  %2085 = vmatpush.bf16.msra.mxu1 %v16604_v40  ;;  %20984 = vst [vmem:[#allocation187_spill] sm:$0xff] %v16648_v53  ;;  %v11124_v40 = vld [vmem:[%s20480_s1 + $0x678] sm:$0x33]  ;;  %v2282_v37 = vpack.c.b16 %v2254_v12, %v2254_v12 }
  0xd9   : > { %20985 = vst [vmem:[#allocation188_spill] sm:$0xff] %v16652_v48  ;;  %v2255_v62 = vunpack.c.l.b16 %v11124_v40  ;;  %v2256_v29 = vunpack.c.h.b16 %v11124_v40  ;;  %10962 = vmatmul.msk.bf16.vlgmr.msrb.gmra.mxu2 %vm439_vm2, %v15275_v52  ;;  %10964 = vmatmul.msk.bf16.vlgmr.msrb.gmra.mxu3 %vm439_vm2, %v15275_v52 }
  0xda   : > { %2104 = vmatpush.bf16.msra.mxu2 %v16608_v17  ;;  %2123 = vmatpush.bf16.msra.mxu3 %v16610_v60  ;;  %20986 = vst [vmem:[#allocation189_spill] sm:$0xff] %v16654_v45  ;;  %v16679_v60 = vand.u32 %v2281_v56, %v14855_v7  ;;  %v16682_v52 = vand.u32 %v2282_v37, %v14855_v7  ;;  %v14118_v56 = vld [vmem:[%s20480_s1 + $0x65c] sm:$0xf0]  ;;  %v14116_v37 = vld [vmem:[%s20480_s1 + $0x654] sm:$0xf] }
  0xdb   : > { %v2283_v59 = vpack.c.b16 %v2255_v62, %v2255_v62  ;;  %v2284_v44 = vpack.c.b16 %v2256_v29, %v2256_v29  ;;  %v11207_v29 = vld [vmem:[%s20480_s1 + $0x650] sm:$0xf]  ;;  %v11201_v17 = vld [vmem:[%s20480_s1 + $0x648] sm:$0xf0] }
  0xdc   : > { %2067 = vmatpush.bf16.msra.mxu0 %v16646_v28  ;;  %2086 = vmatpush.bf16.msra.mxu1 %v16648_v53  ;;  %v16674_v18 = vpop.f32.mrf.mxu2  ;;  %v16676_v40 = vpop.f32.mrf.mxu3  ;;  %20987 = vst [vmem:[#allocation190_spill] sm:$0xff] %v16679_v60 }
  0xdd   : > { %20988 = vst [vmem:[#allocation191_spill] sm:$0xff] %v16682_v52  ;;  %v16685_v53 = vand.u32 %v2283_v59, %v14855_v7  ;;  %v16689_v12 = vpop.f32.mrf.mxu1  ;;  %v16692_v62 = vand.u32 %v2284_v44, %v14855_v7  ;;  %v16707_v59 = vor.u32 %v14118_v56, %v11207_v29  ;;  %v11209_v44 = vld [vmem:[%s20480_s1 + $0x660] sm:$0xf0]  ;;  %v14117_v29 = vld [vmem:[%s20480_s1 + $0x65c] sm:$0xf] }
  0xde   : > { %2105 = vmatpush.bf16.msra.mxu2 %v16652_v48  ;;  %2124 = vmatpush.bf16.msra.mxu3 %v16654_v45  ;;  %v16687_v6 = vpop.f32.mrf.mxu0  ;;  %v16718_v45 = vor.u32 %v14116_v37, %v11209_v44  ;;  %v11217_v56 = vld [vmem:[%s20480_s1 + $0x668] sm:$0xf0]  ;;  %v14112_v37 = vld [vmem:[%s20480_s1 + $0x634] sm:$0xf] }
  0xdf   : > { %20989 = vst [vmem:[#allocation192_spill] sm:$0xff] %v16685_v53 }
  0xe0   : > { %20990 = vst [vmem:[#allocation193_spill] sm:$0xff] %v16692_v62  ;;  %2322 = vmatpush.bf16.msrb.mxu0 %v16679_v60  ;;  %2341 = vmatpush.bf16.msrb.mxu1 %v16682_v52  ;;  %v11215_v52 = vld [vmem:[%s20480_s1 + $0x658] sm:$0xf]  ;;  %v14119_v60 = vld [vmem:[%s20480_s1 + $0x664] sm:$0xf0] }
  0xe1   : > { %20991 = vst [vmem:[#allocation194_spill] sm:$0xff] %v16707_v59  ;;  %v16720_v48 = vor.u32 %v14119_v60, %v11215_v52  ;;  %v11191_v60 = vld [vmem:[%s20480_s1 + $0x630] sm:$0xf]  ;;  %v14114_v52 = vld [vmem:[%s20480_s1 + $0x63c] sm:$0xf0] }
  0xe2   : > { %2360 = vmatpush.bf16.msrb.mxu2 %v16685_v53  ;;  %2379 = vmatpush.bf16.msrb.mxu3 %v16692_v62  ;;  %20992 = vst [vmem:[#allocation195_spill] sm:$0xff] %v16718_v45  ;;  %v16728_v62 = vor.u32 %v14117_v29, %v11217_v56  ;;  %v16747_v56 = vor.u32 %v14114_v52, %v11191_v60  ;;  %v14113_v52 = vld [vmem:[%s20480_s1 + $0x63c] sm:$0xf] }
  0xe3   : > { %20993 = vst [vmem:[#allocation196_spill] sm:$0xff] %v16720_v48  ;;  %v16773_v58 = vor.u32 %v14113_v52, %v11201_v17  ;;  %v11183_v52 = vld [vmem:[%s20480_s1 + $0x618] sm:$0xf] }
  0xe4   : > { %20994 = vst [vmem:[#allocation197_spill] sm:$0xff] %v16728_v62  ;;  %2323 = vmatpush.bf16.msrb.mxu0 %v16707_v59  ;;  %2342 = vmatpush.bf16.msrb.mxu1 %v16718_v45  ;;  %v16743_v44 = vpop.f32.mrf.mxu2  ;;  %v16745_v29 = vpop.f32.mrf.mxu3  ;;  %v14115_v45 = vld [vmem:[%s20480_s1 + $0x644] sm:$0xf0] }
  0xe5   : > { %20995 = vst [vmem:[#allocation198_spill] sm:$0xff] %v16747_v56  ;;  %v16760_v53 = vpop.f32.mrf.mxu1 }
  0xe6   : > { %2361 = vmatpush.bf16.msrb.mxu2 %v16720_v48  ;;  %2380 = vmatpush.bf16.msrb.mxu3 %v16728_v62  ;;  %v11193_v62 = vld [vmem:[%s20480_s1 + $0x640] sm:$0xf0]  ;;  %v11199_v48 = vld [vmem:[%s20480_s1 + $0x638] sm:$0xf]  ;;  %v16758_v59 = vpop.f32.mrf.mxu0  ;;  %20998 = vst [vmem:[#allocation201_spill] sm:$0xff] %v16773_v58 }
  0xe7   : > { %v16762_v28 = vor.u32 %v14112_v37, %v11193_v62  ;;  %v16764_v60 = vor.u32 %v14115_v45, %v11199_v48  ;;  %v11175_v45 = vld [vmem:[%s20480_s1 + $0x610] sm:$0xf]  ;;  %v14110_v48 = vld [vmem:[%s20480_s1 + $0x61c] sm:$0xf0]  ;;  %v14108_v62 = vld [vmem:[%s20480_s1 + $0x614] sm:$0xf]  ;;  %10959 = vmatmul.msk.bf16.gmra.mxu0 %vm439_vm2, %v16455_v34  ;;  %10961 = vmatmul.msk.bf16.gmra.mxu1 %vm439_vm2, %v16455_v34 }
  0xe8   : > { %2324 = vmatpush.bf16.msrb.mxu0 %v16747_v56  ;;  %v16790_v17 = vor.u32 %v14110_v48, %v11175_v45  ;;  %v11177_v37 = vld [vmem:[%s20480_s1 + $0x620] sm:$0xf0]  ;;  %v11185_v56 = vld [vmem:[%s20480_s1 + $0x628] sm:$0xf0] }
  0xe9   : > { %20996 = vst [vmem:[#allocation199_spill] sm:$0xff] %v16762_v28  ;;  %2343 = vmatpush.bf16.msrb.mxu1 %v16762_v28  ;;  %10963 = vmatmul.msk.bf16.gmra.mxu2 %vm439_vm2, %v16455_v34  ;;  %v16805_v45 = vor.u32 %v14108_v62, %v11177_v37  ;;  %v14109_v28 = vld [vmem:[%s20480_s1 + $0x61c] sm:$0xf]  ;;  %v14106_v62 = vld [vmem:[%s20480_s1 + $0x5fc] sm:$0xf0] }
  0xea   : > { %20997 = vst [vmem:[#allocation200_spill] sm:$0xff] %v16764_v60  ;;  %2362 = vmatpush.bf16.msrb.mxu2 %v16764_v60  ;;  %v14111_v60 = vld [vmem:[%s20480_s1 + $0x624] sm:$0xf0]  ;;  %10965 = vmatmul.msk.bf16.gmra.mxu3 %vm439_vm2, %v16455_v34  ;;  %v16817_v41 = vor.u32 %v14109_v28, %v11185_v56  ;;  %v14104_v37 = vld [vmem:[%s20480_s1 + $0x5f4] sm:$0xf] }
  0xeb   : > { %20999 = vst [vmem:[#allocation202_spill] sm:$0xff] %v16790_v17  ;;  %v16807_v48 = vor.u32 %v14111_v60, %v11183_v52  ;;  %2381 = vmatpush.bf16.msrb.mxu3 %v16773_v58  ;;  %v11159_v60 = vld [vmem:[%s20480_s1 + $0x5f0] sm:$0xf] }
  0xec   : > { %21000 = vst [vmem:[#allocation203_spill] sm:$0xff] %v16805_v45  ;;  %2325 = vmatpush.bf16.msrb.mxu0 %v16790_v17  ;;  %v16830_v52 = vpop.f32.mrf.mxu2  ;;  %v16832_v28 = vpop.f32.mrf.mxu3  ;;  %v16834_v56 = vor.u32 %v14106_v62, %v11159_v60  ;;  %v14107_v17 = vld [vmem:[%s20480_s1 + $0x604] sm:$0xf0]  ;;  %v14105_v62 = vld [vmem:[%s20480_s1 + $0x5fc] sm:$0xf] }
  0xed   : > { %21001 = vst [vmem:[#allocation204_spill] sm:$0xff] %v16807_v48  ;;  %2344 = vmatpush.bf16.msrb.mxu1 %v16805_v45  ;;  %v11167_v45 = vld [vmem:[%s20480_s1 + $0x5f8] sm:$0xf]  ;;  %v16847_v23 = vpop.f32.mrf.mxu1  ;;  %v16861_v15 = vor.u32 %v14105_v62, %v11169_v16  ;;  %v11145_v16 = vld [vmem:[%s20480_s1 + $0x5e0] sm:$0xf0] }
  0xee   : > { %21002 = vst [vmem:[#allocation205_spill] sm:$0xff] %v16817_v41  ;;  %2363 = vmatpush.bf16.msrb.mxu2 %v16807_v48  ;;  %v11161_v48 = vld [vmem:[%s20480_s1 + $0x600] sm:$0xf0]  ;;  %v16845_v58 = vpop.f32.mrf.mxu0  ;;  %v16851_v60 = vor.u32 %v14107_v17, %v11167_v45  ;;  %v14102_v17 = vld [vmem:[%s20480_s1 + $0x5dc] sm:$0xf0] }
  0xef   : > { %21003 = vst [vmem:[#allocation206_spill] sm:$0xff] %v16834_v56  ;;  %v16849_v22 = vor.u32 %v14104_v37, %v11161_v48  ;;  %2382 = vmatpush.bf16.msrb.mxu3 %v16817_v41  ;;  %v11143_v48 = vld [vmem:[%s20480_s1 + $0x5d0] sm:$0xf]  ;;  %v14100_v45 = vld [vmem:[%s20480_s1 + $0x5d4] sm:$0xf] }
  0xf0   : > { %21005 = vst [vmem:[#allocation208_spill] sm:$0xff] %v16851_v60  ;;  %2326 = vmatpush.bf16.msrb.mxu0 %v16834_v56  ;;  %v16874_v37 = vor.u32 %v14102_v17, %v11143_v48  ;;  %v11151_v62 = vld [vmem:[%s20480_s1 + $0x5d8] sm:$0xf]  ;;  %v14103_v56 = vld [vmem:[%s20480_s1 + $0x5e4] sm:$0xf0]  ;;  %v16885_v41 = vor.u32 %v14100_v45, %v11145_v16 }
  0xf1   : > { %21004 = vst [vmem:[#allocation207_spill] sm:$0xff] %v16849_v22  ;;  %2345 = vmatpush.bf16.msrb.mxu1 %v16849_v22  ;;  %v16887_v5 = vor.u32 %v14103_v56, %v11151_v62  ;;  %v14101_v48 = vld [vmem:[%s20480_s1 + $0x5dc] sm:$0xf]  ;;  %v11153_v17 = vld [vmem:[%s20480_s1 + $0x5e8] sm:$0xf0] }
  0xf2   : > { %21006 = vst [vmem:[#allocation209_spill] sm:$0xff] %v16861_v15  ;;  %2364 = vmatpush.bf16.msrb.mxu2 %v16851_v60  ;;  %v16897_v60 = vor.u32 %v14101_v48, %v11153_v17  ;;  %v11127_v56 = vld [vmem:[%s20480_s1 + $0x5b0] sm:$0xf]  ;;  %v14098_v45 = vld [vmem:[%s20480_s1 + $0x5bc] sm:$0xf0] }
  0xf3   : > { %21007 = vst [vmem:[#allocation210_spill] sm:$0xff] %v16874_v37  ;;  %2383 = vmatpush.bf16.msrb.mxu3 %v16861_v15  ;;  %v14096_v16 = vld [vmem:[%s20480_s1 + $0x5b4] sm:$0xf]  ;;  %v16914_v17 = vor.u32 %v14098_v45, %v11127_v56  ;;  %v14097_v56 = vld [vmem:[%s20480_s1 + $0x5bc] sm:$0xf] }
  0xf4   : > { %21008 = vst [vmem:[#allocation211_spill] sm:$0xff] %v16885_v41  ;;  %2327 = vmatpush.bf16.msrb.mxu0 %v16874_v37  ;;  %v16910_v62 = vpop.f32.mrf.mxu2  ;;  %v16912_v48 = vpop.f32.mrf.mxu3  ;;  %v14099_v37 = vld [vmem:[%s20480_s1 + $0x5c4] sm:$0xf0]  ;;  %v11137_v45 = vld [vmem:[%s20480_s1 + $0x5c8] sm:$0xf0] }
  0xf5   : > { %21009 = vst [vmem:[#allocation212_spill] sm:$0xff] %v16887_v5  ;;  %2346 = vmatpush.bf16.msrb.mxu1 %v16885_v41  ;;  %v11135_v41 = vld [vmem:[%s20480_s1 + $0x5b8] sm:$0xf]  ;;  %v1028_v22 = vpop.f32.mrf.mxu1 }
  0xf6   : > { %21010 = vst [vmem:[#allocation213_spill] sm:$0xff] %v16897_v60  ;;  %2365 = vmatpush.bf16.msrb.mxu2 %v16887_v5  ;;  %v11129_v5 = vld [vmem:[%s20480_s1 + $0x5c0] sm:$0xf0]  ;;  %v1009_v15 = vpop.f32.mrf.mxu0  ;;  %v16927_v0 = vor.u32 %v14099_v37, %v11135_v41  ;;  %v16939_v55 = vadd.f32 %v1028_v22, %v16316_v57 }
  0xf7   : > { %21011 = vst [vmem:[#allocation214_spill] sm:$0xff] %v16914_v17  ;;  %v16925_v4 = vor.u32 %v14096_v16, %v11129_v5  ;;  %v16936_v63 = vadd.f32 %v1009_v15, %v16314_v11  ;;  %2384 = vmatpush.bf16.msrb.mxu3 %v16897_v60  ;;  %v16943_v5 = vor.u32 %v14097_v56, %v11137_v45  ;;  %v11256_v41 = vld [vmem:[%s20480_s1 + $0x740] sm:$0x33]  ;;  %v11257_v15 = vld [vmem:[%s20480_s1 + $0x748] sm:$0x33] }
  0xf8   : > { %21013 = vst [vmem:[#allocation216_spill] sm:$0xff] %v16927_v0  ;;  %2328 = vmatpush.bf16.msrb.mxu0 %v16914_v17  ;;  %11093 = vmatmul.msk.bf16.vlgmr.msra.gmra.mxu1 %vm439_vm2, %v15866_v36  ;;  %v2519_v22 = vunpack.c.l.b16 %v11256_v41  ;;  %v2520_v11 = vunpack.c.h.b16 %v11256_v41  ;;  %v2521_v57 = vunpack.c.l.b16 %v11257_v15  ;;  %v2522_v37 = vunpack.c.h.b16 %v11257_v15 }
  0xf9   : > { %21012 = vst [vmem:[#allocation215_spill] sm:$0xff] %v16925_v4  ;;  %2347 = vmatpush.bf16.msrb.mxu1 %v16925_v4  ;;  %11091 = vmatmul.msk.bf16.vlgmr.msra.gmra.mxu0 %vm439_vm2, %v15866_v36 }
  0xfa   : > { %21014 = vst [vmem:[#allocation217_spill] sm:$0xff] %v16943_v5  ;;  %2366 = vmatpush.bf16.msrb.mxu2 %v16927_v0  ;;  %11097 = vmatmul.msk.bf16.vlgmr.msra.gmra.mxu3 %vm439_vm2, %v15866_v36  ;;  %v2547_v16 = vpack.c.b16 %v2519_v22, %v2519_v22  ;;  %v2548_v56 = vpack.c.b16 %v2520_v11, %v2520_v11 }
  0xfb   : > { %11095 = vmatmul.msk.bf16.vlgmr.msra.gmra.mxu2 %vm439_vm2, %v15866_v36  ;;  %2385 = vmatpush.bf16.msrb.mxu3 %v16943_v5  ;;  %v2549_v45 = vpack.c.b16 %v2521_v57, %v2521_v57  ;;  %v2550_v0 = vpack.c.b16 %v2522_v37, %v2522_v37 }
  0xfc   : > { %v1047_v4 = vpop.f32.mrf.mxu2  ;;  %v1066_v17 = vpop.f32.mrf.mxu3  ;;  %v16963_v60 = vand.u32 %v2547_v16, %v14855_v7  ;;  %v16966_v41 = vand.u32 %v2548_v56, %v14855_v7 }
  0xfd   : > { %v16969_v15 = vand.u32 %v2549_v45, %v14855_v7  ;;  %v16972_v54 = vand.u32 %v2550_v0, %v14855_v7  ;;  %v16975_v5 = vadd.f32 %v1047_v4, %v16380_v9  ;;  %v16978_v22 = vadd.f32 %v1066_v17, %v16382_v13  ;;  %v1030_v57 = vpop.f32.mrf.mxu1  ;;  %v11340_v0 = vld [vmem:[%s20480_s1 + $0x720] sm:$0xf]  ;;  %v14142_v4 = vld [vmem:[%s20480_s1 + $0x72c] sm:$0xf0]  ;;  %v14140_v9 = vld [vmem:[%s20480_s1 + $0x724] sm:$0xf] }
  0xfe   : > { %21015 = vst [vmem:[#allocation218_spill] sm:$0xff] %v16963_v60  ;;  %v1011_v11 = vpop.f32.mrf.mxu0  ;;  %v16984_v16 = vadd.f32 %v1030_v57, %v16392_v33  ;;  %2591 = vmatpush.bf16.msra.mxu0 %v16963_v60  ;;  %2610 = vmatpush.bf16.msra.mxu1 %v16966_v41  ;;  %v16999_v13 = vor.u32 %v14142_v4, %v11340_v0  ;;  %v11348_v33 = vld [vmem:[%s20480_s1 + $0x728] sm:$0xf]  ;;  %v14143_v17 = vld [vmem:[%s20480_s1 + $0x734] sm:$0xf0] }
  0xff   : > { %21016 = vst [vmem:[#allocation219_spill] sm:$0xff] %v16966_v41  ;;  %v16981_v37 = vadd.f32 %v1011_v11, %v16390_v61  ;;  %2629 = vmatpush.bf16.msra.mxu2 %v16969_v15  ;;  %2648 = vmatpush.bf16.msra.mxu3 %v16972_v54  ;;  %v11342_v61 = vld [vmem:[%s20480_s1 + $0x730] sm:$0xf0]  ;;  %v17012_v45 = vor.u32 %v14143_v17, %v11348_v33  ;;  %v14141_v11 = vld [vmem:[%s20480_s1 + $0x72c] sm:$0xf] }
 0x100   : > { %21017 = vst [vmem:[#allocation220_spill] sm:$0xff] %v16969_v15  ;;  %v17010_v56 = vor.u32 %v14140_v9, %v11342_v61  ;;  %v11350_v57 = vld [vmem:[%s20480_s1 + $0x738] sm:$0xf0]  ;;  %v10967_v0 = vld [vmem:[%s15078_s16 + $0x29] sm:$0xff]  ;;  %v10968_v4 = vld [vmem:[%s15078_s16 + $0x31] sm:$0xff] }
 0x101   : > { %21018 = vst [vmem:[#allocation221_spill] sm:$0xff] %v16972_v54  ;;  %v17022_v54 = vor.u32 %v14141_v11, %v11350_v57  ;;  %v11324_v9 = vld [vmem:[%s20480_s1 + $0x700] sm:$0xf]  ;;  %v14138_v61 = vld [vmem:[%s20480_s1 + $0x70c] sm:$0xf0]  ;;  %v17037_v57 = vpack.c.bf16 %v10968_v4, %v10967_v0 }
 0x102   : > { %21019 = vst [vmem:[#allocation222_spill] sm:$0xff] %v16999_v13  ;;  %2592 = vmatpush.bf16.msra.mxu0 %v16999_v13  ;;  %2611 = vmatpush.bf16.msra.mxu1 %v17010_v56  ;;  %v14136_v33 = vld [vmem:[%s20480_s1 + $0x704] sm:$0xf]  ;;  %v14139_v13 = vld [vmem:[%s20480_s1 + $0x714] sm:$0xf0] }
 0x103   : > { %21020 = vst [vmem:[#allocation223_spill] sm:$0xff] %v17010_v56  ;;  %2630 = vmatpush.bf16.msra.mxu2 %v17012_v45  ;;  %2649 = vmatpush.bf16.msra.mxu3 %v17022_v54  ;;  %v17039_v56 = vor.u32 %v14138_v61, %v11324_v9  ;;  %v14137_v60 = vld [vmem:[%s20480_s1 + $0x70c] sm:$0xf] }
 0x104   : > { %21021 = vst [vmem:[#allocation224_spill] sm:$0xff] %v17012_v45  ;;  %v1049_v17 = vpop.f32.mrf.mxu2  ;;  %v1068_v11 = vpop.f32.mrf.mxu3  ;;  %v11332_v45 = vld [vmem:[%s20480_s1 + $0x708] sm:$0xf] }
 0x105   : > { %21022 = vst [vmem:[#allocation225_spill] sm:$0xff] %v17022_v54  ;;  %v11326_v54 = vld [vmem:[%s20480_s1 + $0x710] sm:$0xf0]  ;;  %v17051_v15 = vadd.f32 %v1049_v17, %v16451_v47  ;;  %v17054_v0 = vadd.f32 %v1068_v11, %v16453_v10  ;;  %v1033_v9 = vpop.f32.mrf.mxu1  ;;  %v17058_v41 = vor.u32 %v14139_v13, %v11332_v45  ;;  %v11308_v13 = vld [vmem:[%s20480_s1 + $0x6e0] sm:$0xf] }
 0x106   : > { %21023 = vst [vmem:[#allocation226_spill] sm:$0xff] %v17039_v56  ;;  %v1014_v4 = vpop.f32.mrf.mxu0  ;;  %v17056_v61 = vor.u32 %v14136_v33, %v11326_v54  ;;  %v17070_v10 = vadd.f32 %v1033_v9, %v16470_v35  ;;  %2593 = vmatpush.bf16.msra.mxu0 %v17039_v56  ;;  %v17073_v54 = vor.u32 %v14137_v60, %v11334_v51  ;;  %v14132_v35 = vld [vmem:[%s20480_s1 + $0x6e4] sm:$0xf]  ;;  %v11310_v60 = vld [vmem:[%s20480_s1 + $0x6f0] sm:$0xf0] }
 0x107   : > { %21025 = vst [vmem:[#allocation228_spill] sm:$0xff] %v17058_v41  ;;  %v17067_v47 = vadd.f32 %v1014_v4, %v16468_v21  ;;  %2631 = vmatpush.bf16.msra.mxu2 %v17058_v41  ;;  %v14134_v21 = vld [vmem:[%s20480_s1 + $0x6ec] sm:$0xf0]  ;;  %v11316_v45 = vld [vmem:[%s20480_s1 + $0x6e8] sm:$0xf]  ;;  %v17105_v17 = vor.u32 %v14132_v35, %v11310_v60 }
 0x108   : > { %21024 = vst [vmem:[#allocation227_spill] sm:$0xff] %v17056_v61  ;;  %2612 = vmatpush.bf16.msra.mxu1 %v17056_v61  ;;  %v17090_v51 = vor.u32 %v14134_v21, %v11308_v13  ;;  %v14135_v33 = vld [vmem:[%s20480_s1 + $0x6f4] sm:$0xf0]  ;;  %v14133_v4 = vld [vmem:[%s20480_s1 + $0x6ec] sm:$0xf]  ;;  %2650 = vmatpush.bf16.msra.mxu3 %v17073_v54 }
 0x109   : > { %21026 = vst [vmem:[#allocation229_spill] sm:$0xff] %v17073_v54  ;;  %11092 = vmatmul.msk.bf16.gmra.mxu0 %vm439_vm2, %v17037_v57  ;;  %11094 = vmatmul.msk.bf16.gmra.mxu1 %vm439_vm2, %v17037_v57  ;;  %v17107_v11 = vor.u32 %v14135_v33, %v11316_v45  ;;  %v11318_v9 = vld [vmem:[%s20480_s1 + $0x6f8] sm:$0xf0]  ;;  %v11292_v21 = vld [vmem:[%s20480_s1 + $0x6c0] sm:$0xf] }
 0x10a   : > { %21027 = vst [vmem:[#allocation230_spill] sm:$0xff] %v17090_v51  ;;  %11098 = vmatmul.msk.bf16.gmra.mxu3 %vm439_vm2, %v17037_v57  ;;  %2594 = vmatpush.bf16.msra.mxu0 %v17090_v51  ;;  %v17117_v13 = vor.u32 %v14133_v4, %v11318_v9  ;;  %v14130_v35 = vld [vmem:[%s20480_s1 + $0x6cc] sm:$0xf0]  ;;  %v14128_v60 = vld [vmem:[%s20480_s1 + $0x6c4] sm:$0xf] }
 0x10b   : > { %11096 = vmatmul.msk.bf16.gmra.mxu2 %vm439_vm2, %v17037_v57  ;;  %21028 = vst [vmem:[#allocation231_spill] sm:$0xff] %v17105_v17  ;;  %v17130_v4 = vor.u32 %v14130_v35, %v11292_v21  ;;  %v11294_v9 = vld [vmem:[%s20480_s1 + $0x6d0] sm:$0xf0]  ;;  %v14129_v56 = vld [vmem:[%s20480_s1 + $0x6cc] sm:$0xf] }
 0x10c   : > { %21029 = vst [vmem:[#allocation232_spill] sm:$0xff] %v17107_v11  ;;  %2613 = vmatpush.bf16.msra.mxu1 %v17105_v17  ;;  %2632 = vmatpush.bf16.msra.mxu2 %v17107_v11  ;;  %v1052_v45 = vpop.f32.mrf.mxu2  ;;  %v1071_v33 = vpop.f32.mrf.mxu3  ;;  %v11300_v11 = vld [vmem:[%s20480_s1 + $0x6c8] sm:$0xf]  ;;  %v14131_v17 = vld [vmem:[%s20480_s1 + $0x6d4] sm:$0xf0]  ;;  %v17147_v41 = vor.u32 %v14128_v60, %v11294_v9 }
 0x10d   : > { %21030 = vst [vmem:[#allocation233_spill] sm:$0xff] %v17117_v13  ;;  %v17142_v51 = vadd.f32 %v1052_v45, %v16541_v46  ;;  %v17145_v54 = vadd.f32 %v1071_v33, %v16543_v2  ;;  %v1035_v35 = vpop.f32.mrf.mxu1  ;;  %v17149_v61 = vor.u32 %v14131_v17, %v11300_v11  ;;  %2651 = vmatpush.bf16.msra.mxu3 %v17117_v13  ;;  %v11276_v11 = vld [vmem:[%s20480_s1 + $0x6a0] sm:$0xf]  ;;  %v14126_v60 = vld [vmem:[%s20480_s1 + $0x6ac] sm:$0xf0] }
 0x10e   : > { %21031 = vst [vmem:[#allocation234_spill] sm:$0xff] %v17130_v4  ;;  %v1016_v21 = vpop.f32.mrf.mxu0  ;;  %v17161_v2 = vadd.f32 %v1035_v35, %v16556_v3  ;;  %2595 = vmatpush.bf16.msra.mxu0 %v17130_v4  ;;  %v17165_v17 = vor.u32 %v14129_v56, %v11302_v50  ;;  %v17178_v3 = vor.u32 %v14126_v60, %v11276_v11  ;;  %v11278_v50 = vld [vmem:[%s20480_s1 + $0x6b0] sm:$0xf0]  ;;  %v11284_v56 = vld [vmem:[%s20480_s1 + $0x6a8] sm:$0xf] }
 0x10f   : > { %21032 = vst [vmem:[#allocation235_spill] sm:$0xff] %v17147_v41  ;;  %v17158_v46 = vadd.f32 %v1016_v21, %v16554_v49  ;;  %v14124_v49 = vld [vmem:[%s20480_s1 + $0x6a4] sm:$0xf]  ;;  %v14127_v45 = vld [vmem:[%s20480_s1 + $0x6b4] sm:$0xf0] }
 0x110   : > { %21033 = vst [vmem:[#allocation236_spill] sm:$0xff] %v17149_v61  ;;  %2614 = vmatpush.bf16.msra.mxu1 %v17147_v41  ;;  %2633 = vmatpush.bf16.msra.mxu2 %v17149_v61  ;;  %v17189_v33 = vor.u32 %v14124_v49, %v11278_v50  ;;  %v17191_v9 = vor.u32 %v14127_v45, %v11284_v56  ;;  %v14125_v21 = vld [vmem:[%s20480_s1 + $0x6ac] sm:$0xf]  ;;  %v11286_v35 = vld [vmem:[%s20480_s1 + $0x6b8] sm:$0xf0] }
 0x111   : > { %21034 = vst [vmem:[#allocation237_spill] sm:$0xff] %v17165_v17  ;;  %2652 = vmatpush.bf16.msra.mxu3 %v17165_v17  ;;  %v17201_v11 = vor.u32 %v14125_v21, %v11286_v35  ;;  %v11260_v60 = vld [vmem:[%s20480_s1 + $0x680] sm:$0xf]  ;;  %v14122_v49 = vld [vmem:[%s20480_s1 + $0x68c] sm:$0xf0] }
 0x112   : > { %21035 = vst [vmem:[#allocation238_spill] sm:$0xff] %v17178_v3  ;;  %2596 = vmatpush.bf16.msra.mxu0 %v17178_v3  ;;  %v14120_v50 = vld [vmem:[%s20480_s1 + $0x684] sm:$0xf]  ;;  %v17214_v21 = vor.u32 %v14122_v49, %v11260_v60  ;;  %v11262_v35 = vld [vmem:[%s20480_s1 + $0x690] sm:$0xf0] }
 0x113   : > { %21036 = vst [vmem:[#allocation239_spill] sm:$0xff] %v17189_v33  ;;  %v17231_v61 = vor.u32 %v14120_v50, %v11262_v35  ;;  %v14121_v4 = vld [vmem:[%s20480_s1 + $0x68c] sm:$0xf]  ;;  %v11270_v13 = vld [vmem:[%s20480_s1 + $0x698] sm:$0xf0] }
 0x114   : > { %21037 = vst [vmem:[#allocation240_spill] sm:$0xff] %v17191_v9  ;;  %2615 = vmatpush.bf16.msra.mxu1 %v17189_v33  ;;  %2634 = vmatpush.bf16.msra.mxu2 %v17191_v9  ;;  %v1054_v56 = vpop.f32.mrf.mxu2  ;;  %v1073_v45 = vpop.f32.mrf.mxu3  ;;  %v11268_v9 = vld [vmem:[%s20480_s1 + $0x688] sm:$0xf]  ;;  %v14123_v33 = vld [vmem:[%s20480_s1 + $0x694] sm:$0xf0] }
 0x115   : > { %21038 = vst [vmem:[#allocation241_spill] sm:$0xff] %v17201_v11  ;;  %v17226_v3 = vadd.f32 %v1054_v56, %v16621_v1  ;;  %v17229_v17 = vadd.f32 %v1073_v45, %v16623_v8  ;;  %v1289_v49 = vpop.f32.mrf.mxu1  ;;  %v17233_v41 = vor.u32 %v14123_v33, %v11268_v9  ;;  %2653 = vmatpush.bf16.msra.mxu3 %v17201_v11  ;;  %v11386_v9 = vld [vmem:[%s20480_s1 + $0x810] sm:$0x33]  ;;  %v11565_v11 = vld [vmem:[%s20480_s1 + $0x878] sm:$0xf0] }
 0x116   : > { %21039 = vst [vmem:[#allocation242_spill] sm:$0xff] %v17214_v21  ;;  %v1270_v60 = vpop.f32.mrf.mxu0  ;;  %v17245_v8 = vadd.f32 %v1289_v49, %v16636_v14  ;;  %2597 = vmatpush.bf16.msra.mxu0 %v17214_v21  ;;  %v17249_v33 = vor.u32 %v14121_v4, %v11270_v13  ;;  %v2783_v14 = vunpack.c.l.b16 %v11386_v9  ;;  %v2784_v13 = vunpack.c.h.b16 %v11386_v9 }
 0x117   : > { %21040 = vst [vmem:[#allocation243_spill] sm:$0xff] %v17231_v61  ;;  %v17242_v1 = vadd.f32 %v1270_v60, %v16634_v32  ;;  %v11387_v32 = vld [vmem:[%s20480_s1 + $0x818] sm:$0x33] }
 0x118   : > { %21041 = vst [vmem:[#allocation244_spill] sm:$0xff] %v17233_v41  ;;  %2616 = vmatpush.bf16.msra.mxu1 %v17231_v61  ;;  %2635 = vmatpush.bf16.msra.mxu2 %v17233_v41  ;;  %v2785_v4 = vunpack.c.l.b16 %v11387_v32  ;;  %v2786_v50 = vunpack.c.h.b16 %v11387_v32  ;;  %v2811_v56 = vpack.c.b16 %v2783_v14, %v2783_v14  ;;  %v2812_v45 = vpack.c.b16 %v2784_v13, %v2784_v13 }
 0x119   : > { %21042 = vst [vmem:[#allocation245_spill] sm:$0xff] %v17249_v33  ;;  %11221 = vmatmul.msk.bf16.vlgmr.msrb.gmra.mxu0 %vm439_vm2, %v15866_v36  ;;  %11223 = vmatmul.msk.bf16.vlgmr.msrb.gmra.mxu1 %vm439_vm2, %v15866_v36 }
 0x11a   : > { %11227 = vmatmul.msk.bf16.vlgmr.msrb.gmra.mxu3 %vm439_vm2, %v15866_v36  ;;  %v2813_v35 = vpack.c.b16 %v2785_v4, %v2785_v4  ;;  %v2814_v60 = vpack.c.b16 %v2786_v50, %v2786_v50  ;;  %v17269_v61 = vand.u32 %v2811_v56, %v14855_v7  ;;  %v17272_v9 = vand.u32 %v2812_v45, %v14855_v7  ;;  %v11478_v45 = vld [vmem:[%s20480_s1 + $0x7f8] sm:$0xf] }
 0x11b   : > { %11225 = vmatmul.msk.bf16.vlgmr.msrb.gmra.mxu2 %vm439_vm2, %v15866_v36  ;;  %2654 = vmatpush.bf16.msra.mxu3 %v17249_v33  ;;  %v11432_v33 = vld [vmem:[%s20480_s1 + $0x7a8] sm:$0xf0] }
 0x11c   : > { %v1308_v49 = vpop.f32.mrf.mxu2  ;;  %v1327_v41 = vpop.f32.mrf.mxu3  ;;  %21043 = vst [vmem:[#allocation246_spill] sm:$0xff] %v17269_v61  ;;  %v17275_v32 = vand.u32 %v2813_v35, %v14855_v7  ;;  %v17278_v21 = vand.u32 %v2814_v60, %v14855_v7  ;;  %2852 = vmatpush.bf16.msrb.mxu0 %v17269_v61  ;;  %2871 = vmatpush.bf16.msrb.mxu1 %v17272_v9  ;;  %v14167_v35 = vld [vmem:[%s20480_s1 + $0x804] sm:$0xf0]  ;;  %v11464_v61 = vld [vmem:[%s20480_s1 + $0x7e8] sm:$0xf0] }
 0x11d   : > { %21044 = vst [vmem:[#allocation247_spill] sm:$0xff] %v17272_v9  ;;  %v17281_v36 = vadd.f32 %v1308_v49, %v16674_v18  ;;  %v17284_v14 = vadd.f32 %v1327_v41, %v16676_v40  ;;  %v1291_v4 = vpop.f32.mrf.mxu1  ;;  %v11470_v18 = vld [vmem:[%s20480_s1 + $0x7f0] sm:$0xf]  ;;  %v14166_v40 = vld [vmem:[%s20480_s1 + $0x7fc] sm:$0xf0]  ;;  %v17318_v49 = vor.u32 %v14167_v35, %v11478_v45 }
 0x11e   : > { %21045 = vst [vmem:[#allocation248_spill] sm:$0xff] %v17275_v32  ;;  %v1272_v13 = vpop.f32.mrf.mxu0  ;;  %v17290_v56 = vadd.f32 %v1291_v4, %v16689_v12  ;;  %2890 = vmatpush.bf16.msrb.mxu2 %v17275_v32  ;;  %v17305_v12 = vor.u32 %v14166_v40, %v11470_v18  ;;  %v11472_v41 = vld [vmem:[%s20480_s1 + $0x800] sm:$0xf0]  ;;  %v11480_v4 = vld [vmem:[%s20480_s1 + $0x808] sm:$0xf0] }
 0x11f   : > { %21046 = vst [vmem:[#allocation249_spill] sm:$0xff] %v17278_v21  ;;  %v17287_v50 = vadd.f32 %v1272_v13, %v16687_v6  ;;  %v14164_v6 = vld [vmem:[%s20480_s1 + $0x7f4] sm:$0xf]  ;;  %2909 = vmatpush.bf16.msrb.mxu3 %v17278_v21  ;;  %v14165_v13 = vld [vmem:[%s20480_s1 + $0x7fc] sm:$0xf] }
 0x120   : > { %21047 = vst [vmem:[#allocation250_spill] sm:$0xff] %v17305_v12  ;;  %v17316_v60 = vor.u32 %v14164_v6, %v11472_v41  ;;  %v17326_v18 = vor.u32 %v14165_v13, %v11480_v4  ;;  %2853 = vmatpush.bf16.msrb.mxu0 %v17305_v12  ;;  %v11454_v40 = vld [vmem:[%s20480_s1 + $0x7d0] sm:$0xf]  ;;  %v14162_v6 = vld [vmem:[%s20480_s1 + $0x7dc] sm:$0xf0] }
 0x121   : > { %21049 = vst [vmem:[#allocation252_spill] sm:$0xff] %v17318_v49  ;;  %v14160_v41 = vld [vmem:[%s20480_s1 + $0x7d4] sm:$0xf]  ;;  %v17341_v13 = vor.u32 %v14162_v6, %v11454_v40  ;;  %v11456_v4 = vld [vmem:[%s20480_s1 + $0x7e0] sm:$0xf0] }
 0x122   : > { %21048 = vst [vmem:[#allocation251_spill] sm:$0xff] %v17316_v60  ;;  %2872 = vmatpush.bf16.msrb.mxu1 %v17316_v60  ;;  %2891 = vmatpush.bf16.msrb.mxu2 %v17318_v49  ;;  %v14163_v49 = vld [vmem:[%s20480_s1 + $0x7e4] sm:$0xf0]  ;;  %v17358_v21 = vor.u32 %v14160_v41, %v11456_v4  ;;  %v14161_v9 = vld [vmem:[%s20480_s1 + $0x7dc] sm:$0xf] }
 0x123   : > { %21050 = vst [vmem:[#allocation253_spill] sm:$0xff] %v17326_v18  ;;  %2910 = vmatpush.bf16.msrb.mxu3 %v17326_v18  ;;  %v11462_v18 = vld [vmem:[%s20480_s1 + $0x7d8] sm:$0xf]  ;;  %v17375_v41 = vor.u32 %v14161_v9, %v11464_v61  ;;  %v11440_v9 = vld [vmem:[%s20480_s1 + $0x7c0] sm:$0xf0] }
 0x124   : > { %v1310_v45 = vpop.f32.mrf.mxu2  ;;  %v1329_v35 = vpop.f32.mrf.mxu3  ;;  %21051 = vst [vmem:[#allocation254_spill] sm:$0xff] %v17341_v13  ;;  %v17360_v32 = vor.u32 %v14163_v49, %v11462_v18  ;;  %2854 = vmatpush.bf16.msrb.mxu0 %v17341_v13  ;;  %v11438_v49 = vld [vmem:[%s20480_s1 + $0x7b0] sm:$0xf]  ;;  %v11446_v18 = vld [vmem:[%s20480_s1 + $0x7b8] sm:$0xf] }
 0x125   : > { %v17353_v60 = vadd.f32 %v1310_v45, %v16743_v44  ;;  %v17356_v12 = vadd.f32 %v1329_v35, %v16745_v29  ;;  %v1294_v6 = vpop.f32.mrf.mxu1  ;;  %21052 = vst [vmem:[#allocation255_spill] sm:$0xff] %v17358_v21  ;;  %v14159_v45 = vld [vmem:[%s20480_s1 + $0x7c4] sm:$0xf0]  ;;  %v14153_v13 = vld [vmem:[%s20480_s1 + $0x79c] sm:$0xf] }
 0x126   : > { %v1275_v40 = vpop.f32.mrf.mxu0  ;;  %21053 = vst [vmem:[#allocation256_spill] sm:$0xff] %v17360_v32  ;;  %v17372_v29 = vadd.f32 %v1294_v6, %v16760_v53  ;;  %2873 = vmatpush.bf16.msrb.mxu1 %v17358_v21  ;;  %2892 = vmatpush.bf16.msrb.mxu2 %v17360_v32  ;;  %v14156_v53 = vld [vmem:[%s20480_s1 + $0x7b4] sm:$0xf]  ;;  %v17409_v4 = vor.u32 %v14159_v45, %v11446_v18  ;;  %v11448_v6 = vld [vmem:[%s20480_s1 + $0x7c8] sm:$0xf0] }
 0x127   : > { %v17369_v44 = vadd.f32 %v1275_v40, %v16758_v59  ;;  %21054 = vst [vmem:[#allocation257_spill] sm:$0xff] %v17375_v41  ;;  %v14158_v59 = vld [vmem:[%s20480_s1 + $0x7bc] sm:$0xf0]  ;;  %v17407_v35 = vor.u32 %v14156_v53, %v11440_v9  ;;  %v14157_v40 = vld [vmem:[%s20480_s1 + $0x7bc] sm:$0xf]  ;;  %2911 = vmatpush.bf16.msrb.mxu3 %v17375_v41 }
 0x128   : > { %v17392_v61 = vor.u32 %v14158_v59, %v11438_v49  ;;  %21057 = vst [vmem:[#allocation260_spill] sm:$0xff] %v17409_v4  ;;  %v17419_v49 = vor.u32 %v14157_v40, %v11448_v6  ;;  %v11422_v59 = vld [vmem:[%s20480_s1 + $0x790] sm:$0xf]  ;;  %v14154_v53 = vld [vmem:[%s20480_s1 + $0x79c] sm:$0xf0] }
 0x129   : > { %11222 = vmatmul.msk.bf16.gmra.mxu0 %vm439_vm2, %v17037_v57  ;;  %11224 = vmatmul.msk.bf16.gmra.mxu1 %vm439_vm2, %v17037_v57  ;;  %21056 = vst [vmem:[#allocation259_spill] sm:$0xff] %v17407_v35  ;;  %v14152_v9 = vld [vmem:[%s20480_s1 + $0x794] sm:$0xf]  ;;  %v17432_v40 = vor.u32 %v14154_v53, %v11422_v59  ;;  %v11424_v6 = vld [vmem:[%s20480_s1 + $0x7a0] sm:$0xf0] }
 0x12a   : > { %21055 = vst [vmem:[#allocation258_spill] sm:$0xff] %v17392_v61  ;;  %11228 = vmatmul.msk.bf16.gmra.mxu3 %vm439_vm2, %v17037_v57  ;;  %2855 = vmatpush.bf16.msrb.mxu0 %v17392_v61  ;;  %v17449_v32 = vor.u32 %v14152_v9, %v11424_v6  ;;  %v14150_v9 = vld [vmem:[%s20480_s1 + $0x77c] sm:$0xf0] }
 0x12b   : > { %11226 = vmatmul.msk.bf16.gmra.mxu2 %vm439_vm2, %v17037_v57  ;;  %21058 = vst [vmem:[#allocation261_spill] sm:$0xff] %v17419_v49  ;;  %2874 = vmatpush.bf16.msrb.mxu1 %v17407_v35  ;;  %v14155_v35 = vld [vmem:[%s20480_s1 + $0x7a4] sm:$0xf0] }
 0x12c   : > { %2893 = vmatpush.bf16.msrb.mxu2 %v17409_v4  ;;  %v1313_v18 = vpop.f32.mrf.mxu2  ;;  %v1332_v45 = vpop.f32.mrf.mxu3  ;;  %21059 = vst [vmem:[#allocation262_spill] sm:$0xff] %v17432_v40  ;;  %v11430_v4 = vld [vmem:[%s20480_s1 + $0x798] sm:$0xf]  ;;  %2912 = vmatpush.bf16.msrb.mxu3 %v17419_v49  ;;  %v11400_v49 = vld [vmem:[%s20480_s1 + $0x768] sm:$0xf0] }
 0x12d   : > { %v17444_v61 = vadd.f32 %v1313_v18, %v16830_v52  ;;  %v17447_v41 = vadd.f32 %v1332_v45, %v16832_v28  ;;  %v1296_v53 = vpop.f32.mrf.mxu1  ;;  %21060 = vst [vmem:[#allocation263_spill] sm:$0xff] %v17449_v32  ;;  %v17451_v21 = vor.u32 %v14155_v35, %v11430_v4  ;;  %v17467_v35 = vor.u32 %v14153_v13, %v11432_v33  ;;  %v11406_v4 = vld [vmem:[%s20480_s1 + $0x770] sm:$0xf]  ;;  %v11408_v33 = vld [vmem:[%s20480_s1 + $0x780] sm:$0xf0] }
 0x12e   : > { %v1277_v59 = vpop.f32.mrf.mxu0  ;;  %v17463_v28 = vadd.f32 %v1296_v53, %v16847_v23  ;;  %2856 = vmatpush.bf16.msrb.mxu0 %v17432_v40  ;;  %v17480_v23 = vor.u32 %v14150_v9, %v11406_v4  ;;  %v11414_v13 = vld [vmem:[%s20480_s1 + $0x778] sm:$0xf]  ;;  %v14151_v18 = vld [vmem:[%s20480_s1 + $0x784] sm:$0xf0]  ;;  %v11416_v53 = vld [vmem:[%s20480_s1 + $0x788] sm:$0xf0] }
 0x12f   : > { %21061 = vst [vmem:[#allocation264_spill] sm:$0xff] %v17451_v21  ;;  %v17460_v52 = vadd.f32 %v1277_v59, %v16845_v58  ;;  %v14148_v58 = vld [vmem:[%s20480_s1 + $0x774] sm:$0xf]  ;;  %2875 = vmatpush.bf16.msrb.mxu1 %v17449_v32  ;;  %v17493_v6 = vor.u32 %v14151_v18, %v11414_v13  ;;  %v14149_v59 = vld [vmem:[%s20480_s1 + $0x77c] sm:$0xf] }
 0x130   : > { %21062 = vst [vmem:[#allocation265_spill] sm:$0xff] %v17467_v35  ;;  %2894 = vmatpush.bf16.msrb.mxu2 %v17451_v21  ;;  %v17491_v45 = vor.u32 %v14148_v58, %v11408_v33  ;;  %2913 = vmatpush.bf16.msrb.mxu3 %v17467_v35  ;;  %v17503_v4 = vor.u32 %v14149_v59, %v11416_v53  ;;  %v11390_v9 = vld [vmem:[%s20480_s1 + $0x750] sm:$0xf]  ;;  %v14146_v58 = vld [vmem:[%s20480_s1 + $0x75c] sm:$0xf0] }
 0x131   : > { %21063 = vst [vmem:[#allocation266_spill] sm:$0xff] %v17480_v23  ;;  %v14144_v33 = vld [vmem:[%s20480_s1 + $0x754] sm:$0xf]  ;;  %v17516_v59 = vor.u32 %v14146_v58, %v11390_v9  ;;  %v11392_v53 = vld [vmem:[%s20480_s1 + $0x760] sm:$0xf0] }
 0x132   : > { %21064 = vst [vmem:[#allocation267_spill] sm:$0xff] %v17491_v45  ;;  %2857 = vmatpush.bf16.msrb.mxu0 %v17480_v23  ;;  %v17533_v21 = vor.u32 %v14144_v33, %v11392_v53  ;;  %v14145_v40 = vld [vmem:[%s20480_s1 + $0x75c] sm:$0xf] }
 0x133   : > { %21065 = vst [vmem:[#allocation268_spill] sm:$0xff] %v17493_v6  ;;  %2876 = vmatpush.bf16.msrb.mxu1 %v17491_v45  ;;  %v14147_v45 = vld [vmem:[%s20480_s1 + $0x764] sm:$0xf0] }
 0x134   : > { %21066 = vst [vmem:[#allocation269_spill] sm:$0xff] %v17503_v4  ;;  %2895 = vmatpush.bf16.msrb.mxu2 %v17493_v6  ;;  %v1315_v13 = vpop.f32.mrf.mxu2  ;;  %v1334_v18 = vpop.f32.mrf.mxu3  ;;  %v11398_v6 = vld [vmem:[%s20480_s1 + $0x758] sm:$0xf]  ;;  %2914 = vmatpush.bf16.msrb.mxu3 %v17503_v4  ;;  %v11597_v4 = vld [vmem:[%s20480_s1 + $0x8b8] sm:$0xf0] }
 0x135   : > { %21067 = vst [vmem:[#allocation270_spill] sm:$0xff] %v17516_v59  ;;  %v17528_v23 = vadd.f32 %v1315_v13, %v16910_v62  ;;  %v17531_v35 = vadd.f32 %v1334_v18, %v16912_v48  ;;  %v1558_v58 = vpop.f32.mrf.mxu1  ;;  %v17535_v32 = vor.u32 %v14147_v45, %v11398_v6  ;;  %v17551_v45 = vor.u32 %v14145_v40, %v11400_v49  ;;  %v11519_v6 = vld [vmem:[%s20480_s1 + $0x8e0] sm:$0x33] }
 0x136   : > { %v1539_v9 = vpop.f32.mrf.mxu0  ;;  %21068 = vst [vmem:[#allocation271_spill] sm:$0xff] %v17533_v21  ;;  %v17547_v48 = vadd.f32 %v1558_v58, %v16939_v55  ;;  %2858 = vmatpush.bf16.msrb.mxu0 %v17516_v59  ;;  %v3049_v55 = vunpack.c.l.b16 %v11519_v6  ;;  %v3050_v49 = vunpack.c.h.b16 %v11519_v6 }
 0x137   : > { %21069 = vst [vmem:[#allocation272_spill] sm:$0xff] %v17535_v32  ;;  %v17544_v62 = vadd.f32 %v1539_v9, %v16936_v63  ;;  %2877 = vmatpush.bf16.msrb.mxu1 %v17533_v21  ;;  %v11520_v63 = vld [vmem:[%s20480_s1 + $0x8e8] sm:$0x33] }
 0x138   : > { %21070 = vst [vmem:[#allocation273_spill] sm:$0xff] %v17551_v45  ;;  %2896 = vmatpush.bf16.msrb.mxu2 %v17535_v32  ;;  %v3051_v40 = vunpack.c.l.b16 %v11520_v63  ;;  %v3052_v33 = vunpack.c.h.b16 %v11520_v63  ;;  %2915 = vmatpush.bf16.msrb.mxu3 %v17551_v45  ;;  %v3077_v13 = vpack.c.b16 %v3049_v55, %v3049_v55  ;;  %v3078_v18 = vpack.c.b16 %v3050_v49, %v3050_v49 }
 0x139   : > { %11354 = vmatmul.msk.bf16.vlgmr.msra.gmra.mxu0 %vm439_vm2, %v16455_v34  ;;  %11356 = vmatmul.msk.bf16.vlgmr.msra.gmra.mxu1 %vm439_vm2, %v16455_v34 }
 0x13a   : > { %11360 = vmatmul.msk.bf16.vlgmr.msra.gmra.mxu3 %vm439_vm2, %v16455_v34  ;;  %v3079_v53 = vpack.c.b16 %v3051_v40, %v3051_v40  ;;  %v3080_v9 = vpack.c.b16 %v3052_v33, %v3052_v33  ;;  %v17571_v21 = vand.u32 %v3077_v13, %v14855_v7  ;;  %v17574_v6 = vand.u32 %v3078_v18, %v14855_v7  ;;  %v11611_v18 = vld [vmem:[%s20480_s1 + $0x8c8] sm:$0xf] }
 0x13b   : > { %11358 = vmatmul.msk.bf16.vlgmr.msra.gmra.mxu2 %vm439_vm2, %v16455_v34 }
 0x13c   : > { %v1577_v58 = vpop.f32.mrf.mxu2  ;;  %v1596_v32 = vpop.f32.mrf.mxu3  ;;  %21071 = vst [vmem:[#allocation274_spill] sm:$0xff] %v17571_v21  ;;  %v17577_v63 = vand.u32 %v3079_v53, %v14855_v7  ;;  %v17580_v59 = vand.u32 %v3080_v9, %v14855_v7  ;;  %3121 = vmatpush.bf16.msra.mxu0 %v17571_v21  ;;  %3140 = vmatpush.bf16.msra.mxu1 %v17574_v6  ;;  %v14191_v53 = vld [vmem:[%s20480_s1 + $0x8d4] sm:$0xf0]  ;;  %v14185_v21 = vld [vmem:[%s20480_s1 + $0x8ac] sm:$0xf] }
 0x13d   : > { %21072 = vst [vmem:[#allocation275_spill] sm:$0xff] %v17574_v6  ;;  %v17583_v45 = vadd.f32 %v1577_v58, %v16975_v5  ;;  %v17586_v55 = vadd.f32 %v1596_v32, %v16978_v22  ;;  %v1560_v40 = vpop.f32.mrf.mxu1  ;;  %v11603_v5 = vld [vmem:[%s20480_s1 + $0x8c0] sm:$0xf]  ;;  %v14190_v22 = vld [vmem:[%s20480_s1 + $0x8cc] sm:$0xf0]  ;;  %v17620_v58 = vor.u32 %v14191_v53, %v11611_v18 }
 0x13e   : > { %21073 = vst [vmem:[#allocation276_spill] sm:$0xff] %v17577_v63  ;;  %v1541_v49 = vpop.f32.mrf.mxu0  ;;  %v17592_v13 = vadd.f32 %v1560_v40, %v16984_v16  ;;  %3159 = vmatpush.bf16.msra.mxu2 %v17577_v63  ;;  %3178 = vmatpush.bf16.msra.mxu3 %v17580_v59  ;;  %v17607_v16 = vor.u32 %v14190_v22, %v11603_v5  ;;  %v11605_v32 = vld [vmem:[%s20480_s1 + $0x8d0] sm:$0xf0]  ;;  %v11613_v40 = vld [vmem:[%s20480_s1 + $0x8d8] sm:$0xf0] }
 0x13f   : > { %21074 = vst [vmem:[#allocation277_spill] sm:$0xff] %v17580_v59  ;;  %v17589_v33 = vadd.f32 %v1541_v49, %v16981_v37  ;;  %v14188_v37 = vld [vmem:[%s20480_s1 + $0x8c4] sm:$0xf]  ;;  %v14189_v49 = vld [vmem:[%s20480_s1 + $0x8cc] sm:$0xf]  ;;  %v11230_v5 = vld [vmem:[%s15078_s16 + $0x51] sm:$0xff] }
 0x140   : > { %21075 = vst [vmem:[#allocation278_spill] sm:$0xff] %v17607_v16  ;;  %v17618_v9 = vor.u32 %v14188_v37, %v11605_v32  ;;  %v11231_v22 = vld [vmem:[%s15078_s16 + $0x59] sm:$0xff]  ;;  %v17630_v59 = vor.u32 %v14189_v49, %v11613_v40  ;;  %3122 = vmatpush.bf16.msra.mxu0 %v17607_v16  ;;  %v14186_v32 = vld [vmem:[%s20480_s1 + $0x8ac] sm:$0xf0]  ;;  %v14184_v18 = vld [vmem:[%s20480_s1 + $0x8a4] sm:$0xf] }
 0x141   : > { %21077 = vst [vmem:[#allocation280_spill] sm:$0xff] %v17620_v58  ;;  %v11587_v37 = vld [vmem:[%s20480_s1 + $0x8a0] sm:$0xf]  ;;  %v17645_v40 = vpack.c.bf16 %v11231_v22, %v11230_v5  ;;  %v14187_v16 = vld [vmem:[%s20480_s1 + $0x8b4] sm:$0xf0] }
 0x142   : > { %21076 = vst [vmem:[#allocation279_spill] sm:$0xff] %v17618_v9  ;;  %3141 = vmatpush.bf16.msra.mxu1 %v17618_v9  ;;  %3160 = vmatpush.bf16.msra.mxu2 %v17620_v58  ;;  %v17647_v9 = vor.u32 %v14186_v32, %v11587_v37  ;;  %v11595_v58 = vld [vmem:[%s20480_s1 + $0x8a8] sm:$0xf] }
 0x143   : > { %21078 = vst [vmem:[#allocation281_spill] sm:$0xff] %v17630_v59  ;;  %3179 = vmatpush.bf16.msra.mxu3 %v17630_v59  ;;  %v11589_v59 = vld [vmem:[%s20480_s1 + $0x8b0] sm:$0xf0]  ;;  %v17666_v6 = vor.u32 %v14187_v16, %v11595_v58  ;;  %v11571_v16 = vld [vmem:[%s20480_s1 + $0x880] sm:$0xf] }
 0x144   : > { %v1579_v53 = vpop.f32.mrf.mxu2  ;;  %v1598_v49 = vpop.f32.mrf.mxu3  ;;  %21079 = vst [vmem:[#allocation282_spill] sm:$0xff] %v17647_v9  ;;  %v17664_v32 = vor.u32 %v14184_v18, %v11589_v59  ;;  %3123 = vmatpush.bf16.msra.mxu0 %v17647_v9  ;;  %v17681_v59 = vor.u32 %v14185_v21, %v11597_v4  ;;  %v11573_v4 = vld [vmem:[%s20480_s1 + $0x890] sm:$0xf0]  ;;  %v11579_v58 = vld [vmem:[%s20480_s1 + $0x888] sm:$0xf] }
 0x145   : > { %v17659_v63 = vadd.f32 %v1579_v53, %v17051_v15  ;;  %v17662_v5 = vadd.f32 %v1598_v49, %v17054_v0  ;;  %v1563_v37 = vpop.f32.mrf.mxu1  ;;  %21081 = vst [vmem:[#allocation284_spill] sm:$0xff] %v17666_v6  ;;  %v14183_v18 = vld [vmem:[%s20480_s1 + $0x894] sm:$0xf0]  ;;  %v14177_v9 = vld [vmem:[%s20480_s1 + $0x86c] sm:$0xf] }
 0x146   : > { %v1544_v22 = vpop.f32.mrf.mxu0  ;;  %21080 = vst [vmem:[#allocation283_spill] sm:$0xff] %v17664_v32  ;;  %v17678_v0 = vadd.f32 %v1563_v37, %v17070_v10  ;;  %3142 = vmatpush.bf16.msra.mxu1 %v17664_v32  ;;  %3161 = vmatpush.bf16.msra.mxu2 %v17666_v6  ;;  %v14180_v10 = vld [vmem:[%s20480_s1 + $0x884] sm:$0xf]  ;;  %v17715_v49 = vor.u32 %v14183_v18, %v11579_v58  ;;  %v11581_v37 = vld [vmem:[%s20480_s1 + $0x898] sm:$0xf0] }
 0x147   : > { %v17675_v15 = vadd.f32 %v1544_v22, %v17067_v47  ;;  %21082 = vst [vmem:[#allocation285_spill] sm:$0xff] %v17681_v59  ;;  %v14182_v47 = vld [vmem:[%s20480_s1 + $0x88c] sm:$0xf0]  ;;  %v17713_v53 = vor.u32 %v14180_v10, %v11573_v4  ;;  %v14181_v22 = vld [vmem:[%s20480_s1 + $0x88c] sm:$0xf]  ;;  %3180 = vmatpush.bf16.msra.mxu3 %v17681_v59 }
 0x148   : > { %v17698_v21 = vor.u32 %v14182_v47, %v11571_v16  ;;  %21085 = vst [vmem:[#allocation288_spill] sm:$0xff] %v17715_v49  ;;  %v17725_v16 = vor.u32 %v14181_v22, %v11581_v37  ;;  %v11555_v47 = vld [vmem:[%s20480_s1 + $0x860] sm:$0xf]  ;;  %v14178_v10 = vld [vmem:[%s20480_s1 + $0x86c] sm:$0xf0] }
 0x149   : > { %11355 = vmatmul.msk.bf16.gmra.mxu0 %vm439_vm2, %v17645_v40  ;;  %11357 = vmatmul.msk.bf16.gmra.mxu1 %vm439_vm2, %v17645_v40  ;;  %21084 = vst [vmem:[#allocation287_spill] sm:$0xff] %v17713_v53  ;;  %v14176_v4 = vld [vmem:[%s20480_s1 + $0x864] sm:$0xf]  ;;  %v17738_v22 = vor.u32 %v14178_v10, %v11555_v47  ;;  %v11557_v37 = vld [vmem:[%s20480_s1 + $0x870] sm:$0xf0] }
 0x14a   : > { %21083 = vst [vmem:[#allocation286_spill] sm:$0xff] %v17698_v21  ;;  %11361 = vmatmul.msk.bf16.gmra.mxu3 %vm439_vm2, %v17645_v40  ;;  %3124 = vmatpush.bf16.msra.mxu0 %v17698_v21  ;;  %v17755_v6 = vor.u32 %v14176_v4, %v11557_v37  ;;  %v14174_v4 = vld [vmem:[%s20480_s1 + $0x84c] sm:$0xf0] }
 0x14b   : > { %11359 = vmatmul.msk.bf16.gmra.mxu2 %vm439_vm2, %v17645_v40  ;;  %21086 = vst [vmem:[#allocation289_spill] sm:$0xff] %v17725_v16  ;;  %3143 = vmatpush.bf16.msra.mxu1 %v17713_v53  ;;  %v14179_v53 = vld [vmem:[%s20480_s1 + $0x874] sm:$0xf0] }
 0x14c   : > { %3162 = vmatpush.bf16.msra.mxu2 %v17715_v49  ;;  %v1582_v58 = vpop.f32.mrf.mxu2  ;;  %v1601_v18 = vpop.f32.mrf.mxu3  ;;  %21087 = vst [vmem:[#allocation290_spill] sm:$0xff] %v17738_v22  ;;  %v11563_v49 = vld [vmem:[%s20480_s1 + $0x868] sm:$0xf]  ;;  %3181 = vmatpush.bf16.msra.mxu3 %v17725_v16  ;;  %v11533_v16 = vld [vmem:[%s20480_s1 + $0x838] sm:$0xf0] }
 0x14d   : > { %v17750_v21 = vadd.f32 %v1582_v58, %v17142_v51  ;;  %v17753_v59 = vadd.f32 %v1601_v18, %v17145_v54  ;;  %v1565_v10 = vpop.f32.mrf.mxu1  ;;  %21088 = vst [vmem:[#allocation291_spill] sm:$0xff] %v17755_v6  ;;  %v17757_v32 = vor.u32 %v14179_v53, %v11563_v49  ;;  %v17773_v53 = vor.u32 %v14177_v9, %v11565_v11  ;;  %v11539_v49 = vld [vmem:[%s20480_s1 + $0x840] sm:$0xf]  ;;  %v11541_v11 = vld [vmem:[%s20480_s1 + $0x850] sm:$0xf0] }
 0x14e   : > { %v1546_v47 = vpop.f32.mrf.mxu0  ;;  %v17769_v54 = vadd.f32 %v1565_v10, %v17161_v2  ;;  %3125 = vmatpush.bf16.msra.mxu0 %v17738_v22  ;;  %v17786_v2 = vor.u32 %v14174_v4, %v11539_v49  ;;  %v11547_v9 = vld [vmem:[%s20480_s1 + $0x848] sm:$0xf]  ;;  %v14175_v58 = vld [vmem:[%s20480_s1 + $0x854] sm:$0xf0]  ;;  %v11549_v10 = vld [vmem:[%s20480_s1 + $0x858] sm:$0xf0] }
 0x14f   : > { %21089 = vst [vmem:[#allocation292_spill] sm:$0xff] %v17757_v32  ;;  %v17766_v51 = vadd.f32 %v1546_v47, %v17158_v46  ;;  %v14172_v46 = vld [vmem:[%s20480_s1 + $0x844] sm:$0xf]  ;;  %3144 = vmatpush.bf16.msra.mxu1 %v17755_v6  ;;  %v17799_v37 = vor.u32 %v14175_v58, %v11547_v9  ;;  %v14173_v47 = vld [vmem:[%s20480_s1 + $0x84c] sm:$0xf] }
 0x150   : > { %21090 = vst [vmem:[#allocation293_spill] sm:$0xff] %v17773_v53  ;;  %3163 = vmatpush.bf16.msra.mxu2 %v17757_v32  ;;  %v17797_v18 = vor.u32 %v14172_v46, %v11541_v11  ;;  %3182 = vmatpush.bf16.msra.mxu3 %v17773_v53  ;;  %v17809_v49 = vor.u32 %v14173_v47, %v11549_v10  ;;  %v11523_v4 = vld [vmem:[%s20480_s1 + $0x820] sm:$0xf]  ;;  %v14170_v46 = vld [vmem:[%s20480_s1 + $0x82c] sm:$0xf0] }
 0x151   : > { %21091 = vst [vmem:[#allocation294_spill] sm:$0xff] %v17786_v2  ;;  %v14168_v11 = vld [vmem:[%s20480_s1 + $0x824] sm:$0xf]  ;;  %v17822_v47 = vor.u32 %v14170_v46, %v11523_v4  ;;  %v11525_v10 = vld [vmem:[%s20480_s1 + $0x830] sm:$0xf0] }
 0x152   : > { %21092 = vst [vmem:[#allocation295_spill] sm:$0xff] %v17797_v18  ;;  %3126 = vmatpush.bf16.msra.mxu0 %v17786_v2  ;;  %v17839_v32 = vor.u32 %v14168_v11, %v11525_v10  ;;  %v14169_v22 = vld [vmem:[%s20480_s1 + $0x82c] sm:$0xf] }
 0x153   : > { %21093 = vst [vmem:[#allocation296_spill] sm:$0xff] %v17799_v37  ;;  %3145 = vmatpush.bf16.msra.mxu1 %v17797_v18  ;;  %v14171_v18 = vld [vmem:[%s20480_s1 + $0x834] sm:$0xf0] }
 0x154   : > { %3164 = vmatpush.bf16.msra.mxu2 %v17799_v37  ;;  %v1584_v9 = vpop.f32.mrf.mxu2  ;;  %v1603_v58 = vpop.f32.mrf.mxu3  ;;  %21094 = vst [vmem:[#allocation297_spill] sm:$0xff] %v17822_v47  ;;  %v11531_v37 = vld [vmem:[%s20480_s1 + $0x828] sm:$0xf]  ;;  %3183 = vmatpush.bf16.msra.mxu3 %v17809_v49 }
 0x155   : > { %v17834_v2 = vadd.f32 %v1584_v9, %v17226_v3  ;;  %v17837_v53 = vadd.f32 %v1603_v58, %v17229_v17  ;;  %v1819_v46 = vpop.f32.mrf.mxu1  ;;  %21095 = vst [vmem:[#allocation298_spill] sm:$0xff] %v17839_v32  ;;  %v17841_v6 = vor.u32 %v14171_v18, %v11531_v37  ;;  %v17857_v18 = vor.u32 %v14169_v22, %v11533_v16  ;;  %v11649_v37 = vld [vmem:[%s20480_s1 + $0x9b0] sm:$0x33] }
 0x156   : > { %v1800_v4 = vpop.f32.mrf.mxu0  ;;  %v17853_v17 = vadd.f32 %v1819_v46, %v17245_v8  ;;  %3127 = vmatpush.bf16.msra.mxu0 %v17822_v47  ;;  %v3313_v8 = vunpack.c.l.b16 %v11649_v37  ;;  %v3314_v16 = vunpack.c.h.b16 %v11649_v37 }
 0x157   : > { %21096 = vst [vmem:[#allocation299_spill] sm:$0xff] %v17841_v6  ;;  %v17850_v3 = vadd.f32 %v1800_v4, %v17242_v1  ;;  %3146 = vmatpush.bf16.msra.mxu1 %v17839_v32  ;;  %v11650_v1 = vld [vmem:[%s20480_s1 + $0x9b8] sm:$0x33] }
 0x158   : > { %3165 = vmatpush.bf16.msra.mxu2 %v17841_v6  ;;  %v3315_v22 = vunpack.c.l.b16 %v11650_v1  ;;  %v3316_v11 = vunpack.c.h.b16 %v11650_v1  ;;  %3184 = vmatpush.bf16.msra.mxu3 %v17857_v18  ;;  %v3341_v9 = vpack.c.b16 %v3313_v8, %v3313_v8  ;;  %v3342_v58 = vpack.c.b16 %v3314_v16, %v3314_v16 }
 0x159   : > { %11484 = vmatmul.msk.bf16.vlgmr.msrb.gmra.mxu0 %vm439_vm2, %v16455_v34  ;;  %11486 = vmatmul.msk.bf16.vlgmr.msrb.gmra.mxu1 %vm439_vm2, %v16455_v34 }
 0x15a   : > { %11490 = vmatmul.msk.bf16.vlgmr.msrb.gmra.mxu3 %vm439_vm2, %v16455_v34  ;;  %v3343_v10 = vpack.c.b16 %v3315_v22, %v3315_v22  ;;  %v3344_v4 = vpack.c.b16 %v3316_v11, %v3316_v11  ;;  %v17877_v32 = vand.u32 %v3341_v9, %v14855_v7  ;;  %v17880_v37 = vand.u32 %v3342_v58, %v14855_v7  ;;  %v14215_v58 = vld [vmem:[%s20480_s1 + $0x9a4] sm:$0xf0] }
 0x15b   : > { %11488 = vmatmul.msk.bf16.vlgmr.msrb.gmra.mxu2 %vm439_vm2, %v16455_v34 }
 0x15c   : > { %v1838_v46 = vpop.f32.mrf.mxu2  ;;  %v1857_v6 = vpop.f32.mrf.mxu3  ;;  %21097 = vst [vmem:[#allocation300_spill] sm:$0xff] %v17880_v37  ;;  %v17883_v1 = vand.u32 %v3343_v10, %v14855_v7  ;;  %v17886_v47 = vand.u32 %v3344_v4, %v14855_v7  ;;  %3382 = vmatpush.bf16.msrb.mxu0 %v17877_v32  ;;  %3401 = vmatpush.bf16.msrb.mxu1 %v17880_v37  ;;  %v11733_v7 = vld [vmem:[%s20480_s1 + $0x990] sm:$0xf]  ;;  %v11727_v37 = vld [vmem:[%s20480_s1 + $0x988] sm:$0xf0] }
 0x15d   : > { %v17889_v34 = vadd.f32 %v1838_v46, %v17281_v36  ;;  %v17892_v8 = vadd.f32 %v1857_v6, %v17284_v14  ;;  %v1821_v22 = vpop.f32.mrf.mxu1  ;;  %v14214_v36 = vld [vmem:[%s20480_s1 + $0x99c] sm:$0xf0]  ;;  %v14212_v14 = vld [vmem:[%s20480_s1 + $0x994] sm:$0xf]  ;;  %v11741_v6 = vld [vmem:[%s20480_s1 + $0x998] sm:$0xf] }
 0x15e   : > { %21098 = vst [vmem:[#allocation301_spill] sm:$0xff] %v17883_v1  ;;  %v1802_v16 = vpop.f32.mrf.mxu0  ;;  %v17898_v9 = vadd.f32 %v1821_v22, %v17290_v56  ;;  %3420 = vmatpush.bf16.msrb.mxu2 %v17883_v1  ;;  %3439 = vmatpush.bf16.msrb.mxu3 %v17886_v47  ;;  %v11735_v56 = vld [vmem:[%s20480_s1 + $0x9a0] sm:$0xf0]  ;;  %v17926_v4 = vor.u32 %v14215_v58, %v11741_v6  ;;  %v14213_v46 = vld [vmem:[%s20480_s1 + $0x99c] sm:$0xf] }
 0x15f   : > { %21099 = vst [vmem:[#allocation302_spill] sm:$0xff] %v17886_v47  ;;  %v17895_v11 = vadd.f32 %v1802_v16, %v17287_v50  ;;  %v17913_v50 = vor.u32 %v14214_v36, %v11733_v7  ;;  %v17924_v10 = vor.u32 %v14212_v14, %v11735_v56  ;;  %v11743_v16 = vld [vmem:[%s20480_s1 + $0x9a8] sm:$0xf0]  ;;  %v11717_v7 = vld [vmem:[%s20480_s1 + $0x970] sm:$0xf] }
 0x160   : > { %21102 = vst [vmem:[#allocation305_spill] sm:$0xff] %v17926_v4  ;;  %v17934_v22 = vor.u32 %v14213_v46, %v11743_v16  ;;  %v14210_v36 = vld [vmem:[%s20480_s1 + $0x97c] sm:$0xf0]  ;;  %v14208_v14 = vld [vmem:[%s20480_s1 + $0x974] sm:$0xf] }
 0x161   : > { %21100 = vst [vmem:[#allocation303_spill] sm:$0xff] %v17913_v50  ;;  %3383 = vmatpush.bf16.msrb.mxu0 %v17913_v50  ;;  %3402 = vmatpush.bf16.msrb.mxu1 %v17924_v10  ;;  %v17949_v58 = vor.u32 %v14210_v36, %v11717_v7  ;;  %v11719_v46 = vld [vmem:[%s20480_s1 + $0x980] sm:$0xf0]  ;;  %v11725_v16 = vld [vmem:[%s20480_s1 + $0x978] sm:$0xf] }
 0x162   : > { %21101 = vst [vmem:[#allocation304_spill] sm:$0xff] %v17924_v10  ;;  %3421 = vmatpush.bf16.msrb.mxu2 %v17926_v4  ;;  %3440 = vmatpush.bf16.msrb.mxu3 %v17934_v22  ;;  %v17966_v50 = vor.u32 %v14208_v14, %v11719_v46  ;;  %v14209_v1 = vld [vmem:[%s20480_s1 + $0x97c] sm:$0xf] }
 0x163   : > { %21103 = vst [vmem:[#allocation306_spill] sm:$0xff] %v17934_v22  ;;  %v14211_v22 = vld [vmem:[%s20480_s1 + $0x984] sm:$0xf0]  ;;  %v17983_v14 = vor.u32 %v14209_v1, %v11727_v37  ;;  %v11703_v1 = vld [vmem:[%s20480_s1 + $0x960] sm:$0xf0] }
 0x164   : > { %v1840_v56 = vpop.f32.mrf.mxu2  ;;  %v1859_v6 = vpop.f32.mrf.mxu3  ;;  %21104 = vst [vmem:[#allocation307_spill] sm:$0xff] %v17949_v58  ;;  %v17968_v47 = vor.u32 %v14211_v22, %v11725_v16  ;;  %v11701_v22 = vld [vmem:[%s20480_s1 + $0x950] sm:$0xf] }
 0x165   : > { %v17961_v4 = vadd.f32 %v1840_v56, %v17353_v60  ;;  %v17964_v10 = vadd.f32 %v1859_v6, %v17356_v12  ;;  %v1824_v36 = vpop.f32.mrf.mxu1  ;;  %21105 = vst [vmem:[#allocation308_spill] sm:$0xff] %v17966_v50  ;;  %3384 = vmatpush.bf16.msrb.mxu0 %v17949_v58  ;;  %3403 = vmatpush.bf16.msrb.mxu1 %v17966_v50  ;;  %v11709_v56 = vld [vmem:[%s20480_s1 + $0x958] sm:$0xf]  ;;  %v14207_v6 = vld [vmem:[%s20480_s1 + $0x964] sm:$0xf0] }
 0x166   : > { %v1805_v7 = vpop.f32.mrf.mxu0  ;;  %21106 = vst [vmem:[#allocation309_spill] sm:$0xff] %v17968_v47  ;;  %v17980_v12 = vadd.f32 %v1824_v36, %v17372_v29  ;;  %3422 = vmatpush.bf16.msrb.mxu2 %v17968_v47  ;;  %v14204_v29 = vld [vmem:[%s20480_s1 + $0x954] sm:$0xf]  ;;  %v18017_v16 = vor.u32 %v14207_v6, %v11709_v56  ;;  %v11711_v36 = vld [vmem:[%s20480_s1 + $0x968] sm:$0xf0]  ;;  %3441 = vmatpush.bf16.msrb.mxu3 %v17983_v14 }
 0x167   : > { %v17977_v60 = vadd.f32 %v1805_v7, %v17369_v44  ;;  %21107 = vst [vmem:[#allocation310_spill] sm:$0xff] %v17983_v14  ;;  %v14206_v44 = vld [vmem:[%s20480_s1 + $0x95c] sm:$0xf0]  ;;  %v18015_v46 = vor.u32 %v14204_v29, %v11703_v1  ;;  %v14205_v7 = vld [vmem:[%s20480_s1 + $0x95c] sm:$0xf] }
 0x168   : > { %v18000_v37 = vor.u32 %v14206_v44, %v11701_v22  ;;  %21110 = vst [vmem:[#allocation313_spill] sm:$0xff] %v18017_v16  ;;  %v18027_v22 = vor.u32 %v14205_v7, %v11711_v36  ;;  %v14202_v44 = vld [vmem:[%s20480_s1 + $0x93c] sm:$0xf0]  ;;  %v14200_v29 = vld [vmem:[%s20480_s1 + $0x934] sm:$0xf] }
 0x169   : > { %11485 = vmatmul.msk.bf16.gmra.mxu0 %vm439_vm2, %v17645_v40  ;;  %11487 = vmatmul.msk.bf16.gmra.mxu1 %vm439_vm2, %v17645_v40  ;;  %21109 = vst [vmem:[#allocation312_spill] sm:$0xff] %v18015_v46  ;;  %v11687_v7 = vld [vmem:[%s20480_s1 + $0x940] sm:$0xf0]  ;;  %v11693_v36 = vld [vmem:[%s20480_s1 + $0x938] sm:$0xf] }
 0x16a   : > { %21108 = vst [vmem:[#allocation311_spill] sm:$0xff] %v18000_v37  ;;  %11491 = vmatmul.msk.bf16.gmra.mxu3 %vm439_vm2, %v17645_v40  ;;  %3385 = vmatpush.bf16.msrb.mxu0 %v18000_v37  ;;  %v18057_v14 = vor.u32 %v14200_v29, %v11687_v7  ;;  %v14201_v50 = vld [vmem:[%s20480_s1 + $0x93c] sm:$0xf]  ;;  %v11695_v58 = vld [vmem:[%s20480_s1 + $0x948] sm:$0xf0] }
 0x16b   : > { %11489 = vmatmul.msk.bf16.gmra.mxu2 %vm439_vm2, %v17645_v40  ;;  %21111 = vst [vmem:[#allocation314_spill] sm:$0xff] %v18027_v22  ;;  %3404 = vmatpush.bf16.msrb.mxu1 %v18015_v46  ;;  %v11685_v40 = vld [vmem:[%s20480_s1 + $0x930] sm:$0xf] }
 0x16c   : > { %3423 = vmatpush.bf16.msrb.mxu2 %v18017_v16  ;;  %v1843_v1 = vpop.f32.mrf.mxu2  ;;  %v18040_v6 = vor.u32 %v14202_v44, %v11685_v40  ;;  %v14203_v16 = vld [vmem:[%s20480_s1 + $0x944] sm:$0xf0]  ;;  %21113 = vst [vmem:[#allocation316_spill] sm:$0xff] %v18057_v14  ;;  %3442 = vmatpush.bf16.msrb.mxu3 %v18027_v22  ;;  %v11669_v29 = vld [vmem:[%s20480_s1 + $0x910] sm:$0xf] }
 0x16d   : > { %v1862_v56 = vpop.f32.mrf.mxu3  ;;  %v18052_v46 = vadd.f32 %v1843_v1, %v17444_v61  ;;  %v1826_v44 = vpop.f32.mrf.mxu1  ;;  %v18059_v47 = vor.u32 %v14203_v16, %v11693_v36  ;;  %v18075_v16 = vor.u32 %v14201_v50, %v11695_v58  ;;  %v14198_v1 = vld [vmem:[%s20480_s1 + $0x91c] sm:$0xf0]  ;;  %v11671_v50 = vld [vmem:[%s20480_s1 + $0x920] sm:$0xf0]  ;;  %v11677_v58 = vld [vmem:[%s20480_s1 + $0x918] sm:$0xf] }
 0x16e   : > { %21112 = vst [vmem:[#allocation315_spill] sm:$0xff] %v18040_v6  ;;  %v18055_v37 = vadd.f32 %v1862_v56, %v17447_v41  ;;  %v1807_v40 = vpop.f32.mrf.mxu0  ;;  %v18071_v41 = vadd.f32 %v1826_v44, %v17463_v28  ;;  %3386 = vmatpush.bf16.msrb.mxu0 %v18040_v6  ;;  %v18088_v28 = vor.u32 %v14198_v1, %v11669_v29  ;;  %v14199_v56 = vld [vmem:[%s20480_s1 + $0x924] sm:$0xf0]  ;;  %v11679_v44 = vld [vmem:[%s20480_s1 + $0x928] sm:$0xf0] }
 0x16f   : > { %21114 = vst [vmem:[#allocation317_spill] sm:$0xff] %v18059_v47  ;;  %v18068_v61 = vadd.f32 %v1807_v40, %v17460_v52  ;;  %v14196_v52 = vld [vmem:[%s20480_s1 + $0x914] sm:$0xf]  ;;  %3405 = vmatpush.bf16.msrb.mxu1 %v18057_v14  ;;  %v18101_v36 = vor.u32 %v14199_v56, %v11677_v58  ;;  %v14197_v40 = vld [vmem:[%s20480_s1 + $0x91c] sm:$0xf] }
 0x170   : > { %21115 = vst [vmem:[#allocation318_spill] sm:$0xff] %v18075_v16  ;;  %3424 = vmatpush.bf16.msrb.mxu2 %v18059_v47  ;;  %v18099_v7 = vor.u32 %v14196_v52, %v11671_v50  ;;  %3443 = vmatpush.bf16.msrb.mxu3 %v18075_v16  ;;  %v18111_v29 = vor.u32 %v14197_v40, %v11679_v44  ;;  %v11653_v1 = vld [vmem:[%s20480_s1 + $0x8f0] sm:$0xf]  ;;  %v14194_v52 = vld [vmem:[%s20480_s1 + $0x8fc] sm:$0xf0] }
 0x171   : > { %21116 = vst [vmem:[#allocation319_spill] sm:$0xff] %v18088_v28  ;;  %v14192_v50 = vld [vmem:[%s20480_s1 + $0x8f4] sm:$0xf]  ;;  %v18124_v40 = vor.u32 %v14194_v52, %v11653_v1  ;;  %v11655_v44 = vld [vmem:[%s20480_s1 + $0x900] sm:$0xf0] }
 0x172   : > { %21117 = vst [vmem:[#allocation320_spill] sm:$0xff] %v18099_v7  ;;  %3387 = vmatpush.bf16.msrb.mxu0 %v18088_v28  ;;  %v18141_v47 = vor.u32 %v14192_v50, %v11655_v44  ;;  %v14193_v6 = vld [vmem:[%s20480_s1 + $0x8fc] sm:$0xf]  ;;  %v11663_v22 = vld [vmem:[%s20480_s1 + $0x908] sm:$0xf0] }
 0x173   : > { %21118 = vst [vmem:[#allocation321_spill] sm:$0xff] %v18101_v36  ;;  %3406 = vmatpush.bf16.msrb.mxu1 %v18099_v7  ;;  %v14195_v7 = vld [vmem:[%s20480_s1 + $0x904] sm:$0xf0] }
 0x174   : > { %3425 = vmatpush.bf16.msrb.mxu2 %v18101_v36  ;;  %v1845_v58 = vpop.f32.mrf.mxu2  ;;  %v11661_v36 = vld [vmem:[%s20480_s1 + $0x8f8] sm:$0xf]  ;;  %3444 = vmatpush.bf16.msrb.mxu3 %v18111_v29 }
 0x175   : > { %v1864_v56 = vpop.f32.mrf.mxu3  ;;  %v18136_v28 = vadd.f32 %v1845_v58, %v17528_v23  ;;  %v2088_v52 = vpop.f32.mrf.mxu1  ;;  %v18143_v14 = vor.u32 %v14195_v7, %v11661_v36  ;;  %v18159_v7 = vor.u32 %v14193_v6, %v11663_v22  ;;  %v21121_v58 = vld [vmem:[#allocation8_spill] sm:$0xff] }
 0x176   : > { %v18139_v16 = vadd.f32 %v1864_v56, %v17531_v35  ;;  %v2069_v1 = vpop.f32.mrf.mxu0  ;;  %v18155_v35 = vadd.f32 %v2088_v52, %v17547_v48  ;;  %3388 = vmatpush.bf16.msrb.mxu0 %v18124_v40 }
 0x177   : > { %v18152_v23 = vadd.f32 %v2069_v1, %v17544_v62  ;;  %3407 = vmatpush.bf16.msrb.mxu1 %v18141_v47 }
 0x178   : > { %3426 = vmatpush.bf16.msrb.mxu2 %v18143_v14  ;;  %3445 = vmatpush.bf16.msrb.mxu3 %v18159_v7 }
 0x179   : > { %11617 = vmatmul.msk.bf16.vlgmr.msra.gmra.mxu0 %vm439_vm2, %v17037_v57  ;;  %11619 = vmatmul.msk.bf16.vlgmr.msra.gmra.mxu1 %vm439_vm2, %v17037_v57 }
 0x17a   : > { %11623 = vmatmul.msk.bf16.vlgmr.msra.gmra.mxu3 %vm439_vm2, %v17037_v57  ;;  %3540 = vmatpush.bf16.msra.mxu0 %v14873_v19 }
 0x17b   : > { %11621 = vmatmul.msk.bf16.vlgmr.msra.gmra.mxu2 %vm439_vm2, %v17037_v57  ;;  %3559 = vmatpush.bf16.msra.mxu1 %v14876_v20 }
 0x17c   : > { %3578 = vmatpush.bf16.msra.mxu2 %v14888_v24  ;;  %3597 = vmatpush.bf16.msra.mxu3 %v14891_v25  ;;  %v11493_v24 = vld [vmem:[%s15078_s16 + $0x79] sm:$0xff]  ;;  %v11494_v25 = vld [vmem:[%s15078_s16 + $0x81] sm:$0xff] }
 0x17d   : > { %v2126_v48 = vpop.f32.mrf.mxu3  ;;  %v2090_v50 = vpop.f32.mrf.mxu1 }
 0x17e   : > { %v2107_v62 = vpop.f32.mrf.mxu2  ;;  %v18180_v6 = vadd.f32 %v2126_v48, %v17586_v55  ;;  %v2071_v36 = vpop.f32.mrf.mxu0  ;;  %v18186_v20 = vadd.f32 %v2090_v50, %v17592_v13  ;;  %3541 = vmatpush.bf16.msra.mxu0 %v14895_v26  ;;  %v21120_v13 = vld [vmem:[#allocation7_spill] sm:$0xff]  ;;  %v21126_v50 = vld [vmem:[#allocation13_spill] sm:$0xff] }
 0x17f   : > { %v18177_v22 = vadd.f32 %v2107_v62, %v17583_v45  ;;  %v18183_v19 = vadd.f32 %v2071_v36, %v17589_v33  ;;  %3560 = vmatpush.bf16.msra.mxu1 %v14897_v27  ;;  %v18197_v33 = vpack.c.bf16 %v11494_v25, %v11493_v24  ;;  %v21127_v24 = vld [vmem:[#allocation14_spill] sm:$0xff]  ;;  %v21128_v25 = vld [vmem:[#allocation15_spill] sm:$0xff] }
 0x180   : > { %3579 = vmatpush.bf16.msra.mxu2 %v14907_v30  ;;  %3598 = vmatpush.bf16.msra.mxu3 %v14909_v31 }
 0x182   : > { %3542 = vmatpush.bf16.msra.mxu0 %v14931_v38 }
 0x183   : > { %3561 = vmatpush.bf16.msra.mxu1 %v14933_v39 }
 0x184   : > { %3580 = vmatpush.bf16.msra.mxu2 %v14943_v42  ;;  %3599 = vmatpush.bf16.msra.mxu3 %v14945_v43  ;;  %v21119_v42 = vld [vmem:[#allocation6_spill] sm:$0xff]  ;;  %v21122_v43 = vld [vmem:[#allocation9_spill] sm:$0xff] }
 0x185   : > { %v2128_v55 = vpop.f32.mrf.mxu3 }
 0x186   : > { %v2109_v45 = vpop.f32.mrf.mxu2  ;;  %v18204_v27 = vadd.f32 %v2128_v55, %v17662_v5  ;;  %v2074_v30 = vpop.f32.mrf.mxu0  ;;  %3543 = vmatpush.bf16.msra.mxu0 %v21119_v42  ;;  %v21124_v5 = vld [vmem:[#allocation11_spill] sm:$0xff] }
 0x187   : > { %v18201_v26 = vadd.f32 %v2109_v45, %v17659_v63  ;;  %v2093_v31 = vpop.f32.mrf.mxu1  ;;  %v18207_v38 = vadd.f32 %v2074_v30, %v17675_v15  ;;  %3562 = vmatpush.bf16.msra.mxu1 %v21120_v13  ;;  %v21123_v63 = vld [vmem:[#allocation10_spill] sm:$0xff]  ;;  %v21125_v15 = vld [vmem:[#allocation12_spill] sm:$0xff]  ;;  %v21132_v55 = vld [vmem:[#allocation19_spill] sm:$0xff] }
 0x188   : > { %v18210_v39 = vadd.f32 %v2093_v31, %v17678_v0  ;;  %3581 = vmatpush.bf16.msra.mxu2 %v21121_v58  ;;  %3600 = vmatpush.bf16.msra.mxu3 %v21122_v43  ;;  %v21129_v45 = vld [vmem:[#allocation16_spill] sm:$0xff] }
 0x189   : > { %11618 = vmatmul.msk.bf16.gmra.mxu0 %vm439_vm2, %v18197_v33  ;;  %11620 = vmatmul.msk.bf16.gmra.mxu1 %vm439_vm2, %v18197_v33  ;;  %v21133_v30 = vld [vmem:[#allocation20_spill] sm:$0xff] }
 0x18a   : > { %11624 = vmatmul.msk.bf16.gmra.mxu3 %vm439_vm2, %v18197_v33  ;;  %3544 = vmatpush.bf16.msra.mxu0 %v21123_v63 }
 0x18b   : > { %11622 = vmatmul.msk.bf16.gmra.mxu2 %vm439_vm2, %v18197_v33  ;;  %3563 = vmatpush.bf16.msra.mxu1 %v21124_v5  ;;  %v21134_v5 = vld [vmem:[#allocation21_spill] sm:$0xff] }
 0x18c   : > { %3582 = vmatpush.bf16.msra.mxu2 %v21125_v15  ;;  %3601 = vmatpush.bf16.msra.mxu3 %v21126_v50 }
 0x18d   : > { %v2131_v56 = vpop.f32.mrf.mxu3 }
 0x18e   : > { %v2112_v0 = vpop.f32.mrf.mxu2  ;;  %v18231_v1 = vadd.f32 %v2131_v56, %v17753_v59  ;;  %v2076_v52 = vpop.f32.mrf.mxu0  ;;  %3545 = vmatpush.bf16.msra.mxu0 %v21127_v24  ;;  %v21131_v59 = vld [vmem:[#allocation18_spill] sm:$0xff] }
 0x18f   : > { %v18228_v44 = vadd.f32 %v2112_v0, %v17750_v21  ;;  %v2095_v62 = vpop.f32.mrf.mxu1  ;;  %v18234_v48 = vadd.f32 %v2076_v52, %v17766_v51  ;;  %3564 = vmatpush.bf16.msra.mxu1 %v21128_v25  ;;  %v21130_v21 = vld [vmem:[#allocation17_spill] sm:$0xff]  ;;  %v21139_v25 = vld [vmem:[#allocation26_spill] sm:$0xff] }
 0x190   : > { %v18237_v36 = vadd.f32 %v2095_v62, %v17769_v54  ;;  %3583 = vmatpush.bf16.msra.mxu2 %v21129_v45  ;;  %3602 = vmatpush.bf16.msra.mxu3 %v21130_v21  ;;  %v21140_v45 = vld [vmem:[#allocation27_spill] sm:$0xff]  ;;  %v21141_v21 = vld [vmem:[#allocation28_spill] sm:$0xff] }
 0x192   : > { %3546 = vmatpush.bf16.msra.mxu0 %v21131_v59  ;;  %v21142_v59 = vld [vmem:[#allocation29_spill] sm:$0xff] }
 0x193   : > { %3565 = vmatpush.bf16.msra.mxu1 %v21132_v55  ;;  %v21145_v55 = vld [vmem:[#allocation32_spill] sm:$0xff] }
 0x194   : > { %3584 = vmatpush.bf16.msra.mxu2 %v21133_v30  ;;  %3603 = vmatpush.bf16.msra.mxu3 %v21134_v5  ;;  %v21146_v30 = vld [vmem:[#allocation33_spill] sm:$0xff] }
 0x195   : > { %v2133_v31 = vpop.f32.mrf.mxu3 }
 0x196   : > { %v2114_v51 = vpop.f32.mrf.mxu2  ;;  %v18251_v42 = vadd.f32 %v2133_v31, %v17837_v53  ;;  %v2330_v13 = vpop.f32.mrf.mxu0  ;;  %v21135_v53 = vld [vmem:[#allocation22_spill] sm:$0xff] }
 0x197   : > { %v18248_v54 = vadd.f32 %v2114_v51, %v17834_v2  ;;  %v2349_v58 = vpop.f32.mrf.mxu1  ;;  %v18254_v43 = vadd.f32 %v2330_v13, %v17850_v3  ;;  %v21136_v2 = vld [vmem:[#allocation23_spill] sm:$0xff]  ;;  %v21137_v3 = vld [vmem:[#allocation24_spill] sm:$0xff] }
 0x198   : > { %v18257_v63 = vadd.f32 %v2349_v58, %v17853_v17  ;;  %v21138_v17 = vld [vmem:[#allocation25_spill] sm:$0xff] }
 0x199   : > { %11747 = vmatmul.msk.bf16.vlgmr.msrb.gmra.mxu0 %vm439_vm2, %v17037_v57  ;;  %11749 = vmatmul.msk.bf16.vlgmr.msrb.gmra.mxu1 %vm439_vm2, %v17037_v57 }
 0x19a   : > { %11753 = vmatmul.msk.bf16.vlgmr.msrb.gmra.mxu3 %vm439_vm2, %v17037_v57  ;;  %3632 = vmatpush.bf16.msrb.mxu0 %v21135_v53 }
 0x19b   : > { %11751 = vmatmul.msk.bf16.vlgmr.msrb.gmra.mxu2 %vm439_vm2, %v17037_v57  ;;  %3651 = vmatpush.bf16.msrb.mxu1 %v21136_v2  ;;  %v21147_v2 = vld [vmem:[#allocation34_spill] sm:$0xff] }
 0x19c   : > { %3670 = vmatpush.bf16.msrb.mxu2 %v21137_v3  ;;  %3689 = vmatpush.bf16.msrb.mxu3 %v21138_v17  ;;  %v21148_v3 = vld [vmem:[#allocation35_spill] sm:$0xff]  ;;  %v21149_v17 = vld [vmem:[#allocation36_spill] sm:$0xff] }
 0x19d   : > { %v2387_v0 = vpop.f32.mrf.mxu3 }
 0x19e   : > { %v2368_v15 = vpop.f32.mrf.mxu2  ;;  %v18276_v52 = vadd.f32 %v2387_v0, %v17892_v8  ;;  %v2332_v62 = vpop.f32.mrf.mxu0  ;;  %3633 = vmatpush.bf16.msrb.mxu0 %v21139_v25  ;;  %v21144_v8 = vld [vmem:[#allocation31_spill] sm:$0xff] }
 0x19f   : > { %v18273_v56 = vadd.f32 %v2368_v15, %v17889_v34  ;;  %v2351_v50 = vpop.f32.mrf.mxu1  ;;  %v18279_v57 = vadd.f32 %v2332_v62, %v17895_v11  ;;  %3652 = vmatpush.bf16.msrb.mxu1 %v21140_v45  ;;  %v21143_v34 = vld [vmem:[#allocation30_spill] sm:$0xff]  ;;  %v21150_v15 = vld [vmem:[#allocation37_spill] sm:$0xff] }
 0x1a0   : > { %v18282_v24 = vadd.f32 %v2351_v50, %v17898_v9  ;;  %3671 = vmatpush.bf16.msrb.mxu2 %v21141_v21  ;;  %3690 = vmatpush.bf16.msrb.mxu3 %v21142_v59 }
 0x1a2   : > { %3634 = vmatpush.bf16.msrb.mxu0 %v21143_v34  ;;  %v21155_v34 = vld [vmem:[#allocation42_spill] sm:$0xff] }
 0x1a3   : > { %3653 = vmatpush.bf16.msrb.mxu1 %v21144_v8  ;;  %v21156_v8 = vld [vmem:[#allocation43_spill] sm:$0xff] }
 0x1a4   : > { %3672 = vmatpush.bf16.msrb.mxu2 %v21145_v55  ;;  %3691 = vmatpush.bf16.msrb.mxu3 %v21146_v30  ;;  %v21157_v55 = vld [vmem:[#allocation44_spill] sm:$0xff]  ;;  %v21158_v30 = vld [vmem:[#allocation45_spill] sm:$0xff] }
 0x1a5   : > { %v2389_v51 = vpop.f32.mrf.mxu3 }
 0x1a6   : > { %v2370_v11 = vpop.f32.mrf.mxu2  ;;  %v18296_v31 = vadd.f32 %v2389_v51, %v17964_v10  ;;  %v2335_v13 = vpop.f32.mrf.mxu0  ;;  %3635 = vmatpush.bf16.msrb.mxu0 %v21147_v2  ;;  %v21151_v10 = vld [vmem:[#allocation38_spill] sm:$0xff]  ;;  %v21160_v51 = vld [vmem:[#allocation47_spill] sm:$0xff] }
 0x1a7   : > { %v18293_v9 = vadd.f32 %v2370_v11, %v17961_v4  ;;  %v2354_v58 = vpop.f32.mrf.mxu1  ;;  %v18299_v5 = vadd.f32 %v2335_v13, %v17977_v60  ;;  %3654 = vmatpush.bf16.msrb.mxu1 %v21148_v3  ;;  %v21152_v4 = vld [vmem:[#allocation39_spill] sm:$0xff]  ;;  %v21153_v60 = vld [vmem:[#allocation40_spill] sm:$0xff]  ;;  %v21161_v13 = vld [vmem:[#allocation50_spill] sm:$0xff] }
 0x1a8   : > { %v18302_v53 = vadd.f32 %v2354_v58, %v17980_v12  ;;  %3673 = vmatpush.bf16.msrb.mxu2 %v21149_v17  ;;  %3692 = vmatpush.bf16.msrb.mxu3 %v21150_v15  ;;  %v21154_v12 = vld [vmem:[#allocation41_spill] sm:$0xff]  ;;  %v11757_v11 = vld [vmem:[%s15078_s16 + $0xa8] sm:$0xff] }
 0x1a9   : > { %11748 = vmatmul.msk.bf16.gmra.mxu0 %vm439_vm2, %v18197_v33  ;;  %11750 = vmatmul.msk.bf16.gmra.mxu1 %vm439_vm2, %v18197_v33 }
 0x1aa   : > { %11754 = vmatmul.msk.bf16.gmra.mxu3 %vm439_vm2, %v18197_v33  ;;  %3636 = vmatpush.bf16.msrb.mxu0 %v21151_v10 }
 0x1ab   : > { %11752 = vmatmul.msk.bf16.gmra.mxu2 %vm439_vm2, %v18197_v33  ;;  %3655 = vmatpush.bf16.msrb.mxu1 %v21152_v4 }
 0x1ac   : > { %3674 = vmatpush.bf16.msrb.mxu2 %v21153_v60  ;;  %3693 = vmatpush.bf16.msrb.mxu3 %v21154_v12 }
 0x1ad   : > { %v2392_v62 = vpop.f32.mrf.mxu3 }
 0x1ae   : > { %v2373_v0 = vpop.f32.mrf.mxu2  ;;  %v18324_v25 = vadd.f32 %v2392_v62, %v18055_v37  ;;  %v2337_v45 = vpop.f32.mrf.mxu0  ;;  %3637 = vmatpush.bf16.msrb.mxu0 %v21155_v34  ;;  %v21159_v37 = vld [vmem:[#allocation46_spill] sm:$0xff] }
 0x1af   : > { %v18321_v50 = vadd.f32 %v2373_v0, %v18052_v46  ;;  %v2356_v33 = vpop.f32.mrf.mxu1  ;;  %v18327_v21 = vadd.f32 %v2337_v45, %v18068_v61  ;;  %3656 = vmatpush.bf16.msrb.mxu1 %v21156_v8  ;;  %v11756_v46 = vld [vmem:[%s15078_s16 + $0xa0] sm:$0xff]  ;;  %v21162_v61 = vld [vmem:[#allocation51_spill] sm:$0xff] }
 0x1b0   : > { %v18330_v59 = vadd.f32 %v2356_v33, %v18071_v41  ;;  %3675 = vmatpush.bf16.msrb.mxu2 %v21157_v55  ;;  %3694 = vmatpush.bf16.msrb.mxu3 %v21158_v30  ;;  %v18342_v2 = vpack.c.bf16 %v11757_v11, %v11756_v46  ;;  %v21167_v30 = vld [vmem:[#allocation54_spill] sm:$0xff]  ;;  %v21168_v46 = vld [vmem:[#allocation55_spill] sm:$0xff]  ;;  %v21169_v11 = vld [vmem:[#allocation56_spill] sm:$0xff] }
 0x1b2   : > { %3638 = vmatpush.bf16.msrb.mxu0 %v21159_v37  ;;  %v21170_v37 = vld [vmem:[#allocation57_spill] sm:$0xff] }
 0x1b3   : > { %3657 = vmatpush.bf16.msrb.mxu1 %v21160_v51  ;;  %v11760_v51 = vld [vmem:[%s15078_s16 + $0xf8] sm:$0xff] }
 0x1b4   : > { %3676 = vmatpush.bf16.msrb.mxu2 %v21161_v13  ;;  %3695 = vmatpush.bf16.msrb.mxu3 %v21162_v61  ;;  %v21172_v13 = vld [vmem:[#allocation59_spill] sm:$0xff]  ;;  %v21173_v61 = vld [vmem:[#allocation60_spill] sm:$0xff] }
 0x1b5   : > { %v2394_v58 = vpop.f32.mrf.mxu3 }
 0x1b6   : > { %v2375_v41 = vpop.f32.mrf.mxu2  ;;  %v18348_v17 = vadd.f32 %v2394_v58, %v18139_v16  ;;  %v2599_v15 = vpop.f32.mrf.mxu0  ;;  %v21163_v16 = vld [vmem:[#allocation48_spill] sm:$0xff] }
 0x1b7   : > { %v18345_v3 = vadd.f32 %v2375_v41, %v18136_v28  ;;  %v2618_v10 = vpop.f32.mrf.mxu1  ;;  %v18351_v4 = vadd.f32 %v2599_v15, %v18152_v23  ;;  %v21164_v28 = vld [vmem:[#allocation49_spill] sm:$0xff]  ;;  %v21165_v23 = vld [vmem:[#allocation52_spill] sm:$0xff] }
 0x1b8   : > { %v18354_v60 = vadd.f32 %v2618_v10, %v18155_v35  ;;  %v21166_v35 = vld [vmem:[#allocation53_spill] sm:$0xff] }
 0x1b9   : > { %11761 = vmatmul.msk.bf16.vlgmr.msra.gmra.mxu0 %vm439_vm2, %v18342_v2  ;;  %11763 = vmatmul.msk.bf16.vlgmr.msra.gmra.mxu1 %vm439_vm2, %v18342_v2 }
 0x1ba   : > { %11767 = vmatmul.msk.bf16.vlgmr.msra.gmra.mxu3 %vm439_vm2, %v18342_v2  ;;  %3740 = vmatpush.bf16.msra.mxu0 %v21163_v16 }
 0x1bb   : > { %11765 = vmatmul.msk.bf16.vlgmr.msra.gmra.mxu2 %vm439_vm2, %v18342_v2  ;;  %3759 = vmatpush.bf16.msra.mxu1 %v21164_v28 }
 0x1bc   : > { %3778 = vmatpush.bf16.msra.mxu2 %v21165_v23  ;;  %3797 = vmatpush.bf16.msra.mxu3 %v21166_v35 }
 0x1bd   : > { %v2656_v0 = vpop.f32.mrf.mxu3 }
 0x1be   : > { %v2637_v12 = vpop.f32.mrf.mxu2  ;;  %v18372_v45 = vadd.f32 %v2656_v0, %v18180_v6  ;;  %v2601_v33 = vpop.f32.mrf.mxu0  ;;  %3741 = vmatpush.bf16.msra.mxu0 %v21167_v30  ;;  %v21171_v6 = vld [vmem:[#allocation58_spill] sm:$0xff]  ;;  %v21176_v0 = vld [vmem:[#allocation63_spill] sm:$0xff] }
 0x1bf   : > { %v18369_v62 = vadd.f32 %v2637_v12, %v18177_v22  ;;  %v2620_v34 = vpop.f32.mrf.mxu1  ;;  %v18375_v8 = vadd.f32 %v2601_v33, %v18183_v19  ;;  %3760 = vmatpush.bf16.msra.mxu1 %v21168_v46  ;;  %v11759_v22 = vld [vmem:[%s15078_s16 + $0xf0] sm:$0xff]  ;;  %v21174_v19 = vld [vmem:[#allocation61_spill] sm:$0xff]  ;;  %v21175_v12 = vld [vmem:[#allocation62_spill] sm:$0xff] }
 0x1c0   : > { %v18378_v55 = vadd.f32 %v2620_v34, %v18186_v20  ;;  %3779 = vmatpush.bf16.msra.mxu2 %v21169_v11  ;;  %3798 = vmatpush.bf16.msra.mxu3 %v21170_v37  ;;  %v18390_v58 = vpack.c.bf16 %v11760_v51, %v11759_v22  ;;  %v21177_v33 = vld [vmem:[#allocation64_spill] sm:$0xff]  ;;  %v21178_v34 = vld [vmem:[#allocation65_spill] sm:$0xff] }
 0x1c2   : > { %3742 = vmatpush.bf16.msra.mxu0 %v21171_v6 }
 0x1c3   : > { %3761 = vmatpush.bf16.msra.mxu1 %v21172_v13 }
 0x1c4   : > { %3780 = vmatpush.bf16.msra.mxu2 %v21173_v61  ;;  %3799 = vmatpush.bf16.msra.mxu3 %v21174_v19  ;;  %v21183_v61 = vld [vmem:[#allocation70_spill] sm:$0xff]  ;;  %v21184_v19 = vld [vmem:[#allocation71_spill] sm:$0xff] }
 0x1c5   : > { %v2658_v41 = vpop.f32.mrf.mxu3 }
 0x1c6   : > { %v2639_v20 = vpop.f32.mrf.mxu2  ;;  %v18396_v10 = vadd.f32 %v2658_v41, %v18204_v27  ;;  %v2604_v16 = vpop.f32.mrf.mxu0  ;;  %3743 = vmatpush.bf16.msra.mxu0 %v21175_v12  ;;  %v21180_v27 = vld [vmem:[#allocation67_spill] sm:$0xff]  ;;  %v21186_v41 = vld [vmem:[#allocation73_spill] sm:$0xff] }
 0x1c7   : > { %v18393_v15 = vadd.f32 %v2639_v20, %v18201_v26  ;;  %v2623_v28 = vpop.f32.mrf.mxu1  ;;  %v18399_v23 = vadd.f32 %v2604_v16, %v18207_v38  ;;  %3762 = vmatpush.bf16.msra.mxu1 %v21176_v0  ;;  %v21179_v26 = vld [vmem:[#allocation66_spill] sm:$0xff]  ;;  %v21181_v38 = vld [vmem:[#allocation68_spill] sm:$0xff] }
 0x1c8   : > { %v18402_v35 = vadd.f32 %v2623_v28, %v18210_v39  ;;  %3781 = vmatpush.bf16.msra.mxu2 %v21177_v33  ;;  %3800 = vmatpush.bf16.msra.mxu3 %v21178_v34  ;;  %v21182_v39 = vld [vmem:[#allocation69_spill] sm:$0xff]  ;;  %v21185_v20 = vld [vmem:[#allocation72_spill] sm:$0xff] }
 0x1c9   : > { %11762 = vmatmul.msk.bf16.gmra.mxu0 %vm439_vm2, %v18390_v58  ;;  %11764 = vmatmul.msk.bf16.gmra.mxu1 %vm439_vm2, %v18390_v58  ;;  %v21189_v16 = vld [vmem:[#allocation76_spill] sm:$0xff]  ;;  %v21190_v28 = vld [vmem:[#allocation77_spill] sm:$0xff] }
 0x1ca   : > { %11768 = vmatmul.msk.bf16.gmra.mxu3 %vm439_vm2, %v18390_v58  ;;  %3744 = vmatpush.bf16.msra.mxu0 %v21179_v26 }
 0x1cb   : > { %11766 = vmatmul.msk.bf16.gmra.mxu2 %vm439_vm2, %v18390_v58  ;;  %3763 = vmatpush.bf16.msra.mxu1 %v21180_v27 }
 0x1cc   : > { %3782 = vmatpush.bf16.msra.mxu2 %v21181_v38  ;;  %3801 = vmatpush.bf16.msra.mxu3 %v21182_v39 }
 0x1cd   : > { %v2661_v46 = vpop.f32.mrf.mxu3 }
 0x1ce   : > { %v2642_v30 = vpop.f32.mrf.mxu2  ;;  %v18424_v37 = vadd.f32 %v2661_v46, %v18231_v1  ;;  %v2606_v22 = vpop.f32.mrf.mxu0  ;;  %3745 = vmatpush.bf16.msra.mxu0 %v21183_v61  ;;  %v21188_v1 = vld [vmem:[#allocation75_spill] sm:$0xff] }
 0x1cf   : > { %v18421_v11 = vadd.f32 %v2642_v30, %v18228_v44  ;;  %v2625_v51 = vpop.f32.mrf.mxu1  ;;  %v18427_v6 = vadd.f32 %v2606_v22, %v18234_v48  ;;  %3764 = vmatpush.bf16.msra.mxu1 %v21184_v19  ;;  %v21187_v44 = vld [vmem:[#allocation74_spill] sm:$0xff] }
 0x1d0   : > { %v18430_v13 = vadd.f32 %v2625_v51, %v18237_v36  ;;  %3783 = vmatpush.bf16.msra.mxu2 %v21185_v20  ;;  %3802 = vmatpush.bf16.msra.mxu3 %v21186_v41  ;;  %v21195_v19 = vld [vmem:[#allocation82_spill] sm:$0xff]  ;;  %v21196_v20 = vld [vmem:[#allocation83_spill] sm:$0xff]  ;;  %v21197_v41 = vld [vmem:[#allocation84_spill] sm:$0xff] }
 0x1d2   : > { %3746 = vmatpush.bf16.msra.mxu0 %v21187_v44  ;;  %v21198_v44 = vld [vmem:[#allocation85_spill] sm:$0xff] }
 0x1d3   : > { %3765 = vmatpush.bf16.msra.mxu1 %v21188_v1  ;;  %v21201_v1 = vld [vmem:[#allocation88_spill] sm:$0xff] }
 0x1d4   : > { %3784 = vmatpush.bf16.msra.mxu2 %v21189_v16  ;;  %3803 = vmatpush.bf16.msra.mxu3 %v21190_v28  ;;  %v21202_v16 = vld [vmem:[#allocation89_spill] sm:$0xff] }
 0x1d5   : > { %v2663_v12 = vpop.f32.mrf.mxu3 }
 0x1d6   : > { %v2644_v48 = vpop.f32.mrf.mxu2  ;;  %v18444_v0 = vadd.f32 %v2663_v12, %v18251_v42  ;;  %v2860_v33 = vpop.f32.mrf.mxu0  ;;  %v21192_v42 = vld [vmem:[#allocation79_spill] sm:$0xff] }
 0x1d7   : > { %v18441_v36 = vadd.f32 %v2644_v48, %v18248_v54  ;;  %v2879_v34 = vpop.f32.mrf.mxu1  ;;  %v18447_v26 = vadd.f32 %v2860_v33, %v18254_v43  ;;  %v21191_v54 = vld [vmem:[#allocation78_spill] sm:$0xff]  ;;  %v21193_v43 = vld [vmem:[#allocation80_spill] sm:$0xff] }
 0x1d8   : > { %v18450_v27 = vadd.f32 %v2879_v34, %v18257_v63  ;;  %v21194_v63 = vld [vmem:[#allocation81_spill] sm:$0xff] }
 0x1d9   : > { %11769 = vmatmul.msk.bf16.vlgmr.msrb.gmra.mxu0 %vm439_vm2, %v18342_v2  ;;  %11771 = vmatmul.msk.bf16.vlgmr.msrb.gmra.mxu1 %vm439_vm2, %v18342_v2 }
 0x1da   : > { %11775 = vmatmul.msk.bf16.vlgmr.msrb.gmra.mxu3 %vm439_vm2, %v18342_v2  ;;  %3832 = vmatpush.bf16.msrb.mxu0 %v21191_v54 }
 0x1db   : > { %11773 = vmatmul.msk.bf16.vlgmr.msrb.gmra.mxu2 %vm439_vm2, %v18342_v2  ;;  %3851 = vmatpush.bf16.msrb.mxu1 %v21192_v42  ;;  %v21203_v42 = vld [vmem:[#allocation90_spill] sm:$0xff] }
 0x1dc   : > { %3870 = vmatpush.bf16.msrb.mxu2 %v21193_v43  ;;  %3889 = vmatpush.bf16.msrb.mxu3 %v21194_v63  ;;  %v21204_v43 = vld [vmem:[#allocation91_spill] sm:$0xff]  ;;  %v21205_v63 = vld [vmem:[#allocation92_spill] sm:$0xff] }
 0x1dd   : > { %v2917_v39 = vpop.f32.mrf.mxu3 }
 0x1de   : > { %v2898_v38 = vpop.f32.mrf.mxu2  ;;  %v18468_v46 = vadd.f32 %v2917_v39, %v18276_v52  ;;  %v2862_v22 = vpop.f32.mrf.mxu0  ;;  %3833 = vmatpush.bf16.msrb.mxu0 %v21195_v19  ;;  %v21200_v52 = vld [vmem:[#allocation87_spill] sm:$0xff] }
 0x1df   : > { %v18465_v30 = vadd.f32 %v2898_v38, %v18273_v56  ;;  %v2881_v51 = vpop.f32.mrf.mxu1  ;;  %v18471_v2 = vadd.f32 %v2862_v22, %v18279_v57  ;;  %3852 = vmatpush.bf16.msrb.mxu1 %v21196_v20  ;;  %v21199_v56 = vld [vmem:[#allocation86_spill] sm:$0xff]  ;;  %v21206_v38 = vld [vmem:[#allocation93_spill] sm:$0xff] }
 0x1e0   : > { %v18474_v61 = vadd.f32 %v2881_v51, %v18282_v24  ;;  %3871 = vmatpush.bf16.msrb.mxu2 %v21197_v41  ;;  %3890 = vmatpush.bf16.msrb.mxu3 %v21198_v44 }
 0x1e2   : > { %3834 = vmatpush.bf16.msrb.mxu0 %v21199_v56 }
 0x1e3   : > { %3853 = vmatpush.bf16.msrb.mxu1 %v21200_v52  ;;  %v21211_v52 = vld [vmem:[#allocation98_spill] sm:$0xff] }
 0x1e4   : > { %3872 = vmatpush.bf16.msrb.mxu2 %v21201_v1  ;;  %3891 = vmatpush.bf16.msrb.mxu3 %v21202_v16  ;;  %v21212_v1 = vld [vmem:[#allocation99_spill] sm:$0xff]  ;;  %v21213_v16 = vld [vmem:[#allocation100_spill] sm:$0xff] }
 0x1e5   : > { %v2919_v28 = vpop.f32.mrf.mxu3 }
 0x1e6   : > { %v2900_v57 = vpop.f32.mrf.mxu2  ;;  %v18488_v48 = vadd.f32 %v2919_v28, %v18296_v31  ;;  %v2865_v12 = vpop.f32.mrf.mxu0  ;;  %3835 = vmatpush.bf16.msrb.mxu0 %v21203_v42  ;;  %v21208_v31 = vld [vmem:[#allocation95_spill] sm:$0xff] }
 0x1e7   : > { %v18485_v24 = vadd.f32 %v2900_v57, %v18293_v9  ;;  %v2884_v33 = vpop.f32.mrf.mxu1  ;;  %v18491_v34 = vadd.f32 %v2865_v12, %v18299_v5  ;;  %3854 = vmatpush.bf16.msrb.mxu1 %v21204_v43  ;;  %v21207_v9 = vld [vmem:[#allocation94_spill] sm:$0xff]  ;;  %v21209_v5 = vld [vmem:[#allocation96_spill] sm:$0xff]  ;;  %v21214_v57 = vld [vmem:[#allocation101_spill] sm:$0xff] }
 0x1e8   : > { %v18494_v54 = vadd.f32 %v2884_v33, %v18302_v53  ;;  %3873 = vmatpush.bf16.msrb.mxu2 %v21205_v63  ;;  %3892 = vmatpush.bf16.msrb.mxu3 %v21206_v38  ;;  %v21210_v53 = vld [vmem:[#allocation97_spill] sm:$0xff]  ;;  %v11779_v28 = vld [vmem:[%s15078_s16 + $0xd0] sm:$0xff] }
 0x1e9   : > { %11770 = vmatmul.msk.bf16.gmra.mxu0 %vm439_vm2, %v18390_v58  ;;  %11772 = vmatmul.msk.bf16.gmra.mxu1 %vm439_vm2, %v18390_v58  ;;  %v21216_v12 = vld [vmem:[#allocation103_spill] sm:$0xff]  ;;  %v21217_v33 = vld [vmem:[#allocation104_spill] sm:$0xff] }
 0x1ea   : > { %11776 = vmatmul.msk.bf16.gmra.mxu3 %vm439_vm2, %v18390_v58  ;;  %3836 = vmatpush.bf16.msrb.mxu0 %v21207_v9 }
 0x1eb   : > { %11774 = vmatmul.msk.bf16.gmra.mxu2 %vm439_vm2, %v18390_v58  ;;  %3855 = vmatpush.bf16.msrb.mxu1 %v21208_v31 }
 0x1ec   : > { %3874 = vmatpush.bf16.msrb.mxu2 %v21209_v5  ;;  %3893 = vmatpush.bf16.msrb.mxu3 %v21210_v53 }
 0x1ed   : > { %v2922_v22 = vpop.f32.mrf.mxu3 }
 0x1ee   : > { %v2903_v39 = vpop.f32.mrf.mxu2  ;;  %v18516_v19 = vadd.f32 %v2922_v22, %v18324_v25  ;;  %v2867_v20 = vpop.f32.mrf.mxu0  ;;  %3837 = vmatpush.bf16.msrb.mxu0 %v21211_v52  ;;  %v21215_v25 = vld [vmem:[#allocation102_spill] sm:$0xff] }
 0x1ef   : > { %v18513_v51 = vadd.f32 %v2903_v39, %v18321_v50  ;;  %v2886_v41 = vpop.f32.mrf.mxu1  ;;  %v18519_v44 = vadd.f32 %v2867_v20, %v18327_v21  ;;  %3856 = vmatpush.bf16.msrb.mxu1 %v21212_v1  ;;  %v11778_v50 = vld [vmem:[%s15078_s16 + $0xc8] sm:$0xff]  ;;  %v21218_v21 = vld [vmem:[#allocation105_spill] sm:$0xff] }
 0x1f0   : > { %v18522_v56 = vadd.f32 %v2886_v41, %v18330_v59  ;;  %3875 = vmatpush.bf16.msrb.mxu2 %v21213_v16  ;;  %3894 = vmatpush.bf16.msrb.mxu3 %v21214_v57  ;;  %v18534_v43 = vpack.c.bf16 %v11779_v28, %v11778_v50  ;;  %v21223_v50 = vld [vmem:[#allocation110_spill] sm:$0xff]  ;;  %v21224_v28 = vld [vmem:[#allocation111_spill] sm:$0xff] }
 0x1f2   : > { %3838 = vmatpush.bf16.msrb.mxu0 %v21215_v25  ;;  %v21225_v25 = vld [vmem:[#allocation112_spill] sm:$0xff] }
 0x1f3   : > { %3857 = vmatpush.bf16.msrb.mxu1 %v21216_v12  ;;  %v21226_v12 = vld [vmem:[#allocation113_spill] sm:$0xff] }
 0x1f4   : > { %3876 = vmatpush.bf16.msrb.mxu2 %v21217_v33  ;;  %3895 = vmatpush.bf16.msrb.mxu3 %v21218_v21  ;;  %v11782_v33 = vld [vmem:[%s15078_s16 + $0x120] sm:$0xff]  ;;  %v21228_v21 = vld [vmem:[#allocation115_spill] sm:$0xff] }
 0x1f5   : > { %v2924_v42 = vpop.f32.mrf.mxu3 }
 0x1f6   : > { %v2905_v59 = vpop.f32.mrf.mxu2  ;;  %v18540_v38 = vadd.f32 %v2924_v42, %v18348_v17  ;;  %v3129_v9 = vpop.f32.mrf.mxu0  ;;  %v21220_v17 = vld [vmem:[#allocation107_spill] sm:$0xff] }
 0x1f7   : > { %v18537_v63 = vadd.f32 %v2905_v59, %v18345_v3  ;;  %v3148_v31 = vpop.f32.mrf.mxu1  ;;  %v18543_v5 = vadd.f32 %v3129_v9, %v18351_v4  ;;  %v21219_v3 = vld [vmem:[#allocation106_spill] sm:$0xff]  ;;  %v21221_v4 = vld [vmem:[#allocation108_spill] sm:$0xff] }
 0x1f8   : > { %v18546_v53 = vadd.f32 %v3148_v31, %v18354_v60  ;;  %v21222_v60 = vld [vmem:[#allocation109_spill] sm:$0xff]  ;;  %v21229_v59 = vld [vmem:[#allocation116_spill] sm:$0xff] }
 0x1f9   : > { %11783 = vmatmul.msk.bf16.vlgmr.msra.gmra.mxu0 %vm439_vm2, %v18534_v43  ;;  %11785 = vmatmul.msk.bf16.vlgmr.msra.gmra.mxu1 %vm439_vm2, %v18534_v43 }
 0x1fa   : > { %11789 = vmatmul.msk.bf16.vlgmr.msra.gmra.mxu3 %vm439_vm2, %v18534_v43  ;;  %3932 = vmatpush.bf16.msra.mxu0 %v21219_v3 }
 0x1fb   : > { %11787 = vmatmul.msk.bf16.vlgmr.msra.gmra.mxu2 %vm439_vm2, %v18534_v43  ;;  %3951 = vmatpush.bf16.msra.mxu1 %v21220_v17 }
 0x1fc   : > { %3970 = vmatpush.bf16.msra.mxu2 %v21221_v4  ;;  %3989 = vmatpush.bf16.msra.mxu3 %v21222_v60 }
 0x1fd   : > { %v3186_v22 = vpop.f32.mrf.mxu3 }
 0x1fe   : > { %v3167_v39 = vpop.f32.mrf.mxu2  ;;  %v18564_v41 = vadd.f32 %v3186_v22, %v18372_v45  ;;  %v3131_v52 = vpop.f32.mrf.mxu0  ;;  %3933 = vmatpush.bf16.msra.mxu0 %v21223_v50  ;;  %v21227_v45 = vld [vmem:[#allocation114_spill] sm:$0xff]  ;;  %v21234_v50 = vld [vmem:[#allocation121_spill] sm:$0xff] }
 0x1ff   : > { %v18561_v20 = vadd.f32 %v3167_v39, %v18369_v62  ;;  %v3150_v1 = vpop.f32.mrf.mxu1  ;;  %v18567_v16 = vadd.f32 %v3131_v52, %v18375_v8  ;;  %3952 = vmatpush.bf16.msra.mxu1 %v21224_v28  ;;  %v11781_v62 = vld [vmem:[%s15078_s16 + $0x118] sm:$0xff]  ;;  %v21231_v22 = vld [vmem:[#allocation118_spill] sm:$0xff]  ;;  %v21232_v52 = vld [vmem:[#allocation119_spill] sm:$0xff] }
 0x200   : > { %v18570_v57 = vadd.f32 %v3150_v1, %v18378_v55  ;;  %3971 = vmatpush.bf16.msra.mxu2 %v21225_v25  ;;  %3990 = vmatpush.bf16.msra.mxu3 %v21226_v12  ;;  %v21230_v8 = vld [vmem:[#allocation117_spill] sm:$0xff]  ;;  %v18582_v9 = vpack.c.bf16 %v11782_v33, %v11781_v62  ;;  %v21233_v1 = vld [vmem:[#allocation120_spill] sm:$0xff] }
 0x202   : > { %3934 = vmatpush.bf16.msra.mxu0 %v21227_v45 }
 0x203   : > { %3953 = vmatpush.bf16.msra.mxu1 %v21228_v21 }
 0x204   : > { %3972 = vmatpush.bf16.msra.mxu2 %v21229_v59  ;;  %3991 = vmatpush.bf16.msra.mxu3 %v21230_v8  ;;  %v21239_v8 = vld [vmem:[#allocation126_spill] sm:$0xff] }
 0x205   : > { %v3188_v42 = vpop.f32.mrf.mxu3 }
 0x206   : > { %v3169_v55 = vpop.f32.mrf.mxu2  ;;  %v18588_v3 = vadd.f32 %v3188_v42, %v18396_v10  ;;  %v3134_v17 = vpop.f32.mrf.mxu0  ;;  %3935 = vmatpush.bf16.msra.mxu0 %v21231_v22  ;;  %v21236_v10 = vld [vmem:[#allocation123_spill] sm:$0xff]  ;;  %v21241_v42 = vld [vmem:[#allocation128_spill] sm:$0xff]  ;;  %v21246_v22 = vld [vmem:[#allocation133_spill] sm:$0xff] }
 0x207   : > { %v18585_v31 = vadd.f32 %v3169_v55, %v18393_v15  ;;  %v3153_v4 = vpop.f32.mrf.mxu1  ;;  %v18591_v60 = vadd.f32 %v3134_v17, %v18399_v23  ;;  %3954 = vmatpush.bf16.msra.mxu1 %v21232_v52  ;;  %v21235_v15 = vld [vmem:[#allocation122_spill] sm:$0xff]  ;;  %v21237_v23 = vld [vmem:[#allocation124_spill] sm:$0xff]  ;;  %v21240_v55 = vld [vmem:[#allocation127_spill] sm:$0xff] }
 0x208   : > { %v18594_v39 = vadd.f32 %v3153_v4, %v18402_v35  ;;  %3973 = vmatpush.bf16.msra.mxu2 %v21233_v1  ;;  %3992 = vmatpush.bf16.msra.mxu3 %v21234_v50  ;;  %v21238_v35 = vld [vmem:[#allocation125_spill] sm:$0xff]  ;;  %v21245_v4 = vld [vmem:[#allocation132_spill] sm:$0xff] }
 0x209   : > { %11784 = vmatmul.msk.bf16.gmra.mxu0 %vm439_vm2, %v18582_v9  ;;  %11786 = vmatmul.msk.bf16.gmra.mxu1 %vm439_vm2, %v18582_v9  ;;  %v21242_v17 = vld [vmem:[#allocation129_spill] sm:$0xff] }
 0x20a   : > { %11790 = vmatmul.msk.bf16.gmra.mxu3 %vm439_vm2, %v18582_v9  ;;  %3936 = vmatpush.bf16.msra.mxu0 %v21235_v15 }
 0x20b   : > { %11788 = vmatmul.msk.bf16.gmra.mxu2 %vm439_vm2, %v18582_v9  ;;  %3955 = vmatpush.bf16.msra.mxu1 %v21236_v10 }
 0x20c   : > { %3974 = vmatpush.bf16.msra.mxu2 %v21237_v23  ;;  %3993 = vmatpush.bf16.msra.mxu3 %v21238_v35 }
 0x20d   : > { %v3191_v25 = vpop.f32.mrf.mxu3 }
 0x20e   : > { %v3172_v28 = vpop.f32.mrf.mxu2  ;;  %v18616_v62 = vadd.f32 %v3191_v25, %v18424_v37  ;;  %v3136_v33 = vpop.f32.mrf.mxu0  ;;  %3937 = vmatpush.bf16.msra.mxu0 %v21239_v8  ;;  %v21244_v37 = vld [vmem:[#allocation131_spill] sm:$0xff] }
 0x20f   : > { %v18613_v12 = vadd.f32 %v3172_v28, %v18421_v11  ;;  %v3155_v45 = vpop.f32.mrf.mxu1  ;;  %v18619_v21 = vadd.f32 %v3136_v33, %v18427_v6  ;;  %3956 = vmatpush.bf16.msra.mxu1 %v21240_v55  ;;  %v21243_v11 = vld [vmem:[#allocation130_spill] sm:$0xff] }
 0x210   : > { %v18622_v59 = vadd.f32 %v3155_v45, %v18430_v13  ;;  %3975 = vmatpush.bf16.msra.mxu2 %v21241_v42  ;;  %3994 = vmatpush.bf16.msra.mxu3 %v21242_v17  ;;  %v21251_v42 = vld [vmem:[#allocation138_spill] sm:$0xff]  ;;  %v21252_v17 = vld [vmem:[#allocation139_spill] sm:$0xff] }
 0x212   : > { %3938 = vmatpush.bf16.msra.mxu0 %v21243_v11 }
 0x213   : > { %3957 = vmatpush.bf16.msra.mxu1 %v21244_v37 }
 0x214   : > { %3976 = vmatpush.bf16.msra.mxu2 %v21245_v4  ;;  %3995 = vmatpush.bf16.msra.mxu3 %v21246_v22  ;;  %v21253_v4 = vld [vmem:[#allocation140_spill] sm:$0xff]  ;;  %v21254_v22 = vld [vmem:[#allocation141_spill] sm:$0xff] }
 0x215   : > { %v3193_v52 = vpop.f32.mrf.mxu3 }
 0x216   : > { %v3174_v6 = vpop.f32.mrf.mxu2  ;;  %v18636_v1 = vadd.f32 %v3193_v52, %v18444_v0  ;;  %v3390_v50 = vpop.f32.mrf.mxu0  ;;  %v21248_v0 = vld [vmem:[#allocation135_spill] sm:$0xff]  ;;  %v21258_v52 = vld [vmem:[#allocation145_spill] sm:$0xff] }
 0x217   : > { %v18633_v13 = vadd.f32 %v3174_v6, %v18441_v36  ;;  %v3409_v15 = vpop.f32.mrf.mxu1  ;;  %v3457_v10 = vadd.f32 %v3390_v50, %v18447_v26  ;;  %v21247_v36 = vld [vmem:[#allocation134_spill] sm:$0xff]  ;;  %v21249_v26 = vld [vmem:[#allocation136_spill] sm:$0xff] }
 0x218   : > { %v3458_v23 = vadd.f32 %v3409_v15, %v18450_v27  ;;  %v21250_v27 = vld [vmem:[#allocation137_spill] sm:$0xff]  ;;  %v21255_v6 = vld [vmem:[#allocation142_spill] sm:$0xff] }
 0x219   : > { %v3473_v35 = vmax.f32 %v18543_v5, %v3457_v10  ;;  %11791 = vmatmul.msk.bf16.vlgmr.msrb.gmra.mxu0 %vm439_vm2, %v18534_v43  ;;  %11793 = vmatmul.msk.bf16.vlgmr.msrb.gmra.mxu1 %vm439_vm2, %v18534_v43 }
 0x21a   : > { %v3474_v28 = vmax.f32 %v18546_v53, %v3458_v23  ;;  %11797 = vmatmul.msk.bf16.vlgmr.msrb.gmra.mxu3 %vm439_vm2, %v18534_v43  ;;  %4024 = vmatpush.bf16.msrb.mxu0 %v21247_v36  ;;  %v21259_v36 = vld [vmem:[#allocation146_spill] sm:$0xff] }
 0x21b   : > { %11795 = vmatmul.msk.bf16.vlgmr.msrb.gmra.mxu2 %vm439_vm2, %v18534_v43  ;;  %4043 = vmatpush.bf16.msrb.mxu1 %v21248_v0  ;;  %v21260_v0 = vld [vmem:[#allocation147_spill] sm:$0xff] }
 0x21c   : > { %4062 = vmatpush.bf16.msrb.mxu2 %v21249_v26  ;;  %4081 = vmatpush.bf16.msrb.mxu3 %v21250_v27 }
 0x21d   : > { %v3447_v53 = vpop.f32.mrf.mxu3 }
 0x21e   : > { %v3428_v5 = vpop.f32.mrf.mxu2  ;;  %v3460_v33 = vadd.f32 %v3447_v53, %v18468_v46  ;;  %v3392_v45 = vpop.f32.mrf.mxu0  ;;  %4025 = vmatpush.bf16.msrb.mxu0 %v21251_v42  ;;  %v21262_v53 = vld [vmem:[#allocation149_spill] sm:$0xff]  ;;  %v21267_v42 = vld [vmem:[#allocation154_spill] sm:$0xff] }
 0x21f   : > { %v3459_v25 = vadd.f32 %v3428_v5, %v18465_v30  ;;  %v3411_v8 = vpop.f32.mrf.mxu1  ;;  %v3461_v55 = vadd.f32 %v3392_v45, %v18471_v2  ;;  %4044 = vmatpush.bf16.msrb.mxu1 %v21252_v17  ;;  %v21256_v2 = vld [vmem:[#allocation143_spill] sm:$0xff]  ;;  %v21261_v5 = vld [vmem:[#allocation148_spill] sm:$0xff] }
 0x220   : > { %v3462_v43 = vadd.f32 %v3411_v8, %v18474_v61  ;;  %v3476_v37 = vmax.f32 %v18564_v41, %v3460_v33  ;;  %4063 = vmatpush.bf16.msrb.mxu2 %v21253_v4  ;;  %4082 = vmatpush.bf16.msrb.mxu3 %v21254_v22  ;;  %v21257_v61 = vld [vmem:[#allocation144_spill] sm:$0xff]  ;;  %v21268_v17 = vld [vmem:[#allocation155_spill] sm:$0xff] }
 0x221   : > { %v3475_v11 = vmax.f32 %v18561_v20, %v3459_v25  ;;  %v3477_v30 = vmax.f32 %v18567_v16, %v3461_v55 }
 0x222   : > { %v3478_v46 = vmax.f32 %v18570_v57, %v3462_v43  ;;  %4026 = vmatpush.bf16.msrb.mxu0 %v21255_v6  ;;  %v21269_v6 = vld [vmem:[#allocation156_spill] sm:$0xff] }
 0x223   : > { %4045 = vmatpush.bf16.msrb.mxu1 %v21256_v2  ;;  %v21270_v2 = vld [vmem:[#allocation157_spill] sm:$0xff] }
 0x224   : > { %4064 = vmatpush.bf16.msrb.mxu2 %v21257_v61  ;;  %4083 = vmatpush.bf16.msrb.mxu3 %v21258_v52 }
 0x225   : > { %v3449_v20 = vpop.f32.mrf.mxu3 }
 0x226   : > { %v3430_v50 = vpop.f32.mrf.mxu2  ;;  %v3464_v15 = vadd.f32 %v3449_v20, %v18488_v48  ;;  %v3395_v10 = vpop.f32.mrf.mxu0  ;;  %4027 = vmatpush.bf16.msrb.mxu0 %v21259_v36  ;;  %v21276_v20 = vld [vmem:[#allocation161_spill] sm:$0xff] }
 0x227   : > { %v3463_v41 = vadd.f32 %v3430_v50, %v18485_v24  ;;  %v3414_v23 = vpop.f32.mrf.mxu1  ;;  %v3465_v16 = vadd.f32 %v3395_v10, %v18491_v34  ;;  %4046 = vmatpush.bf16.msrb.mxu1 %v21260_v0  ;;  %v21273_v50 = vld [vmem:[#allocation158_spill] sm:$0xff] }
 0x228   : > { %v3466_v57 = vadd.f32 %v3414_v23, %v18494_v54  ;;  %v3480_v27 = vmax.f32 %v18588_v3, %v3464_v15  ;;  %4065 = vmatpush.bf16.msrb.mxu2 %v21261_v5  ;;  %4084 = vmatpush.bf16.msrb.mxu3 %v21262_v53  ;;  %v21264_v3 = vld [vmem:[#allocation151_spill] sm:$0xff]  ;;  %v21282_v23 = vld [vmem:[#allocation165_spill] sm:$0xff]  ;;  %v21285_v5 = vld [vmem:[#allocation168_spill] sm:$0xff] }
 0x229   : > { %v3479_v26 = vmax.f32 %v18585_v31, %v3463_v41  ;;  %v3481_v24 = vmax.f32 %v18591_v60, %v3465_v16  ;;  %11792 = vmatmul.msk.bf16.gmra.mxu0 %vm439_vm2, %v18582_v9  ;;  %11794 = vmatmul.msk.bf16.gmra.mxu1 %vm439_vm2, %v18582_v9  ;;  %v21263_v31 = vld [vmem:[#allocation150_spill] sm:$0xff]  ;;  %v21265_v60 = vld [vmem:[#allocation152_spill] sm:$0xff]  ;;  %v21286_v53 = vld [vmem:[#allocation169_spill] sm:$0xff] }
 0x22a   : > { %v3482_v48 = vmax.f32 %v18594_v39, %v3466_v57  ;;  %11798 = vmatmul.msk.bf16.gmra.mxu3 %vm439_vm2, %v18582_v9  ;;  %4028 = vmatpush.bf16.msrb.mxu0 %v21263_v31  ;;  %v21266_v39 = vld [vmem:[#allocation153_spill] sm:$0xff]  ;;  %v21287_v31 = vld [vmem:[#allocation170_spill] sm:$0xff] }
 0x22b   : > { %11796 = vmatmul.msk.bf16.gmra.mxu2 %vm439_vm2, %v18582_v9  ;;  %v18690_v34 = vmax.f32 %v3473_v35, %v3481_v24  ;;  %4047 = vmatpush.bf16.msrb.mxu1 %v21264_v3  ;;  %v11800_v24 = vld [vmem:[%s15078_s16 + $0xa1] sm:$0xff]  ;;  %v21288_v3 = vld [vmem:[#allocation171_spill] sm:$0xff] }
 0x22c   : > { %v18692_v54 = vmax.f32 %v3474_v28, %v3482_v48  ;;  %4066 = vmatpush.bf16.msrb.mxu2 %v21265_v60  ;;  %4085 = vmatpush.bf16.msrb.mxu3 %v21266_v39  ;;  %v11801_v48 = vld [vmem:[%s15078_s16 + $0xa9] sm:$0xff]  ;;  %v21289_v60 = vld [vmem:[#allocation172_spill] sm:$0xff]  ;;  %v21290_v39 = vld [vmem:[#allocation173_spill] sm:$0xff] }
 0x22d   : > { %v3452_v33 = vpop.f32.mrf.mxu3 }
 0x22e   : > { %v3433_v25 = vpop.f32.mrf.mxu2  ;;  %v3468_v8 = vadd.f32 %v3452_v33, %v18516_v19  ;;  %v3397_v55 = vpop.f32.mrf.mxu0  ;;  %4029 = vmatpush.bf16.msrb.mxu0 %v21267_v42  ;;  %v21294_v42 = vld [vmem:[#allocation177_spill] sm:$0xff] }
 0x22f   : > { %v3467_v45 = vadd.f32 %v3433_v25, %v18513_v51  ;;  %v3416_v43 = vpop.f32.mrf.mxu1  ;;  %v3469_v35 = vadd.f32 %v3397_v55, %v18519_v44  ;;  %4048 = vmatpush.bf16.msrb.mxu1 %v21268_v17  ;;  %v21295_v17 = vld [vmem:[#allocation178_spill] sm:$0xff] }
 0x230   : > { %v3470_v28 = vadd.f32 %v3416_v43, %v18522_v56  ;;  %v3484_v22 = vmax.f32 %v18616_v62, %v3468_v8  ;;  %4067 = vmatpush.bf16.msrb.mxu2 %v21269_v6  ;;  %4086 = vmatpush.bf16.msrb.mxu3 %v21270_v2  ;;  %v21275_v62 = vld [vmem:[#allocation160_spill] sm:$0xff]  ;;  %v21291_v43 = vld [vmem:[#allocation174_spill] sm:$0xff]  ;;  %v21298_v6 = vld [vmem:[#allocation181_spill] sm:$0xff] }
 0x231   : > { %v3483_v4 = vmax.f32 %v18613_v12, %v3467_v45  ;;  %v3485_v51 = vmax.f32 %v18619_v21, %v3469_v35  ;;  %v21274_v12 = vld [vmem:[#allocation159_spill] sm:$0xff]  ;;  %v18768_v45 = vpack.c.bf16 %v11801_v48, %v11800_v24 }
 0x232   : > { %v3486_v19 = vmax.f32 %v18622_v59, %v3470_v28  ;;  %v18712_v44 = vmax.f32 %v3476_v37, %v3484_v22  ;;  %4030 = vmatpush.bf16.msrb.mxu0 %v21273_v50  ;;  %v21292_v35 = vld [vmem:[#allocation175_spill] sm:$0xff]  ;;  %v21293_v28 = vld [vmem:[#allocation176_spill] sm:$0xff] }
 0x233   : > { %v18710_v61 = vmax.f32 %v3475_v11, %v3483_v4  ;;  %v18714_v56 = vmax.f32 %v3477_v30, %v3485_v51  ;;  %4049 = vmatpush.bf16.msrb.mxu1 %v21274_v12  ;;  %v21296_v4 = vld [vmem:[#allocation179_spill] sm:$0xff]  ;;  %v21297_v22 = vld [vmem:[#allocation180_spill] sm:$0xff]  ;;  %v21299_v12 = vld [vmem:[#allocation182_spill] sm:$0xff] }
 0x234   : > { %v18716_v52 = vmax.f32 %v3478_v46, %v3486_v19  ;;  %4068 = vmatpush.bf16.msrb.mxu2 %v21275_v62  ;;  %4087 = vmatpush.bf16.msrb.mxu3 %v21276_v20  ;;  %v21300_v62 = vld [vmem:[#allocation183_spill] sm:$0xff]  ;;  %v21301_v20 = vld [vmem:[#allocation184_spill] sm:$0xff] }
 0x235   : > { %21271 = vst [vmem:[#allocation6_spill] sm:$0xff] %v18714_v56  ;;  %v3454_v21 = vpop.f32.mrf.mxu3 }
 0x236   : > { %21272 = vst [vmem:[#allocation7_spill] sm:$0xff] %v18716_v52  ;;  %v3435_v41 = vpop.f32.mrf.mxu2  ;;  %v3472_v11 = vadd.f32 %v3454_v21, %v18540_v38  ;;  %v18724_v37 = vpop.f32.mrf.mxu0  ;;  %v21279_v38 = vld [vmem:[#allocation162_spill] sm:$0xff] }
 0x237   : > { %v3471_v59 = vadd.f32 %v3435_v41, %v18537_v63  ;;  %v18726_v30 = vpop.f32.mrf.mxu1  ;;  %v21302_v41 = vld [vmem:[#allocation185_spill] sm:$0xff]  ;;  %v21303_v21 = vld [vmem:[#allocation186_spill] sm:$0xff] }
 0x238   : > { %v3488_v15 = vmax.f32 %v18636_v1, %v3472_v11  ;;  %v21281_v1 = vld [vmem:[#allocation164_spill] sm:$0xff] }
 0x239   : > { %v3487_v46 = vmax.f32 %v18633_v13, %v3471_v59  ;;  %11802 = vmatmul.msk.bf16.vlgmr.msra.gmra.mxu0 %vm439_vm2, %v18390_v58  ;;  %11804 = vmatmul.msk.bf16.vlgmr.msra.gmra.mxu1 %vm439_vm2, %v18390_v58  ;;  %v21280_v13 = vld [vmem:[#allocation163_spill] sm:$0xff]  ;;  %v21305_v11 = vld [vmem:[#allocation188_spill] sm:$0xff] }
 0x23a   : > { %v18736_v63 = vmax.f32 %v3480_v27, %v3488_v15  ;;  %11808 = vmatmul.msk.bf16.vlgmr.msra.gmra.mxu3 %vm439_vm2, %v18390_v58  ;;  %4124 = vmatpush.bf16.msra.mxu0 %v21279_v38  ;;  %v21284_v27 = vld [vmem:[#allocation167_spill] sm:$0xff] }
 0x23b   : > { %v18734_v10 = vmax.f32 %v3479_v26, %v3487_v46  ;;  %11806 = vmatmul.msk.bf16.vlgmr.msra.gmra.mxu2 %vm439_vm2, %v18390_v58  ;;  %4143 = vmatpush.bf16.msra.mxu1 %v21280_v13  ;;  %v21283_v26 = vld [vmem:[#allocation166_spill] sm:$0xff]  ;;  %v21304_v59 = vld [vmem:[#allocation187_spill] sm:$0xff]  ;;  %v21306_v46 = vld [vmem:[#allocation189_spill] sm:$0xff] }
 0x23c   : > { %21278 = vst [vmem:[#allocation9_spill] sm:$0xff] %v18736_v63  ;;  %4162 = vmatpush.bf16.msra.mxu2 %v21281_v1  ;;  %4181 = vmatpush.bf16.msra.mxu3 %v21282_v23  ;;  %v21307_v23 = vld [vmem:[#allocation190_spill] sm:$0xff] }
 0x23d   : > { %21277 = vst [vmem:[#allocation8_spill] sm:$0xff] %v18734_v10  ;;  %v18748_v57 = vpop.f32.mrf.mxu3 }
 0x23e   : > { %v18746_v16 = vpop.f32.mrf.mxu2  ;;  %v18750_v36 = vpop.f32.mrf.mxu0  ;;  %4125 = vmatpush.bf16.msra.mxu0 %v21283_v26  ;;  %v21308_v26 = vld [vmem:[#allocation191_spill] sm:$0xff] }
 0x23f   : > { %v18752_v0 = vpop.f32.mrf.mxu1  ;;  %4144 = vmatpush.bf16.msra.mxu1 %v21284_v27  ;;  %v21309_v27 = vld [vmem:[#allocation192_spill] sm:$0xff] }
 0x240   : > { %4163 = vmatpush.bf16.msra.mxu2 %v21285_v5  ;;  %4182 = vmatpush.bf16.msra.mxu3 %v21286_v53  ;;  %v21310_v5 = vld [vmem:[#allocation193_spill] sm:$0xff] }
 0x242   : > { %4126 = vmatpush.bf16.msra.mxu0 %v21287_v31 }
 0x243   : > { %4145 = vmatpush.bf16.msra.mxu1 %v21288_v3  ;;  %v21311_v3 = vld [vmem:[#allocation194_spill] sm:$0xff] }
 0x244   : > { %4164 = vmatpush.bf16.msra.mxu2 %v21289_v60  ;;  %4183 = vmatpush.bf16.msra.mxu3 %v21290_v39  ;;  %v21312_v60 = vld [vmem:[#allocation195_spill] sm:$0xff]  ;;  %v21314_v39 = vld [vmem:[#allocation197_spill] sm:$0xff] }
 0x245   : > { %v18766_v33 = vpop.f32.mrf.mxu3 }
 0x246   : > { %v18764_v25 = vpop.f32.mrf.mxu2  ;;  %v18770_v8 = vpop.f32.mrf.mxu0  ;;  %4127 = vmatpush.bf16.msra.mxu0 %v21291_v43  ;;  %v21315_v43 = vld [vmem:[#allocation198_spill] sm:$0xff] }
 0x247   : > { %v18772_v55 = vpop.f32.mrf.mxu1  ;;  %4146 = vmatpush.bf16.msra.mxu1 %v21292_v35  ;;  %v21316_v35 = vld [vmem:[#allocation199_spill] sm:$0xff] }
 0x248   : > { %4165 = vmatpush.bf16.msra.mxu2 %v21293_v28  ;;  %4184 = vmatpush.bf16.msra.mxu3 %v21294_v42  ;;  %v21317_v28 = vld [vmem:[#allocation200_spill] sm:$0xff]  ;;  %v21318_v42 = vld [vmem:[#allocation201_spill] sm:$0xff] }
 0x249   : > { %11803 = vmatmul.msk.bf16.gmra.mxu0 %vm439_vm2, %v18768_v45  ;;  %11805 = vmatmul.msk.bf16.gmra.mxu1 %vm439_vm2, %v18768_v45 }
 0x24a   : > { %11809 = vmatmul.msk.bf16.gmra.mxu3 %vm439_vm2, %v18768_v45  ;;  %4128 = vmatpush.bf16.msra.mxu0 %v21295_v17 }
 0x24b   : > { %11807 = vmatmul.msk.bf16.gmra.mxu2 %vm439_vm2, %v18768_v45  ;;  %4147 = vmatpush.bf16.msra.mxu1 %v21296_v4 }
 0x24c   : > { %4166 = vmatpush.bf16.msra.mxu2 %v21297_v22  ;;  %4185 = vmatpush.bf16.msra.mxu3 %v21298_v6 }
 0x24d   : > { %v18792_v51 = vpop.f32.mrf.mxu3 }
 0x24e   : > { %v18790_v2 = vpop.f32.mrf.mxu2  ;;  %v18794_v19 = vpop.f32.mrf.mxu0  ;;  %4129 = vmatpush.bf16.msra.mxu0 %v21299_v12  ;;  %v21319_v12 = vld [vmem:[#allocation202_spill] sm:$0xff] }
 0x24f   : > { %v18796_v50 = vpop.f32.mrf.mxu1  ;;  %4148 = vmatpush.bf16.msra.mxu1 %v21300_v62  ;;  %v21320_v62 = vld [vmem:[#allocation203_spill] sm:$0xff] }
 0x250   : > { %4167 = vmatpush.bf16.msra.mxu2 %v21301_v20  ;;  %4186 = vmatpush.bf16.msra.mxu3 %v21302_v41  ;;  %v21321_v20 = vld [vmem:[#allocation204_spill] sm:$0xff]  ;;  %v21322_v41 = vld [vmem:[#allocation205_spill] sm:$0xff] }
 0x252   : > { %4130 = vmatpush.bf16.msra.mxu0 %v21303_v21  ;;  %v21323_v21 = vld [vmem:[#allocation206_spill] sm:$0xff] }
 0x253   : > { %4149 = vmatpush.bf16.msra.mxu1 %v21304_v59  ;;  %v21324_v59 = vld [vmem:[#allocation207_spill] sm:$0xff] }
 0x254   : > { %4168 = vmatpush.bf16.msra.mxu2 %v21305_v11  ;;  %4187 = vmatpush.bf16.msra.mxu3 %v21306_v46  ;;  %v21325_v11 = vld [vmem:[#allocation208_spill] sm:$0xff]  ;;  %v21326_v46 = vld [vmem:[#allocation209_spill] sm:$0xff] }
 0x255   : > { %v18808_v38 = vpop.f32.mrf.mxu3 }
 0x256   : > { %v18806_v15 = vpop.f32.mrf.mxu2  ;;  %v18810_v13 = vpop.f32.mrf.mxu0 }
 0x257   : > { %v18812_v1 = vpop.f32.mrf.mxu1 }
 0x259   : > { %11810 = vmatmul.msk.bf16.vlgmr.msrb.gmra.mxu0 %vm439_vm2, %v18390_v58  ;;  %11812 = vmatmul.msk.bf16.vlgmr.msrb.gmra.mxu1 %vm439_vm2, %v18390_v58 }
 0x25a   : > { %11816 = vmatmul.msk.bf16.vlgmr.msrb.gmra.mxu3 %vm439_vm2, %v18390_v58  ;;  %4216 = vmatpush.bf16.msrb.mxu0 %v21307_v23 }
 0x25b   : > { %11814 = vmatmul.msk.bf16.vlgmr.msrb.gmra.mxu2 %vm439_vm2, %v18390_v58  ;;  %4235 = vmatpush.bf16.msrb.mxu1 %v21308_v26  ;;  %v21313_v58 = vld [vmem:[#allocation196_spill] sm:$0xff] }
 0x25c   : > { %4254 = vmatpush.bf16.msrb.mxu2 %v21309_v27  ;;  %4273 = vmatpush.bf16.msrb.mxu3 %v21310_v5 }
 0x25d   : > { %v18828_v24 = vpop.f32.mrf.mxu3 }
 0x25e   : > { %v18826_v53 = vpop.f32.mrf.mxu2  ;;  %v18830_v48 = vpop.f32.mrf.mxu0  ;;  %4217 = vmatpush.bf16.msrb.mxu0 %v21311_v3  ;;  %v21327_v3 = vld [vmem:[#allocation210_spill] sm:$0xff] }
 0x25f   : > { %v18832_v31 = vpop.f32.mrf.mxu1  ;;  %4236 = vmatpush.bf16.msrb.mxu1 %v21312_v60  ;;  %v21328_v60 = vld [vmem:[#allocation211_spill] sm:$0xff] }
 0x260   : > { %4255 = vmatpush.bf16.msrb.mxu2 %v21313_v58  ;;  %4274 = vmatpush.bf16.msrb.mxu3 %v21314_v39  ;;  %v21329_v58 = vld [vmem:[#allocation212_spill] sm:$0xff]  ;;  %v21330_v39 = vld [vmem:[#allocation213_spill] sm:$0xff] }
 0x262   : > { %4218 = vmatpush.bf16.msrb.mxu0 %v21315_v43  ;;  %v21331_v43 = vld [vmem:[#allocation214_spill] sm:$0xff] }
 0x263   : > { %4237 = vmatpush.bf16.msrb.mxu1 %v21316_v35  ;;  %v21332_v35 = vld [vmem:[#allocation215_spill] sm:$0xff] }
 0x264   : > { %4256 = vmatpush.bf16.msrb.mxu2 %v21317_v28  ;;  %4275 = vmatpush.bf16.msrb.mxu3 %v21318_v42  ;;  %v21333_v28 = vld [vmem:[#allocation216_spill] sm:$0xff]  ;;  %v21334_v42 = vld [vmem:[#allocation217_spill] sm:$0xff] }
 0x265   : > { %v18844_v4 = vpop.f32.mrf.mxu3 }
 0x266   : > { %v18842_v17 = vpop.f32.mrf.mxu2  ;;  %v18846_v22 = vpop.f32.mrf.mxu0  ;;  %4219 = vmatpush.bf16.msrb.mxu0 %v21319_v12 }
 0x267   : > { %v18848_v6 = vpop.f32.mrf.mxu1  ;;  %4238 = vmatpush.bf16.msrb.mxu1 %v21320_v62 }
 0x268   : > { %4257 = vmatpush.bf16.msrb.mxu2 %v21321_v20  ;;  %4276 = vmatpush.bf16.msrb.mxu3 %v21322_v41 }
 0x269   : > { %11811 = vmatmul.msk.bf16.gmra.mxu0 %vm439_vm2, %v18768_v45  ;;  %11813 = vmatmul.msk.bf16.gmra.mxu1 %vm439_vm2, %v18768_v45 }
 0x26a   : > { %11817 = vmatmul.msk.bf16.gmra.mxu3 %vm439_vm2, %v18768_v45  ;;  %4220 = vmatpush.bf16.msrb.mxu0 %v21323_v21 }
 0x26b   : > { %11815 = vmatmul.msk.bf16.gmra.mxu2 %vm439_vm2, %v18768_v45  ;;  %4239 = vmatpush.bf16.msrb.mxu1 %v21324_v59 }
 0x26c   : > { %4258 = vmatpush.bf16.msrb.mxu2 %v21325_v11  ;;  %4277 = vmatpush.bf16.msrb.mxu3 %v21326_v46  ;;  %v21335_v11 = vld [vmem:[#allocation218_spill] sm:$0xff]  ;;  %v21336_v46 = vld [vmem:[#allocation219_spill] sm:$0xff] }
 0x26d   : > { %v18868_v26 = vpop.f32.mrf.mxu3 }
 0x26e   : > { %v18866_v23 = vpop.f32.mrf.mxu2  ;;  %v18870_v27 = vpop.f32.mrf.mxu0  ;;  %4221 = vmatpush.bf16.msrb.mxu0 %v21327_v3 }
 0x26f   : > { %v18872_v5 = vpop.f32.mrf.mxu1  ;;  %4240 = vmatpush.bf16.msrb.mxu1 %v21328_v60 }
 0x270   : > { %4259 = vmatpush.bf16.msrb.mxu2 %v21329_v58  ;;  %4278 = vmatpush.bf16.msrb.mxu3 %v21330_v39 }
 0x272   : > { %4222 = vmatpush.bf16.msrb.mxu0 %v21331_v43 }
 0x273   : > { %4241 = vmatpush.bf16.msrb.mxu1 %v21332_v35 }
 0x274   : > { %4260 = vmatpush.bf16.msrb.mxu2 %v21333_v28  ;;  %4279 = vmatpush.bf16.msrb.mxu3 %v21334_v42 }
 0x275   : > { %v18884_v62 = vpop.f32.mrf.mxu3 }
 0x276   : > { %v18882_v12 = vpop.f32.mrf.mxu2  ;;  %v3748_v20 = vpop.f32.mrf.mxu0 }
 0x277   : > { %v3767_v41 = vpop.f32.mrf.mxu1  ;;  %v18887_v21 = vadd.f32 %v3748_v20, %v18724_v37  ;;  %v21337_v37 = vld [vmem:[#allocation220_spill] sm:$0xff]  ;;  %v21339_v20 = vld [vmem:[#allocation222_spill] sm:$0xff] }
 0x278   : > { %v18890_v59 = vadd.f32 %v3767_v41, %v18726_v30  ;;  %v21338_v30 = vld [vmem:[#allocation221_spill] sm:$0xff]  ;;  %v21340_v41 = vld [vmem:[#allocation223_spill] sm:$0xff] }
 0x279   : > { %11821 = vmatmul.msk.bf16.vlgmr.msra.gmra.mxu0 %vm439_vm2, %v18582_v9  ;;  %11823 = vmatmul.msk.bf16.vlgmr.msra.gmra.mxu1 %vm439_vm2, %v18582_v9 }
 0x27a   : > { %11827 = vmatmul.msk.bf16.vlgmr.msra.gmra.mxu3 %vm439_vm2, %v18582_v9  ;;  %4316 = vmatpush.bf16.msra.mxu0 %v21335_v11  ;;  %v21341_v11 = vld [vmem:[#allocation224_spill] sm:$0xff] }
 0x27b   : > { %11825 = vmatmul.msk.bf16.vlgmr.msra.gmra.mxu2 %vm439_vm2, %v18582_v9  ;;  %4335 = vmatpush.bf16.msra.mxu1 %v21336_v46  ;;  %v21342_v46 = vld [vmem:[#allocation225_spill] sm:$0xff] }
 0x27c   : > { %4354 = vmatpush.bf16.msra.mxu2 %v21337_v37  ;;  %4373 = vmatpush.bf16.msra.mxu3 %v21338_v30  ;;  %v11820_v37 = vld [vmem:[%s15078_s16 + $0xd1] sm:$0xff] }
 0x27d   : > { %v3805_v60 = vpop.f32.mrf.mxu3  ;;  %v21344_v30 = vld [vmem:[#allocation227_spill] sm:$0xff] }
 0x27e   : > { %v3786_v3 = vpop.f32.mrf.mxu2  ;;  %v18908_v39 = vadd.f32 %v3805_v60, %v18748_v57  ;;  %v3750_v43 = vpop.f32.mrf.mxu0  ;;  %4317 = vmatpush.bf16.msra.mxu0 %v21339_v20  ;;  %v21343_v57 = vld [vmem:[#allocation226_spill] sm:$0xff] }
 0x27f   : > { %v18905_v58 = vadd.f32 %v3786_v3, %v18746_v16  ;;  %v3769_v35 = vpop.f32.mrf.mxu1  ;;  %v18911_v28 = vadd.f32 %v3750_v43, %v18750_v36  ;;  %4336 = vmatpush.bf16.msra.mxu1 %v21340_v41  ;;  %v11819_v16 = vld [vmem:[%s15078_s16 + $0xc9] sm:$0xff]  ;;  %v21345_v3 = vld [vmem:[#allocation228_spill] sm:$0xff]  ;;  %v21346_v36 = vld [vmem:[#allocation229_spill] sm:$0xff] }
 0x280   : > { %v18914_v42 = vadd.f32 %v3769_v35, %v18752_v0  ;;  %4355 = vmatpush.bf16.msra.mxu2 %v21341_v11  ;;  %4374 = vmatpush.bf16.msra.mxu3 %v21342_v46  ;;  %v18926_v43 = vpack.c.bf16 %v11820_v37, %v11819_v16  ;;  %v21349_v16 = vld [vmem:[#allocation232_spill] sm:$0xff]  ;;  %v21350_v37 = vld [vmem:[#allocation233_spill] sm:$0xff] }
 0x282   : > { %4318 = vmatpush.bf16.msra.mxu0 %v21343_v57 }
 0x283   : > { %4337 = vmatpush.bf16.msra.mxu1 %v21344_v30  ;;  %v21347_v30 = vld [vmem:[#allocation230_spill] sm:$0xff] }
 0x284   : > { %4356 = vmatpush.bf16.msra.mxu2 %v21345_v3  ;;  %4375 = vmatpush.bf16.msra.mxu3 %v21346_v36  ;;  %v21348_v3 = vld [vmem:[#allocation231_spill] sm:$0xff] }
 0x285   : > { %v3807_v60 = vpop.f32.mrf.mxu3 }
 0x286   : > { %v3788_v0 = vpop.f32.mrf.mxu2  ;;  %v18932_v20 = vadd.f32 %v3807_v60, %v18766_v33  ;;  %v3753_v41 = vpop.f32.mrf.mxu0  ;;  %4319 = vmatpush.bf16.msra.mxu0 %v21347_v30  ;;  %v21352_v33 = vld [vmem:[#allocation235_spill] sm:$0xff] }
 0x287   : > { %v18929_v35 = vadd.f32 %v3788_v0, %v18764_v25  ;;  %v3772_v11 = vpop.f32.mrf.mxu1  ;;  %v18935_v46 = vadd.f32 %v3753_v41, %v18770_v8  ;;  %4338 = vmatpush.bf16.msra.mxu1 %v21348_v3  ;;  %v21351_v25 = vld [vmem:[#allocation234_spill] sm:$0xff]  ;;  %v21353_v8 = vld [vmem:[#allocation236_spill] sm:$0xff] }
 0x288   : > { %v18938_v57 = vadd.f32 %v3772_v11, %v18772_v55  ;;  %4357 = vmatpush.bf16.msra.mxu2 %v21349_v16  ;;  %4376 = vmatpush.bf16.msra.mxu3 %v21350_v37  ;;  %v21354_v55 = vld [vmem:[#allocation237_spill] sm:$0xff]  ;;  %v21355_v37 = vld [vmem:[#allocation238_spill] sm:$0xff] }
 0x289   : > { %11822 = vmatmul.msk.bf16.gmra.mxu0 %vm439_vm2, %v18926_v43  ;;  %11824 = vmatmul.msk.bf16.gmra.mxu1 %vm439_vm2, %v18926_v43 }
 0x28a   : > { %11828 = vmatmul.msk.bf16.gmra.mxu3 %vm439_vm2, %v18926_v43  ;;  %4320 = vmatpush.bf16.msra.mxu0 %v21351_v25  ;;  %v21356_v25 = vld [vmem:[#allocation239_spill] sm:$0xff] }
 0x28b   : > { %11826 = vmatmul.msk.bf16.gmra.mxu2 %vm439_vm2, %v18926_v43  ;;  %4339 = vmatpush.bf16.msra.mxu1 %v21352_v33  ;;  %v21357_v33 = vld [vmem:[#allocation240_spill] sm:$0xff] }
 0x28c   : > { %4358 = vmatpush.bf16.msra.mxu2 %v21353_v8  ;;  %4377 = vmatpush.bf16.msra.mxu3 %v21354_v55  ;;  %v21358_v8 = vld [vmem:[#allocation241_spill] sm:$0xff]  ;;  %v21361_v55 = vld [vmem:[#allocation244_spill] sm:$0xff] }
 0x28d   : > { %v3810_v0 = vpop.f32.mrf.mxu3 }
 0x28e   : > { %v3791_v36 = vpop.f32.mrf.mxu2  ;;  %v18960_v41 = vadd.f32 %v3810_v0, %v18792_v51  ;;  %v3755_v11 = vpop.f32.mrf.mxu0  ;;  %4321 = vmatpush.bf16.msra.mxu0 %v21355_v37  ;;  %v21360_v51 = vld [vmem:[#allocation243_spill] sm:$0xff] }
 0x28f   : > { %v18957_v60 = vadd.f32 %v3791_v36, %v18790_v2  ;;  %v3774_v30 = vpop.f32.mrf.mxu1  ;;  %v18963_v3 = vadd.f32 %v3755_v11, %v18794_v19  ;;  %4340 = vmatpush.bf16.msra.mxu1 %v21356_v25  ;;  %v21359_v2 = vld [vmem:[#allocation242_spill] sm:$0xff]  ;;  %v21362_v36 = vld [vmem:[#allocation245_spill] sm:$0xff] }
 0x290   : > { %v18966_v16 = vadd.f32 %v3774_v30, %v18796_v50  ;;  %4359 = vmatpush.bf16.msra.mxu2 %v21357_v33  ;;  %4378 = vmatpush.bf16.msra.mxu3 %v21358_v8 }
 0x292   : > { %4322 = vmatpush.bf16.msra.mxu0 %v21359_v2 }
 0x293   : > { %4341 = vmatpush.bf16.msra.mxu1 %v21360_v51 }
 0x294   : > { %4360 = vmatpush.bf16.msra.mxu2 %v21361_v55  ;;  %4379 = vmatpush.bf16.msra.mxu3 %v21362_v36 }
 0x295   : > { %v3812_v0 = vpop.f32.mrf.mxu3 }
 0x296   : > { %v3793_v19 = vpop.f32.mrf.mxu2  ;;  %v18980_v11 = vadd.f32 %v3812_v0, %v18808_v38  ;;  %v3840_v30 = vpop.f32.mrf.mxu0  ;;  %v21364_v38 = vld [vmem:[#allocation247_spill] sm:$0xff] }
 0x297   : > { %v18977_v50 = vadd.f32 %v3793_v19, %v18806_v15  ;;  %v3859_v37 = vpop.f32.mrf.mxu1  ;;  %v18983_v25 = vadd.f32 %v3840_v30, %v18810_v13  ;;  %v21363_v15 = vld [vmem:[#allocation246_spill] sm:$0xff]  ;;  %v21365_v13 = vld [vmem:[#allocation248_spill] sm:$0xff] }
 0x298   : > { %v18986_v33 = vadd.f32 %v3859_v37, %v18812_v1  ;;  %v21366_v1 = vld [vmem:[#allocation249_spill] sm:$0xff]  ;;  %v21367_v30 = vld [vmem:[#allocation250_spill] sm:$0xff]  ;;  %v21368_v37 = vld [vmem:[#allocation251_spill] sm:$0xff] }
 0x299   : > { %11829 = vmatmul.msk.bf16.vlgmr.msrb.gmra.mxu0 %vm439_vm2, %v18582_v9  ;;  %11831 = vmatmul.msk.bf16.vlgmr.msrb.gmra.mxu1 %vm439_vm2, %v18582_v9 }
 0x29a   : > { %11835 = vmatmul.msk.bf16.vlgmr.msrb.gmra.mxu3 %vm439_vm2, %v18582_v9  ;;  %4408 = vmatpush.bf16.msrb.mxu0 %v21363_v15  ;;  %v21369_v15 = vld [vmem:[#allocation252_spill] sm:$0xff] }
 0x29b   : > { %11833 = vmatmul.msk.bf16.vlgmr.msrb.gmra.mxu2 %vm439_vm2, %v18582_v9  ;;  %4427 = vmatpush.bf16.msrb.mxu1 %v21364_v38  ;;  %v21370_v38 = vld [vmem:[#allocation253_spill] sm:$0xff] }
 0x29c   : > { %4446 = vmatpush.bf16.msrb.mxu2 %v21365_v13  ;;  %4465 = vmatpush.bf16.msrb.mxu3 %v21366_v1  ;;  %v21373_v13 = vld [vmem:[#allocation256_spill] sm:$0xff]  ;;  %v21374_v1 = vld [vmem:[#allocation257_spill] sm:$0xff] }
 0x29d   : > { %v3897_v2 = vpop.f32.mrf.mxu3 }
 0x29e   : > { %v3878_v8 = vpop.f32.mrf.mxu2  ;;  %v19004_v55 = vadd.f32 %v3897_v2, %v18828_v24  ;;  %v3842_v36 = vpop.f32.mrf.mxu0  ;;  %4409 = vmatpush.bf16.msrb.mxu0 %v21367_v30  ;;  %v21372_v24 = vld [vmem:[#allocation255_spill] sm:$0xff] }
 0x29f   : > { %v19001_v51 = vadd.f32 %v3878_v8, %v18826_v53  ;;  %v3861_v19 = vpop.f32.mrf.mxu1  ;;  %v19007_v9 = vadd.f32 %v3842_v36, %v18830_v48  ;;  %4428 = vmatpush.bf16.msrb.mxu1 %v21368_v37  ;;  %v21371_v53 = vld [vmem:[#allocation254_spill] sm:$0xff] }
 0x2a0   : > { %v19010_v0 = vadd.f32 %v3861_v19, %v18832_v31  ;;  %4447 = vmatpush.bf16.msrb.mxu2 %v21369_v15  ;;  %4466 = vmatpush.bf16.msrb.mxu3 %v21370_v38  ;;  %v21375_v15 = vld [vmem:[#allocation258_spill] sm:$0xff]  ;;  %v21376_v38 = vld [vmem:[#allocation259_spill] sm:$0xff] }
 0x2a2   : > { %4410 = vmatpush.bf16.msrb.mxu0 %v21371_v53  ;;  %v21377_v53 = vld [vmem:[#allocation260_spill] sm:$0xff] }
 0x2a3   : > { %4429 = vmatpush.bf16.msrb.mxu1 %v21372_v24  ;;  %v21378_v24 = vld [vmem:[#allocation261_spill] sm:$0xff] }
 0x2a4   : > { %4448 = vmatpush.bf16.msrb.mxu2 %v21373_v13  ;;  %4467 = vmatpush.bf16.msrb.mxu3 %v21374_v1 }
 0x2a5   : > { %v3899_v8 = vpop.f32.mrf.mxu3 }
 0x2a6   : > { %v3880_v48 = vpop.f32.mrf.mxu2  ;;  %v19024_v2 = vadd.f32 %v3899_v8, %v18844_v4  ;;  %v3845_v36 = vpop.f32.mrf.mxu0  ;;  %4411 = vmatpush.bf16.msrb.mxu0 %v21375_v15  ;;  %v21380_v4 = vld [vmem:[#allocation263_spill] sm:$0xff] }
 0x2a7   : > { %v19021_v31 = vadd.f32 %v3880_v48, %v18842_v17  ;;  %v3864_v19 = vpop.f32.mrf.mxu1  ;;  %v19027_v30 = vadd.f32 %v3845_v36, %v18846_v22  ;;  %4430 = vmatpush.bf16.msrb.mxu1 %v21376_v38  ;;  %v21379_v17 = vld [vmem:[#allocation262_spill] sm:$0xff]  ;;  %v21381_v22 = vld [vmem:[#allocation264_spill] sm:$0xff] }
 0x2a8   : > { %v19030_v37 = vadd.f32 %v3864_v19, %v18848_v6  ;;  %4449 = vmatpush.bf16.msrb.mxu2 %v21377_v53  ;;  %4468 = vmatpush.bf16.msrb.mxu3 %v21378_v24  ;;  %v21382_v6 = vld [vmem:[#allocation265_spill] sm:$0xff]  ;;  %v21383_v53 = vld [vmem:[#allocation266_spill] sm:$0xff]  ;;  %v21384_v24 = vld [vmem:[#allocation267_spill] sm:$0xff] }
 0x2a9   : > { %11830 = vmatmul.msk.bf16.gmra.mxu0 %vm439_vm2, %v18926_v43  ;;  %11832 = vmatmul.msk.bf16.gmra.mxu1 %vm439_vm2, %v18926_v43 }
 0x2aa   : > { %11836 = vmatmul.msk.bf16.gmra.mxu3 %vm439_vm2, %v18926_v43  ;;  %4412 = vmatpush.bf16.msrb.mxu0 %v21379_v17  ;;  %v21385_v17 = vld [vmem:[#allocation268_spill] sm:$0xff] }
 0x2ab   : > { %11834 = vmatmul.msk.bf16.gmra.mxu2 %vm439_vm2, %v18926_v43  ;;  %4431 = vmatpush.bf16.msrb.mxu1 %v21380_v4  ;;  %v21386_v4 = vld [vmem:[#allocation269_spill] sm:$0xff] }
 0x2ac   : > { %4450 = vmatpush.bf16.msrb.mxu2 %v21381_v22  ;;  %4469 = vmatpush.bf16.msrb.mxu3 %v21382_v6  ;;  %v21389_v22 = vld [vmem:[#allocation272_spill] sm:$0xff]  ;;  %v21390_v6 = vld [vmem:[#allocation273_spill] sm:$0xff] }
 0x2ad   : > { %v3902_v1 = vpop.f32.mrf.mxu3 }
 0x2ae   : > { %v3883_v13 = vpop.f32.mrf.mxu2  ;;  %v19052_v8 = vadd.f32 %v3902_v1, %v18868_v26  ;;  %v3847_v36 = vpop.f32.mrf.mxu0  ;;  %4413 = vmatpush.bf16.msrb.mxu0 %v21383_v53  ;;  %v21388_v26 = vld [vmem:[#allocation271_spill] sm:$0xff] }
 0x2af   : > { %v19049_v48 = vadd.f32 %v3883_v13, %v18866_v23  ;;  %v3866_v19 = vpop.f32.mrf.mxu1  ;;  %v19055_v15 = vadd.f32 %v3847_v36, %v18870_v27  ;;  %4432 = vmatpush.bf16.msrb.mxu1 %v21384_v24  ;;  %v21387_v23 = vld [vmem:[#allocation270_spill] sm:$0xff] }
 0x2b0   : > { %v19058_v38 = vadd.f32 %v3866_v19, %v18872_v5  ;;  %4451 = vmatpush.bf16.msrb.mxu2 %v21385_v17  ;;  %4470 = vmatpush.bf16.msrb.mxu3 %v21386_v4 }
 0x2b2   : > { %4414 = vmatpush.bf16.msrb.mxu0 %v21387_v23 }
 0x2b3   : > { %4433 = vmatpush.bf16.msrb.mxu1 %v21388_v26 }
 0x2b4   : > { %4452 = vmatpush.bf16.msrb.mxu2 %v21389_v22  ;;  %4471 = vmatpush.bf16.msrb.mxu3 %v21390_v6 }
 0x2b5   : > { %v3904_v13 = vpop.f32.mrf.mxu3 }
 0x2b6   : > { %v3885_v27 = vpop.f32.mrf.mxu2  ;;  %v19072_v1 = vadd.f32 %v3904_v13, %v18884_v62  ;;  %v3940_v36 = vpop.f32.mrf.mxu0  ;;  %v21392_v62 = vld [vmem:[#allocation275_spill] sm:$0xff] }
 0x2b7   : > { %v19069_v5 = vadd.f32 %v3885_v27, %v18882_v12  ;;  %v3959_v19 = vpop.f32.mrf.mxu1  ;;  %v19075_v53 = vadd.f32 %v3940_v36, %v18887_v21  ;;  %v21391_v12 = vld [vmem:[#allocation274_spill] sm:$0xff]  ;;  %v21393_v21 = vld [vmem:[#allocation276_spill] sm:$0xff] }
 0x2b8   : > { %v19078_v24 = vadd.f32 %v3959_v19, %v18890_v59  ;;  %v21394_v59 = vld [vmem:[#allocation277_spill] sm:$0xff]  ;;  %v21395_v36 = vld [vmem:[#allocation278_spill] sm:$0xff]  ;;  %v21396_v19 = vld [vmem:[#allocation279_spill] sm:$0xff] }
 0x2b9   : > { %11840 = vmatmul.msk.bf16.vlgmr.msra.gmra.mxu0 %vm439_vm2, %v18768_v45  ;;  %11842 = vmatmul.msk.bf16.vlgmr.msra.gmra.mxu1 %vm439_vm2, %v18768_v45 }
 0x2ba   : > { %11846 = vmatmul.msk.bf16.vlgmr.msra.gmra.mxu3 %vm439_vm2, %v18768_v45  ;;  %4508 = vmatpush.bf16.msra.mxu0 %v21391_v12  ;;  %v21397_v12 = vld [vmem:[#allocation280_spill] sm:$0xff] }
 0x2bb   : > { %11844 = vmatmul.msk.bf16.vlgmr.msra.gmra.mxu2 %vm439_vm2, %v18768_v45  ;;  %4527 = vmatpush.bf16.msra.mxu1 %v21392_v62  ;;  %v21398_v62 = vld [vmem:[#allocation281_spill] sm:$0xff] }
 0x2bc   : > { %4546 = vmatpush.bf16.msra.mxu2 %v21393_v21  ;;  %4565 = vmatpush.bf16.msra.mxu3 %v21394_v59  ;;  %v11839_v21 = vld [vmem:[%s15078_s16 + $0xf9] sm:$0xff]  ;;  %v21400_v59 = vld [vmem:[#allocation283_spill] sm:$0xff] }
 0x2bd   : > { %v3997_v4 = vpop.f32.mrf.mxu3 }
 0x2be   : > { %v3978_v17 = vpop.f32.mrf.mxu2  ;;  %v19096_v26 = vadd.f32 %v3997_v4, %v18908_v39  ;;  %v3942_v22 = vpop.f32.mrf.mxu0  ;;  %4509 = vmatpush.bf16.msra.mxu0 %v21395_v36  ;;  %v21399_v39 = vld [vmem:[#allocation282_spill] sm:$0xff] }
 0x2bf   : > { %v19093_v23 = vadd.f32 %v3978_v17, %v18905_v58  ;;  %v3961_v6 = vpop.f32.mrf.mxu1  ;;  %v19099_v27 = vadd.f32 %v3942_v22, %v18911_v28  ;;  %4528 = vmatpush.bf16.msra.mxu1 %v21396_v19  ;;  %v11838_v58 = vld [vmem:[%s15078_s16 + $0xf1] sm:$0xff]  ;;  %v21402_v28 = vld [vmem:[#allocation285_spill] sm:$0xff] }
 0x2c0   : > { %v19102_v13 = vadd.f32 %v3961_v6, %v18914_v42  ;;  %4547 = vmatpush.bf16.msra.mxu2 %v21397_v12  ;;  %4566 = vmatpush.bf16.msra.mxu3 %v21398_v62  ;;  %v21401_v17 = vld [vmem:[#allocation284_spill] sm:$0xff]  ;;  %v19114_v22 = vpack.c.bf16 %v11839_v21, %v11838_v58  ;;  %v21406_v21 = vld [vmem:[#allocation289_spill] sm:$0xff] }
 0x2c1   : > { %v21405_v58 = vld [vmem:[#allocation288_spill] sm:$0xff] }
 0x2c2   : > { %4510 = vmatpush.bf16.msra.mxu0 %v21399_v39 }
 0x2c3   : > { %4529 = vmatpush.bf16.msra.mxu1 %v21400_v59  ;;  %v21403_v59 = vld [vmem:[#allocation286_spill] sm:$0xff] }
 0x2c4   : > { %4548 = vmatpush.bf16.msra.mxu2 %v21401_v17  ;;  %4567 = vmatpush.bf16.msra.mxu3 %v21402_v28  ;;  %v21404_v17 = vld [vmem:[#allocation287_spill] sm:$0xff] }
 0x2c5   : > { %v3999_v4 = vpop.f32.mrf.mxu3 }
 0x2c6   : > { %v3980_v42 = vpop.f32.mrf.mxu2  ;;  %v19120_v36 = vadd.f32 %v3999_v4, %v18932_v20  ;;  %v3945_v19 = vpop.f32.mrf.mxu0  ;;  %4511 = vmatpush.bf16.msra.mxu0 %v21403_v59  ;;  %v21408_v20 = vld [vmem:[#allocation291_spill] sm:$0xff] }
 0x2c7   : > { %v19117_v6 = vadd.f32 %v3980_v42, %v18929_v35  ;;  %v3964_v12 = vpop.f32.mrf.mxu1  ;;  %v19123_v62 = vadd.f32 %v3945_v19, %v18935_v46  ;;  %4530 = vmatpush.bf16.msra.mxu1 %v21404_v17  ;;  %v21407_v35 = vld [vmem:[#allocation290_spill] sm:$0xff]  ;;  %v21409_v46 = vld [vmem:[#allocation292_spill] sm:$0xff] }
 0x2c8   : > { %v19126_v39 = vadd.f32 %v3964_v12, %v18938_v57  ;;  %4549 = vmatpush.bf16.msra.mxu2 %v21405_v58  ;;  %4568 = vmatpush.bf16.msra.mxu3 %v21406_v21  ;;  %v21410_v57 = vld [vmem:[#allocation293_spill] sm:$0xff]  ;;  %v21413_v21 = vld [vmem:[#allocation294_spill] sm:$0xff] }
 0x2c9   : > { %11841 = vmatmul.msk.bf16.gmra.mxu0 %vm439_vm2, %v19114_v22  ;;  %11843 = vmatmul.msk.bf16.gmra.mxu1 %vm439_vm2, %v19114_v22 }
 0x2ca   : > { %11847 = vmatmul.msk.bf16.gmra.mxu3 %vm439_vm2, %v19114_v22  ;;  %4512 = vmatpush.bf16.msra.mxu0 %v21407_v35  ;;  %v21414_v35 = vld [vmem:[#allocation295_spill] sm:$0xff] }
 0x2cb   : > { %11845 = vmatmul.msk.bf16.gmra.mxu2 %vm439_vm2, %v19114_v22  ;;  %4531 = vmatpush.bf16.msra.mxu1 %v21408_v20  ;;  %v21415_v20 = vld [vmem:[#allocation296_spill] sm:$0xff] }
 0x2cc   : > { %4550 = vmatpush.bf16.msra.mxu2 %v21409_v46  ;;  %4569 = vmatpush.bf16.msra.mxu3 %v21410_v57  ;;  %v21418_v46 = vld [vmem:[#allocation299_spill] sm:$0xff] }
 0x2cd   : > { %v4002_v42 = vpop.f32.mrf.mxu3 }
 0x2ce   : > { %v3983_v28 = vpop.f32.mrf.mxu2  ;;  %v19148_v19 = vadd.f32 %v4002_v42, %v18960_v41  ;;  %v3947_v12 = vpop.f32.mrf.mxu0  ;;  %4513 = vmatpush.bf16.msra.mxu0 %v21413_v21  ;;  %v21417_v41 = vld [vmem:[#allocation298_spill] sm:$0xff] }
 0x2cf   : > { %v19145_v4 = vadd.f32 %v3983_v28, %v18957_v60  ;;  %v3966_v59 = vpop.f32.mrf.mxu1  ;;  %v19151_v17 = vadd.f32 %v3947_v12, %v18963_v3  ;;  %4532 = vmatpush.bf16.msra.mxu1 %v21414_v35  ;;  %v21416_v60 = vld [vmem:[#allocation297_spill] sm:$0xff] }
 0x2d0   : > { %v19154_v58 = vadd.f32 %v3966_v59, %v18966_v16  ;;  %4551 = vmatpush.bf16.msra.mxu2 %v21415_v20  ;;  %4570 = vmatpush.bf16.msra.mxu3 %v17809_v49 }
 0x2d1   : > { %21411 = vst [vmem:[#allocation10_spill] sm:$0xff] %v19151_v17 }
 0x2d2   : > { %21412 = vst [vmem:[#allocation11_spill] sm:$0xff] %v19154_v58  ;;  %4514 = vmatpush.bf16.msra.mxu0 %v21416_v60  ;;  %v14243_v58 = vld [vmem:[%s14845_s8 + $0xd8] sm:$0xff] }
 0x2d3   : > { %4533 = vmatpush.bf16.msra.mxu1 %v21417_v41  ;;  %v21424_v41 = vld [vmem:[#allocation303_spill] sm:$0xff] }
 0x2d4   : > { %4552 = vmatpush.bf16.msra.mxu2 %v21418_v46  ;;  %4571 = vmatpush.bf16.msra.mxu3 %v17857_v18  ;;  %v21421_v18 = vld [vmem:[#allocation300_spill] sm:$0xff] }
 0x2d5   : > { %v4004_v57 = vpop.f32.mrf.mxu3  ;;  %v21425_v46 = vld [vmem:[#allocation304_spill] sm:$0xff] }
 0x2d6   : > { %v3985_v3 = vpop.f32.mrf.mxu2  ;;  %v19168_v28 = vadd.f32 %v4004_v57, %v18980_v11  ;;  %v4032_v42 = vpop.f32.mrf.mxu0  ;;  %v21423_v11 = vld [vmem:[#allocation302_spill] sm:$0xff] }
 0x2d7   : > { %v19165_v16 = vadd.f32 %v3985_v3, %v18977_v50  ;;  %v4051_v12 = vpop.f32.mrf.mxu1  ;;  %v19171_v49 = vadd.f32 %v4032_v42, %v18983_v25  ;;  %v21422_v50 = vld [vmem:[#allocation301_spill] sm:$0xff]  ;;  %v21427_v57 = vld [vmem:[#allocation306_spill] sm:$0xff] }
 0x2d8   : > { %21420 = vst [vmem:[#allocation13_spill] sm:$0xff] %v19168_v28  ;;  %v19174_v59 = vadd.f32 %v4051_v12, %v18986_v33  ;;  %v21426_v3 = vld [vmem:[#allocation305_spill] sm:$0xff]  ;;  %v21431_v12 = vld [vmem:[#allocation310_spill] sm:$0xff] }
 0x2d9   : > { %21419 = vst [vmem:[#allocation12_spill] sm:$0xff] %v19165_v16  ;;  %11848 = vmatmul.msk.bf16.vlgmr.msrb.gmra.mxu0 %vm439_vm2, %v18768_v45  ;;  %11850 = vmatmul.msk.bf16.vlgmr.msrb.gmra.mxu1 %vm439_vm2, %v18768_v45  ;;  %v21430_v42 = vld [vmem:[#allocation309_spill] sm:$0xff]  ;;  %v14226_v16 = vld [vmem:[%s14845_s8 + $0x50] sm:$0xff] }
 0x2da   : > { %11854 = vmatmul.msk.bf16.vlgmr.msrb.gmra.mxu3 %vm439_vm2, %v18768_v45  ;;  %4600 = vmatpush.bf16.msrb.mxu0 %v17877_v32  ;;  %v14228_v28 = vld [vmem:[%s14845_s8 + $0x60] sm:$0xff] }
 0x2db   : > { %11852 = vmatmul.msk.bf16.vlgmr.msrb.gmra.mxu2 %vm439_vm2, %v18768_v45  ;;  %4619 = vmatpush.bf16.msrb.mxu1 %v21421_v18 }
 0x2dc   : > { %4638 = vmatpush.bf16.msrb.mxu2 %v21422_v50  ;;  %4657 = vmatpush.bf16.msrb.mxu3 %v21423_v11 }
 0x2dd   : > { %v4089_v33 = vpop.f32.mrf.mxu3 }
 0x2de   : > { %v4070_v25 = vpop.f32.mrf.mxu2  ;;  %v19192_v35 = vadd.f32 %v4089_v33, %v19004_v55  ;;  %v4034_v20 = vpop.f32.mrf.mxu0  ;;  %4601 = vmatpush.bf16.msrb.mxu0 %v21424_v41  ;;  %v21429_v55 = vld [vmem:[#allocation308_spill] sm:$0xff] }
 0x2df   : > { %v19189_v21 = vadd.f32 %v4070_v25, %v19001_v51  ;;  %v4053_v60 = vpop.f32.mrf.mxu1  ;;  %v19195_v45 = vadd.f32 %v4034_v20, %v19007_v9  ;;  %4620 = vmatpush.bf16.msrb.mxu1 %v21425_v46  ;;  %v21428_v51 = vld [vmem:[#allocation307_spill] sm:$0xff]  ;;  %v21433_v41 = vld [vmem:[#allocation312_spill] sm:$0xff]  ;;  %v21434_v46 = vld [vmem:[#allocation313_spill] sm:$0xff] }
 0x2e0   : > { %v19198_v32 = vadd.f32 %v4053_v60, %v19010_v0  ;;  %4639 = vmatpush.bf16.msrb.mxu2 %v21426_v3  ;;  %4658 = vmatpush.bf16.msrb.mxu3 %v21427_v57  ;;  %v21432_v60 = vld [vmem:[#allocation311_spill] sm:$0xff]  ;;  %v21435_v3 = vld [vmem:[#allocation314_spill] sm:$0xff] }
 0x2e2   : > { %4602 = vmatpush.bf16.msrb.mxu0 %v21428_v51 }
 0x2e3   : > { %4621 = vmatpush.bf16.msrb.mxu1 %v21429_v55 }
 0x2e4   : > { %4640 = vmatpush.bf16.msrb.mxu2 %v21430_v42  ;;  %4659 = vmatpush.bf16.msrb.mxu3 %v21431_v12 }
 0x2e5   : > { %v4091_v18 = vpop.f32.mrf.mxu3 }
 0x2e6   : > { %v4072_v9 = vpop.f32.mrf.mxu2  ;;  %v19212_v50 = vadd.f32 %v4091_v18, %v19024_v2  ;;  %v4037_v11 = vpop.f32.mrf.mxu0  ;;  %4603 = vmatpush.bf16.msrb.mxu0 %v21432_v60  ;;  %v21437_v2 = vld [vmem:[#allocation316_spill] sm:$0xff]  ;;  %v21444_v60 = vld [vmem:[#allocation321_spill] sm:$0xff] }
 0x2e7   : > { %v19209_v0 = vadd.f32 %v4072_v9, %v19021_v31  ;;  %v4056_v25 = vpop.f32.mrf.mxu1  ;;  %v19215_v33 = vadd.f32 %v4037_v11, %v19027_v30  ;;  %4622 = vmatpush.bf16.msrb.mxu1 %v21433_v41  ;;  %v21436_v31 = vld [vmem:[#allocation315_spill] sm:$0xff]  ;;  %v21438_v30 = vld [vmem:[#allocation317_spill] sm:$0xff] }
 0x2e8   : > { %v19218_v20 = vadd.f32 %v4056_v25, %v19030_v37  ;;  %4641 = vmatpush.bf16.msrb.mxu2 %v21434_v46  ;;  %4660 = vmatpush.bf16.msrb.mxu3 %v21435_v3  ;;  %v21439_v37 = vld [vmem:[#allocation318_spill] sm:$0xff]  ;;  %v21442_v11 = vld [vmem:[#allocation319_spill] sm:$0xff]  ;;  %v21443_v25 = vld [vmem:[#allocation320_spill] sm:$0xff] }
 0x2e9   : > { %11849 = vmatmul.msk.bf16.gmra.mxu0 %vm439_vm2, %v19114_v22  ;;  %11851 = vmatmul.msk.bf16.gmra.mxu1 %vm439_vm2, %v19114_v22  ;;  %v11857_v46 = vld [vmem:[%s15078_s16 + $0x119] sm:$0xff]  ;;  %v11858_v3 = vld [vmem:[%s15078_s16 + $0x121] sm:$0xff] }
 0x2ea   : > { %11855 = vmatmul.msk.bf16.gmra.mxu3 %vm439_vm2, %v19114_v22  ;;  %4604 = vmatpush.bf16.msrb.mxu0 %v21436_v31 }
 0x2eb   : > { %11853 = vmatmul.msk.bf16.gmra.mxu2 %vm439_vm2, %v19114_v22  ;;  %4623 = vmatpush.bf16.msrb.mxu1 %v21437_v2 }
 0x2ec   : > { %4642 = vmatpush.bf16.msrb.mxu2 %v21438_v30  ;;  %4661 = vmatpush.bf16.msrb.mxu3 %v21439_v37  ;;  %v4503_v30 = vpack.c.bf16 %v11858_v3, %v11857_v46 }
 0x2ed   : > { %v4094_v51 = vpop.f32.mrf.mxu3 }
 0x2ee   : > { %v4075_v57 = vpop.f32.mrf.mxu2  ;;  %v19240_v42 = vadd.f32 %v4094_v51, %v19052_v8  ;;  %v4039_v12 = vpop.f32.mrf.mxu0  ;;  %4605 = vmatpush.bf16.msrb.mxu0 %v21442_v11 }
 0x2ef   : > { %v19237_v55 = vadd.f32 %v4075_v57, %v19049_v48  ;;  %v4058_v9 = vpop.f32.mrf.mxu1  ;;  %v19243_v22 = vadd.f32 %v4039_v12, %v19055_v15  ;;  %4624 = vmatpush.bf16.msrb.mxu1 %v21443_v25 }
 0x2f0   : > { %v19246_v18 = vadd.f32 %v4058_v9, %v19058_v38  ;;  %4643 = vmatpush.bf16.msrb.mxu2 %v21444_v60  ;;  %4662 = vmatpush.bf16.msrb.mxu3 %v18111_v29 }
 0x2f1   : > { %21440 = vst [vmem:[#allocation14_spill] sm:$0xff] %v19243_v22  ;;  %v14246_v22 = vld [vmem:[%s14845_s8 + $0xf0] sm:$0xff] }
 0x2f2   : > { %21441 = vst [vmem:[#allocation15_spill] sm:$0xff] %v19246_v18  ;;  %4606 = vmatpush.bf16.msrb.mxu0 %v18124_v40  ;;  %v14272_v18 = vld [vmem:[%s14845_s8 + $0x1c0] sm:$0xff] }
 0x2f3   : > { %4625 = vmatpush.bf16.msrb.mxu1 %v18141_v47 }
 0x2f4   : > { %4644 = vmatpush.bf16.msrb.mxu2 %v18143_v14  ;;  %4663 = vmatpush.bf16.msrb.mxu3 %v18159_v7 }
 0x2f5   : > { %v4096_v8 = vpop.f32.mrf.mxu3 }
 0x2f6   : > { %v4077_v48 = vpop.f32.mrf.mxu2  ;;  %v19260_v38 = vadd.f32 %v4096_v8, %v19072_v1  ;;  %v4132_v41 = vpop.f32.mrf.mxu0 }
 0x2f7   : > { %v19257_v15 = vadd.f32 %v4077_v48, %v19069_v5  ;;  %v4151_v29 = vpop.f32.mrf.mxu1  ;;  %v19263_v40 = vadd.f32 %v4132_v41, %v19075_v53 }
 0x2f8   : > { %21446 = vst [vmem:[#allocation17_spill] sm:$0xff] %v19260_v38  ;;  %v19266_v47 = vadd.f32 %v4151_v29, %v19078_v24 }
 0x2f9   : > { %21445 = vst [vmem:[#allocation16_spill] sm:$0xff] %v19257_v15  ;;  %11859 = vmatmul.msk.bf16.vlgmr.msra.gmra.mxu0 %vm439_vm2, %v18926_v43  ;;  %11861 = vmatmul.msk.bf16.vlgmr.msra.gmra.mxu1 %vm439_vm2, %v18926_v43  ;;  %v14258_v15 = vld [vmem:[%s14845_s8 + $0x150] sm:$0xff] }
 0x2fa   : > { %11865 = vmatmul.msk.bf16.vlgmr.msra.gmra.mxu3 %vm439_vm2, %v18926_v43 }
 0x2fb   : > { %11863 = vmatmul.msk.bf16.vlgmr.msra.gmra.mxu2 %vm439_vm2, %v18926_v43 }
 0x2fd   : > { %v4189_v7 = vpop.f32.mrf.mxu3 }
 0x2fe   : > { %v4170_v14 = vpop.f32.mrf.mxu2  ;;  %v19280_v1 = vadd.f32 %v4189_v7, %v19096_v26  ;;  %v19282_v53 = vpop.f32.mrf.mxu0 }
 0x2ff   : > { %v19277_v5 = vadd.f32 %v4170_v14, %v19093_v23  ;;  %v19284_v24 = vpop.f32.mrf.mxu1 }
 0x305   : > { %v19290_v2 = vpop.f32.mrf.mxu3 }
 0x306   : > { %v19288_v31 = vpop.f32.mrf.mxu2  ;;  %v4137_v37 = vpop.f32.mrf.mxu0 }
 0x307   : > { %v4156_v57 = vpop.f32.mrf.mxu1  ;;  %v4207_v51 = vadd.f32 %v4137_v37, %v19123_v62 }
 0x308   : > { %v4208_v23 = vadd.f32 %v4156_v57, %v19126_v39 }
 0x309   : > { %11860 = vmatmul.msk.bf16.gmra.mxu0 %vm439_vm2, %v4503_v30  ;;  %11862 = vmatmul.msk.bf16.gmra.mxu1 %vm439_vm2, %v4503_v30 }
 0x30a   : > { %11866 = vmatmul.msk.bf16.gmra.mxu3 %vm439_vm2, %v4503_v30 }
 0x30b   : > { %11864 = vmatmul.msk.bf16.gmra.mxu2 %vm439_vm2, %v4503_v30 }
 0x30d   : > { %v4194_v12 = vpop.f32.mrf.mxu3 }
 0x30e   : > { %v4175_v26 = vpop.f32.mrf.mxu2  ;;  %v4210_v11 = vadd.f32 %v4194_v12, %v19148_v19  ;;  %v19300_v25 = vpop.f32.mrf.mxu0 }
 0x30f   : > { %v4209_v9 = vadd.f32 %v4175_v26, %v19145_v4  ;;  %21447 = vst [vmem:[#allocation18_spill] sm:$0xff] %v19300_v25  ;;  %v19302_v60 = vpop.f32.mrf.mxu1 }
 0x310   : > { %21448 = vst [vmem:[#allocation19_spill] sm:$0xff] %v19302_v60  ;;  %v14235_v60 = vld [vmem:[%s14845_s8 + $0x98] sm:$0xff] }
 0x315   : > { %v19306_v39 = vpop.f32.mrf.mxu3 }
 0x316   : > { %v19304_v62 = vpop.f32.mrf.mxu2  ;;  %21450 = vst [vmem:[#allocation21_spill] sm:$0xff] %v19306_v39  ;;  %v4224_v48 = vpop.f32.mrf.mxu0  ;;  %v14220_v39 = vld [vmem:[%s14845_s8 + $0x20] sm:$0xff] }
 0x317   : > { %21449 = vst [vmem:[#allocation20_spill] sm:$0xff] %v19304_v62  ;;  %v4243_v8 = vpop.f32.mrf.mxu1  ;;  %v4291_v41 = vadd.f32 %v4224_v48, %v19171_v49  ;;  %v14218_v62 = vld [vmem:[%s14845_s8 + $0x10] sm:$0xff] }
 0x318   : > { %v4292_v29 = vadd.f32 %v4243_v8, %v19174_v59 }
 0x319   : > { %11867 = vmatmul.msk.bf16.vlgmr.msrb.gmra.mxu0 %vm439_vm2, %v18926_v43  ;;  %11869 = vmatmul.msk.bf16.vlgmr.msrb.gmra.mxu1 %vm439_vm2, %v18926_v43 }
 0x31a   : > { %11873 = vmatmul.msk.bf16.vlgmr.msrb.gmra.mxu3 %vm439_vm2, %v18926_v43 }
 0x31b   : > { %11871 = vmatmul.msk.bf16.vlgmr.msrb.gmra.mxu2 %vm439_vm2, %v18926_v43 }
 0x31d   : > { %v4281_v19 = vpop.f32.mrf.mxu3 }
 0x31e   : > { %v4262_v4 = vpop.f32.mrf.mxu2  ;;  %v4294_v49 = vadd.f32 %v4281_v19, %v19192_v35  ;;  %v19320_v7 = vpop.f32.mrf.mxu0 }
 0x31f   : > { %v4293_v14 = vadd.f32 %v4262_v4, %v19189_v21  ;;  %v19322_v59 = vpop.f32.mrf.mxu1 }
 0x325   : > { %v19326_v3 = vpop.f32.mrf.mxu3 }
 0x326   : > { %v19324_v46 = vpop.f32.mrf.mxu2  ;;  %v4229_v37 = vpop.f32.mrf.mxu0 }
 0x327   : > { %v4248_v57 = vpop.f32.mrf.mxu1  ;;  %v19329_v26 = vadd.f32 %v4229_v37, %v19215_v33 }
 0x328   : > { %v19332_v43 = vadd.f32 %v4248_v57, %v19218_v20 }
 0x329   : > { %11868 = vmatmul.msk.bf16.gmra.mxu0 %vm439_vm2, %v4503_v30  ;;  %11870 = vmatmul.msk.bf16.gmra.mxu1 %vm439_vm2, %v4503_v30 }
 0x32a   : > { %11874 = vmatmul.msk.bf16.gmra.mxu3 %vm439_vm2, %v4503_v30 }
 0x32b   : > { %11872 = vmatmul.msk.bf16.gmra.mxu2 %vm439_vm2, %v4503_v30 }
 0x32d   : > { %v4286_v35 = vpop.f32.mrf.mxu3 }
 0x32e   : > { %v4267_v21 = vpop.f32.mrf.mxu2  ;;  %v19342_v48 = vadd.f32 %v4286_v35, %v19240_v42  ;;  %v19344_v33 = vpop.f32.mrf.mxu0 }
 0x32f   : > { %v19339_v12 = vadd.f32 %v4267_v21, %v19237_v55  ;;  %21453 = vst [vmem:[#allocation24_spill] sm:$0xff] %v19344_v33  ;;  %v19346_v20 = vpop.f32.mrf.mxu1  ;;  %v14239_v33 = vld [vmem:[%s14845_s8 + $0xb8] sm:$0xff] }
 0x330   : > { %21452 = vst [vmem:[#allocation23_spill] sm:$0xff] %v19342_v48 }
 0x331   : > { %21451 = vst [vmem:[#allocation22_spill] sm:$0xff] %v19339_v12 }
 0x332   : > { %21454 = vst [vmem:[#allocation25_spill] sm:$0xff] %v19346_v20  ;;  %v14249_v20 = vld [vmem:[%s14845_s8 + $0x108] sm:$0xff] }
 0x335   : > { %v19350_v4 = vpop.f32.mrf.mxu3 }
 0x336   : > { %v19348_v8 = vpop.f32.mrf.mxu2  ;;  %21456 = vst [vmem:[#allocation27_spill] sm:$0xff] %v19350_v4  ;;  %v4324_v19 = vpop.f32.mrf.mxu0 }
 0x337   : > { %21455 = vst [vmem:[#allocation26_spill] sm:$0xff] %v19348_v8  ;;  %v4343_v37 = vpop.f32.mrf.mxu1  ;;  %v19353_v30 = vadd.f32 %v4324_v19, %v19263_v40 }
 0x338   : > { %v19356_v57 = vadd.f32 %v4343_v37, %v19266_v47 }
 0x33d   : > { %v4381_v21 = vpop.f32.mrf.mxu3 }
 0x33e   : > { %v4362_v55 = vpop.f32.mrf.mxu2  ;;  %v19362_v35 = vadd.f32 %v4381_v21, %v19280_v1  ;;  %v19364_v63 = vpop.f32.mrf.mxu0 }
 0x33f   : > { %v19359_v42 = vadd.f32 %v4362_v55, %v19277_v5  ;;  %v19366_v10 = vpop.f32.mrf.mxu1 }
 0x345   : > { %v19370_v56 = vpop.f32.mrf.mxu3 }
 0x346   : > { %v19368_v52 = vpop.f32.mrf.mxu2  ;;  %v4329_v40 = vpop.f32.mrf.mxu0 }
 0x347   : > { %v4348_v47 = vpop.f32.mrf.mxu1  ;;  %v19372_v19 = vadd.f32 %v4329_v40, %v4207_v51 }
 0x348   : > { %v19374_v37 = vadd.f32 %v4348_v47, %v4208_v23 }
 0x34d   : > { %v4386_v55 = vpop.f32.mrf.mxu3 }
 0x34e   : > { %v4367_v5 = vpop.f32.mrf.mxu2  ;;  %v19378_v21 = vadd.f32 %v4386_v55, %v4210_v11  ;;  %v19380_v4 = vpop.f32.mrf.mxu0  ;;  %v14263_v11 = vld [vmem:[%s14845_s8 + $0x178] sm:$0xff] }
 0x34f   : > { %v19376_v1 = vadd.f32 %v4367_v5, %v4209_v9  ;;  %21459 = vst [vmem:[#allocation30_spill] sm:$0xff] %v19380_v4  ;;  %v19382_v38 = vpop.f32.mrf.mxu1  ;;  %v14255_v9 = vld [vmem:[%s14845_s8 + $0x138] sm:$0xff]  ;;  %5104 = vmatpush.bf16.msra.mxu1 %v14263_v11  ;;  %v14253_v11 = vld [vmem:[%s14845_s8 + $0x128] sm:$0xff] }
 0x350   : > { %21458 = vst [vmem:[#allocation29_spill] sm:$0xff] %v19378_v21  ;;  %5091 = vmatpush.bf16.msra.mxu0 %v14255_v9  ;;  %v14254_v21 = vld [vmem:[%s14845_s8 + $0x130] sm:$0xff]  ;;  %v14279_v9 = vld [vmem:[%s14845_s8 + $0x1f8] sm:$0xff] }
 0x351   : > { %21457 = vst [vmem:[#allocation28_spill] sm:$0xff] %v19376_v1  ;;  %v14261_v1 = vld [vmem:[%s14845_s8 + $0x168] sm:$0xff]  ;;  %5130 = vmatpush.bf16.msra.mxu3 %v14279_v9  ;;  %v14259_v4 = vld [vmem:[%s14845_s8 + $0x158] sm:$0xff] }
 0x352   : > { %21460 = vst [vmem:[#allocation31_spill] sm:$0xff] %v19382_v38  ;;  %v14251_v38 = vld [vmem:[%s14845_s8 + $0x118] sm:$0xff] }
 0x354   : > { %5092 = vmatpush.bf16.msra.mxu0 %v14254_v21 }
 0x355   : > { %v19386_v12 = vpop.f32.mrf.mxu3 }
 0x356   : > { %v19384_v48 = vpop.f32.mrf.mxu2  ;;  %21462 = vst [vmem:[#allocation33_spill] sm:$0xff] %v19386_v12  ;;  %v4416_v51 = vpop.f32.mrf.mxu0 }
 0x357   : > { %21461 = vst [vmem:[#allocation32_spill] sm:$0xff] %v19384_v48  ;;  %v4435_v40 = vpop.f32.mrf.mxu1  ;;  %v19388_v23 = vadd.f32 %v4416_v51, %v4291_v41  ;;  %v14262_v48 = vld [vmem:[%s14845_s8 + $0x170] sm:$0xff] }
 0x358   : > { %v19390_v47 = vadd.f32 %v4435_v40, %v4292_v29  ;;  %5105 = vmatpush.bf16.msra.mxu1 %v14262_v48  ;;  %v14271_v40 = vld [vmem:[%s14845_s8 + $0x1b8] sm:$0xff]  ;;  %5093 = vmatpush.bf16.msra.mxu0 %v14253_v11  ;;  %v14252_v48 = vld [vmem:[%s14845_s8 + $0x120] sm:$0xff]  ;;  %v14277_v11 = vld [vmem:[%s14845_s8 + $0x1e8] sm:$0xff] }
 0x359   : > { %5117 = vmatpush.bf16.msra.mxu2 %v14271_v40 }
 0x35c   : > { %5106 = vmatpush.bf16.msra.mxu1 %v14261_v1  ;;  %5094 = vmatpush.bf16.msra.mxu0 %v14252_v48  ;;  %v14269_v1 = vld [vmem:[%s14845_s8 + $0x1a8] sm:$0xff] }
 0x35d   : > { %v4473_v55 = vpop.f32.mrf.mxu3 }
 0x35e   : > { %v4454_v5 = vpop.f32.mrf.mxu2  ;;  %v19398_v41 = vadd.f32 %v4473_v55, %v4294_v49  ;;  %v19400_v51 = vpop.f32.mrf.mxu0  ;;  %v14278_v49 = vld [vmem:[%s14845_s8 + $0x1f0] sm:$0xff]  ;;  %v14260_v55 = vld [vmem:[%s14845_s8 + $0x160] sm:$0xff] }
 0x35f   : > { %v19396_v12 = vadd.f32 %v4454_v5, %v4293_v14  ;;  %v19402_v29 = vpop.f32.mrf.mxu1  ;;  %v14270_v14 = vld [vmem:[%s14845_s8 + $0x1b0] sm:$0xff]  ;;  %5131 = vmatpush.bf16.msra.mxu3 %v14278_v49  ;;  %v14276_v49 = vld [vmem:[%s14845_s8 + $0x1e0] sm:$0xff] }
 0x360   : > { %5118 = vmatpush.bf16.msra.mxu2 %v14270_v14  ;;  %5107 = vmatpush.bf16.msra.mxu1 %v14260_v55  ;;  %v14268_v14 = vld [vmem:[%s14845_s8 + $0x1a0] sm:$0xff]  ;;  %v14250_v55 = vld [vmem:[%s14845_s8 + $0x110] sm:$0xff] }
 0x361   : > { %5095 = vmatpush.bf16.msra.mxu0 %v14251_v38  ;;  %v14267_v38 = vld [vmem:[%s14845_s8 + $0x198] sm:$0xff] }
 0x363   : > { %5132 = vmatpush.bf16.msra.mxu3 %v14277_v11 }
 0x364   : > { %5119 = vmatpush.bf16.msra.mxu2 %v14269_v1  ;;  %5108 = vmatpush.bf16.msra.mxu1 %v14259_v4  ;;  %v14275_v4 = vld [vmem:[%s14845_s8 + $0x1d8] sm:$0xff] }
 0x365   : > { %v19412_v21 = vpop.f32.mrf.mxu3  ;;  %5096 = vmatpush.bf16.msra.mxu0 %v14250_v55 }
 0x366   : > { %v19410_v5 = vpop.f32.mrf.mxu2  ;;  %v19416_v40 = vpop.f32.mrf.mxu0 }
 0x367   : > { %v19418_v9 = vpop.f32.mrf.mxu1  ;;  %5133 = vmatpush.bf16.msra.mxu3 %v14276_v49  ;;  %v14274_v49 = vld [vmem:[%s14845_s8 + $0x1d0] sm:$0xff] }
 0x368   : > { %5120 = vmatpush.bf16.msra.mxu2 %v14268_v14  ;;  %5109 = vmatpush.bf16.msra.mxu1 %v14258_v15  ;;  %v14266_v14 = vld [vmem:[%s14845_s8 + $0x190] sm:$0xff]  ;;  %v14248_v15 = vld [vmem:[%s14845_s8 + $0x100] sm:$0xff] }
 0x369   : > { %5097 = vmatpush.bf16.msra.mxu0 %v14249_v20 }
 0x36b   : > { %5134 = vmatpush.bf16.msra.mxu3 %v14275_v4  ;;  %v14231_v4 = vld [vmem:[%s14845_s8 + $0x78] sm:$0xff] }
 0x36c   : > { %5121 = vmatpush.bf16.msra.mxu2 %v14267_v38 }
 0x36d   : > { %v19428_v48 = vpop.f32.mrf.mxu3  ;;  %5098 = vmatpush.bf16.msra.mxu0 %v14248_v15  ;;  %v14247_v15 = vld [vmem:[%s14845_s8 + $0xf8] sm:$0xff] }
 0x36e   : > { %v19426_v8 = vpop.f32.mrf.mxu2  ;;  %21464 = vst [vmem:[#allocation35_spill] sm:$0xff] %v19428_v48  ;;  %v19432_v1 = vpop.f32.mrf.mxu0  ;;  %v14264_v48 = vld [vmem:[%s14845_s8 + $0x180] sm:$0xff] }
 0x36f   : > { %21463 = vst [vmem:[#allocation34_spill] sm:$0xff] %v19426_v8  ;;  %v19434_v11 = vpop.f32.mrf.mxu1  ;;  %v14257_v8 = vld [vmem:[%s14845_s8 + $0x148] sm:$0xff]  ;;  %5135 = vmatpush.bf16.msra.mxu3 %v14274_v49  ;;  %v14230_v49 = vld [vmem:[%s14845_s8 + $0x70] sm:$0xff] }
 0x370   : > { %21465 = vst [vmem:[#allocation36_spill] sm:$0xff] %v19432_v1  ;;  %5110 = vmatpush.bf16.msra.mxu1 %v14257_v8  ;;  %5122 = vmatpush.bf16.msra.mxu2 %v14266_v14  ;;  %v14223_v8 = vld [vmem:[%s14845_s8 + $0x38] sm:$0xff]  ;;  %v14222_v14 = vld [vmem:[%s14845_s8 + $0x30] sm:$0xff] }
 0x371   : > { %21466 = vst [vmem:[#allocation37_spill] sm:$0xff] %v19434_v11  ;;  %v14256_v11 = vld [vmem:[%s14845_s8 + $0x140] sm:$0xff]  ;;  %5335 = vmatpush.bf16.msrb.mxu0 %v14223_v8 }
 0x374   : > { %5111 = vmatpush.bf16.msra.mxu1 %v14256_v11 }
 0x375   : > { %v19444_v55 = vpop.f32.mrf.mxu3  ;;  %5336 = vmatpush.bf16.msrb.mxu0 %v14222_v14  ;;  %v14229_v14 = vld [vmem:[%s14845_s8 + $0x68] sm:$0xff] }
 0x376   : > { %v19442_v1 = vpop.f32.mrf.mxu2  ;;  %21468 = vst [vmem:[#allocation39_spill] sm:$0xff] %v19444_v55  ;;  %v19448_v38 = vpop.f32.mrf.mxu0  ;;  %v14273_v55 = vld [vmem:[%s14845_s8 + $0x1c8] sm:$0xff] }
 0x377   : > { %21467 = vst [vmem:[#allocation38_spill] sm:$0xff] %v19442_v1  ;;  %v19450_v20 = vpop.f32.mrf.mxu1  ;;  %v14265_v1 = vld [vmem:[%s14845_s8 + $0x188] sm:$0xff]  ;;  %5136 = vmatpush.bf16.msra.mxu3 %v14273_v55 }
 0x378   : > { %5348 = vmatpush.bf16.msrb.mxu1 %v14231_v4  ;;  %5123 = vmatpush.bf16.msra.mxu2 %v14265_v1  ;;  %v14221_v4 = vld [vmem:[%s14845_s8 + $0x28] sm:$0xff] }
 0x379   : > { %5337 = vmatpush.bf16.msrb.mxu0 %v14221_v4 }
 0x37b   : > { %5137 = vmatpush.bf16.msra.mxu3 %v14272_v18  ;;  %v14237_v18 = vld [vmem:[%s14845_s8 + $0xa8] sm:$0xff] }
 0x37c   : > { %5349 = vmatpush.bf16.msrb.mxu1 %v14230_v49  ;;  %5124 = vmatpush.bf16.msra.mxu2 %v14264_v48  ;;  %v14238_v49 = vld [vmem:[%s14845_s8 + $0xb0] sm:$0xff] }
 0x37d   : > { %v19464_v8 = vpop.f32.mrf.mxu3  ;;  %5338 = vmatpush.bf16.msrb.mxu0 %v14220_v39  ;;  %v14244_v39 = vld [vmem:[%s14845_s8 + $0xe0] sm:$0xff] }
 0x37e   : > { %v19462_v11 = vpop.f32.mrf.mxu2  ;;  %v19466_v1 = vpop.f32.mrf.mxu0 }
 0x37f   : > { %v19468_v55 = vpop.f32.mrf.mxu1  ;;  %5374 = vmatpush.bf16.msrb.mxu3 %v14247_v15 }
 0x380   : > { %5361 = vmatpush.bf16.msrb.mxu2 %v14239_v33  ;;  %5350 = vmatpush.bf16.msrb.mxu1 %v14229_v14  ;;  %v14245_v33 = vld [vmem:[%s14845_s8 + $0xe8] sm:$0xff] }
 0x383   : > { %5375 = vmatpush.bf16.msrb.mxu3 %v14246_v22  ;;  %v14219_v22 = vld [vmem:[%s14845_s8 + $0x18] sm:$0xff] }
 0x384   : > { %5362 = vmatpush.bf16.msrb.mxu2 %v14238_v49  ;;  %5351 = vmatpush.bf16.msrb.mxu1 %v14228_v28  ;;  %v14227_v49 = vld [vmem:[%s14845_s8 + $0x58] sm:$0xff]  ;;  %v14236_v28 = vld [vmem:[%s14845_s8 + $0xa0] sm:$0xff] }
 0x385   : > { %v19480_v15 = vpop.f32.mrf.mxu3  ;;  %5339 = vmatpush.bf16.msrb.mxu0 %v14219_v22 }
 0x386   : > { %v19478_v48 = vpop.f32.mrf.mxu2  ;;  %v19482_v4 = vpop.f32.mrf.mxu0 }
 0x387   : > { %v19484_v14 = vpop.f32.mrf.mxu1  ;;  %5376 = vmatpush.bf16.msrb.mxu3 %v14245_v33 }
 0x388   : > { %5363 = vmatpush.bf16.msrb.mxu2 %v14237_v18  ;;  %5352 = vmatpush.bf16.msrb.mxu1 %v14227_v49 }
 0x389   : > { %5340 = vmatpush.bf16.msrb.mxu0 %v14218_v62  ;;  %v14242_v62 = vld [vmem:[%s14845_s8 + $0xd0] sm:$0xff] }
 0x38b   : > { %5377 = vmatpush.bf16.msrb.mxu3 %v14244_v39  ;;  %v14225_v39 = vld [vmem:[%s14845_s8 + $0x48] sm:$0xff] }
 0x38c   : > { %5364 = vmatpush.bf16.msrb.mxu2 %v14236_v28  ;;  %5353 = vmatpush.bf16.msrb.mxu1 %v14226_v16  ;;  %v14217_v28 = vld [vmem:[%s14845_s8 + $0x8] sm:$0xff]  ;;  %v14234_v16 = vld [vmem:[%s14845_s8 + $0x90] sm:$0xff] }
 0x38d   : > { %v19496_v33 = vpop.f32.mrf.mxu3  ;;  %5341 = vmatpush.bf16.msrb.mxu0 %v14217_v28 }
 0x38e   : > { %v19494_v18 = vpop.f32.mrf.mxu2  ;;  %21470 = vst [vmem:[#allocation41_spill] sm:$0xff] %v19496_v33  ;;  %v19498_v22 = vpop.f32.mrf.mxu0  ;;  %v14216_v33 = vld [vmem:[%s14845_s8] sm:$0xff] }
 0x38f   : > { %21469 = vst [vmem:[#allocation40_spill] sm:$0xff] %v19494_v18  ;;  %v19500_v49 = vpop.f32.mrf.mxu1  ;;  %5378 = vmatpush.bf16.msrb.mxu3 %v14243_v58  ;;  %v3497_v18 = vld [vmem:[%s20481_s2] sm:$0xf]  ;;  %v14233_v58 = vld [vmem:[%s14845_s8 + $0x88] sm:$0xff] }
 0x390   : > { %21471 = vst [vmem:[#allocation42_spill] sm:$0xff] %v19498_v22  ;;  %5365 = vmatpush.bf16.msrb.mxu2 %v14235_v60  ;;  %5354 = vmatpush.bf16.msrb.mxu1 %v14225_v39  ;;  %v14224_v22 = vld [vmem:[%s14845_s8 + $0x40] sm:$0xff]  ;;  %v19511_v25 = vperm.slane %v3497_v18, 0  ;;  %v14241_v60 = vld [vmem:[%s14845_s8 + $0xc8] sm:$0xff] }
 0x391   : > { %21472 = vst [vmem:[#allocation43_spill] sm:$0xff] %v19500_v49  ;;  %5342 = vmatpush.bf16.msrb.mxu0 %v14216_v33  ;;  %v19525_v33 = vadd.f32 %v19450_v20, %v19356_v57 }
 0x393   : > { %5379 = vmatpush.bf16.msrb.mxu3 %v14242_v62 }
 0x394   : > { %5366 = vmatpush.bf16.msrb.mxu2 %v14234_v16  ;;  %5355 = vmatpush.bf16.msrb.mxu1 %v14224_v22  ;;  %v19521_v16 = vadd.f32 %v19448_v38, %v19353_v30 }
 0x395   : > { %v19517_v39 = vpop.f32.mrf.mxu3 }
 0x396   : > { %v19515_v28 = vpop.f32.mrf.mxu2  ;;  %21474 = vst [vmem:[#allocation45_spill] sm:$0xff] %v19517_v39  ;;  %v4608_v49 = vpop.f32.mrf.mxu0  ;;  %v3507_v39 = vadd.f32 %v19511_v25, %v18690_v34  ;;  %v4295_v34 = vadd.f32 %v19320_v7, %v19195_v45 }
 0x397   : > { %21473 = vst [vmem:[#allocation44_spill] sm:$0xff] %v19515_v28  ;;  %v4627_v17 = vpop.f32.mrf.mxu1  ;;  %5380 = vmatpush.bf16.msrb.mxu3 %v14241_v60  ;;  %v19528_v22 = vadd.f32 %v4608_v49, %v19388_v23  ;;  %v19535_v28 = vperm.slane %v3497_v18, 1  ;;  %v14240_v60 = vld [vmem:[%s14845_s8 + $0xc0] sm:$0xff]  ;;  %v4203_v23 = vadd.f32 %v19282_v53, %v19099_v27  ;;  %v19555_v49 = vperm.slane %v3497_v18, 2 }
 0x398   : > { %5367 = vmatpush.bf16.msrb.mxu2 %v14233_v58  ;;  %v19531_v62 = vadd.f32 %v4627_v17, %v19390_v47  ;;  %v14232_v58 = vld [vmem:[%s14845_s8 + $0x80] sm:$0xff]  ;;  %v4204_v17 = vadd.f32 %v19284_v24, %v19102_v13  ;;  %v4296_v47 = vadd.f32 %v19322_v59, %v19198_v32  ;;  %v19551_v38 = vmax.f32 %v3507_v39, 0.0 }
 0x399   : > { %v4691_v30 = vmax.f32 %v19521_v16, %v19528_v22  ;;  %v3508_v20 = vadd.f32 %v19535_v28, %v18692_v54  ;;  %v4395_v27 = vadd.f32 %v19364_v63, %v4203_v23  ;;  %v4487_v13 = vadd.f32 %v19400_v51, %v4295_v34  ;;  %v21500_v16 = vld [vmem:[#allocation41_spill] sm:$0xff] }
 0x39a   : > { %v4692_v57 = vmax.f32 %v19525_v33, %v19531_v62  ;;  %v4396_v53 = vadd.f32 %v19366_v10, %v4204_v17  ;;  %v4488_v45 = vadd.f32 %v19402_v29, %v4296_v47  ;;  %v19565_v32 = vadd.f32 %v19462_v11, %v19359_v42 }
 0x39b   : > { %5381 = vmatpush.bf16.msrb.mxu3 %v14240_v60  ;;  %v19569_v54 = vadd.f32 %v19464_v8, %v19362_v35  ;;  %v19578_v29 = vadd.f32 %v19466_v1, %v4395_v27  ;;  %v3509_v8 = vadd.f32 %v19555_v49, %v18710_v61  ;;  %v4205_v39 = vadd.f32 %v19288_v31, %v19117_v6 }
 0x39c   : > { %5368 = vmatpush.bf16.msrb.mxu2 %v14232_v58  ;;  %v19557_v58 = vperm.slane %v3497_v18, 3  ;;  %v19581_v18 = vadd.f32 %v19468_v55, %v4396_v53  ;;  %v4206_v60 = vadd.f32 %v19290_v2, %v19120_v36  ;;  %v4297_v23 = vadd.f32 %v19324_v46, %v19209_v0 }
 0x39d   : > { %v4665_v7 = vpop.f32.mrf.mxu3  ;;  %v4298_v17 = vadd.f32 %v19326_v3, %v19212_v50  ;;  %v4819_v34 = vrot.slane %v19551_v38, 1  ;;  %v4397_v47 = vadd.f32 %v19368_v52, %v4205_v39  ;;  %v19614_v36 = vmax.f32 %v3509_v8, 0.0  ;;  %v21481_v39 = vld [vmem:[#allocation13_spill] sm:$0xff] }
 0x39e   : > { %v4646_v24 = vpop.f32.mrf.mxu2  ;;  %v19575_v63 = vadd.f32 %v4665_v7, %v19398_v41  ;;  %v4610_v10 = vpop.f32.mrf.mxu0  ;;  %v19591_v41 = vmax.f32 %v3508_v20, 0.0  ;;  %v3510_v61 = vadd.f32 %v19557_v58, %v18712_v44  ;;  %v4398_v20 = vadd.f32 %v19370_v56, %v4206_v60  ;;  %v21477_v7 = vld [vmem:[#allocation11_spill] sm:$0xff]  ;;  %v21482_v60 = vld [vmem:[#allocation21_spill] sm:$0xff] }
 0x39f   : > { %v19572_v59 = vadd.f32 %v4646_v24, %v19396_v12  ;;  %v4629_v51 = vpop.f32.mrf.mxu1  ;;  %v19583_v42 = vadd.f32 %v4610_v10, %v4487_v13  ;;  %v4489_v6 = vadd.f32 %v19410_v5, %v4297_v23  ;;  %v4490_v31 = vadd.f32 %v19412_v21, %v4298_v17  ;;  %v21476_v13 = vld [vmem:[#allocation18_spill] sm:$0xff]  ;;  %v21478_v10 = vld [vmem:[#allocation19_spill] sm:$0xff] }
 0x3a0   : > { %v19585_v11 = vadd.f32 %v4629_v51, %v4488_v45  ;;  %v4694_v12 = vmax.f32 %v19569_v54, %v19575_v63  ;;  %v4491_v0 = vadd.f32 %v19416_v40, %v19329_v26  ;;  %v4492_v50 = vadd.f32 %v19418_v9, %v19332_v43  ;;  %v21483_v17 = vld [vmem:[#allocation14_spill] sm:$0xff]  ;;  %v21508_v54 = vld [vmem:[#allocation39_spill] sm:$0xff] }
 0x3a1   : > { %v4693_v35 = vmax.f32 %v19565_v32, %v19572_v59  ;;  %v4695_v1 = vmax.f32 %v19578_v29, %v19583_v42  ;;  %v4820_v46 = vrot.slane %v19591_v41, 1  ;;  %v19622_v52 = vadd.f32 %v19478_v48, %v4397_v47  ;;  %v21475_v48 = vld [vmem:[#allocation10_spill] sm:$0xff] }
 0x3a2   : > { %v4696_v55 = vmax.f32 %v19581_v18, %v19585_v11  ;;  %v19625_v56 = vadd.f32 %v19480_v15, %v4398_v20  ;;  %v4591_v26 = vadd.f32 %v19482_v4, %v19372_v19  ;;  %v4592_v43 = vadd.f32 %v19484_v14, %v19374_v37  ;;  %v21479_v19 = vld [vmem:[#allocation12_spill] sm:$0xff]  ;;  %v21485_v20 = vld [vmem:[#allocation15_spill] sm:$0xff] }
 0x3a3   : > { %v19635_v53 = vmax.f32 %v3510_v61, 0.0  ;;  %v4211_v15 = vadd.f32 %v21476_v13, %v21475_v48  ;;  %v4212_v51 = vadd.f32 %v21478_v10, %v21477_v7  ;;  %v21480_v4 = vld [vmem:[#allocation20_spill] sm:$0xff]  ;;  %v4214_v23 = vadd.f32 %v21482_v60, %v21481_v39  ;;  %v21493_v7 = vld [vmem:[#allocation23_spill] sm:$0xff]  ;;  %v21496_v60 = vld [vmem:[#allocation37_spill] sm:$0xff] }
 0x3a4   : > { %v4213_v8 = vadd.f32 %v21480_v4, %v21479_v19  ;;  %v21484_v61 = vld [vmem:[#allocation24_spill] sm:$0xff]  ;;  %v21494_v10 = vld [vmem:[#allocation35_spill] sm:$0xff] }
 0x3a5   : > { %v4667_v44 = vpop.f32.mrf.mxu3  ;;  %v4303_v47 = vadd.f32 %v21484_v61, %v21483_v17  ;;  %v4494_v19 = vadd.f32 %v21494_v10, %v21493_v7  ;;  %v21495_v4 = vld [vmem:[#allocation36_spill] sm:$0xff]  ;;  %v21503_v7 = vld [vmem:[#allocation17_spill] sm:$0xff] }
 0x3a6   : > { %v4648_v2 = vpop.f32.mrf.mxu2  ;;  %v19629_v5 = vadd.f32 %v4667_v44, %v4490_v31  ;;  %v4613_v21 = vpop.f32.mrf.mxu0  ;;  %v21489_v44 = vld [vmem:[#allocation30_spill] sm:$0xff]  ;;  %v21497_v17 = vld [vmem:[#allocation28_spill] sm:$0xff] }
 0x3a7   : > { %v19627_v3 = vadd.f32 %v4648_v2, %v4489_v6  ;;  %v4632_v27 = vpop.f32.mrf.mxu1  ;;  %v4683_v40 = vadd.f32 %v4613_v21, %v4491_v0  ;;  %v21486_v6 = vld [vmem:[#allocation25_spill] sm:$0xff]  ;;  %v21487_v0 = vld [vmem:[#allocation16_spill] sm:$0xff]  ;;  %v4403_v21 = vadd.f32 %v21489_v44, %v4211_v15  ;;  %v4495_v39 = vadd.f32 %v21495_v4, %v4303_v47 }
 0x3a8   : > { %v4684_v9 = vadd.f32 %v4632_v27, %v4492_v50  ;;  %v4698_v24 = vmax.f32 %v19625_v56, %v19629_v5  ;;  %v4304_v31 = vadd.f32 %v21486_v6, %v21485_v20  ;;  %v21488_v50 = vld [vmem:[#allocation26_spill] sm:$0xff]  ;;  %v21490_v27 = vld [vmem:[#allocation31_spill] sm:$0xff]  ;;  %v21499_v20 = vld [vmem:[#allocation29_spill] sm:$0xff] }
 0x3a9   : > { %v4697_v45 = vmax.f32 %v19622_v52, %v19627_v3  ;;  %v4699_v37 = vmax.f32 %v4591_v26, %v4683_v40  ;;  %v4305_v2 = vadd.f32 %v21488_v50, %v21487_v0  ;;  %v4404_v48 = vadd.f32 %v21490_v27, %v4212_v51  ;;  %v21491_v40 = vld [vmem:[#allocation22_spill] sm:$0xff]  ;;  %v21498_v51 = vld [vmem:[#allocation40_spill] sm:$0xff]  ;;  %v21502_v6 = vld [vmem:[#allocation43_spill] sm:$0xff] }
 0x3aa   : > { %v4700_v14 = vmax.f32 %v4592_v43, %v4684_v9  ;;  %v21492_v9 = vld [vmem:[#allocation34_spill] sm:$0xff]  ;;  %v4496_v15 = vadd.f32 %v21496_v60, %v4304_v31  ;;  %v4593_v61 = vadd.f32 %v21498_v51, %v21497_v17  ;;  %v4594_v22 = vadd.f32 %v21500_v16, %v21499_v20  ;;  %v21505_v4 = vld [vmem:[#allocation32_spill] sm:$0xff] }
 0x3ab   : > { %v4707_v26 = vmax.f32 %v4691_v30, %v4699_v37  ;;  %v4493_v13 = vadd.f32 %v21492_v9, %v21491_v40  ;;  %v21501_v37 = vld [vmem:[#allocation42_spill] sm:$0xff]  ;;  %v4596_v0 = vadd.f32 %v21502_v6, %v4404_v48  ;;  %v4405_v60 = vadd.f32 %v21505_v4, %v4213_v8  ;;  %v14287_v20 = vld [vmem:[%s14845_s8 + $0x238] sm:$0xff]  ;;  %v14286_v18 = vld [vmem:[%s14845_s8 + $0x230] sm:$0xff] }
 0x3ac   : > { %v4708_v43 = vmax.f32 %v4692_v57, %v4700_v14  ;;  %v4595_v14 = vadd.f32 %v21501_v37, %v4403_v21  ;;  %v14294_v11 = vld [vmem:[%s14845_s8 + $0x270] sm:$0xff]  ;;  %v14284_v3 = vld [vmem:[%s14845_s8 + $0x220] sm:$0xff]  ;;  %v14301_v5 = vld [vmem:[%s14845_s8 + $0x2a8] sm:$0xff] }
 0x3ad   : > { %v4715_v30 = vadd.f32 %v4707_v26, %v19511_v25  ;;  %v4670_v57 = vpop.f32.mrf.mxu3  ;;  %v14292_v56 = vld [vmem:[%s14845_s8 + $0x260] sm:$0xff] }
 0x3ae   : > { %v4716_v33 = vadd.f32 %v4708_v43, %v19535_v28  ;;  %v4651_v62 = vpop.f32.mrf.mxu2  ;;  %v4686_v47 = vadd.f32 %v4670_v57, %v4494_v19  ;;  %v4615_v31 = vpop.f32.mrf.mxu0  ;;  %v21504_v43 = vld [vmem:[#allocation27_spill] sm:$0xff] }
 0x3af   : > { %v4685_v50 = vadd.f32 %v4651_v62, %v4493_v13  ;;  %v4634_v44 = vpop.f32.mrf.mxu1  ;;  %v19677_v27 = vmax.f32 %v4715_v30, 0.0  ;;  %v4687_v9 = vadd.f32 %v4615_v31, %v4495_v39  ;;  %v4306_v10 = vadd.f32 %v21504_v43, %v21503_v7  ;;  %v14295_v39 = vld [vmem:[%s14845_s8 + $0x278] sm:$0xff]  ;;  %v14285_v43 = vld [vmem:[%s14845_s8 + $0x228] sm:$0xff] }
 0x3b0   : > { %v19679_v40 = vmax.f32 %v4716_v33, 0.0  ;;  %v4688_v26 = vadd.f32 %v4634_v44, %v4496_v15  ;;  %v4702_v17 = vmax.f32 %v4594_v22, %v4686_v47  ;;  %v21506_v22 = vld [vmem:[#allocation33_spill] sm:$0xff]  ;;  %v21507_v33 = vld [vmem:[#allocation38_spill] sm:$0xff] }
 0x3b1   : > { %v4701_v21 = vmax.f32 %v4593_v61, %v4685_v50  ;;  %v4703_v48 = vmax.f32 %v4595_v14, %v4687_v9  ;;  %v4827_v19 = vsel %vm446_vm0, %v4819_v34, %v19677_v27  ;;  %v4406_v30 = vadd.f32 %v21506_v22, %v4214_v23  ;;  %v14303_v44 = vld [vmem:[%s14845_s8 + $0x2b8] sm:$0xff]  ;;  %v14282_v22 = vld [vmem:[%s14845_s8 + $0x210] sm:$0xff] }
 0x3b2   : > { %v4704_v13 = vmax.f32 %v4596_v0, %v4688_v26  ;;  %v4828_v51 = vsel %vm446_vm0, %v4820_v46, %v19679_v40  ;;  %v4710_v8 = vmax.f32 %v4694_v12, %v4702_v17  ;;  %v4831_v61 = vpack.c.bf16 %v4827_v19, %v4827_v19  ;;  %v21509_v12 = vld [vmem:[#allocation44_spill] sm:$0xff] }
 0x3b3   : > { %v4709_v15 = vmax.f32 %v4693_v35, %v4701_v21  ;;  %v4832_v16 = vpack.c.bf16 %v4828_v51, %v4828_v51  ;;  %v4497_v34 = vadd.f32 %v21507_v33, %v4305_v2  ;;  %v19703_v46 = vmax.f32 %v4695_v1, %v4703_v48  ;;  %v21510_v2 = vld [vmem:[#allocation45_spill] sm:$0xff]  ;;  %v14302_v21 = vld [vmem:[%s14845_s8 + $0x2b0] sm:$0xff] }
 0x3b4   : > { %v19708_v32 = vmax.f32 %v4696_v55, %v4704_v13  ;;  %v4498_v59 = vadd.f32 %v21508_v54, %v4306_v10  ;;  %v4718_v35 = vadd.f32 %v4710_v8, %v19557_v58  ;;  %5099 = vmatmul.bf16.vlgmr.msra.gmra.mxu0 %v4831_v61  ;;  %v4597_v23 = vadd.f32 %v21509_v12, %v4405_v60  ;;  %v14311_v9 = vld [vmem:[%s14845_s8 + $0x2f8] sm:$0xff]  ;;  %v14293_v10 = vld [vmem:[%s14845_s8 + $0x268] sm:$0xff]  ;;  %v14310_v17 = vld [vmem:[%s14845_s8 + $0x2f0] sm:$0xff] }
 0x3b5   : > { %v4717_v63 = vadd.f32 %v4709_v15, %v19555_v49  ;;  %5112 = vmatmul.bf16.vlgmr.msra.gmra.mxu1 %v4832_v16  ;;  %v4598_v62 = vadd.f32 %v21510_v2, %v4406_v30  ;;  %v4672_v42 = vpop.f32.mrf.mxu3  ;;  %5667 = vmatpush.bf16.msra.mxu0 %v14287_v20  ;;  %v4821_v1 = vrot.slane %v19614_v36, 1  ;;  %v4822_v55 = vrot.slane %v19635_v53, 1  ;;  %v14283_v19 = vld [vmem:[%s14845_s8 + $0x218] sm:$0xff]  ;;  %v14300_v61 = vld [vmem:[%s14845_s8 + $0x2a0] sm:$0xff]  ;;  %v14290_v30 = vld [vmem:[%s14845_s8 + $0x250] sm:$0xff] }
 0x3b6   : > { %v4653_v29 = vpop.f32.mrf.mxu2  ;;  %5680 = vmatpush.bf16.msra.mxu1 %v14295_v39  ;;  %v19721_v37 = vmax.f32 %v4718_v35, 0.0  ;;  %v4690_v6 = vadd.f32 %v4672_v42, %v4498_v59  ;;  %v4735_v48 = vrot.slane %v19677_v27, 7  ;;  %v4736_v52 = vrot.slane %v19679_v40, 7  ;;  %v14291_v51 = vld [vmem:[%s14845_s8 + $0x258] sm:$0xff]  ;;  %v14308_v16 = vld [vmem:[%s14845_s8 + $0x2e0] sm:$0xff]  ;;  %v14281_v12 = vld [vmem:[%s14845_s8 + $0x208] sm:$0xff] }
 0x3b7   : > { %v19719_v57 = vmax.f32 %v4717_v63, 0.0  ;;  %v4689_v14 = vadd.f32 %v4653_v29, %v4497_v34  ;;  %v14299_v54 = vld [vmem:[%s14845_s8 + $0x298] sm:$0xff]  ;;  %v14298_v2 = vld [vmem:[%s14845_s8 + $0x290] sm:$0xff]  ;;  %v5395_v29 = vrot.slane %v19677_v27, 1  ;;  %v5396_v42 = vrot.slane %v19679_v40, 1 }
 0x3b8   : > { %v4706_v50 = vmax.f32 %v4598_v62, %v4690_v6  ;;  %v4830_v31 = vsel %vm446_vm0, %v4822_v55, %v19721_v37  ;;  %v4744_v13 = vsel %vm446_vm0, %v19591_v41, %v4736_v52  ;;  %v4738_v39 = vrot.slane %v19721_v37, 7  ;;  %v14307_v59 = vld [vmem:[%s14845_s8 + $0x2d8] sm:$0xff]  ;;  %v14306_v62 = vld [vmem:[%s14845_s8 + $0x2d0] sm:$0xff] }
 0x3b9   : > { %v4705_v0 = vmax.f32 %v4597_v23, %v4689_v14  ;;  %v4829_v47 = vsel %vm446_vm0, %v4821_v1, %v19719_v57  ;;  %5668 = vmatpush.bf16.msra.mxu0 %v14286_v18  ;;  %v4834_v7 = vpack.c.bf16 %v4830_v31, %v4830_v31  ;;  %v4737_v20 = vrot.slane %v19719_v57, 7  ;;  %v14289_v23 = vld [vmem:[%s14845_s8 + $0x248] sm:$0xff]  ;;  %v14280_v18 = vld [vmem:[%s14845_s8 + $0x200] sm:$0xff]  ;;  %v14319_v14 = vld [vmem:[%s14845_s8 + $0x338] sm:$0xff] }
 0x3ba   : > { %5681 = vmatpush.bf16.msra.mxu1 %v14294_v11  ;;  %v4833_v26 = vpack.c.bf16 %v4829_v47, %v4829_v47  ;;  %v19739_v60 = vmax.f32 %v4698_v24, %v4706_v50  ;;  %v4743_v24 = vsel %vm446_vm0, %v19551_v38, %v4735_v48  ;;  %v4748_v8 = vpack.c.bf16 %v4744_v13, %v4744_v13  ;;  %v14288_v11 = vld [vmem:[%s14845_s8 + $0x240] sm:$0xff]  ;;  %v14327_v6 = vld [vmem:[%s14845_s8 + $0x378] sm:$0xff]  ;;  %v14305_v50 = vld [vmem:[%s14845_s8 + $0x2c8] sm:$0xff] }
 0x3bb   : > { %v19734_v4 = vmax.f32 %v4697_v45, %v4705_v0  ;;  %5138 = vmatmul.bf16.vlgmr.msra.gmra.mxu3 %v4834_v7  ;;  %v14309_v45 = vld [vmem:[%s14845_s8 + $0x2e8] sm:$0xff]  ;;  %v4747_v15 = vpack.c.bf16 %v4743_v24, %v4743_v24  ;;  %v4745_v33 = vsel %vm446_vm0, %v19614_v36, %v4737_v20  ;;  %v4746_v34 = vsel %vm446_vm0, %v19635_v53, %v4738_v39  ;;  %v14326_v7 = vld [vmem:[%s14845_s8 + $0x370] sm:$0xff]  ;;  %v14335_v48 = vld [vmem:[%s14845_s8 + $0x3b8] sm:$0xff] }
 0x3bc   : > { %5125 = vmatmul.bf16.vlgmr.msra.gmra.mxu2 %v4833_v26  ;;  %5706 = vmatpush.bf16.msra.mxu3 %v14311_v9  ;;  %v4749_v63 = vpack.c.bf16 %v4745_v33, %v4745_v33  ;;  %v4750_v35 = vpack.c.bf16 %v4746_v34, %v4746_v34  ;;  %v5387_v1 = vrot.slane %v19551_v38, 2  ;;  %v5388_v55 = vrot.slane %v19591_v41, 2  ;;  %v14297_v0 = vld [vmem:[%s14845_s8 + $0x288] sm:$0xff]  ;;  %v14318_v26 = vld [vmem:[%s14845_s8 + $0x330] sm:$0xff]  ;;  %v14343_v52 = vld [vmem:[%s14845_s8 + $0x3f8] sm:$0xff] }
 0x3bd   : > { %5693 = vmatpush.bf16.msra.mxu2 %v14303_v44  ;;  %5669 = vmatpush.bf16.msra.mxu0 %v14285_v43  ;;  %v5397_v43 = vrot.slane %v19719_v57, 1  ;;  %v14332_v33 = vld [vmem:[%s14845_s8 + $0x3a0] sm:$0xff] }
 0x3be   : > { %5682 = vmatpush.bf16.msra.mxu1 %v14293_v10  ;;  %v5403_v47 = vsel %vm446_vm0, %v5387_v1, %v5395_v29  ;;  %v5404_v31 = vsel %vm446_vm0, %v5388_v55, %v5396_v42  ;;  %v5398_v10 = vrot.slane %v19721_v37, 1  ;;  %v14340_v34 = vld [vmem:[%s14845_s8 + $0x3e0] sm:$0xff]  ;;  %v5728_v29 = vrot.slane %v19677_v27, 2 }
 0x3bf   : > { %v5407_v44 = vpack.c.bf16 %v5403_v47, %v5403_v47  ;;  %v5408_v9 = vpack.c.bf16 %v5404_v31, %v5404_v31  ;;  %v5729_v42 = vrot.slane %v19679_v40, 2  ;;  %v5720_v1 = vrot.slane %v19551_v38, 3 }
 0x3c0   : > { %5707 = vmatpush.bf16.msra.mxu3 %v14310_v17  ;;  %v14304_v17 = vld [vmem:[%s14845_s8 + $0x2c0] sm:$0xff]  ;;  %v5721_v55 = vrot.slane %v19591_v41, 3 }
 0x3c1   : > { %5694 = vmatpush.bf16.msra.mxu2 %v14302_v21  ;;  %5670 = vmatpush.bf16.msra.mxu0 %v14284_v3  ;;  %v14296_v21 = vld [vmem:[%s14845_s8 + $0x280] sm:$0xff]  ;;  %v5389_v3 = vrot.slane %v19614_v36, 2  ;;  %v5736_v47 = vsel %vm446_vm0, %v5720_v1, %v5728_v29  ;;  %v6061_v29 = vrot.slane %v19677_v27, 3  ;;  %v6053_v1 = vrot.slane %v19551_v38, 4 }
 0x3c2   : > { %5683 = vmatpush.bf16.msra.mxu1 %v14292_v56  ;;  %v5390_v56 = vrot.slane %v19635_v53, 2  ;;  %v5737_v31 = vsel %vm446_vm0, %v5721_v55, %v5729_v42  ;;  %v6062_v42 = vrot.slane %v19679_v40, 3  ;;  %v6054_v55 = vrot.slane %v19591_v41, 4 }
 0x3c3   : > { %v5405_v24 = vsel %vm446_vm0, %v5389_v3, %v5397_v43  ;;  %v14350_v43 = vld [vmem:[%s14845_s8 + $0x430] sm:$0xff]  ;;  %v14367_v3 = vld [vmem:[%s14845_s8 + $0x4b8] sm:$0xff] }
 0x3c4   : > { %5708 = vmatpush.bf16.msra.mxu3 %v14309_v45  ;;  %5343 = vmatmul.bf16.vlgmr.msrb.gmra.mxu0 %v4747_v15  ;;  %v14325_v45 = vld [vmem:[%s14845_s8 + $0x368] sm:$0xff]  ;;  %v5406_v13 = vsel %vm446_vm0, %v5390_v56, %v5398_v10  ;;  %v5409_v20 = vpack.c.bf16 %v5405_v24, %v5405_v24  ;;  %v14316_v15 = vld [vmem:[%s14845_s8 + $0x320] sm:$0xff]  ;;  %v14358_v10 = vld [vmem:[%s14845_s8 + $0x470] sm:$0xff] }
 0x3c5   : > { %5695 = vmatpush.bf16.msra.mxu2 %v14301_v5  ;;  %5356 = vmatmul.bf16.vlgmr.msrb.gmra.mxu1 %v4748_v8  ;;  %v14317_v5 = vld [vmem:[%s14845_s8 + $0x328] sm:$0xff]  ;;  %v5410_v39 = vpack.c.bf16 %v5406_v13, %v5406_v13  ;;  %v14324_v8 = vld [vmem:[%s14845_s8 + $0x360] sm:$0xff]  ;;  %v14375_v56 = vld [vmem:[%s14845_s8 + $0x4f8] sm:$0xff] }
 0x3c6   : > { %5671 = vmatpush.bf16.msra.mxu0 %v14283_v19  ;;  %5684 = vmatpush.bf16.msra.mxu1 %v14291_v51  ;;  %v14334_v19 = vld [vmem:[%s14845_s8 + $0x3b0] sm:$0xff]  ;;  %v14349_v24 = vld [vmem:[%s14845_s8 + $0x428] sm:$0xff] }
 0x3c7   : > { %v14342_v51 = vld [vmem:[%s14845_s8 + $0x3f0] sm:$0xff]  ;;  %v14357_v13 = vld [vmem:[%s14845_s8 + $0x468] sm:$0xff] }
 0x3c8   : > { %5709 = vmatpush.bf16.msra.mxu3 %v14308_v16  ;;  %v14341_v16 = vld [vmem:[%s14845_s8 + $0x3e8] sm:$0xff] }
 0x3c9   : > { %5696 = vmatpush.bf16.msra.mxu2 %v14300_v61  ;;  %v14333_v61 = vld [vmem:[%s14845_s8 + $0x3a8] sm:$0xff] }
 0x3ca   : > { %5672 = vmatpush.bf16.msra.mxu0 %v14282_v22  ;;  %5685 = vmatpush.bf16.msra.mxu1 %v14290_v30  ;;  %v14315_v22 = vld [vmem:[%s14845_s8 + $0x318] sm:$0xff] }
 0x3cb   : > { %5382 = vmatmul.bf16.vlgmr.msrb.gmra.mxu3 %v4750_v35  ;;  %v14323_v30 = vld [vmem:[%s14845_s8 + $0x358] sm:$0xff] }
 0x3cc   : > { %5369 = vmatmul.bf16.vlgmr.msrb.gmra.mxu2 %v4749_v63  ;;  %5710 = vmatpush.bf16.msra.mxu3 %v14307_v59  ;;  %v14322_v59 = vld [vmem:[%s14845_s8 + $0x350] sm:$0xff]  ;;  %v14331_v63 = vld [vmem:[%s14845_s8 + $0x398] sm:$0xff] }
 0x3cd   : > { %5697 = vmatpush.bf16.msra.mxu2 %v14299_v54  ;;  %v14314_v54 = vld [vmem:[%s14845_s8 + $0x310] sm:$0xff]  ;;  %v14339_v35 = vld [vmem:[%s14845_s8 + $0x3d8] sm:$0xff] }
 0x3ce   : > { %5673 = vmatpush.bf16.msra.mxu0 %v14281_v12  ;;  %5686 = vmatpush.bf16.msra.mxu1 %v14289_v23  ;;  %v14313_v12 = vld [vmem:[%s14845_s8 + $0x308] sm:$0xff] }
 0x3cf   : > { %v14321_v23 = vld [vmem:[%s14845_s8 + $0x348] sm:$0xff] }
 0x3d0   : > { %5711 = vmatpush.bf16.msra.mxu3 %v14306_v62  ;;  %v14338_v62 = vld [vmem:[%s14845_s8 + $0x3d0] sm:$0xff] }
 0x3d1   : > { %5698 = vmatpush.bf16.msra.mxu2 %v14298_v2  ;;  %v14330_v2 = vld [vmem:[%s14845_s8 + $0x390] sm:$0xff] }
 0x3d2   : > { %5674 = vmatpush.bf16.msra.mxu0 %v14280_v18  ;;  %5687 = vmatpush.bf16.msra.mxu1 %v14288_v11  ;;  %v14312_v18 = vld [vmem:[%s14845_s8 + $0x300] sm:$0xff] }
 0x3d3   : > { %v14320_v11 = vld [vmem:[%s14845_s8 + $0x340] sm:$0xff] }
 0x3d4   : > { %5712 = vmatpush.bf16.msra.mxu3 %v14305_v50  ;;  %v14337_v50 = vld [vmem:[%s14845_s8 + $0x3c8] sm:$0xff] }
 0x3d5   : > { %5699 = vmatpush.bf16.msra.mxu2 %v14297_v0  ;;  %5675 = vmatmul.bf16.vlgmr.msra.gmra.mxu0 %v5407_v44  ;;  %v14329_v0 = vld [vmem:[%s14845_s8 + $0x388] sm:$0xff]  ;;  %v5730_v44 = vrot.slane %v19719_v57, 2 }
 0x3d6   : > { %6000 = vmatpush.bf16.msrb.mxu0 %v14319_v14  ;;  %6013 = vmatpush.bf16.msrb.mxu1 %v14327_v6  ;;  %v14351_v14 = vld [vmem:[%s14845_s8 + $0x438] sm:$0xff] }
 0x3d7   : > { %5688 = vmatmul.bf16.vlgmr.msra.gmra.mxu1 %v5408_v9  ;;  %v14359_v6 = vld [vmem:[%s14845_s8 + $0x478] sm:$0xff]  ;;  %v5731_v9 = vrot.slane %v19721_v37, 2 }
 0x3d8   : > { %5713 = vmatpush.bf16.msra.mxu3 %v14304_v17  ;;  %v14336_v17 = vld [vmem:[%s14845_s8 + $0x3c0] sm:$0xff] }
 0x3d9   : > { %5700 = vmatpush.bf16.msra.mxu2 %v14296_v21  ;;  %v14328_v21 = vld [vmem:[%s14845_s8 + $0x380] sm:$0xff] }
 0x3da   : > { %6001 = vmatpush.bf16.msrb.mxu0 %v14318_v26  ;;  %6014 = vmatpush.bf16.msrb.mxu1 %v14326_v7  ;;  %v5740_v26 = vpack.c.bf16 %v5736_v47, %v5736_v47  ;;  %v5741_v7 = vpack.c.bf16 %v5737_v31, %v5737_v31  ;;  %v6069_v47 = vsel %vm446_vm0, %v6053_v1, %v6061_v29  ;;  %v6394_v29 = vrot.slane %v19677_v27, 4 }
 0x3db   : > { %5714 = vmatmul.bf16.vlgmr.msra.gmra.mxu3 %v5410_v39  ;;  %v14374_v39 = vld [vmem:[%s14845_s8 + $0x4f0] sm:$0xff]  ;;  %v6070_v31 = vsel %vm446_vm0, %v6054_v55, %v6062_v42  ;;  %v6395_v42 = vrot.slane %v19679_v40, 4  ;;  %v6386_v1 = vrot.slane %v19551_v38, 5  ;;  %v6387_v55 = vrot.slane %v19591_v41, 5 }
 0x3dc   : > { %6039 = vmatpush.bf16.msrb.mxu3 %v14343_v52  ;;  %5701 = vmatmul.bf16.vlgmr.msra.gmra.mxu2 %v5409_v20  ;;  %v5723_v52 = vrot.slane %v19635_v53, 3  ;;  %v14366_v20 = vld [vmem:[%s14845_s8 + $0x4b0] sm:$0xff] }
 0x3dd   : > { %6026 = vmatpush.bf16.msrb.mxu2 %v14335_v48  ;;  %v5722_v48 = vrot.slane %v19614_v36, 3 }
 0x3de   : > { %6002 = vmatpush.bf16.msrb.mxu0 %v14317_v5  ;;  %6015 = vmatpush.bf16.msrb.mxu1 %v14325_v45  ;;  %v5739_v45 = vsel %vm446_vm0, %v5723_v52, %v5731_v9  ;;  %v6064_v9 = vrot.slane %v19721_v37, 3  ;;  %v6056_v52 = vrot.slane %v19635_v53, 4 }
 0x3df   : > { %v5738_v5 = vsel %vm446_vm0, %v5722_v48, %v5730_v44  ;;  %v6063_v44 = vrot.slane %v19719_v57, 3  ;;  %v6055_v48 = vrot.slane %v19614_v36, 4 }
 0x3e0   : > { %6040 = vmatpush.bf16.msrb.mxu3 %v14342_v51  ;;  %v5743_v51 = vpack.c.bf16 %v5739_v45, %v5739_v45  ;;  %v6072_v45 = vsel %vm446_vm0, %v6056_v52, %v6064_v9  ;;  %v6397_v9 = vrot.slane %v19721_v37, 4  ;;  %v6389_v52 = vrot.slane %v19635_v53, 5 }
 0x3e1   : > { %6027 = vmatpush.bf16.msrb.mxu2 %v14334_v19  ;;  %v5742_v19 = vpack.c.bf16 %v5738_v5, %v5738_v5  ;;  %v6071_v5 = vsel %vm446_vm0, %v6055_v48, %v6063_v44  ;;  %v6396_v44 = vrot.slane %v19719_v57, 4  ;;  %v6388_v48 = vrot.slane %v19614_v36, 5 }
 0x3e2   : > { %6003 = vmatpush.bf16.msrb.mxu0 %v14316_v15  ;;  %6016 = vmatpush.bf16.msrb.mxu1 %v14324_v8  ;;  %v14348_v15 = vld [vmem:[%s14845_s8 + $0x420] sm:$0xff] }
 0x3e3   : > { %v14356_v8 = vld [vmem:[%s14845_s8 + $0x460] sm:$0xff] }
 0x3e4   : > { %6041 = vmatpush.bf16.msrb.mxu3 %v14341_v16  ;;  %v14373_v16 = vld [vmem:[%s14845_s8 + $0x4e8] sm:$0xff] }
 0x3e5   : > { %6028 = vmatpush.bf16.msrb.mxu2 %v14333_v61  ;;  %v14365_v61 = vld [vmem:[%s14845_s8 + $0x4a8] sm:$0xff] }
 0x3e6   : > { %6004 = vmatpush.bf16.msrb.mxu0 %v14315_v22  ;;  %6017 = vmatpush.bf16.msrb.mxu1 %v14323_v30  ;;  %v14347_v22 = vld [vmem:[%s14845_s8 + $0x418] sm:$0xff] }
 0x3e7   : > { %v14355_v30 = vld [vmem:[%s14845_s8 + $0x458] sm:$0xff] }
 0x3e8   : > { %6042 = vmatpush.bf16.msrb.mxu3 %v14340_v34  ;;  %v14372_v34 = vld [vmem:[%s14845_s8 + $0x4e0] sm:$0xff] }
 0x3e9   : > { %6029 = vmatpush.bf16.msrb.mxu2 %v14332_v33  ;;  %v14364_v33 = vld [vmem:[%s14845_s8 + $0x4a0] sm:$0xff] }
 0x3ea   : > { %6005 = vmatpush.bf16.msrb.mxu0 %v14314_v54  ;;  %6018 = vmatpush.bf16.msrb.mxu1 %v14322_v59  ;;  %v14346_v54 = vld [vmem:[%s14845_s8 + $0x410] sm:$0xff] }
 0x3eb   : > { %v14354_v59 = vld [vmem:[%s14845_s8 + $0x450] sm:$0xff] }
 0x3ec   : > { %6043 = vmatpush.bf16.msrb.mxu3 %v14339_v35  ;;  %v14371_v35 = vld [vmem:[%s14845_s8 + $0x4d8] sm:$0xff] }
 0x3ed   : > { %6030 = vmatpush.bf16.msrb.mxu2 %v14331_v63  ;;  %v14363_v63 = vld [vmem:[%s14845_s8 + $0x498] sm:$0xff] }
 0x3ee   : > { %6006 = vmatpush.bf16.msrb.mxu0 %v14313_v12  ;;  %6019 = vmatpush.bf16.msrb.mxu1 %v14321_v23  ;;  %v14345_v12 = vld [vmem:[%s14845_s8 + $0x408] sm:$0xff] }
 0x3ef   : > { %v14353_v23 = vld [vmem:[%s14845_s8 + $0x448] sm:$0xff] }
 0x3f0   : > { %6044 = vmatpush.bf16.msrb.mxu3 %v14338_v62  ;;  %v14370_v62 = vld [vmem:[%s14845_s8 + $0x4d0] sm:$0xff] }
 0x3f1   : > { %6031 = vmatpush.bf16.msrb.mxu2 %v14330_v2  ;;  %v14362_v2 = vld [vmem:[%s14845_s8 + $0x490] sm:$0xff] }
 0x3f2   : > { %6007 = vmatpush.bf16.msrb.mxu0 %v14312_v18  ;;  %6020 = vmatpush.bf16.msrb.mxu1 %v14320_v11  ;;  %v14344_v18 = vld [vmem:[%s14845_s8 + $0x400] sm:$0xff] }
 0x3f3   : > { %v14352_v11 = vld [vmem:[%s14845_s8 + $0x440] sm:$0xff] }
 0x3f4   : > { %6045 = vmatpush.bf16.msrb.mxu3 %v14337_v50  ;;  %v14369_v50 = vld [vmem:[%s14845_s8 + $0x4c8] sm:$0xff] }
 0x3f5   : > { %6032 = vmatpush.bf16.msrb.mxu2 %v14329_v0  ;;  %6008 = vmatmul.bf16.vlgmr.msrb.gmra.mxu0 %v5740_v26  ;;  %v14361_v0 = vld [vmem:[%s14845_s8 + $0x488] sm:$0xff]  ;;  %v6073_v26 = vpack.c.bf16 %v6069_v47, %v6069_v47  ;;  %v6402_v47 = vsel %vm446_vm0, %v6386_v1, %v6394_v29 }
 0x3f6   : > { %6333 = vmatpush.bf16.msra.mxu0 %v14351_v14  ;;  %6346 = vmatpush.bf16.msra.mxu1 %v14359_v6  ;;  %v14383_v14 = vld [vmem:[%s14845_s8 + $0x538] sm:$0xff] }
 0x3f7   : > { %6021 = vmatmul.bf16.vlgmr.msrb.gmra.mxu1 %v5741_v7  ;;  %v14391_v6 = vld [vmem:[%s14845_s8 + $0x578] sm:$0xff]  ;;  %v6074_v7 = vpack.c.bf16 %v6070_v31, %v6070_v31  ;;  %v6403_v31 = vsel %vm446_vm0, %v6387_v55, %v6395_v42  ;;  %v14409_v55 = vld [vmem:[%s14845_s8 + $0x608] sm:$0xff] }
 0x3f8   : > { %6046 = vmatpush.bf16.msrb.mxu3 %v14336_v17  ;;  %v14368_v17 = vld [vmem:[%s14845_s8 + $0x4c0] sm:$0xff]  ;;  %v14427_v42 = vld [vmem:[%s14845_s8 + $0x698] sm:$0xff] }
 0x3f9   : > { %6033 = vmatpush.bf16.msrb.mxu2 %v14328_v21  ;;  %v14360_v21 = vld [vmem:[%s14845_s8 + $0x480] sm:$0xff] }
 0x3fa   : > { %6334 = vmatpush.bf16.msra.mxu0 %v14350_v43  ;;  %6347 = vmatpush.bf16.msra.mxu1 %v14358_v10  ;;  %v14382_v43 = vld [vmem:[%s14845_s8 + $0x530] sm:$0xff] }
 0x3fb   : > { %6047 = vmatmul.bf16.vlgmr.msrb.gmra.mxu3 %v5743_v51  ;;  %v14390_v10 = vld [vmem:[%s14845_s8 + $0x570] sm:$0xff]  ;;  %v6076_v51 = vpack.c.bf16 %v6072_v45, %v6072_v45  ;;  %v6405_v45 = vsel %vm446_vm0, %v6389_v52, %v6397_v9  ;;  %v6728_v9 = vrot.slane %v19679_v40, 5  ;;  %v14447_v52 = vld [vmem:[%s14845_s8 + $0x738] sm:$0xff] }
 0x3fc   : > { %6372 = vmatpush.bf16.msra.mxu3 %v14375_v56  ;;  %6034 = vmatmul.bf16.vlgmr.msrb.gmra.mxu2 %v5742_v19  ;;  %v14407_v56 = vld [vmem:[%s14845_s8 + $0x5f8] sm:$0xff]  ;;  %v6075_v19 = vpack.c.bf16 %v6071_v5, %v6071_v5  ;;  %v6404_v5 = vsel %vm446_vm0, %v6388_v48, %v6396_v44  ;;  %v6727_v44 = vrot.slane %v19677_v27, 5 }
 0x3fd   : > { %6359 = vmatpush.bf16.msra.mxu2 %v14367_v3  ;;  %v14399_v3 = vld [vmem:[%s14845_s8 + $0x5b8] sm:$0xff] }
 0x3fe   : > { %6335 = vmatpush.bf16.msra.mxu0 %v14349_v24  ;;  %6348 = vmatpush.bf16.msra.mxu1 %v14357_v13  ;;  %v14381_v24 = vld [vmem:[%s14845_s8 + $0x528] sm:$0xff] }
 0x3ff   : > { %v14389_v13 = vld [vmem:[%s14845_s8 + $0x568] sm:$0xff] }
 0x400   : > { %6373 = vmatpush.bf16.msra.mxu3 %v14374_v39  ;;  %v14406_v39 = vld [vmem:[%s14845_s8 + $0x5f0] sm:$0xff] }
 0x401   : > { %6360 = vmatpush.bf16.msra.mxu2 %v14366_v20  ;;  %v14398_v20 = vld [vmem:[%s14845_s8 + $0x5b0] sm:$0xff] }
 0x402   : > { %6336 = vmatpush.bf16.msra.mxu0 %v14348_v15  ;;  %6349 = vmatpush.bf16.msra.mxu1 %v14356_v8  ;;  %v14380_v15 = vld [vmem:[%s14845_s8 + $0x520] sm:$0xff] }
 0x403   : > { %v14388_v8 = vld [vmem:[%s14845_s8 + $0x560] sm:$0xff] }
 0x404   : > { %6374 = vmatpush.bf16.msra.mxu3 %v14373_v16  ;;  %v14405_v16 = vld [vmem:[%s14845_s8 + $0x5e8] sm:$0xff] }
 0x405   : > { %6361 = vmatpush.bf16.msra.mxu2 %v14365_v61  ;;  %v14397_v61 = vld [vmem:[%s14845_s8 + $0x5a8] sm:$0xff] }
 0x406   : > { %6337 = vmatpush.bf16.msra.mxu0 %v14347_v22  ;;  %6350 = vmatpush.bf16.msra.mxu1 %v14355_v30  ;;  %v14379_v22 = vld [vmem:[%s14845_s8 + $0x518] sm:$0xff] }
 0x407   : > { %v14387_v30 = vld [vmem:[%s14845_s8 + $0x558] sm:$0xff] }
 0x408   : > { %6375 = vmatpush.bf16.msra.mxu3 %v14372_v34  ;;  %v14404_v34 = vld [vmem:[%s14845_s8 + $0x5e0] sm:$0xff] }
 0x409   : > { %6362 = vmatpush.bf16.msra.mxu2 %v14364_v33  ;;  %v14396_v33 = vld [vmem:[%s14845_s8 + $0x5a0] sm:$0xff] }
 0x40a   : > { %6338 = vmatpush.bf16.msra.mxu0 %v14346_v54  ;;  %6351 = vmatpush.bf16.msra.mxu1 %v14354_v59  ;;  %v14378_v54 = vld [vmem:[%s14845_s8 + $0x510] sm:$0xff] }
 0x40b   : > { %v14386_v59 = vld [vmem:[%s14845_s8 + $0x550] sm:$0xff] }
 0x40c   : > { %6376 = vmatpush.bf16.msra.mxu3 %v14371_v35  ;;  %v14403_v35 = vld [vmem:[%s14845_s8 + $0x5d8] sm:$0xff] }
 0x40d   : > { %6363 = vmatpush.bf16.msra.mxu2 %v14363_v63  ;;  %v14395_v63 = vld [vmem:[%s14845_s8 + $0x598] sm:$0xff] }
 0x40e   : > { %6339 = vmatpush.bf16.msra.mxu0 %v14345_v12  ;;  %6352 = vmatpush.bf16.msra.mxu1 %v14353_v23  ;;  %v14377_v12 = vld [vmem:[%s14845_s8 + $0x508] sm:$0xff] }
 0x40f   : > { %v14385_v23 = vld [vmem:[%s14845_s8 + $0x548] sm:$0xff] }
 0x410   : > { %6377 = vmatpush.bf16.msra.mxu3 %v14370_v62  ;;  %v14402_v62 = vld [vmem:[%s14845_s8 + $0x5d0] sm:$0xff] }
 0x411   : > { %6364 = vmatpush.bf16.msra.mxu2 %v14362_v2  ;;  %v14394_v2 = vld [vmem:[%s14845_s8 + $0x590] sm:$0xff] }
 0x412   : > { %6340 = vmatpush.bf16.msra.mxu0 %v14344_v18  ;;  %6353 = vmatpush.bf16.msra.mxu1 %v14352_v11  ;;  %v14376_v18 = vld [vmem:[%s14845_s8 + $0x500] sm:$0xff] }
 0x413   : > { %v14384_v11 = vld [vmem:[%s14845_s8 + $0x540] sm:$0xff] }
 0x414   : > { %6378 = vmatpush.bf16.msra.mxu3 %v14369_v50  ;;  %v14401_v50 = vld [vmem:[%s14845_s8 + $0x5c8] sm:$0xff] }
 0x415   : > { %6365 = vmatpush.bf16.msra.mxu2 %v14361_v0  ;;  %6341 = vmatmul.bf16.vlgmr.msra.gmra.mxu0 %v6073_v26  ;;  %v14393_v0 = vld [vmem:[%s14845_s8 + $0x588] sm:$0xff]  ;;  %v6406_v26 = vpack.c.bf16 %v6402_v47, %v6402_v47  ;;  %v14434_v47 = vld [vmem:[%s14845_s8 + $0x6d0] sm:$0xff] }
 0x416   : > { %6666 = vmatpush.bf16.msrb.mxu0 %v14383_v14  ;;  %6679 = vmatpush.bf16.msrb.mxu1 %v14391_v6  ;;  %v14415_v14 = vld [vmem:[%s14845_s8 + $0x638] sm:$0xff] }
 0x417   : > { %6354 = vmatmul.bf16.vlgmr.msra.gmra.mxu1 %v6074_v7  ;;  %v14423_v6 = vld [vmem:[%s14845_s8 + $0x678] sm:$0xff]  ;;  %v6407_v7 = vpack.c.bf16 %v6403_v31, %v6403_v31 }
 0x418   : > { %6379 = vmatpush.bf16.msra.mxu3 %v14368_v17  ;;  %v14400_v17 = vld [vmem:[%s14845_s8 + $0x5c0] sm:$0xff] }
 0x419   : > { %6366 = vmatpush.bf16.msra.mxu2 %v14360_v21  ;;  %v14392_v21 = vld [vmem:[%s14845_s8 + $0x580] sm:$0xff] }
 0x41a   : > { %6667 = vmatpush.bf16.msrb.mxu0 %v14382_v43  ;;  %6680 = vmatpush.bf16.msrb.mxu1 %v14390_v10  ;;  %v14414_v43 = vld [vmem:[%s14845_s8 + $0x630] sm:$0xff] }
 0x41b   : > { %6380 = vmatmul.bf16.vlgmr.msra.gmra.mxu3 %v6076_v51  ;;  %v14422_v10 = vld [vmem:[%s14845_s8 + $0x670] sm:$0xff] }
 0x41c   : > { %6705 = vmatpush.bf16.msrb.mxu3 %v14407_v56  ;;  %6367 = vmatmul.bf16.vlgmr.msra.gmra.mxu2 %v6075_v19  ;;  %v14439_v56 = vld [vmem:[%s14845_s8 + $0x6f8] sm:$0xff] }
 0x41d   : > { %6692 = vmatpush.bf16.msrb.mxu2 %v14399_v3  ;;  %v14431_v3 = vld [vmem:[%s14845_s8 + $0x6b8] sm:$0xff] }
 0x41e   : > { %6668 = vmatpush.bf16.msrb.mxu0 %v14381_v24  ;;  %6681 = vmatpush.bf16.msrb.mxu1 %v14389_v13  ;;  %v14413_v24 = vld [vmem:[%s14845_s8 + $0x628] sm:$0xff] }
 0x41f   : > { %v14421_v13 = vld [vmem:[%s14845_s8 + $0x668] sm:$0xff] }
 0x420   : > { %6706 = vmatpush.bf16.msrb.mxu3 %v14406_v39  ;;  %v6409_v39 = vpack.c.bf16 %v6405_v45, %v6405_v45 }
 0x421   : > { %6693 = vmatpush.bf16.msrb.mxu2 %v14398_v20  ;;  %v6408_v20 = vpack.c.bf16 %v6404_v5, %v6404_v5  ;;  %v14433_v5 = vld [vmem:[%s14845_s8 + $0x6c8] sm:$0xff] }
 0x422   : > { %6669 = vmatpush.bf16.msrb.mxu0 %v14380_v15  ;;  %6682 = vmatpush.bf16.msrb.mxu1 %v14388_v8  ;;  %v14430_v8 = vld [vmem:[%s14845_s8 + $0x6b0] sm:$0xff] }
 0x424   : > { %6707 = vmatpush.bf16.msrb.mxu3 %v14405_v16  ;;  %v14412_v16 = vld [vmem:[%s14845_s8 + $0x620] sm:$0xff] }
 0x425   : > { %6694 = vmatpush.bf16.msrb.mxu2 %v14397_v61  ;;  %v14438_v61 = vld [vmem:[%s14845_s8 + $0x6f0] sm:$0xff] }
 0x426   : > { %6670 = vmatpush.bf16.msrb.mxu0 %v14379_v22  ;;  %6683 = vmatpush.bf16.msrb.mxu1 %v14387_v30  ;;  %v14420_v22 = vld [vmem:[%s14845_s8 + $0x660] sm:$0xff]  ;;  %v14429_v30 = vld [vmem:[%s14845_s8 + $0x6a8] sm:$0xff] }
 0x428   : > { %6708 = vmatpush.bf16.msrb.mxu3 %v14404_v34  ;;  %v14411_v34 = vld [vmem:[%s14845_s8 + $0x618] sm:$0xff] }
 0x429   : > { %6695 = vmatpush.bf16.msrb.mxu2 %v14396_v33  ;;  %v14437_v33 = vld [vmem:[%s14845_s8 + $0x6e8] sm:$0xff] }
 0x42a   : > { %6671 = vmatpush.bf16.msrb.mxu0 %v14378_v54  ;;  %6684 = vmatpush.bf16.msrb.mxu1 %v14386_v59  ;;  %v14419_v54 = vld [vmem:[%s14845_s8 + $0x658] sm:$0xff] }
 0x42c   : > { %6709 = vmatpush.bf16.msrb.mxu3 %v14403_v35  ;;  %v14428_v35 = vld [vmem:[%s14845_s8 + $0x6a0] sm:$0xff] }
 0x42d   : > { %6696 = vmatpush.bf16.msrb.mxu2 %v14395_v63 }
 0x42e   : > { %6672 = vmatpush.bf16.msrb.mxu0 %v14377_v12  ;;  %6685 = vmatpush.bf16.msrb.mxu1 %v14385_v23  ;;  %v14436_v12 = vld [vmem:[%s14845_s8 + $0x6e0] sm:$0xff]  ;;  %v14410_v23 = vld [vmem:[%s14845_s8 + $0x610] sm:$0xff] }
 0x430   : > { %6710 = vmatpush.bf16.msrb.mxu3 %v14402_v62 }
 0x431   : > { %6697 = vmatpush.bf16.msrb.mxu2 %v14394_v2  ;;  %v5100_v19 = vpop.f32.mrf.mxu0  ;;  %v14418_v2 = vld [vmem:[%s14845_s8 + $0x650] sm:$0xff] }
 0x432   : > { %6673 = vmatpush.bf16.msrb.mxu0 %v14376_v18  ;;  %6686 = vmatpush.bf16.msrb.mxu1 %v14384_v11  ;;  %v5113_v51 = vpop.f32.mrf.mxu1  ;;  %v14435_v18 = vld [vmem:[%s14845_s8 + $0x6d8] sm:$0xff] }
 0x433   : > { %v5114_v15 = vadd.f32 %v5113_v51, %v5100_v19  ;;  %v6730_v19 = vrot.slane %v19721_v37, 5 }
 0x434   : > { %6711 = vmatpush.bf16.msrb.mxu3 %v14401_v50  ;;  %v14426_v50 = vld [vmem:[%s14845_s8 + $0x690] sm:$0xff] }
 0x435   : > { %6698 = vmatpush.bf16.msrb.mxu2 %v14393_v0  ;;  %6674 = vmatmul.bf16.vlgmr.msrb.gmra.mxu0 %v6406_v26 }
 0x436   : > { %6999 = vmatpush.bf16.msra.mxu0 %v14415_v14  ;;  %7012 = vmatpush.bf16.msra.mxu1 %v14423_v6  ;;  %v14417_v14 = vld [vmem:[%s14845_s8 + $0x648] sm:$0xff] }
 0x437   : > { %6687 = vmatmul.bf16.vlgmr.msrb.gmra.mxu1 %v6407_v7  ;;  %v14408_v7 = vld [vmem:[%s14845_s8 + $0x600] sm:$0xff] }
 0x438   : > { %6712 = vmatpush.bf16.msrb.mxu3 %v14400_v17 }
 0x439   : > { %6699 = vmatpush.bf16.msrb.mxu2 %v14392_v21  ;;  %v5102_v59 = vpop.f32.mrf.mxu0  ;;  %v6720_v21 = vrot.slane %v19591_v41, 6 }
 0x43a   : > { %7000 = vmatpush.bf16.msra.mxu0 %v14414_v43  ;;  %7013 = vmatpush.bf16.msra.mxu1 %v14422_v10  ;;  %v5115_v63 = vpop.f32.mrf.mxu1  ;;  %v14416_v43 = vld [vmem:[%s14845_s8 + $0x640] sm:$0xff]  ;;  %v6719_v10 = vrot.slane %v19551_v38, 6 }
 0x43b   : > { %6713 = vmatmul.bf16.vlgmr.msrb.gmra.mxu3 %v6409_v39 }
 0x43c   : > { %7038 = vmatpush.bf16.msra.mxu3 %v14439_v56  ;;  %6700 = vmatmul.bf16.vlgmr.msrb.gmra.mxu2 %v6408_v20  ;;  %v14425_v56 = vld [vmem:[%s14845_s8 + $0x688] sm:$0xff]  ;;  %v6735_v45 = vsel %vm446_vm0, %v6719_v10, %v6727_v44  ;;  %v14468_v10 = vld [vmem:[%s14845_s8 + $0x7e0] sm:$0xff] }
 0x43d   : > { %7025 = vmatpush.bf16.msra.mxu2 %v14431_v3  ;;  %v14455_v3 = vld [vmem:[%s14845_s8 + $0x778] sm:$0xff]  ;;  %v6739_v51 = vpack.c.bf16 %v6735_v45, %v6735_v45 }
 0x43e   : > { %7001 = vmatpush.bf16.msra.mxu0 %v14413_v24  ;;  %7014 = vmatpush.bf16.msra.mxu1 %v14421_v13  ;;  %v5139_v29 = vpop.f32.mrf.mxu3  ;;  %v6736_v24 = vsel %vm446_vm0, %v6720_v21, %v6728_v9  ;;  %v6729_v13 = vrot.slane %v19719_v57, 5 }
 0x43f   : > { %v5126_v62 = vpop.f32.mrf.mxu2  ;;  %v6740_v20 = vpack.c.bf16 %v6736_v24, %v6736_v24  ;;  %v14441_v24 = vld [vmem:[%s14845_s8 + $0x708] sm:$0xff] }
 0x440   : > { %7039 = vmatpush.bf16.msra.mxu3 %v14438_v61  ;;  %v5127_v11 = vadd.f32 %v5126_v62, %v5114_v15  ;;  %v14454_v61 = vld [vmem:[%s14845_s8 + $0x770] sm:$0xff]  ;;  %v14453_v62 = vld [vmem:[%s14845_s8 + $0x768] sm:$0xff] }
 0x441   : > { %7026 = vmatpush.bf16.msra.mxu2 %v14430_v8  ;;  %v5344_v6 = vpop.f32.mrf.mxu0  ;;  %v14446_v8 = vld [vmem:[%s14845_s8 + $0x730] sm:$0xff] }
 0x442   : > { %7002 = vmatpush.bf16.msra.mxu0 %v14412_v16  ;;  %7015 = vmatpush.bf16.msra.mxu1 %v14420_v22  ;;  %v5140_v1 = vadd.f32 %v5139_v29, %v5127_v11  ;;  %v5357_v0 = vpop.f32.mrf.mxu1  ;;  %v14424_v16 = vld [vmem:[%s14845_s8 + $0x680] sm:$0xff]  ;;  %v14470_v11 = vld [vmem:[%s14845_s8 + $0x7f0] sm:$0xff] }
 0x443   : > { %v14432_v22 = vld [vmem:[%s14845_s8 + $0x6c0] sm:$0xff] }
 0x444   : > { %7040 = vmatpush.bf16.msra.mxu3 %v14437_v33  ;;  %v5345_v31 = vadd.f32 %v5344_v6, %v5140_v1  ;;  %v6722_v33 = vrot.slane %v19635_v53, 6 }
 0x445   : > { %7027 = vmatpush.bf16.msra.mxu2 %v14429_v30  ;;  %v6721_v30 = vrot.slane %v19614_v36, 6 }
 0x446   : > { %7003 = vmatpush.bf16.msra.mxu0 %v14411_v34  ;;  %7016 = vmatpush.bf16.msra.mxu1 %v14419_v54  ;;  %v5358_v26 = vadd.f32 %v5357_v0, %v5345_v31  ;;  %v5141_v48 = vpop.f32.mrf.mxu3  ;;  %v14463_v34 = vld [vmem:[%s14845_s8 + $0x7b8] sm:$0xff]  ;;  %v6738_v63 = vsel %vm446_vm0, %v6722_v33, %v6730_v19  ;;  %v14444_v0 = vld [vmem:[%s14845_s8 + $0x720] sm:$0xff]  ;;  %v14469_v31 = vld [vmem:[%s14845_s8 + $0x7e8] sm:$0xff] }
 0x447   : > { %v5128_v17 = vpop.f32.mrf.mxu2  ;;  %v14471_v54 = vld [vmem:[%s14845_s8 + $0x7f8] sm:$0xff]  ;;  %v6737_v59 = vsel %vm446_vm0, %v6721_v30, %v6729_v13  ;;  %v14442_v48 = vld [vmem:[%s14845_s8 + $0x710] sm:$0xff]  ;;  %v14449_v13 = vld [vmem:[%s14845_s8 + $0x748] sm:$0xff]  ;;  %v7053_v30 = vrot.slane %v19591_v41, 7 }
 0x448   : > { %7041 = vmatpush.bf16.msra.mxu3 %v14436_v12  ;;  %v6741_v29 = vpack.c.bf16 %v6737_v59, %v6737_v59  ;;  %v14465_v59 = vld [vmem:[%s14845_s8 + $0x7c8] sm:$0xff] }
 0x449   : > { %7028 = vmatpush.bf16.msra.mxu2 %v14428_v35  ;;  %v5346_v39 = vpop.f32.mrf.mxu0 }
 0x44a   : > { %7004 = vmatpush.bf16.msra.mxu0 %v14410_v23  ;;  %7017 = vmatpush.bf16.msra.mxu1 %v14418_v2  ;;  %v5359_v15 = vpop.f32.mrf.mxu1  ;;  %v14445_v2 = vld [vmem:[%s14845_s8 + $0x728] sm:$0xff]  ;;  %v7060_v39 = vrot.slane %v19677_v27, 6 }
 0x44b   : > { %v7061_v15 = vrot.slane %v19679_v40, 6  ;;  %v14457_v27 = vld [vmem:[%s14845_s8 + $0x788] sm:$0xff] }
 0x44c   : > { %7042 = vmatpush.bf16.msra.mxu3 %v14435_v18  ;;  %v14462_v18 = vld [vmem:[%s14845_s8 + $0x7b0] sm:$0xff] }
 0x44d   : > { %7029 = vmatpush.bf16.msra.mxu2 %v14427_v42  ;;  %v6742_v42 = vpack.c.bf16 %v6738_v63, %v6738_v63  ;;  %v7069_v63 = vsel %vm446_vm0, %v7053_v30, %v7061_v15  ;;  %v21511_v15 = vld [vmem:[#allocation6_spill] sm:$0xff]  ;;  %v4721_v30 = vadd.f32 %v19734_v4, %v19555_v49 }
 0x44e   : > { %7005 = vmatpush.bf16.msra.mxu0 %v14409_v55  ;;  %7018 = vmatpush.bf16.msra.mxu1 %v14417_v14  ;;  %v5383_v12 = vpop.f32.mrf.mxu3 }
 0x44f   : > { %v5370_v35 = vpop.f32.mrf.mxu2 }
 0x450   : > { %7043 = vmatpush.bf16.msra.mxu3 %v14434_v47  ;;  %v5371_v23 = vadd.f32 %v5370_v35, %v5358_v26  ;;  %v14461_v47 = vld [vmem:[%s14845_s8 + $0x7a8] sm:$0xff]  ;;  %v14443_v26 = vld [vmem:[%s14845_s8 + $0x718] sm:$0xff]  ;;  %v7062_v35 = vrot.slane %v19719_v57, 6  ;;  %v7055_v57 = vrot.slane %v19635_v53, 7 }
 0x451   : > { %7030 = vmatpush.bf16.msra.mxu2 %v14426_v50  ;;  %v14452_v50 = vld [vmem:[%s14845_s8 + $0x760] sm:$0xff] }
 0x452   : > { %7006 = vmatpush.bf16.msra.mxu0 %v14408_v7  ;;  %7019 = vmatpush.bf16.msra.mxu1 %v14416_v43  ;;  %v5384_v1 = vadd.f32 %v5383_v12, %v5371_v23  ;;  %v5676_v55 = vpop.f32.mrf.mxu0  ;;  %v14451_v7 = vld [vmem:[%s14845_s8 + $0x758] sm:$0xff]  ;;  %v14460_v43 = vld [vmem:[%s14845_s8 + $0x7a0] sm:$0xff]  ;;  %v7063_v12 = vrot.slane %v19721_v37, 6 }
 0x453   : > { %v14495_v37 = vld [vmem:[%s14845_s8 + $0x8b8] sm:$0xff] }
 0x454   : > { %7044 = vmatpush.bf16.msra.mxu3 %v14433_v5  ;;  %v5689_v14 = vpop.f32.mrf.mxu1 }
 0x455   : > { %7031 = vmatpush.bf16.msra.mxu2 %v14425_v56  ;;  %7007 = vmatmul.bf16.vlgmr.msra.gmra.mxu0 %v6739_v51  ;;  %v5690_v6 = vadd.f32 %v5689_v14, %v5676_v55  ;;  %v14467_v56 = vld [vmem:[%s14845_s8 + $0x7d8] sm:$0xff]  ;;  %v14458_v51 = vld [vmem:[%s14845_s8 + $0x790] sm:$0xff]  ;;  %v7071_v14 = vsel %vm446_vm0, %v7055_v57, %v7063_v12  ;;  %v14472_v12 = vld [vmem:[%s14845_s8 + $0x800] sm:$0xff] }
 0x456   : > { %7332 = vmatpush.bf16.msrb.mxu0 %v14447_v52  ;;  %7345 = vmatpush.bf16.msrb.mxu1 %v14455_v3  ;;  %v5385_v9 = vpop.f32.mrf.mxu3  ;;  %v14450_v52 = vld [vmem:[%s14845_s8 + $0x750] sm:$0xff]  ;;  %v14459_v3 = vld [vmem:[%s14845_s8 + $0x798] sm:$0xff]  ;;  %v14497_v57 = vld [vmem:[%s14845_s8 + $0x8c8] sm:$0xff] }
 0x457   : > { %7020 = vmatmul.bf16.vlgmr.msra.gmra.mxu1 %v6740_v20  ;;  %v5372_v44 = vpop.f32.mrf.mxu2  ;;  %v14466_v20 = vld [vmem:[%s14845_s8 + $0x7d0] sm:$0xff] }
 0x458   : > { %7045 = vmatpush.bf16.msra.mxu3 %v14432_v22  ;;  %v7052_v22 = vrot.slane %v19551_v38, 7 }
 0x459   : > { %7032 = vmatpush.bf16.msra.mxu2 %v14424_v16  ;;  %v14448_v16 = vld [vmem:[%s14845_s8 + $0x740] sm:$0xff] }
 0x45a   : > { %7333 = vmatpush.bf16.msrb.mxu0 %v14446_v8  ;;  %7346 = vmatpush.bf16.msrb.mxu1 %v14454_v61  ;;  %v5678_v21 = vpop.f32.mrf.mxu0  ;;  %v14440_v61 = vld [vmem:[%s14845_s8 + $0x700] sm:$0xff]  ;;  %v7068_v40 = vsel %vm446_vm0, %v7052_v22, %v7060_v39 }
 0x45b   : > { %7046 = vmatmul.bf16.vlgmr.msra.gmra.mxu3 %v6742_v42  ;;  %v7072_v23 = vpack.c.bf16 %v7068_v40, %v7068_v40  ;;  %v14456_v42 = vld [vmem:[%s14845_s8 + $0x780] sm:$0xff]  ;;  %v14475_v21 = vld [vmem:[%s14845_s8 + $0x818] sm:$0xff]  ;;  %v14498_v40 = vld [vmem:[%s14845_s8 + $0x8d0] sm:$0xff] }
 0x45c   : > { %7371 = vmatpush.bf16.msrb.mxu3 %v14471_v54  ;;  %7033 = vmatmul.bf16.vlgmr.msra.gmra.mxu2 %v6741_v29  ;;  %v5691_v17 = vpop.f32.mrf.mxu1  ;;  %v14487_v54 = vld [vmem:[%s14845_s8 + $0x878] sm:$0xff]  ;;  %v14486_v29 = vld [vmem:[%s14845_s8 + $0x870] sm:$0xff] }
 0x45d   : > { %7358 = vmatpush.bf16.msrb.mxu2 %v14463_v34  ;;  %v14479_v34 = vld [vmem:[%s14845_s8 + $0x838] sm:$0xff] }
 0x45e   : > { %7334 = vmatpush.bf16.msrb.mxu0 %v14445_v2  ;;  %7347 = vmatpush.bf16.msrb.mxu1 %v14453_v62  ;;  %v5715_v45 = vpop.f32.mrf.mxu3  ;;  %v7073_v2 = vpack.c.bf16 %v7069_v63, %v7069_v63  ;;  %v14478_v62 = vld [vmem:[%s14845_s8 + $0x830] sm:$0xff]  ;;  %v14483_v17 = vld [vmem:[%s14845_s8 + $0x858] sm:$0xff] }
 0x45f   : > { %v5702_v5 = vpop.f32.mrf.mxu2 }
 0x460   : > { %7372 = vmatpush.bf16.msrb.mxu3 %v14470_v11  ;;  %v5703_v19 = vadd.f32 %v5702_v5, %v5690_v6  ;;  %v7054_v11 = vrot.slane %v19614_v36, 7  ;;  %v14477_v6 = vld [vmem:[%s14845_s8 + $0x828] sm:$0xff] }
 0x461   : > { %7359 = vmatpush.bf16.msrb.mxu2 %v14462_v18  ;;  %v14464_v18 = vld [vmem:[%s14845_s8 + $0x7c0] sm:$0xff]  ;;  %v14485_v36 = vld [vmem:[%s14845_s8 + $0x868] sm:$0xff] }
 0x462   : > { %7335 = vmatpush.bf16.msrb.mxu0 %v14444_v0  ;;  %7348 = vmatpush.bf16.msrb.mxu1 %v14452_v50  ;;  %v5716_v8 = vadd.f32 %v5715_v45, %v5703_v19  ;;  %v7070_v55 = vsel %vm446_vm0, %v7054_v11, %v7062_v35  ;;  %v7075_v0 = vpack.c.bf16 %v7071_v14, %v7071_v14  ;;  %v14494_v50 = vld [vmem:[%s14845_s8 + $0x8b0] sm:$0xff]  ;;  %v14491_v19 = vld [vmem:[%s14845_s8 + $0x898] sm:$0xff]  ;;  %v14489_v11 = vld [vmem:[%s14845_s8 + $0x888] sm:$0xff] }
 0x463   : > { %v7074_v53 = vpack.c.bf16 %v7070_v55, %v7070_v55 }
 0x464   : > { %7373 = vmatpush.bf16.msrb.mxu3 %v14469_v31  ;;  %v19997_v33 = vadd.f32 %v5716_v8, %v5384_v1  ;;  %v14503_v1 = vld [vmem:[%s14845_s8 + $0x8f8] sm:$0xff]  ;;  %v3511_v8 = vadd.f32 %v19511_v25, %v21511_v15  ;;  %v14524_v15 = vld [vmem:[%s14845_s8 + $0x9a0] sm:$0xff] }
 0x465   : > { %7360 = vmatpush.bf16.msrb.mxu2 %v14461_v47  ;;  %v14502_v47 = vld [vmem:[%s14845_s8 + $0x8f0] sm:$0xff] }
 0x466   : > { %7336 = vmatpush.bf16.msrb.mxu0 %v14443_v26  ;;  %7349 = vmatpush.bf16.msrb.mxu1 %v14451_v7  ;;  %v5717_v41 = vpop.f32.mrf.mxu3  ;;  %v14476_v26 = vld [vmem:[%s14845_s8 + $0x820] sm:$0xff]  ;;  %v20058_v63 = vmax.f32 %v3511_v8, 0.0 }
 0x467   : > { %v5704_v38 = vpop.f32.mrf.mxu2  ;;  %v14484_v7 = vld [vmem:[%s14845_s8 + $0x860] sm:$0xff]  ;;  %v20062_v41 = vmax.f32 %v4721_v30, 0.0  ;;  %v14514_v30 = vld [vmem:[%s14845_s8 + $0x950] sm:$0xff] }
 0x468   : > { %7374 = vmatpush.bf16.msrb.mxu3 %v14468_v10  ;;  %v14501_v10 = vld [vmem:[%s14845_s8 + $0x8e8] sm:$0xff]  ;;  %v14532_v8 = vld [vmem:[%s14845_s8 + $0x9e0] sm:$0xff] }
 0x469   : > { %7361 = vmatpush.bf16.msrb.mxu2 %v14460_v43  ;;  %v14493_v43 = vld [vmem:[%s14845_s8 + $0x8a8] sm:$0xff] }
 0x46a   : > { %7337 = vmatpush.bf16.msrb.mxu0 %v14442_v48  ;;  %7350 = vmatpush.bf16.msrb.mxu1 %v14450_v52  ;;  %v14492_v48 = vld [vmem:[%s14845_s8 + $0x8a0] sm:$0xff] }
 0x46b   : > { %v14500_v52 = vld [vmem:[%s14845_s8 + $0x8e0] sm:$0xff] }
 0x46c   : > { %7375 = vmatpush.bf16.msrb.mxu3 %v14467_v56  ;;  %v4720_v56 = vadd.f32 %v19708_v32, %v19535_v28 }
 0x46d   : > { %7362 = vmatpush.bf16.msrb.mxu2 %v14459_v3  ;;  %v4719_v3 = vadd.f32 %v19703_v46, %v19511_v25  ;;  %v14490_v25 = vld [vmem:[%s14845_s8 + $0x890] sm:$0xff] }
 0x46e   : > { %7338 = vmatpush.bf16.msrb.mxu0 %v14441_v24  ;;  %7351 = vmatpush.bf16.msrb.mxu1 %v14449_v13  ;;  %v14474_v24 = vld [vmem:[%s14845_s8 + $0x810] sm:$0xff]  ;;  %v20039_v39 = vmax.f32 %v4720_v56, 0.0 }
 0x46f   : > { %v14482_v13 = vld [vmem:[%s14845_s8 + $0x850] sm:$0xff] }
 0x470   : > { %7376 = vmatpush.bf16.msrb.mxu3 %v14466_v20  ;;  %v20037_v20 = vmax.f32 %v4719_v3, 0.0  ;;  %v7390_v4 = vrot.slane %v20039_v39, 7  ;;  %v14534_v3 = vld [vmem:[%s14845_s8 + $0x9f0] sm:$0xff] }
 0x471   : > { %7363 = vmatpush.bf16.msrb.mxu2 %v14458_v51  ;;  %v14499_v51 = vld [vmem:[%s14845_s8 + $0x8d8] sm:$0xff] }
 0x472   : > { %7339 = vmatpush.bf16.msrb.mxu0 %v14440_v61  ;;  %7352 = vmatpush.bf16.msrb.mxu1 %v14448_v16  ;;  %v6009_v31 = vpop.f32.mrf.mxu0  ;;  %v21512_v16 = vld [vmem:[#allocation7_spill] sm:$0xff] }
 0x473   : > { %v3512_v22 = vadd.f32 %v19535_v28, %v21512_v16  ;;  %v7389_v28 = vrot.slane %v20037_v20, 7 }
 0x474   : > { %7377 = vmatpush.bf16.msrb.mxu3 %v14465_v59  ;;  %v6022_v44 = vpop.f32.mrf.mxu1 }
 0x475   : > { %7364 = vmatpush.bf16.msrb.mxu2 %v14457_v27  ;;  %7340 = vmatmul.bf16.vlgmr.msrb.gmra.mxu0 %v7072_v23  ;;  %v6023_v9 = vadd.f32 %v6022_v44, %v6009_v31  ;;  %v14481_v27 = vld [vmem:[%s14845_s8 + $0x848] sm:$0xff]  ;;  %v20060_v38 = vmax.f32 %v3512_v22, 0.0  ;;  %v14480_v23 = vld [vmem:[%s14845_s8 + $0x840] sm:$0xff]  ;;  %v7397_v55 = vsel %vm446_vm0, %v20058_v63, %v7389_v28  ;;  %v14506_v22 = vld [vmem:[%s14845_s8 + $0x910] sm:$0xff] }
 0x476   : > { %7661 = vmatpush.bf16.msra.mxu0 %v14479_v34  ;;  %7674 = vmatpush.bf16.msra.mxu1 %v14487_v54  ;;  %v4722_v34 = vadd.f32 %v19739_v60, %v19557_v58  ;;  %v14473_v54 = vld [vmem:[%s14845_s8 + $0x808] sm:$0xff]  ;;  %v14488_v31 = vld [vmem:[%s14845_s8 + $0x880] sm:$0xff] }
 0x477   : > { %7353 = vmatmul.bf16.vlgmr.msrb.gmra.mxu1 %v7073_v2  ;;  %v14511_v2 = vld [vmem:[%s14845_s8 + $0x938] sm:$0xff]  ;;  %v7398_v14 = vsel %vm446_vm0, %v20060_v38, %v7390_v4  ;;  %v14496_v44 = vld [vmem:[%s14845_s8 + $0x8c0] sm:$0xff]  ;;  %v14513_v28 = vld [vmem:[%s14845_s8 + $0x948] sm:$0xff] }
 0x478   : > { %7378 = vmatpush.bf16.msrb.mxu3 %v14464_v18  ;;  %v20064_v35 = vmax.f32 %v4722_v34, 0.0  ;;  %v14523_v34 = vld [vmem:[%s14845_s8 + $0x998] sm:$0xff] }
 0x479   : > { %7365 = vmatpush.bf16.msrb.mxu2 %v14456_v42  ;;  %v21514_v42 = vld [vmem:[#allocation9_spill] sm:$0xff] }
 0x47a   : > { %7662 = vmatpush.bf16.msra.mxu0 %v14478_v62  ;;  %7675 = vmatpush.bf16.msra.mxu1 %v14486_v29  ;;  %v6011_v5 = vpop.f32.mrf.mxu0  ;;  %v14519_v62 = vld [vmem:[%s14845_s8 + $0x978] sm:$0xff]  ;;  %v3514_v18 = vadd.f32 %v19557_v58, %v21514_v42  ;;  %v7392_v58 = vrot.slane %v20064_v35, 7  ;;  %v7719_v42 = vrot.slane %v20060_v38, 1 }
 0x47b   : > { %7379 = vmatmul.bf16.vlgmr.msrb.gmra.mxu3 %v7075_v0  ;;  %v21513_v29 = vld [vmem:[#allocation8_spill] sm:$0xff] }
 0x47c   : > { %7700 = vmatpush.bf16.msra.mxu3 %v14503_v1  ;;  %7366 = vmatmul.bf16.vlgmr.msrb.gmra.mxu2 %v7074_v53  ;;  %v6024_v45 = vpop.f32.mrf.mxu1  ;;  %v14510_v53 = vld [vmem:[%s14845_s8 + $0x930] sm:$0xff] }
 0x47d   : > { %7687 = vmatpush.bf16.msra.mxu2 %v14495_v37  ;;  %v14518_v0 = vld [vmem:[%s14845_s8 + $0x970] sm:$0xff] }
 0x47e   : > { %7663 = vmatpush.bf16.msra.mxu0 %v14477_v6  ;;  %7676 = vmatpush.bf16.msra.mxu1 %v14485_v36  ;;  %v6048_v32 = vpop.f32.mrf.mxu3  ;;  %v7401_v6 = vpack.c.bf16 %v7397_v55, %v7397_v55  ;;  %v7402_v36 = vpack.c.bf16 %v7398_v14, %v7398_v14  ;;  %v7727_v14 = vsel %vm446_vm0, %v7719_v42, %v20039_v39  ;;  %v14536_v42 = vld [vmem:[%s14845_s8 + $0xa00] sm:$0xff] }
 0x47f   : > { %v6035_v46 = vpop.f32.mrf.mxu2 }
 0x480   : > { %7701 = vmatpush.bf16.msra.mxu3 %v14502_v47  ;;  %v6036_v61 = vadd.f32 %v6035_v46, %v6023_v9  ;;  %v20086_v47 = vmax.f32 %v3514_v18, 0.0  ;;  %v14527_v9 = vld [vmem:[%s14845_s8 + $0x9b8] sm:$0xff] }
 0x481   : > { %7688 = vmatpush.bf16.msra.mxu2 %v14494_v50  ;;  %v14507_v46 = vld [vmem:[%s14845_s8 + $0x918] sm:$0xff] }
 0x482   : > { %7664 = vmatpush.bf16.msra.mxu0 %v14476_v26  ;;  %7677 = vmatpush.bf16.msra.mxu1 %v14484_v7  ;;  %v6049_v59 = vadd.f32 %v6048_v32, %v6036_v61  ;;  %v14535_v26 = vld [vmem:[%s14845_s8 + $0x9f8] sm:$0xff] }
 0x483   : > { %v14515_v32 = vld [vmem:[%s14845_s8 + $0x958] sm:$0xff] }
 0x484   : > { %7702 = vmatpush.bf16.msra.mxu3 %v14501_v10  ;;  %v20056_v60 = vadd.f32 %v6049_v59, %v19997_v33  ;;  %v3513_v33 = vadd.f32 %v19555_v49, %v21513_v29  ;;  %v7391_v49 = vrot.slane %v20062_v41, 7  ;;  %v14509_v10 = vld [vmem:[%s14845_s8 + $0x928] sm:$0xff]  ;;  %v14512_v29 = vld [vmem:[%s14845_s8 + $0x940] sm:$0xff]  ;;  %v14543_v18 = vld [vmem:[%s14845_s8 + $0xa38] sm:$0xff] }
 0x485   : > { %7689 = vmatpush.bf16.msra.mxu2 %v14493_v43  ;;  %v7400_v43 = vsel %vm446_vm0, %v20086_v47, %v7392_v58  ;;  %v7731_v58 = vpack.c.bf16 %v7727_v14, %v7727_v14 }
 0x486   : > { %7665 = vmatpush.bf16.msra.mxu0 %v14475_v21  ;;  %7678 = vmatpush.bf16.msra.mxu1 %v14483_v17  ;;  %v6050_v1 = vpop.f32.mrf.mxu3  ;;  %v20084_v50 = vmax.f32 %v3513_v33, 0.0  ;;  %v14517_v21 = vld [vmem:[%s14845_s8 + $0x968] sm:$0xff]  ;;  %v7718_v33 = vrot.slane %v20058_v63, 1 }
 0x487   : > { %v6037_v37 = vpop.f32.mrf.mxu2 }
 0x488   : > { %7703 = vmatpush.bf16.msra.mxu3 %v14500_v52  ;;  %v7399_v7 = vsel %vm446_vm0, %v20084_v50, %v7391_v49  ;;  %v14526_v52 = vld [vmem:[%s14845_s8 + $0x9b0] sm:$0xff]  ;;  %v14529_v37 = vld [vmem:[%s14845_s8 + $0x9c8] sm:$0xff]  ;;  %v7726_v55 = vsel %vm446_vm0, %v7718_v33, %v20037_v20 }
 0x489   : > { %7690 = vmatpush.bf16.msra.mxu2 %v14492_v48  ;;  %v7403_v17 = vpack.c.bf16 %v7399_v7, %v7399_v7  ;;  %v7404_v48 = vpack.c.bf16 %v7400_v43, %v7400_v43  ;;  %v7730_v49 = vpack.c.bf16 %v7726_v55, %v7726_v55  ;;  %v14561_v55 = vld [vmem:[%s14845_s8 + $0xac8] sm:$0xff] }
 0x48a   : > { %7666 = vmatpush.bf16.msra.mxu0 %v14474_v24  ;;  %7679 = vmatpush.bf16.msra.mxu1 %v14482_v13  ;;  %v14508_v24 = vld [vmem:[%s14845_s8 + $0x920] sm:$0xff] }
 0x48b   : > { %v14516_v13 = vld [vmem:[%s14845_s8 + $0x960] sm:$0xff] }
 0x48c   : > { %7704 = vmatpush.bf16.msra.mxu3 %v14499_v51  ;;  %v14533_v51 = vld [vmem:[%s14845_s8 + $0x9e8] sm:$0xff] }
 0x48d   : > { %7691 = vmatpush.bf16.msra.mxu2 %v14491_v19  ;;  %v14525_v19 = vld [vmem:[%s14845_s8 + $0x9a8] sm:$0xff] }
 0x48e   : > { %7667 = vmatpush.bf16.msra.mxu0 %v14473_v54  ;;  %7680 = vmatpush.bf16.msra.mxu1 %v14481_v27  ;;  %v14531_v54 = vld [vmem:[%s14845_s8 + $0x9d8] sm:$0xff] }
 0x490   : > { %7705 = vmatpush.bf16.msra.mxu3 %v14498_v40  ;;  %v14505_v40 = vld [vmem:[%s14845_s8 + $0x908] sm:$0xff] }
 0x491   : > { %7692 = vmatpush.bf16.msra.mxu2 %v14490_v25 }
 0x492   : > { %7668 = vmatpush.bf16.msra.mxu0 %v14472_v12  ;;  %7681 = vmatpush.bf16.msra.mxu1 %v14480_v23  ;;  %v6342_v56 = vpop.f32.mrf.mxu0  ;;  %v14522_v12 = vld [vmem:[%s14845_s8 + $0x990] sm:$0xff] }
 0x493   : > { %v14530_v23 = vld [vmem:[%s14845_s8 + $0x9d0] sm:$0xff] }
 0x494   : > { %7706 = vmatpush.bf16.msra.mxu3 %v14497_v57  ;;  %v6355_v5 = vpop.f32.mrf.mxu1  ;;  %v14521_v57 = vld [vmem:[%s14845_s8 + $0x988] sm:$0xff] }
 0x495   : > { %7693 = vmatpush.bf16.msra.mxu2 %v14489_v11  ;;  %7669 = vmatmul.bf16.vlgmr.msra.gmra.mxu0 %v7401_v6  ;;  %v6356_v45 = vadd.f32 %v6355_v5, %v6342_v56  ;;  %v14551_v11 = vld [vmem:[%s14845_s8 + $0xa78] sm:$0xff]  ;;  %v14542_v6 = vld [vmem:[%s14845_s8 + $0xa30] sm:$0xff] }
 0x496   : > { %7990 = vmatpush.bf16.msrb.mxu0 %v14511_v2  ;;  %8003 = vmatpush.bf16.msrb.mxu1 %v14519_v62  ;;  %v14504_v62 = vld [vmem:[%s14845_s8 + $0x900] sm:$0xff] }
 0x497   : > { %7682 = vmatmul.bf16.vlgmr.msra.gmra.mxu1 %v7402_v36  ;;  %v14550_v36 = vld [vmem:[%s14845_s8 + $0xa70] sm:$0xff] }
 0x498   : > { %7707 = vmatpush.bf16.msra.mxu3 %v14496_v44  ;;  %v7721_v44 = vrot.slane %v20086_v47, 1 }
 0x499   : > { %7694 = vmatpush.bf16.msra.mxu2 %v14488_v31  ;;  %v7720_v31 = vrot.slane %v20084_v50, 1 }
 0x49a   : > { %7991 = vmatpush.bf16.msrb.mxu0 %v14510_v53  ;;  %8004 = vmatpush.bf16.msrb.mxu1 %v14518_v0  ;;  %v6344_v61 = vpop.f32.mrf.mxu0  ;;  %v14520_v53 = vld [vmem:[%s14845_s8 + $0x980] sm:$0xff]  ;;  %v7729_v43 = vsel %vm446_vm0, %v7721_v44, %v20064_v35  ;;  %v14582_v44 = vld [vmem:[%s14845_s8 + $0xb70] sm:$0xff] }
 0x49b   : > { %7708 = vmatmul.bf16.vlgmr.msra.gmra.mxu3 %v7404_v48  ;;  %v14528_v0 = vld [vmem:[%s14845_s8 + $0x9c0] sm:$0xff]  ;;  %v7728_v7 = vsel %vm446_vm0, %v7720_v31, %v20062_v41  ;;  %v7733_v48 = vpack.c.bf16 %v7729_v43, %v7729_v43  ;;  %v14574_v31 = vld [vmem:[%s14845_s8 + $0xb30] sm:$0xff]  ;;  %v8046_v43 = vrot.slane %v20086_v47, 2 }
 0x49c   : > { %8029 = vmatpush.bf16.msrb.mxu3 %v14535_v26  ;;  %7695 = vmatmul.bf16.vlgmr.msra.gmra.mxu2 %v7403_v17  ;;  %v6357_v16 = vpop.f32.mrf.mxu1  ;;  %v14567_v26 = vld [vmem:[%s14845_s8 + $0xaf8] sm:$0xff]  ;;  %v7732_v17 = vpack.c.bf16 %v7728_v7, %v7728_v7  ;;  %v8045_v7 = vrot.slane %v20084_v50, 2 }
 0x49d   : > { %8016 = vmatpush.bf16.msrb.mxu2 %v14527_v9  ;;  %v14559_v9 = vld [vmem:[%s14845_s8 + $0xab8] sm:$0xff] }
 0x49e   : > { %7992 = vmatpush.bf16.msrb.mxu0 %v14509_v10  ;;  %8005 = vmatpush.bf16.msrb.mxu1 %v14517_v21  ;;  %v6381_v59 = vpop.f32.mrf.mxu3  ;;  %v14541_v10 = vld [vmem:[%s14845_s8 + $0xa28] sm:$0xff] }
 0x49f   : > { %v6368_v27 = vpop.f32.mrf.mxu2  ;;  %v14549_v21 = vld [vmem:[%s14845_s8 + $0xa68] sm:$0xff] }
 0x4a0   : > { %8030 = vmatpush.bf16.msrb.mxu3 %v14534_v3  ;;  %v6369_v25 = vadd.f32 %v6368_v27, %v6356_v45  ;;  %v14566_v3 = vld [vmem:[%s14845_s8 + $0xaf0] sm:$0xff] }
 0x4a1   : > { %8017 = vmatpush.bf16.msrb.mxu2 %v14526_v52  ;;  %v14558_v52 = vld [vmem:[%s14845_s8 + $0xab0] sm:$0xff] }
 0x4a2   : > { %7993 = vmatpush.bf16.msrb.mxu0 %v14508_v24  ;;  %8006 = vmatpush.bf16.msrb.mxu1 %v14516_v13  ;;  %v6382_v4 = vadd.f32 %v6381_v59, %v6369_v25  ;;  %v14540_v24 = vld [vmem:[%s14845_s8 + $0xa20] sm:$0xff] }
 0x4a3   : > { %v14548_v13 = vld [vmem:[%s14845_s8 + $0xa60] sm:$0xff] }
 0x4a4   : > { %8031 = vmatpush.bf16.msrb.mxu3 %v14533_v51  ;;  %v20117_v2 = vadd.f32 %v6382_v4, %v20056_v60  ;;  %v14565_v51 = vld [vmem:[%s14845_s8 + $0xae8] sm:$0xff] }
 0x4a5   : > { %8018 = vmatpush.bf16.msrb.mxu2 %v14525_v19  ;;  %v14557_v19 = vld [vmem:[%s14845_s8 + $0xaa8] sm:$0xff] }
 0x4a6   : > { %7994 = vmatpush.bf16.msrb.mxu0 %v14507_v46  ;;  %8007 = vmatpush.bf16.msrb.mxu1 %v14515_v32  ;;  %v6383_v1 = vpop.f32.mrf.mxu3  ;;  %v14539_v46 = vld [vmem:[%s14845_s8 + $0xa18] sm:$0xff] }
 0x4a7   : > { %v6370_v60 = vpop.f32.mrf.mxu2  ;;  %v14547_v32 = vld [vmem:[%s14845_s8 + $0xa58] sm:$0xff]  ;;  %v14553_v1 = vld [vmem:[%s14845_s8 + $0xa88] sm:$0xff] }
 0x4a8   : > { %8032 = vmatpush.bf16.msrb.mxu3 %v14532_v8  ;;  %v14564_v8 = vld [vmem:[%s14845_s8 + $0xae0] sm:$0xff]  ;;  %v14583_v60 = vld [vmem:[%s14845_s8 + $0xb78] sm:$0xff] }
 0x4a9   : > { %8019 = vmatpush.bf16.msrb.mxu2 %v14524_v15  ;;  %v14556_v15 = vld [vmem:[%s14845_s8 + $0xaa0] sm:$0xff] }
 0x4aa   : > { %7995 = vmatpush.bf16.msrb.mxu0 %v14506_v22  ;;  %8008 = vmatpush.bf16.msrb.mxu1 %v14514_v30  ;;  %v14538_v22 = vld [vmem:[%s14845_s8 + $0xa10] sm:$0xff] }
 0x4ab   : > { %v14546_v30 = vld [vmem:[%s14845_s8 + $0xa50] sm:$0xff] }
 0x4ac   : > { %8033 = vmatpush.bf16.msrb.mxu3 %v14531_v54  ;;  %v14563_v54 = vld [vmem:[%s14845_s8 + $0xad8] sm:$0xff] }
 0x4ad   : > { %8020 = vmatpush.bf16.msrb.mxu2 %v14523_v34  ;;  %v14555_v34 = vld [vmem:[%s14845_s8 + $0xa98] sm:$0xff] }
 0x4ae   : > { %7996 = vmatpush.bf16.msrb.mxu0 %v14505_v40  ;;  %8009 = vmatpush.bf16.msrb.mxu1 %v14513_v28  ;;  %v14537_v40 = vld [vmem:[%s14845_s8 + $0xa08] sm:$0xff] }
 0x4af   : > { %v14545_v28 = vld [vmem:[%s14845_s8 + $0xa48] sm:$0xff] }
 0x4b0   : > { %8034 = vmatpush.bf16.msrb.mxu3 %v14530_v23  ;;  %v14562_v23 = vld [vmem:[%s14845_s8 + $0xad0] sm:$0xff] }
 0x4b1   : > { %8021 = vmatpush.bf16.msrb.mxu2 %v14522_v12  ;;  %v14554_v12 = vld [vmem:[%s14845_s8 + $0xa90] sm:$0xff] }
 0x4b2   : > { %7997 = vmatpush.bf16.msrb.mxu0 %v14504_v62  ;;  %8010 = vmatpush.bf16.msrb.mxu1 %v14512_v29  ;;  %v6675_v56 = vpop.f32.mrf.mxu0  ;;  %v8051_v62 = vrot.slane %v20037_v20, 1  ;;  %v8052_v29 = vrot.slane %v20039_v39, 1 }
 0x4b4   : > { %8035 = vmatpush.bf16.msrb.mxu3 %v14529_v37  ;;  %v6688_v5 = vpop.f32.mrf.mxu1  ;;  %v14575_v37 = vld [vmem:[%s14845_s8 + $0xb38] sm:$0xff] }
 0x4b5   : > { %8022 = vmatpush.bf16.msrb.mxu2 %v14521_v57  ;;  %7998 = vmatmul.bf16.vlgmr.msrb.gmra.mxu0 %v7730_v49  ;;  %v6689_v45 = vadd.f32 %v6688_v5, %v6675_v56  ;;  %v8044_v57 = vrot.slane %v20060_v38, 2 }
 0x4b6   : > { %8323 = vmatpush.bf16.msra.mxu0 %v14543_v18  ;;  %8336 = vmatpush.bf16.msra.mxu1 %v14551_v11  ;;  %v14544_v18 = vld [vmem:[%s14845_s8 + $0xa40] sm:$0xff]  ;;  %v8043_v11 = vrot.slane %v20058_v63, 2 }
 0x4b7   : > { %8011 = vmatmul.bf16.vlgmr.msrb.gmra.mxu1 %v7731_v58  ;;  %v8060_v58 = vsel %vm446_vm0, %v8044_v57, %v8052_v29  ;;  %v8385_v57 = vrot.slane %v20039_v39, 2 }
 0x4b8   : > { %8036 = vmatpush.bf16.msrb.mxu3 %v14528_v0  ;;  %v8059_v49 = vsel %vm446_vm0, %v8043_v11, %v8051_v62  ;;  %v8064_v0 = vpack.c.bf16 %v8060_v58, %v8060_v58  ;;  %v14577_v62 = vld [vmem:[%s14845_s8 + $0xb48] sm:$0xff]  ;;  %v8384_v11 = vrot.slane %v20037_v20, 2 }
 0x4b9   : > { %8023 = vmatpush.bf16.msrb.mxu2 %v14520_v53  ;;  %v8063_v53 = vpack.c.bf16 %v8059_v49, %v8059_v49  ;;  %v14615_v49 = vld [vmem:[%s14845_s8 + $0xc78] sm:$0xff]  ;;  %v14585_v58 = vld [vmem:[%s14845_s8 + $0xb88] sm:$0xff] }
 0x4ba   : > { %8324 = vmatpush.bf16.msra.mxu0 %v14542_v6  ;;  %8337 = vmatpush.bf16.msra.mxu1 %v14550_v36  ;;  %v6677_v61 = vpop.f32.mrf.mxu0  ;;  %v8053_v6 = vrot.slane %v20062_v41, 1  ;;  %v8054_v36 = vrot.slane %v20064_v35, 1 }
 0x4bb   : > { %8037 = vmatmul.bf16.vlgmr.msrb.gmra.mxu3 %v7733_v48  ;;  %v14571_v61 = vld [vmem:[%s14845_s8 + $0xb18] sm:$0xff] }
 0x4bc   : > { %8362 = vmatpush.bf16.msra.mxu3 %v14567_v26  ;;  %8024 = vmatmul.bf16.vlgmr.msrb.gmra.mxu2 %v7732_v17  ;;  %v6690_v16 = vpop.f32.mrf.mxu1  ;;  %v14560_v26 = vld [vmem:[%s14845_s8 + $0xac0] sm:$0xff]  ;;  %v8061_v17 = vsel %vm446_vm0, %v8045_v7, %v8053_v6  ;;  %v8062_v48 = vsel %vm446_vm0, %v8046_v43, %v8054_v36  ;;  %v14593_v6 = vld [vmem:[%s14845_s8 + $0xbc8] sm:$0xff]  ;;  %v14606_v7 = vld [vmem:[%s14845_s8 + $0xc30] sm:$0xff] }
 0x4bd   : > { %8349 = vmatpush.bf16.msra.mxu2 %v14559_v9  ;;  %v14552_v9 = vld [vmem:[%s14845_s8 + $0xa80] sm:$0xff]  ;;  %v8065_v56 = vpack.c.bf16 %v8061_v17, %v8061_v17  ;;  %v8066_v5 = vpack.c.bf16 %v8062_v48, %v8062_v48  ;;  %v14579_v16 = vld [vmem:[%s14845_s8 + $0xb58] sm:$0xff]  ;;  %v14614_v43 = vld [vmem:[%s14845_s8 + $0xc70] sm:$0xff]  ;;  %v8378_v17 = vrot.slane %v20084_v50, 3  ;;  %v8379_v48 = vrot.slane %v20086_v47, 3 }
 0x4be   : > { %8325 = vmatpush.bf16.msra.mxu0 %v14541_v10  ;;  %8338 = vmatpush.bf16.msra.mxu1 %v14549_v21  ;;  %v6714_v59 = vpop.f32.mrf.mxu3  ;;  %v14591_v10 = vld [vmem:[%s14845_s8 + $0xbb8] sm:$0xff] }
 0x4bf   : > { %v6701_v27 = vpop.f32.mrf.mxu2  ;;  %v14599_v21 = vld [vmem:[%s14845_s8 + $0xbf8] sm:$0xff] }
 0x4c0   : > { %8363 = vmatpush.bf16.msra.mxu3 %v14566_v3  ;;  %v6702_v25 = vadd.f32 %v6701_v27, %v6689_v45  ;;  %v14581_v3 = vld [vmem:[%s14845_s8 + $0xb68] sm:$0xff]  ;;  %v14590_v45 = vld [vmem:[%s14845_s8 + $0xbb0] sm:$0xff] }
 0x4c1   : > { %8350 = vmatpush.bf16.msra.mxu2 %v14558_v52  ;;  %v14573_v52 = vld [vmem:[%s14845_s8 + $0xb28] sm:$0xff]  ;;  %v14570_v27 = vld [vmem:[%s14845_s8 + $0xb10] sm:$0xff] }
 0x4c2   : > { %8326 = vmatpush.bf16.msra.mxu0 %v14540_v24  ;;  %8339 = vmatpush.bf16.msra.mxu1 %v14548_v13  ;;  %v6715_v4 = vadd.f32 %v6714_v59, %v6702_v25  ;;  %v14598_v24 = vld [vmem:[%s14845_s8 + $0xbf0] sm:$0xff]  ;;  %v14587_v25 = vld [vmem:[%s14845_s8 + $0xb98] sm:$0xff] }
 0x4c3   : > { %v14578_v59 = vld [vmem:[%s14845_s8 + $0xb50] sm:$0xff] }
 0x4c4   : > { %8364 = vmatpush.bf16.msra.mxu3 %v14565_v51  ;;  %v20166_v33 = vadd.f32 %v6715_v4, %v20117_v2 }
 0x4c5   : > { %8351 = vmatpush.bf16.msra.mxu2 %v14557_v19 }
 0x4c6   : > { %8327 = vmatpush.bf16.msra.mxu0 %v14539_v46  ;;  %8340 = vmatpush.bf16.msra.mxu1 %v14547_v32  ;;  %v6716_v2 = vpop.f32.mrf.mxu3  ;;  %v14572_v46 = vld [vmem:[%s14845_s8 + $0xb20] sm:$0xff] }
 0x4c7   : > { %v6703_v14 = vpop.f32.mrf.mxu2  ;;  %v14580_v32 = vld [vmem:[%s14845_s8 + $0xb60] sm:$0xff]  ;;  %v14607_v2 = vld [vmem:[%s14845_s8 + $0xc38] sm:$0xff] }
 0x4c8   : > { %8365 = vmatpush.bf16.msra.mxu3 %v14564_v8  ;;  %v14597_v8 = vld [vmem:[%s14845_s8 + $0xbe8] sm:$0xff]  ;;  %v8377_v14 = vrot.slane %v20060_v38, 3 }
 0x4c9   : > { %8352 = vmatpush.bf16.msra.mxu2 %v14556_v15  ;;  %v14589_v15 = vld [vmem:[%s14845_s8 + $0xba8] sm:$0xff] }
 0x4ca   : > { %8328 = vmatpush.bf16.msra.mxu0 %v14538_v22  ;;  %8341 = vmatpush.bf16.msra.mxu1 %v14546_v30  ;;  %v14588_v22 = vld [vmem:[%s14845_s8 + $0xba0] sm:$0xff] }
 0x4cb   : > { %v14596_v30 = vld [vmem:[%s14845_s8 + $0xbe0] sm:$0xff] }
 0x4cc   : > { %8366 = vmatpush.bf16.msra.mxu3 %v14563_v54 }
 0x4cd   : > { %8353 = vmatpush.bf16.msra.mxu2 %v14555_v34 }
 0x4ce   : > { %8329 = vmatpush.bf16.msra.mxu0 %v14537_v40  ;;  %8342 = vmatpush.bf16.msra.mxu1 %v14545_v28  ;;  %v14595_v40 = vld [vmem:[%s14845_s8 + $0xbd8] sm:$0xff] }
 0x4d0   : > { %8367 = vmatpush.bf16.msra.mxu3 %v14562_v23  ;;  %v14569_v23 = vld [vmem:[%s14845_s8 + $0xb08] sm:$0xff] }
 0x4d1   : > { %8354 = vmatpush.bf16.msra.mxu2 %v14554_v12 }
 0x4d2   : > { %8330 = vmatpush.bf16.msra.mxu0 %v14536_v42  ;;  %8343 = vmatpush.bf16.msra.mxu1 %v14544_v18  ;;  %v7008_v13 = vpop.f32.mrf.mxu0  ;;  %v14586_v42 = vld [vmem:[%s14845_s8 + $0xb90] sm:$0xff] }
 0x4d3   : > { %v14594_v18 = vld [vmem:[%s14845_s8 + $0xbd0] sm:$0xff] }
 0x4d4   : > { %8368 = vmatpush.bf16.msra.mxu3 %v14561_v55  ;;  %v7021_v19 = vpop.f32.mrf.mxu1  ;;  %v8376_v55 = vrot.slane %v20058_v63, 3 }
 0x4d5   : > { %8355 = vmatpush.bf16.msra.mxu2 %v14553_v1  ;;  %8331 = vmatmul.bf16.vlgmr.msra.gmra.mxu0 %v8063_v53  ;;  %v7022_v51 = vadd.f32 %v7021_v19, %v7008_v13  ;;  %v14576_v1 = vld [vmem:[%s14845_s8 + $0xb40] sm:$0xff] }
 0x4d6   : > { %8656 = vmatpush.bf16.msrb.mxu0 %v14575_v37  ;;  %8669 = vmatpush.bf16.msrb.mxu1 %v14583_v60  ;;  %v14568_v60 = vld [vmem:[%s14845_s8 + $0xb00] sm:$0xff]  ;;  %v8392_v53 = vsel %vm446_vm0, %v8376_v55, %v8384_v11  ;;  %v14609_v11 = vld [vmem:[%s14845_s8 + $0xc48] sm:$0xff]  ;;  %v8717_v55 = vrot.slane %v20037_v20, 3 }
 0x4d7   : > { %8344 = vmatmul.bf16.vlgmr.msra.gmra.mxu1 %v8064_v0  ;;  %v8393_v0 = vsel %vm446_vm0, %v8377_v14, %v8385_v57  ;;  %v8718_v14 = vrot.slane %v20039_v39, 3 }
 0x4d8   : > { %8369 = vmatpush.bf16.msra.mxu3 %v14560_v26  ;;  %v8397_v26 = vpack.c.bf16 %v8393_v0, %v8393_v0  ;;  %v14617_v0 = vld [vmem:[%s14845_s8 + $0xc88] sm:$0xff] }
 0x4d9   : > { %8356 = vmatpush.bf16.msra.mxu2 %v14552_v9  ;;  %v8396_v9 = vpack.c.bf16 %v8392_v53, %v8392_v53  ;;  %v14647_v53 = vld [vmem:[%s14845_s8 + $0xd78] sm:$0xff] }
 0x4da   : > { %8657 = vmatpush.bf16.msrb.mxu0 %v14574_v31  ;;  %8670 = vmatpush.bf16.msrb.mxu1 %v14582_v44  ;;  %v7010_v34 = vpop.f32.mrf.mxu0  ;;  %v8386_v31 = vrot.slane %v20062_v41, 2  ;;  %v8387_v44 = vrot.slane %v20064_v35, 2 }
 0x4db   : > { %8370 = vmatmul.bf16.vlgmr.msra.gmra.mxu3 %v8066_v5  ;;  %v14603_v34 = vld [vmem:[%s14845_s8 + $0xc18] sm:$0xff] }
 0x4dc   : > { %8695 = vmatpush.bf16.msrb.mxu3 %v14599_v21  ;;  %8357 = vmatmul.bf16.vlgmr.msra.gmra.mxu2 %v8065_v56  ;;  %v7023_v54 = vpop.f32.mrf.mxu1  ;;  %v14592_v21 = vld [vmem:[%s14845_s8 + $0xbc0] sm:$0xff]  ;;  %v8394_v56 = vsel %vm446_vm0, %v8378_v17, %v8386_v31  ;;  %v8395_v5 = vsel %vm446_vm0, %v8379_v48, %v8387_v44  ;;  %v14625_v31 = vld [vmem:[%s14845_s8 + $0xcc8] sm:$0xff]  ;;  %v14638_v17 = vld [vmem:[%s14845_s8 + $0xd30] sm:$0xff] }
 0x4dd   : > { %8682 = vmatpush.bf16.msrb.mxu2 %v14591_v10  ;;  %v14584_v10 = vld [vmem:[%s14845_s8 + $0xb80] sm:$0xff]  ;;  %v8398_v13 = vpack.c.bf16 %v8394_v56, %v8394_v56  ;;  %v8399_v19 = vpack.c.bf16 %v8395_v5, %v8395_v5  ;;  %v14611_v54 = vld [vmem:[%s14845_s8 + $0xc58] sm:$0xff]  ;;  %v14646_v48 = vld [vmem:[%s14845_s8 + $0xd70] sm:$0xff]  ;;  %v8711_v56 = vrot.slane %v20084_v50, 4  ;;  %v8712_v5 = vrot.slane %v20086_v47, 4 }
 0x4de   : > { %8658 = vmatpush.bf16.msrb.mxu0 %v14573_v52  ;;  %8671 = vmatpush.bf16.msrb.mxu1 %v14581_v3  ;;  %v7047_v4 = vpop.f32.mrf.mxu3  ;;  %v14623_v52 = vld [vmem:[%s14845_s8 + $0xcb8] sm:$0xff] }
 0x4df   : > { %v7034_v28 = vpop.f32.mrf.mxu2  ;;  %v14631_v3 = vld [vmem:[%s14845_s8 + $0xcf8] sm:$0xff] }
 0x4e0   : > { %8696 = vmatpush.bf16.msrb.mxu3 %v14598_v24  ;;  %v7035_v12 = vadd.f32 %v7034_v28, %v7022_v51  ;;  %v14613_v24 = vld [vmem:[%s14845_s8 + $0xc68] sm:$0xff]  ;;  %v14622_v51 = vld [vmem:[%s14845_s8 + $0xcb0] sm:$0xff] }
 0x4e1   : > { %8683 = vmatpush.bf16.msrb.mxu2 %v14590_v45  ;;  %v14605_v45 = vld [vmem:[%s14845_s8 + $0xc28] sm:$0xff]  ;;  %v14602_v28 = vld [vmem:[%s14845_s8 + $0xc10] sm:$0xff] }
 0x4e2   : > { %8659 = vmatpush.bf16.msrb.mxu0 %v14572_v46  ;;  %8672 = vmatpush.bf16.msrb.mxu1 %v14580_v32  ;;  %v7048_v29 = vadd.f32 %v7047_v4, %v7035_v12  ;;  %v14630_v46 = vld [vmem:[%s14845_s8 + $0xcf0] sm:$0xff]  ;;  %v14619_v12 = vld [vmem:[%s14845_s8 + $0xc98] sm:$0xff] }
 0x4e3   : > { %v14610_v4 = vld [vmem:[%s14845_s8 + $0xc50] sm:$0xff] }
 0x4e4   : > { %8697 = vmatpush.bf16.msrb.mxu3 %v14597_v8  ;;  %v20213_v37 = vadd.f32 %v7048_v29, %v20166_v33 }
 0x4e5   : > { %8684 = vmatpush.bf16.msrb.mxu2 %v14589_v15 }
 0x4e6   : > { %8660 = vmatpush.bf16.msrb.mxu0 %v14571_v61  ;;  %8673 = vmatpush.bf16.msrb.mxu1 %v14579_v16  ;;  %v7049_v33 = vpop.f32.mrf.mxu3  ;;  %v14604_v61 = vld [vmem:[%s14845_s8 + $0xc20] sm:$0xff] }
 0x4e7   : > { %v7036_v36 = vpop.f32.mrf.mxu2  ;;  %v14612_v16 = vld [vmem:[%s14845_s8 + $0xc60] sm:$0xff]  ;;  %v14639_v33 = vld [vmem:[%s14845_s8 + $0xd38] sm:$0xff] }
 0x4e8   : > { %8698 = vmatpush.bf16.msrb.mxu3 %v14596_v30  ;;  %v14629_v30 = vld [vmem:[%s14845_s8 + $0xce8] sm:$0xff]  ;;  %v8710_v36 = vrot.slane %v20060_v38, 4 }
 0x4e9   : > { %8685 = vmatpush.bf16.msrb.mxu2 %v14588_v22  ;;  %v14621_v22 = vld [vmem:[%s14845_s8 + $0xca8] sm:$0xff] }
 0x4ea   : > { %8661 = vmatpush.bf16.msrb.mxu0 %v14570_v27  ;;  %8674 = vmatpush.bf16.msrb.mxu1 %v14578_v59  ;;  %v14620_v27 = vld [vmem:[%s14845_s8 + $0xca0] sm:$0xff] }
 0x4eb   : > { %v14628_v59 = vld [vmem:[%s14845_s8 + $0xce0] sm:$0xff] }
 0x4ec   : > { %8699 = vmatpush.bf16.msrb.mxu3 %v14595_v40 }
 0x4ed   : > { %8686 = vmatpush.bf16.msrb.mxu2 %v14587_v25 }
 0x4ee   : > { %8662 = vmatpush.bf16.msrb.mxu0 %v14569_v23  ;;  %8675 = vmatpush.bf16.msrb.mxu1 %v14577_v62  ;;  %v14627_v23 = vld [vmem:[%s14845_s8 + $0xcd8] sm:$0xff] }
 0x4f0   : > { %8700 = vmatpush.bf16.msrb.mxu3 %v14594_v18  ;;  %v14601_v18 = vld [vmem:[%s14845_s8 + $0xc08] sm:$0xff] }
 0x4f1   : > { %8687 = vmatpush.bf16.msrb.mxu2 %v14586_v42 }
 0x4f2   : > { %8663 = vmatpush.bf16.msrb.mxu0 %v14568_v60  ;;  %8676 = vmatpush.bf16.msrb.mxu1 %v14576_v1  ;;  %v7341_v32 = vpop.f32.mrf.mxu0  ;;  %v14618_v60 = vld [vmem:[%s14845_s8 + $0xc90] sm:$0xff] }
 0x4f3   : > { %v14626_v1 = vld [vmem:[%s14845_s8 + $0xcd0] sm:$0xff] }
 0x4f4   : > { %8701 = vmatpush.bf16.msrb.mxu3 %v14593_v6  ;;  %v7354_v15 = vpop.f32.mrf.mxu1  ;;  %v8709_v6 = vrot.slane %v20058_v63, 4 }
 0x4f5   : > { %8688 = vmatpush.bf16.msrb.mxu2 %v14585_v58  ;;  %8664 = vmatmul.bf16.vlgmr.msrb.gmra.mxu0 %v8396_v9  ;;  %v7355_v8 = vadd.f32 %v7354_v15, %v7341_v32  ;;  %v14608_v58 = vld [vmem:[%s14845_s8 + $0xc40] sm:$0xff] }
 0x4f6   : > { %8989 = vmatpush.bf16.msra.mxu0 %v14607_v2  ;;  %9002 = vmatpush.bf16.msra.mxu1 %v14615_v49  ;;  %v14600_v49 = vld [vmem:[%s14845_s8 + $0xc00] sm:$0xff]  ;;  %v8725_v9 = vsel %vm446_vm0, %v8709_v6, %v8717_v55  ;;  %v14641_v55 = vld [vmem:[%s14845_s8 + $0xd48] sm:$0xff]  ;;  %v9050_v6 = vrot.slane %v20037_v20, 4 }
 0x4f7   : > { %8677 = vmatmul.bf16.vlgmr.msrb.gmra.mxu1 %v8397_v26  ;;  %v8726_v26 = vsel %vm446_vm0, %v8710_v36, %v8718_v14  ;;  %v9051_v36 = vrot.slane %v20039_v39, 4 }
 0x4f8   : > { %8702 = vmatpush.bf16.msrb.mxu3 %v14592_v21  ;;  %v8730_v21 = vpack.c.bf16 %v8726_v26, %v8726_v26  ;;  %v14649_v26 = vld [vmem:[%s14845_s8 + $0xd88] sm:$0xff] }
 0x4f9   : > { %8689 = vmatpush.bf16.msrb.mxu2 %v14584_v10  ;;  %v8729_v10 = vpack.c.bf16 %v8725_v9, %v8725_v9  ;;  %v14679_v9 = vld [vmem:[%s14845_s8 + $0xe78] sm:$0xff] }
 0x4fa   : > { %8990 = vmatpush.bf16.msra.mxu0 %v14606_v7  ;;  %9003 = vmatpush.bf16.msra.mxu1 %v14614_v43  ;;  %v7343_v25 = vpop.f32.mrf.mxu0  ;;  %v8719_v7 = vrot.slane %v20062_v41, 3  ;;  %v8720_v43 = vrot.slane %v20064_v35, 3 }
 0x4fb   : > { %8703 = vmatmul.bf16.vlgmr.msrb.gmra.mxu3 %v8399_v19  ;;  %v14635_v25 = vld [vmem:[%s14845_s8 + $0xd18] sm:$0xff] }
 0x4fc   : > { %9028 = vmatpush.bf16.msra.mxu3 %v14631_v3  ;;  %8690 = vmatmul.bf16.vlgmr.msrb.gmra.mxu2 %v8398_v13  ;;  %v7356_v40 = vpop.f32.mrf.mxu1  ;;  %v14624_v3 = vld [vmem:[%s14845_s8 + $0xcc0] sm:$0xff]  ;;  %v8727_v13 = vsel %vm446_vm0, %v8711_v56, %v8719_v7  ;;  %v8728_v19 = vsel %vm446_vm0, %v8712_v5, %v8720_v43  ;;  %v14657_v7 = vld [vmem:[%s14845_s8 + $0xdc8] sm:$0xff]  ;;  %v14670_v56 = vld [vmem:[%s14845_s8 + $0xe30] sm:$0xff] }
 0x4fd   : > { %9015 = vmatpush.bf16.msra.mxu2 %v14623_v52  ;;  %v14616_v52 = vld [vmem:[%s14845_s8 + $0xc80] sm:$0xff]  ;;  %v8731_v32 = vpack.c.bf16 %v8727_v13, %v8727_v13  ;;  %v8732_v15 = vpack.c.bf16 %v8728_v19, %v8728_v19  ;;  %v14643_v40 = vld [vmem:[%s14845_s8 + $0xd58] sm:$0xff]  ;;  %v14678_v5 = vld [vmem:[%s14845_s8 + $0xe70] sm:$0xff]  ;;  %v9044_v13 = vrot.slane %v20084_v50, 5  ;;  %v9045_v19 = vrot.slane %v20086_v47, 5 }
 0x4fe   : > { %8991 = vmatpush.bf16.msra.mxu0 %v14605_v45  ;;  %9004 = vmatpush.bf16.msra.mxu1 %v14613_v24  ;;  %v7380_v29 = vpop.f32.mrf.mxu3  ;;  %v14655_v45 = vld [vmem:[%s14845_s8 + $0xdb8] sm:$0xff] }
 0x4ff   : > { %v7367_v62 = vpop.f32.mrf.mxu2  ;;  %v14663_v24 = vld [vmem:[%s14845_s8 + $0xdf8] sm:$0xff] }
 0x500   : > { %9029 = vmatpush.bf16.msra.mxu3 %v14630_v46  ;;  %v7368_v42 = vadd.f32 %v7367_v62, %v7355_v8  ;;  %v14645_v46 = vld [vmem:[%s14845_s8 + $0xd68] sm:$0xff]  ;;  %v14654_v8 = vld [vmem:[%s14845_s8 + $0xdb0] sm:$0xff] }
 0x501   : > { %9016 = vmatpush.bf16.msra.mxu2 %v14622_v51  ;;  %v14637_v51 = vld [vmem:[%s14845_s8 + $0xd28] sm:$0xff]  ;;  %v14634_v62 = vld [vmem:[%s14845_s8 + $0xd10] sm:$0xff] }
 0x502   : > { %8992 = vmatpush.bf16.msra.mxu0 %v14604_v61  ;;  %9005 = vmatpush.bf16.msra.mxu1 %v14612_v16  ;;  %v7381_v57 = vadd.f32 %v7380_v29, %v7368_v42  ;;  %v14662_v61 = vld [vmem:[%s14845_s8 + $0xdf0] sm:$0xff]  ;;  %v14651_v42 = vld [vmem:[%s14845_s8 + $0xd98] sm:$0xff] }
 0x503   : > { %v14642_v29 = vld [vmem:[%s14845_s8 + $0xd50] sm:$0xff] }
 0x504   : > { %9030 = vmatpush.bf16.msra.mxu3 %v14629_v30  ;;  %v20260_v2 = vadd.f32 %v7381_v57, %v20213_v37 }
 0x505   : > { %9017 = vmatpush.bf16.msra.mxu2 %v14621_v22 }
 0x506   : > { %8993 = vmatpush.bf16.msra.mxu0 %v14603_v34  ;;  %9006 = vmatpush.bf16.msra.mxu1 %v14611_v54  ;;  %v7382_v37 = vpop.f32.mrf.mxu3  ;;  %v14636_v34 = vld [vmem:[%s14845_s8 + $0xd20] sm:$0xff] }
 0x507   : > { %v7369_v44 = vpop.f32.mrf.mxu2  ;;  %v14644_v54 = vld [vmem:[%s14845_s8 + $0xd60] sm:$0xff]  ;;  %v14671_v37 = vld [vmem:[%s14845_s8 + $0xe38] sm:$0xff] }
 0x508   : > { %9031 = vmatpush.bf16.msra.mxu3 %v14628_v59  ;;  %v14661_v59 = vld [vmem:[%s14845_s8 + $0xde8] sm:$0xff]  ;;  %v9043_v44 = vrot.slane %v20060_v38, 5 }
 0x509   : > { %9018 = vmatpush.bf16.msra.mxu2 %v14620_v27  ;;  %v14653_v27 = vld [vmem:[%s14845_s8 + $0xda8] sm:$0xff] }
 0x50a   : > { %8994 = vmatpush.bf16.msra.mxu0 %v14602_v28  ;;  %9007 = vmatpush.bf16.msra.mxu1 %v14610_v4  ;;  %v14652_v28 = vld [vmem:[%s14845_s8 + $0xda0] sm:$0xff] }
 0x50b   : > { %v14660_v4 = vld [vmem:[%s14845_s8 + $0xde0] sm:$0xff] }
 0x50c   : > { %9032 = vmatpush.bf16.msra.mxu3 %v14627_v23 }
 0x50d   : > { %9019 = vmatpush.bf16.msra.mxu2 %v14619_v12 }
 0x50e   : > { %8995 = vmatpush.bf16.msra.mxu0 %v14601_v18  ;;  %9008 = vmatpush.bf16.msra.mxu1 %v14609_v11  ;;  %v14659_v18 = vld [vmem:[%s14845_s8 + $0xdd8] sm:$0xff] }
 0x510   : > { %9033 = vmatpush.bf16.msra.mxu3 %v14626_v1  ;;  %v14633_v1 = vld [vmem:[%s14845_s8 + $0xd08] sm:$0xff] }
 0x511   : > { %9020 = vmatpush.bf16.msra.mxu2 %v14618_v60 }
 0x512   : > { %8996 = vmatpush.bf16.msra.mxu0 %v14600_v49  ;;  %9009 = vmatpush.bf16.msra.mxu1 %v14608_v58  ;;  %v7670_v16 = vpop.f32.mrf.mxu0  ;;  %v14650_v49 = vld [vmem:[%s14845_s8 + $0xd90] sm:$0xff] }
 0x513   : > { %v14658_v58 = vld [vmem:[%s14845_s8 + $0xdd0] sm:$0xff] }
 0x514   : > { %9034 = vmatpush.bf16.msra.mxu3 %v14625_v31  ;;  %v7683_v22 = vpop.f32.mrf.mxu1  ;;  %v9042_v31 = vrot.slane %v20058_v63, 5 }
 0x515   : > { %9021 = vmatpush.bf16.msra.mxu2 %v14617_v0  ;;  %8997 = vmatmul.bf16.vlgmr.msra.gmra.mxu0 %v8729_v10  ;;  %v7684_v30 = vadd.f32 %v7683_v22, %v7670_v16  ;;  %v14640_v0 = vld [vmem:[%s14845_s8 + $0xd40] sm:$0xff] }
 0x516   : > { %9322 = vmatpush.bf16.msrb.mxu0 %v14639_v33  ;;  %9335 = vmatpush.bf16.msrb.mxu1 %v14647_v53  ;;  %v14632_v53 = vld [vmem:[%s14845_s8 + $0xd00] sm:$0xff]  ;;  %v9058_v10 = vsel %vm446_vm0, %v9042_v31, %v9050_v6  ;;  %v14673_v6 = vld [vmem:[%s14845_s8 + $0xe48] sm:$0xff]  ;;  %v9383_v31 = vrot.slane %v20037_v20, 5 }
 0x517   : > { %9010 = vmatmul.bf16.vlgmr.msra.gmra.mxu1 %v8730_v21  ;;  %v9059_v21 = vsel %vm446_vm0, %v9043_v44, %v9051_v36  ;;  %v9384_v44 = vrot.slane %v20039_v39, 5 }
 0x518   : > { %9035 = vmatpush.bf16.msra.mxu3 %v14624_v3  ;;  %v9063_v3 = vpack.c.bf16 %v9059_v21, %v9059_v21  ;;  %v14681_v21 = vld [vmem:[%s14845_s8 + $0xe88] sm:$0xff] }
 0x519   : > { %9022 = vmatpush.bf16.msra.mxu2 %v14616_v52  ;;  %v9062_v52 = vpack.c.bf16 %v9058_v10, %v9058_v10  ;;  %v14711_v10 = vld [vmem:[%s14845_s8 + $0xf78] sm:$0xff] }
 0x51a   : > { %9323 = vmatpush.bf16.msrb.mxu0 %v14638_v17  ;;  %9336 = vmatpush.bf16.msrb.mxu1 %v14646_v48  ;;  %v7672_v12 = vpop.f32.mrf.mxu0  ;;  %v9052_v17 = vrot.slane %v20062_v41, 4  ;;  %v9053_v48 = vrot.slane %v20064_v35, 4 }
 0x51b   : > { %9036 = vmatmul.bf16.vlgmr.msra.gmra.mxu3 %v8732_v15  ;;  %v14667_v12 = vld [vmem:[%s14845_s8 + $0xe18] sm:$0xff] }
 0x51c   : > { %9361 = vmatpush.bf16.msrb.mxu3 %v14663_v24  ;;  %9023 = vmatmul.bf16.vlgmr.msra.gmra.mxu2 %v8731_v32  ;;  %v7685_v23 = vpop.f32.mrf.mxu1  ;;  %v14656_v24 = vld [vmem:[%s14845_s8 + $0xdc0] sm:$0xff]  ;;  %v9060_v32 = vsel %vm446_vm0, %v9044_v13, %v9052_v17  ;;  %v9061_v15 = vsel %vm446_vm0, %v9045_v19, %v9053_v48  ;;  %v14689_v17 = vld [vmem:[%s14845_s8 + $0xec8] sm:$0xff]  ;;  %v14702_v13 = vld [vmem:[%s14845_s8 + $0xf30] sm:$0xff] }
 0x51d   : > { %9348 = vmatpush.bf16.msrb.mxu2 %v14655_v45  ;;  %v14648_v45 = vld [vmem:[%s14845_s8 + $0xd80] sm:$0xff]  ;;  %v9064_v16 = vpack.c.bf16 %v9060_v32, %v9060_v32  ;;  %v9065_v22 = vpack.c.bf16 %v9061_v15, %v9061_v15  ;;  %v14675_v23 = vld [vmem:[%s14845_s8 + $0xe58] sm:$0xff]  ;;  %v14710_v19 = vld [vmem:[%s14845_s8 + $0xf70] sm:$0xff]  ;;  %v9377_v32 = vrot.slane %v20084_v50, 6  ;;  %v9378_v15 = vrot.slane %v20086_v47, 6 }
 0x51e   : > { %9324 = vmatpush.bf16.msrb.mxu0 %v14637_v51  ;;  %9337 = vmatpush.bf16.msrb.mxu1 %v14645_v46  ;;  %v7709_v57 = vpop.f32.mrf.mxu3  ;;  %v14687_v51 = vld [vmem:[%s14845_s8 + $0xeb8] sm:$0xff] }
 0x51f   : > { %v7696_v11 = vpop.f32.mrf.mxu2  ;;  %v14695_v46 = vld [vmem:[%s14845_s8 + $0xef8] sm:$0xff] }
 0x520   : > { %9362 = vmatpush.bf16.msrb.mxu3 %v14662_v61  ;;  %v7697_v60 = vadd.f32 %v7696_v11, %v7684_v30  ;;  %v14677_v61 = vld [vmem:[%s14845_s8 + $0xe68] sm:$0xff]  ;;  %v14686_v30 = vld [vmem:[%s14845_s8 + $0xeb0] sm:$0xff] }
 0x521   : > { %9349 = vmatpush.bf16.msrb.mxu2 %v14654_v8  ;;  %v14669_v8 = vld [vmem:[%s14845_s8 + $0xe28] sm:$0xff]  ;;  %v14666_v11 = vld [vmem:[%s14845_s8 + $0xe10] sm:$0xff] }
 0x522   : > { %9325 = vmatpush.bf16.msrb.mxu0 %v14636_v34  ;;  %9338 = vmatpush.bf16.msrb.mxu1 %v14644_v54  ;;  %v7710_v14 = vadd.f32 %v7709_v57, %v7697_v60  ;;  %v14694_v34 = vld [vmem:[%s14845_s8 + $0xef0] sm:$0xff]  ;;  %v14683_v60 = vld [vmem:[%s14845_s8 + $0xe98] sm:$0xff] }
 0x523   : > { %v14674_v57 = vld [vmem:[%s14845_s8 + $0xe50] sm:$0xff] }
 0x524   : > { %9363 = vmatpush.bf16.msrb.mxu3 %v14661_v59  ;;  %v20307_v33 = vadd.f32 %v7710_v14, %v20260_v2 }
 0x525   : > { %9350 = vmatpush.bf16.msrb.mxu2 %v14653_v27 }
 0x526   : > { %9326 = vmatpush.bf16.msrb.mxu0 %v14635_v25  ;;  %9339 = vmatpush.bf16.msrb.mxu1 %v14643_v40  ;;  %v7711_v2 = vpop.f32.mrf.mxu3  ;;  %v14668_v25 = vld [vmem:[%s14845_s8 + $0xe20] sm:$0xff] }
 0x527   : > { %v7698_v43 = vpop.f32.mrf.mxu2  ;;  %v14676_v40 = vld [vmem:[%s14845_s8 + $0xe60] sm:$0xff]  ;;  %v14703_v2 = vld [vmem:[%s14845_s8 + $0xf38] sm:$0xff] }
 0x528   : > { %9364 = vmatpush.bf16.msrb.mxu3 %v14660_v4  ;;  %v14693_v4 = vld [vmem:[%s14845_s8 + $0xee8] sm:$0xff]  ;;  %v9376_v43 = vrot.slane %v20060_v38, 6 }
 0x529   : > { %9351 = vmatpush.bf16.msrb.mxu2 %v14652_v28  ;;  %v14685_v28 = vld [vmem:[%s14845_s8 + $0xea8] sm:$0xff] }
 0x52a   : > { %9327 = vmatpush.bf16.msrb.mxu0 %v14634_v62  ;;  %9340 = vmatpush.bf16.msrb.mxu1 %v14642_v29  ;;  %v14684_v62 = vld [vmem:[%s14845_s8 + $0xea0] sm:$0xff] }
 0x52b   : > { %v14692_v29 = vld [vmem:[%s14845_s8 + $0xee0] sm:$0xff] }
 0x52c   : > { %9365 = vmatpush.bf16.msrb.mxu3 %v14659_v18 }
 0x52d   : > { %9352 = vmatpush.bf16.msrb.mxu2 %v14651_v42 }
 0x52e   : > { %9328 = vmatpush.bf16.msrb.mxu0 %v14633_v1  ;;  %9341 = vmatpush.bf16.msrb.mxu1 %v14641_v55  ;;  %v14691_v1 = vld [vmem:[%s14845_s8 + $0xed8] sm:$0xff] }
 0x530   : > { %9366 = vmatpush.bf16.msrb.mxu3 %v14658_v58  ;;  %v14665_v58 = vld [vmem:[%s14845_s8 + $0xe08] sm:$0xff] }
 0x531   : > { %9353 = vmatpush.bf16.msrb.mxu2 %v14650_v49 }
 0x532   : > { %9329 = vmatpush.bf16.msrb.mxu0 %v14632_v53  ;;  %9342 = vmatpush.bf16.msrb.mxu1 %v14640_v0  ;;  %v7999_v54 = vpop.f32.mrf.mxu0  ;;  %v14682_v53 = vld [vmem:[%s14845_s8 + $0xe90] sm:$0xff] }
 0x533   : > { %v14690_v0 = vld [vmem:[%s14845_s8 + $0xed0] sm:$0xff] }
 0x534   : > { %9367 = vmatpush.bf16.msrb.mxu3 %v14657_v7  ;;  %v8012_v27 = vpop.f32.mrf.mxu1  ;;  %v9375_v7 = vrot.slane %v20058_v63, 6 }
 0x535   : > { %9354 = vmatpush.bf16.msrb.mxu2 %v14649_v26  ;;  %9330 = vmatmul.bf16.vlgmr.msrb.gmra.mxu0 %v9062_v52  ;;  %v8013_v59 = vadd.f32 %v8012_v27, %v7999_v54  ;;  %v14672_v26 = vld [vmem:[%s14845_s8 + $0xe40] sm:$0xff] }
 0x536   : > { %9655 = vmatpush.bf16.msra.mxu0 %v14671_v37  ;;  %9668 = vmatpush.bf16.msra.mxu1 %v14679_v9  ;;  %v14664_v9 = vld [vmem:[%s14845_s8 + $0xe00] sm:$0xff]  ;;  %v9391_v52 = vsel %vm446_vm0, %v9375_v7, %v9383_v31  ;;  %v14705_v31 = vld [vmem:[%s14845_s8 + $0xf48] sm:$0xff]  ;;  %v9716_v7 = vrot.slane %v20037_v20, 6 }
 0x537   : > { %9343 = vmatmul.bf16.vlgmr.msrb.gmra.mxu1 %v9063_v3  ;;  %v9392_v3 = vsel %vm446_vm0, %v9376_v43, %v9384_v44  ;;  %v9717_v43 = vrot.slane %v20039_v39, 6 }
 0x538   : > { %9368 = vmatpush.bf16.msrb.mxu3 %v14656_v24  ;;  %v9396_v24 = vpack.c.bf16 %v9392_v3, %v9392_v3 }
 0x539   : > { %9355 = vmatpush.bf16.msrb.mxu2 %v14648_v45  ;;  %v9395_v45 = vpack.c.bf16 %v9391_v52, %v9391_v52  ;;  %v14721_v52 = vld [vmem:[%s14845_s8 + $0xfc8] sm:$0xff] }
 0x53a   : > { %9656 = vmatpush.bf16.msra.mxu0 %v14670_v56  ;;  %9669 = vmatpush.bf16.msra.mxu1 %v14678_v5  ;;  %v8001_v42 = vpop.f32.mrf.mxu0  ;;  %v9385_v56 = vrot.slane %v20062_v41, 5  ;;  %v9386_v5 = vrot.slane %v20064_v35, 5 }
 0x53b   : > { %9369 = vmatmul.bf16.vlgmr.msrb.gmra.mxu3 %v9065_v22  ;;  %v14699_v42 = vld [vmem:[%s14845_s8 + $0xf18] sm:$0xff] }
 0x53c   : > { %9694 = vmatpush.bf16.msra.mxu3 %v14695_v46  ;;  %9356 = vmatmul.bf16.vlgmr.msrb.gmra.mxu2 %v9064_v16  ;;  %v8014_v18 = vpop.f32.mrf.mxu1  ;;  %v14688_v46 = vld [vmem:[%s14845_s8 + $0xec0] sm:$0xff]  ;;  %v9393_v16 = vsel %vm446_vm0, %v9377_v32, %v9385_v56  ;;  %v9394_v22 = vsel %vm446_vm0, %v9378_v15, %v9386_v5  ;;  %v9718_v56 = vrot.slane %v20062_v41, 6  ;;  %v9719_v5 = vrot.slane %v20064_v35, 6 }
 0x53d   : > { %9681 = vmatpush.bf16.msra.mxu2 %v14687_v51  ;;  %v14680_v51 = vld [vmem:[%s14845_s8 + $0xe80] sm:$0xff]  ;;  %v9397_v54 = vpack.c.bf16 %v9393_v16, %v9393_v16  ;;  %v9398_v27 = vpack.c.bf16 %v9394_v22, %v9394_v22  ;;  %v14707_v18 = vld [vmem:[%s14845_s8 + $0xf58] sm:$0xff] }
 0x53e   : > { %9657 = vmatpush.bf16.msra.mxu0 %v14669_v8  ;;  %9670 = vmatpush.bf16.msra.mxu1 %v14677_v61  ;;  %v8038_v14 = vpop.f32.mrf.mxu3  ;;  %v14719_v8 = vld [vmem:[%s14845_s8 + $0xfb8] sm:$0xff] }
 0x53f   : > { %v8025_v55 = vpop.f32.mrf.mxu2  ;;  %v14727_v61 = vld [vmem:[%s14845_s8 + $0xff8] sm:$0xff] }
 0x540   : > { %9695 = vmatpush.bf16.msra.mxu3 %v14694_v34  ;;  %v8026_v49 = vadd.f32 %v8025_v55, %v8013_v59  ;;  %v14709_v34 = vld [vmem:[%s14845_s8 + $0xf68] sm:$0xff]  ;;  %v14718_v59 = vld [vmem:[%s14845_s8 + $0xfb0] sm:$0xff] }
 0x541   : > { %9682 = vmatpush.bf16.msra.mxu2 %v14686_v30  ;;  %v14701_v30 = vld [vmem:[%s14845_s8 + $0xf28] sm:$0xff]  ;;  %v14698_v55 = vld [vmem:[%s14845_s8 + $0xf10] sm:$0xff] }
 0x542   : > { %9658 = vmatpush.bf16.msra.mxu0 %v14668_v25  ;;  %9671 = vmatpush.bf16.msra.mxu1 %v14676_v40  ;;  %v8039_v36 = vadd.f32 %v8038_v14, %v8026_v49  ;;  %v14726_v25 = vld [vmem:[%s14845_s8 + $0xff0] sm:$0xff]  ;;  %v14715_v49 = vld [vmem:[%s14845_s8 + $0xf98] sm:$0xff] }
 0x543   : > { %v14706_v14 = vld [vmem:[%s14845_s8 + $0xf50] sm:$0xff] }
 0x544   : > { %9696 = vmatpush.bf16.msra.mxu3 %v14693_v4  ;;  %v20354_v37 = vadd.f32 %v8039_v36, %v20307_v33 }
 0x545   : > { %9683 = vmatpush.bf16.msra.mxu2 %v14685_v28 }
 0x546   : > { %9659 = vmatpush.bf16.msra.mxu0 %v14667_v12  ;;  %9672 = vmatpush.bf16.msra.mxu1 %v14675_v23  ;;  %v8040_v33 = vpop.f32.mrf.mxu3  ;;  %v14700_v12 = vld [vmem:[%s14845_s8 + $0xf20] sm:$0xff] }
 0x547   : > { %v8027_v48 = vpop.f32.mrf.mxu2  ;;  %v14708_v23 = vld [vmem:[%s14845_s8 + $0xf60] sm:$0xff]  ;;  %v14713_v33 = vld [vmem:[%s14845_s8 + $0xf88] sm:$0xff] }
 0x548   : > { %9697 = vmatpush.bf16.msra.mxu3 %v14692_v29  ;;  %v14725_v29 = vld [vmem:[%s14845_s8 + $0xfe8] sm:$0xff]  ;;  %v9709_v48 = vrot.slane %v20060_v38, 7 }
 0x549   : > { %9684 = vmatpush.bf16.msra.mxu2 %v14684_v62  ;;  %v14717_v62 = vld [vmem:[%s14845_s8 + $0xfa8] sm:$0xff] }
 0x54a   : > { %9660 = vmatpush.bf16.msra.mxu0 %v14666_v11  ;;  %9673 = vmatpush.bf16.msra.mxu1 %v14674_v57  ;;  %v14716_v11 = vld [vmem:[%s14845_s8 + $0xfa0] sm:$0xff] }
 0x54b   : > { %v14724_v57 = vld [vmem:[%s14845_s8 + $0xfe0] sm:$0xff] }
 0x54c   : > { %9698 = vmatpush.bf16.msra.mxu3 %v14691_v1 }
 0x54d   : > { %9685 = vmatpush.bf16.msra.mxu2 %v14683_v60 }
 0x54e   : > { %9661 = vmatpush.bf16.msra.mxu0 %v14665_v58  ;;  %9674 = vmatpush.bf16.msra.mxu1 %v14673_v6  ;;  %v14723_v58 = vld [vmem:[%s14845_s8 + $0xfd8] sm:$0xff] }
 0x550   : > { %9699 = vmatpush.bf16.msra.mxu3 %v14690_v0  ;;  %v14697_v0 = vld [vmem:[%s14845_s8 + $0xf08] sm:$0xff] }
 0x551   : > { %9686 = vmatpush.bf16.msra.mxu2 %v14682_v53 }
 0x552   : > { %9662 = vmatpush.bf16.msra.mxu0 %v14664_v9  ;;  %9675 = vmatpush.bf16.msra.mxu1 %v14672_v26  ;;  %v8332_v40 = vpop.f32.mrf.mxu0  ;;  %v14714_v9 = vld [vmem:[%s14845_s8 + $0xf90] sm:$0xff] }
 0x553   : > { %v14722_v26 = vld [vmem:[%s14845_s8 + $0xfd0] sm:$0xff] }
 0x554   : > { %9700 = vmatpush.bf16.msra.mxu3 %v14689_v17  ;;  %v8345_v28 = vpop.f32.mrf.mxu1  ;;  %v9708_v17 = vrot.slane %v20058_v63, 7 }
 0x555   : > { %9687 = vmatpush.bf16.msra.mxu2 %v14681_v21  ;;  %9663 = vmatmul.bf16.vlgmr.msra.gmra.mxu0 %v9395_v45  ;;  %v8346_v4 = vadd.f32 %v8345_v28, %v8332_v40  ;;  %v14704_v21 = vld [vmem:[%s14845_s8 + $0xf40] sm:$0xff] }
 0x556   : > { %9988 = vmatpush.bf16.msrb.mxu0 %v14703_v2  ;;  %10001 = vmatpush.bf16.msrb.mxu1 %v14711_v10  ;;  %v14696_v10 = vld [vmem:[%s14845_s8 + $0xf00] sm:$0xff]  ;;  %v9724_v39 = vsel %vm446_vm0, %v9708_v17, %v9716_v7 }
 0x557   : > { %9676 = vmatmul.bf16.vlgmr.msra.gmra.mxu1 %v9396_v24  ;;  %v9728_v63 = vpack.c.bf16 %v9724_v39, %v9724_v39  ;;  %v14712_v45 = vld [vmem:[%s14845_s8 + $0xf80] sm:$0xff] }
 0x558   : > { %9701 = vmatpush.bf16.msra.mxu3 %v14688_v46  ;;  %v14720_v24 = vld [vmem:[%s14845_s8 + $0xfc0] sm:$0xff] }
 0x559   : > { %9688 = vmatpush.bf16.msra.mxu2 %v14680_v51 }
 0x55a   : > { %9989 = vmatpush.bf16.msrb.mxu0 %v14702_v13  ;;  %10002 = vmatpush.bf16.msrb.mxu1 %v14710_v19  ;;  %v8334_v60 = vpop.f32.mrf.mxu0  ;;  %v9710_v13 = vrot.slane %v20084_v50, 7  ;;  %v9711_v19 = vrot.slane %v20086_v47, 7 }
 0x55b   : > { %9702 = vmatmul.bf16.vlgmr.msra.gmra.mxu3 %v9398_v27 }
 0x55c   : > { %10027 = vmatpush.bf16.msrb.mxu3 %v14727_v61  ;;  %9689 = vmatmul.bf16.vlgmr.msra.gmra.mxu2 %v9397_v54  ;;  %v8347_v1 = vpop.f32.mrf.mxu1  ;;  %v9726_v51 = vsel %vm446_vm0, %v9710_v13, %v9718_v56  ;;  %v9727_v41 = vsel %vm446_vm0, %v9711_v19, %v9719_v5 }
 0x55d   : > { %10014 = vmatpush.bf16.msrb.mxu2 %v14719_v8  ;;  %v9730_v35 = vpack.c.bf16 %v9726_v51, %v9726_v51  ;;  %v9731_v46 = vpack.c.bf16 %v9727_v41, %v9727_v41 }
 0x55e   : > { %9990 = vmatpush.bf16.msrb.mxu0 %v14701_v30  ;;  %10003 = vmatpush.bf16.msrb.mxu1 %v14709_v34  ;;  %v8371_v36 = vpop.f32.mrf.mxu3 }
 0x55f   : > { %v8358_v6 = vpop.f32.mrf.mxu2 }
 0x560   : > { %10028 = vmatpush.bf16.msrb.mxu3 %v14726_v25  ;;  %v8359_v53 = vadd.f32 %v8358_v6, %v8346_v4 }
 0x561   : > { %10015 = vmatpush.bf16.msrb.mxu2 %v14718_v59 }
 0x562   : > { %9991 = vmatpush.bf16.msrb.mxu0 %v14700_v12  ;;  %10004 = vmatpush.bf16.msrb.mxu1 %v14708_v23  ;;  %v8372_v44 = vadd.f32 %v8371_v36, %v8359_v53 }
 0x564   : > { %10029 = vmatpush.bf16.msrb.mxu3 %v14725_v29  ;;  %v8375_v2 = vadd.f32 %v8372_v44, %v20354_v37  ;;  %v9725_v37 = vsel %vm446_vm0, %v9709_v48, %v9717_v43 }
 0x565   : > { %10016 = vmatpush.bf16.msrb.mxu2 %v14717_v62  ;;  %v9729_v38 = vpack.c.bf16 %v9725_v37, %v9725_v37 }
 0x566   : > { %9992 = vmatpush.bf16.msrb.mxu0 %v14699_v42  ;;  %10005 = vmatpush.bf16.msrb.mxu1 %v14707_v18  ;;  %v8373_v20 = vpop.f32.mrf.mxu3 }
 0x567   : > { %v8360_v3 = vpop.f32.mrf.mxu2 }
 0x568   : > { %10030 = vmatpush.bf16.msrb.mxu3 %v14724_v57 }
 0x569   : > { %10017 = vmatpush.bf16.msrb.mxu2 %v14716_v11 }
 0x56a   : > { %9993 = vmatpush.bf16.msrb.mxu0 %v14698_v55  ;;  %10006 = vmatpush.bf16.msrb.mxu1 %v14706_v14 }
 0x56c   : > { %10031 = vmatpush.bf16.msrb.mxu3 %v14723_v58 }
 0x56d   : > { %10018 = vmatpush.bf16.msrb.mxu2 %v14715_v49 }
 0x56e   : > { %9994 = vmatpush.bf16.msrb.mxu0 %v14697_v0  ;;  %10007 = vmatpush.bf16.msrb.mxu1 %v14705_v31 }
 0x570   : > { %10032 = vmatpush.bf16.msrb.mxu3 %v14722_v26 }
 0x571   : > { %10019 = vmatpush.bf16.msrb.mxu2 %v14714_v9 }
 0x572   : > { %9995 = vmatpush.bf16.msrb.mxu0 %v14696_v10  ;;  %10008 = vmatpush.bf16.msrb.mxu1 %v14704_v21  ;;  %v8665_v32 = vpop.f32.mrf.mxu0 }
 0x574   : > { %10033 = vmatpush.bf16.msrb.mxu3 %v14721_v52  ;;  %v8678_v15 = vpop.f32.mrf.mxu1 }
 0x575   : > { %10020 = vmatpush.bf16.msrb.mxu2 %v14713_v33  ;;  %9996 = vmatmul.bf16.vlgmr.msrb.gmra.mxu0 %v9728_v63  ;;  %v8679_v8 = vadd.f32 %v8678_v15, %v8665_v32 }
 0x576   : > { %10009 = vmatmul.bf16.vlgmr.msrb.gmra.mxu1 %v9729_v38 }
 0x578   : > { %10034 = vmatpush.bf16.msrb.mxu3 %v14720_v24  ;;  %v10041_v24 = vld [vmem:[#allocation2] sm:$0x3] }
 0x579   : > { %10021 = vmatpush.bf16.msrb.mxu2 %v14712_v45 }
 0x57a   : > { %v8667_v61 = vpop.f32.mrf.mxu0 }
 0x57b   : > { %10035 = vmatmul.bf16.vlgmr.msrb.gmra.mxu3 %v9731_v46 }
 0x57c   : > { %10022 = vmatmul.bf16.vlgmr.msrb.gmra.mxu2 %v9730_v35  ;;  %v8680_v16 = vpop.f32.mrf.mxu1 }
 0x57e   : > { %v8704_v22 = vpop.f32.mrf.mxu3 }
 0x57f   : > { %v8691_v50 = vpop.f32.mrf.mxu2 }
 0x580   : > { %v8692_v47 = vadd.f32 %v8691_v50, %v8679_v8 }
 0x582   : > { %v8705_v30 = vadd.f32 %v8704_v22, %v8692_v47 }
 0x584   : > { %v8708_v34 = vadd.f32 %v8705_v30, %v8375_v2 }
 0x586   : > { %v8706_v27 = vpop.f32.mrf.mxu3 }
 0x587   : > { %v8693_v54 = vpop.f32.mrf.mxu2 }
 0x592   : > { %v8998_v59 = vpop.f32.mrf.mxu0 }
 0x594   : > { %v9011_v25 = vpop.f32.mrf.mxu1 }
 0x595   : > { %v9012_v40 = vadd.f32 %v9011_v25, %v8998_v59 }
 0x59a   : > { %v9000_v28 = vpop.f32.mrf.mxu0 }
 0x59c   : > { %v9013_v4 = vpop.f32.mrf.mxu1 }
 0x59e   : > { %v9037_v23 = vpop.f32.mrf.mxu3 }
 0x59f   : > { %v9024_v12 = vpop.f32.mrf.mxu2 }
 0x5a0   : > { %v9025_v62 = vadd.f32 %v9024_v12, %v9012_v40 }
 0x5a2   : > { %v9038_v29 = vadd.f32 %v9037_v23, %v9025_v62 }
 0x5a4   : > { %v9041_v42 = vadd.f32 %v9038_v29, %v8708_v34 }
 0x5a6   : > { %v9039_v11 = vpop.f32.mrf.mxu3 }
 0x5a7   : > { %v9026_v18 = vpop.f32.mrf.mxu2 }
 0x5b2   : > { %v9331_v57 = vpop.f32.mrf.mxu0 }
 0x5b4   : > { %v9344_v60 = vpop.f32.mrf.mxu1 }
 0x5b5   : > { %v9345_v1 = vadd.f32 %v9344_v60, %v9331_v57 }
 0x5ba   : > { %v9333_v55 = vpop.f32.mrf.mxu0 }
 0x5bc   : > { %v9346_v14 = vpop.f32.mrf.mxu1 }
 0x5be   : > { %v9370_v58 = vpop.f32.mrf.mxu3 }
 0x5bf   : > { %v9357_v49 = vpop.f32.mrf.mxu2 }
 0x5c0   : > { %v9358_v6 = vadd.f32 %v9357_v49, %v9345_v1 }
 0x5c2   : > { %v9371_v36 = vadd.f32 %v9370_v58, %v9358_v6 }
 0x5c4   : > { %v9374_v53 = vadd.f32 %v9371_v36, %v9041_v42 }
 0x5c6   : > { %v9372_v31 = vpop.f32.mrf.mxu3 }
 0x5c7   : > { %v9359_v0 = vpop.f32.mrf.mxu2 }
 0x5d2   : > { %v9664_v44 = vpop.f32.mrf.mxu0 }
 0x5d4   : > { %v9677_v9 = vpop.f32.mrf.mxu1 }
 0x5d5   : > { %v9678_v33 = vadd.f32 %v9677_v9, %v9664_v44 }
 0x5da   : > { %v9666_v26 = vpop.f32.mrf.mxu0 }
 0x5dc   : > { %v9679_v7 = vpop.f32.mrf.mxu1 }
 0x5de   : > { %v9703_v2 = vpop.f32.mrf.mxu3 }
 0x5df   : > { %v9690_v43 = vpop.f32.mrf.mxu2 }
 0x5e0   : > { %v9691_v52 = vadd.f32 %v9690_v43, %v9678_v33 }
 0x5e2   : > { %v9704_v39 = vadd.f32 %v9703_v2, %v9691_v52 }
 0x5e4   : > { %v9707_v38 = vadd.f32 %v9704_v39, %v9374_v53 }
 0x5e6   : > { %v9705_v21 = vpop.f32.mrf.mxu3 }
 0x5e7   : > { %v9692_v10 = vpop.f32.mrf.mxu2 }
 0x5f2   : > { %v9997_v17 = vpop.f32.mrf.mxu0 }
 0x5f3   : > { %v10010_v48 = vpop.f32.mrf.mxu1 }
 0x5f4   : > { %v10011_v37 = vadd.f32 %v10010_v48, %v9997_v17 }
 0x5fa   : > { %v9999_v3 = vpop.f32.mrf.mxu0 }
 0x5fb   : > { %v10012_v20 = vpop.f32.mrf.mxu1 }
 0x5fe   : > { %v10036_v5 = vpop.f32.mrf.mxu3 }
 0x5ff   : > { %v10023_v56 = vpop.f32.mrf.mxu2 }
 0x600   : > { %v10024_v63 = vadd.f32 %v10023_v56, %v10011_v37 }
 0x602   : > { %v10037_v45 = vadd.f32 %v10036_v5, %v10024_v63 }
 0x604   : > { %v10040_v13 = vadd.f32 %v10037_v45, %v9707_v38  ;;  %10047 = sbr.rel (%p13923_p5) target bundleno = 1706 (0x6aa), region = 56 }
 0x606   : > { %v10042_v19 = vadd.f32 %v10041_v24, %v10040_v13  ;;  %v10038_v41 = vpop.f32.mrf.mxu3 }
 0x607   : > { %v10025_v51 = vpop.f32.mrf.mxu2 }
 0x608   : > { %10043 = vst [vmem:[#allocation2] sm:$0x3] %v10042_v19 }
 0x609   : > { %v10070_v35 = vld [vmem:[%s20484_s5 + $0x78] sm:$0xff]  ;;  %v10069_v46 = vld [vmem:[%s20484_s5 + $0x70] sm:$0xff]  ;;  %v10068_v32 = vld [vmem:[%s20484_s5 + $0x68] sm:$0xff]  ;;  %vm10095_vm3 = vcmask 58368  }
 0x60a   : > { %10075 = vmatpush.msra.mxu0 %v10070_v35  ;;  %v10067_v15 = vld [vmem:[%s20484_s5 + $0x60] sm:$0xff]  ;;  %v10066_v8 = vld [vmem:[%s20484_s5 + $0x58] sm:$0xff]  ;;  %v10065_v61 = vld [vmem:[%s20484_s5 + $0x50] sm:$0xff] }
 0x60b   : > { %v10064_v16 = vld [vmem:[%s20484_s5 + $0x48] sm:$0xff]  ;;  %v10063_v50 = vld [vmem:[%s20484_s5 + $0x40] sm:$0xff]  ;;  %v10062_v22 = vld [vmem:[%s20484_s5 + $0x38] sm:$0xff] }
 0x60c   : > { %10076 = vmatpush.msra.mxu0 %v10069_v46  ;;  %v10061_v47 = vld [vmem:[%s20484_s5 + $0x30] sm:$0xff]  ;;  %v10060_v30 = vld [vmem:[%s20484_s5 + $0x28] sm:$0xff]  ;;  %v10059_v34 = vld [vmem:[%s20484_s5 + $0x20] sm:$0xff] }
 0x60d   : > { %v14745_v54 = vld [vmem:[%s20483_s4] ss:$0 sm:$0xff]  ;;  %v10058_v59 = vld [vmem:[%s20484_s5 + $0x18] sm:$0xff]  ;;  %v10057_v25 = vld [vmem:[%s20484_s5 + $0x10] sm:$0xff] }
 0x60e   : > { %10077 = vmatpush.msra.mxu0 %v10068_v32  ;;  %v10056_v28 = vld [vmem:[%s20484_s5 + $0x8] sm:$0xff]  ;;  %v10055_v4 = vld [vmem:[%s20484_s5] sm:$0xff] }
 0x60f   : > { %v10048_v27 = vld [vmem:[#allocation2] sm:$0x3] }
 0x610   : > { %10078 = vmatpush.msra.mxu0 %v10067_v15  ;;  %v10053_v40 = vadd.f32 %v14745_v54, %v10048_v27  ;;  %v14746_v23 = vld [vmem:[%s20485_s6] ss:$0 sm:$0xff] }
 0x612   : > { %10079 = vmatpush.msra.mxu0 %v10066_v8  ;;  %v10054_v12 = vmax.f32 %v10053_v40, 0.0 }
 0x614   : > { %10080 = vmatpush.msra.mxu0 %v10065_v61 }
 0x616   : > { %10081 = vmatpush.msra.mxu0 %v10064_v16 }
 0x618   : > { %10082 = vmatpush.msra.mxu0 %v10063_v50 }
 0x61a   : > { %10083 = vmatpush.msra.mxu0 %v10062_v22 }
 0x61c   : > { %10084 = vmatpush.msra.mxu0 %v10061_v47 }
 0x61e   : > { %10085 = vmatpush.msra.mxu0 %v10060_v30 }
 0x620   : > { %10086 = vmatpush.msra.mxu0 %v10059_v34 }
 0x622   : > { %10087 = vmatpush.msra.mxu0 %v10058_v59 }
 0x624   : > { %10088 = vmatpush.msra.mxu0 %v10057_v25 }
 0x626   : > { %10089 = vmatpush.msra.mxu0 %v10056_v28 }
 0x628   : > { %10090 = vmatpush.msra.mxu0 %v10055_v4 }
 0x629   : > { %10091 = vmatmul.f32.vlgmr.msra.gmra.mxu0 %v10054_v12 }
 0x6a6   : > { %v10092_v62 = vpop.f32.mrf.mxu0 }
 0x6a7   : > { %v10093_v29 = vadd.f32 %v14746_v23, %v10092_v62 }
 0x6a9   : > { %10096 = vst.msk [vmem:[#allocation3] sm:$0x3] %vm10095_vm3, %v10093_v29 }
 0x6aa PF: > { %p14732_p6 = scmp.eq.s32.totalorder %s14836_s25, 1  ;;  %s14789_s10 = smov [#allocation3]  }
 0x6ab   : > { %s10103_s11 = sshll.u32 %s14789_s10, 4  ;;  %s10105_s16 = sshll.u32 %s20486_s7, 4  ;;  %s10104_s11 = int_to_ptr.vmem [resolvable:$true] %s10103_s11  ;;  %s10106_s16 = int_to_ptr.hbm [resolvable:$true] %s10105_s16 }
 0x6ac   : > { %14729 = dma.vmem_to_hbm [thread:$0]  (%p14732_p6), %s10104_s11, 32, %s10106_s16, [#allocation4]  }
 0x6ad   : > { %14780 = dma.done.wait (%p14732_p6), [#allocation4], 32  }
 0x6ae   : > { %14782 = vsyncadd (%p14732_p6), [#allocation4], 4294967264 }
 0x6af PF: > { %s18_s24 = sadd.s32 1, %s14785_s24  }
 0x6b0   : > { %p15_p7 = scmp.ge.s32.totalorder %s18_s24, 4  }
 0x6b2   :  { %17 = sbr.rel (!%p15_p7) target bundleno = 1 (0x1), region = 110 }
 0x6b7   :  { %10119 = vsyncpa [#allocation4], 1 }
 0x6b8   :  { %10121 = vsyncpa [#allocation4 + $0x1], 1 }

</bundles_post_ra>
